<compile_context>
chip_gen: v7x
topology: tpu7x:2x2x1
jax: 0.10.0
libtpu: 0.0.40
codegen_flags: <defaults>
</compile_context>

<pallas_src>
import math

import jax
import jax.numpy as jnp
from jax.experimental import pallas as pl
from jax.experimental.pallas import tpu as pltpu

# Module hyper-parameters (same as the PyTorch test).
INPUT_SIZE = 16    # vocab size for nn.Embedding
EMBED = 32         # embed_size
D_K = 16
D_V = 8
MAX_LEN = 8        # L, sequence length == max_length
_NORM = 1.0 / math.sqrt(D_K)

# Batching / tiling.
BATCH = 128        # independent sequences processed per call
TB = 64            # sequences per grid step  -> grid=(2,), one step per TensorCore on v7x
ROWS = TB * MAX_LEN            # 512 rows per grid step
SB = 32            # sequences per block-diagonal attention sub-block
SROWS = SB * MAX_LEN           # 256 rows per sub-block
N_SUB = TB // SB               # 2 sub-blocks per grid step

# Packed widths (lane-dense).
QKV_W = 128                                   # [0:16) Q | [16:32) K | [32:40) V | zeros
OUT_W = 128                                   # packed output slab width
A_OFF, W_OFF, Z_OFF = 0, D_V, D_V + MAX_LEN   # A lanes, attn lanes, logits lanes
NEG = -1.0e30                                 # additive mask; exp() underflows exactly to 0


def self_attention_kernel(ids_ref, embqkv_ref, mask_ref, cmat_ref, wrows_ref, bfc_ref,
                          out_ref):
    ids = ids_ref[...]                                                      # (ROWS, 1) int32

    # --- embedding lookup + fused Q/K/V projection as ONE MXU matmul ------------------
    # onehot is an exact row-select, so onehot @ (emb @ Wqkv) == (onehot @ emb) @ Wqkv.
    # NOTE: out-of-range token ids map to an all-zero embedding row (same as before).
    vocab_iota = jax.lax.broadcasted_iota(jnp.int32, (ROWS, INPUT_SIZE), 1)
    onehot = (ids == vocab_iota).astype(jnp.float32)                        # (ROWS, VOCAB)
    qkv = jnp.dot(onehot, embqkv_ref[...],
                  preferred_element_type=jnp.float32)                       # (ROWS, 128)

    q2 = qkv[:, 0:D_K]                                                      # (ROWS, d_k)
    k2 = qkv[:, D_K:2 * D_K]                                                # (ROWS, d_k)
    v2 = qkv[:, 2 * D_K:2 * D_K + D_V]                                      # (ROWS, d_v)

    mask = mask_ref[...]                                                    # (SROWS, SROWS)
    cmat = cmat_ref[...]                                                    # (SROWS, L)

    # --- block-diagonal attention: 2 sub-blocks of 32 sequences, all matmuls MXU-shaped
    a_parts = []
    w_parts = []
    for sb in range(N_SUB):                                                 # unrolled (2)
        lo = sb * SROWS
        q = q2[lo:lo + SROWS, :]
        k = k2[lo:lo + SROWS, :]
        v = v2[lo:lo + SROWS, :]
        s = jax.lax.dot_general(q, k, (((1,), (1,)), ((), ())),
                                preferred_element_type=jnp.float32) * _NORM  # (SROWS, SROWS)
        s = s + mask                                                        # kill cross-seq
        m = jnp.max(s, axis=-1, keepdims=True)
        e = jnp.exp(s - m)                                                  # masked -> 0.0
        denom = jnp.sum(e, axis=-1, keepdims=True)
        p = e * pl.reciprocal(denom, approx=True)                           # (SROWS, SROWS)
        a_parts.append(jnp.dot(p, v, preferred_element_type=jnp.float32))   # (SROWS, d_v)
        w_parts.append(jnp.dot(p, cmat, preferred_element_type=jnp.float32))# (SROWS, L)

    a_flat = jnp.concatenate(a_parts, axis=0)                               # (ROWS, d_v)
    attn_flat = jnp.concatenate(w_parts, axis=0)                            # (ROWS, L)

    # --- fc epilogue: z[b, o] = sum_{t,j} A[b,t,j] * wfc[o, j*L + t] + bias[o] ---------
    w0 = wrows_ref[:, 0:D_V]                                                # (ROWS, d_v)
    w1 = wrows_ref[:, D_V:2 * D_V]
    d0 = jnp.sum(a_flat * w0, axis=-1, keepdims=True)                       # (ROWS, 1)
    d1 = jnp.sum(a_flat * w1, axis=-1, keepdims=True)                       # (ROWS, 1)
    d = jnp.concatenate([d0, d1], axis=-1)                                  # (ROWS, 2)
    # layout-preserving segmented sum over the 8 rows of each sequence (sublane reduce)
    z = jnp.sum(d.reshape(TB, MAX_LEN, 2), axis=1)                          # (TB, 2)
    b0 = bfc_ref[0]
    b1 = bfc_ref[1]
    z = z + jnp.concatenate([jnp.full((TB, 1), b0, jnp.float32),
                             jnp.full((TB, 1), b1, jnp.float32)], axis=-1)

    # log-softmax over the 2 classes.
    zm = jnp.max(z, axis=-1, keepdims=True)
    lse = zm + jnp.log(jnp.sum(jnp.exp(z - zm), axis=-1, keepdims=True))
    logz = z - lse                                                          # (TB, 2)
    # broadcast per-sequence logits back to their rows (sublane broadcast, no matmul)
    z_rows = jnp.broadcast_to(logz[:, None, :], (TB, MAX_LEN, 2)).reshape(ROWS, 2)

    # --- single unmasked full-width store of the packed (ROWS, 128) slab ---------------
    pad = jnp.zeros((ROWS, OUT_W - (D_V + MAX_LEN + 2)), jnp.float32)
    out_ref[...] = jnp.concatenate([a_flat, attn_flat, z_rows, pad], axis=-1)


def prepare_params(params):
    """One-time host-side weight/constant layout prep (outside the per-call hot path)."""
    wq, wk, wv = params["wq"], params["wk"], params["wv"]
    # Fused, lane-dense projection slab then fold the embedding table into it.
    wqkv = jnp.concatenate(
        [wq.T, wk.T, wv.T,
         jnp.zeros((EMBED, QKV_W - 2 * D_K - D_V), jnp.float32)], axis=1)   # (E, 128)
    emb_qkv = params["emb"].astype(jnp.float32) @ wqkv.astype(jnp.float32)  # (VOCAB, 128)

    # Block-diagonal additive mask for one 32-sequence sub-block (0 in-block, -1e30 off).
    r = jnp.arange(SROWS) // MAX_LEN
    mask = jnp.where(r[:, None] == r[None, :], 0.0, NEG).astype(jnp.float32)  # (SROWS,SROWS)

    # Lane-compaction matrix: C[c, j] = 1 iff c % L == j  (recovers per-seq attn weights).
    cmat = (jnp.arange(SROWS)[:, None] % MAX_LEN
            == jnp.arange(MAX_LEN)[None, :]).astype(jnp.float32)            # (SROWS, L)

    # fc weight rearranged so z[o] = sum_{t,j} A[t,j] * wfc3[o,t,j] (A.T flattening),
    # then tiled per row position for the TB sequences of one grid step.
    wfc3 = params["wfc"].reshape(2, D_V, MAX_LEN).transpose(0, 2, 1)        # (2, L, d_v)
    wrows = jnp.tile(wfc3, (1, TB, 1))                                      # (2, ROWS, d_v)
    wrows = jnp.concatenate([wrows[0], wrows[1]], axis=-1)                  # (ROWS, 2*d_v)

    return dict(
        emb_qkv=emb_qkv.astype(jnp.float32),
        mask=mask,
        cmat=cmat,
        wrows=wrows.astype(jnp.float32),
        bfc=params["bfc"].reshape(2).astype(jnp.float32),                   # SMEM scalars
    )


def self_attention_forward(token_ids, prep):
    """token_ids: (B, L) int32 -> (output (B, 2), A (B, L, d_v), weight (B, L, L))."""
    B = token_ids.shape[0]
    assert B % TB == 0, "batch must be a multiple of the sequence tile TB"
    nb = B // TB
    ids2 = token_ids.reshape(B * MAX_LEN, 1).astype(jnp.int32)

    packed = pl.pallas_call(
        self_attention_kernel,
        out_shape=jax.ShapeDtypeStruct((B * MAX_LEN, OUT_W), jnp.float32),
        grid=(nb,),
        in_specs=[
            pl.BlockSpec((ROWS, 1), lambda i: (i, 0)),               # token ids (per tile)
            pl.BlockSpec((INPUT_SIZE, QKV_W), lambda i: (0, 0)),     # emb @ [Wq|Wk|Wv] slab
            pl.BlockSpec((SROWS, SROWS), lambda i: (0, 0)),          # block-diag add. mask
            pl.BlockSpec((SROWS, MAX_LEN), lambda i: (0, 0)),        # lane-compaction C
            pl.BlockSpec((ROWS, 2 * D_V), lambda i: (0, 0)),         # position-tiled fc W
            pl.BlockSpec(memory_space=pltpu.MemorySpace.SMEM),       # fc bias (scalars)
        ],
        out_specs=pl.BlockSpec((ROWS, OUT_W), lambda i: (i, 0)),     # lane-dense packed slab
        compiler_params=pltpu.CompilerParams(
            dimension_semantics=("parallel",)),                      # both TCs on v7x
    )(ids2, prep["emb_qkv"], prep["mask"], prep["cmat"], prep["wrows"], prep["bfc"])

    packed = packed.reshape(B, MAX_LEN, OUT_W)
    A = packed[:, :, A_OFF:A_OFF + D_V]
    weight = packed[:, :, W_OFF:W_OFF + MAX_LEN]
    output = packed[:, 0, Z_OFF:Z_OFF + 2]
    return output, A, weight


def _reference_single(ids, params):
    """Pure-JAX reference mirroring the PyTorch forward (A.T flattened for fc)."""
    x = jnp.take(params["emb"], ids, axis=0)
    Q = x @ params["wq"].T
    K = x @ params["wk"].T
    V = x @ params["wv"].T
    w = jax.nn.softmax((Q @ K.T) * _NORM, axis=-1)
    A = w @ V
    z = A.T.reshape(-1) @ params["wfc"].T + params["bfc"]
    return jax.nn.log_softmax(z, axis=-1), A, w


def reference_forward(token_ids, params):
    return jax.vmap(_reference_single, in_axes=(0, None))(token_ids, params)


if __name__ == "__main__":
    key = jax.random.PRNGKey(0)
    k_emb, k_q, k_k, k_v, k_fc, k_b, k_in = jax.random.split(key, 7)

    params = dict(
        emb=0.1 * jax.random.normal(k_emb, (INPUT_SIZE, EMBED), jnp.float32),
        wq=0.1 * jax.random.normal(k_q, (D_K, EMBED), jnp.float32),
        wk=0.1 * jax.random.normal(k_k, (D_K, EMBED), jnp.float32),
        wv=0.1 * jax.random.normal(k_v, (D_V, EMBED), jnp.float32),
        wfc=0.1 * jax.random.normal(k_fc, (2, D_V * MAX_LEN), jnp.float32),
        bfc=0.1 * jax.random.normal(k_b, (2,), jnp.float32),
    )
    token_ids = jax.random.randint(k_in, (BATCH, MAX_LEN), 0, INPUT_SIZE, dtype=jnp.int32)

    prep = prepare_params(params)
    out, A, weight = self_attention_forward(token_ids, prep)
    jax.block_until_ready((out, A, weight))

    r_out, r_A, r_w = reference_forward(token_ids, params)
    assert bool(jnp.allclose(out, r_out, atol=1e-3, rtol=1e-3)), "log-softmax output mismatch"
    assert bool(jnp.allclose(A, r_A, atol=1e-3, rtol=1e-3)), "A mismatch"
    assert bool(jnp.allclose(weight, r_w, atol=1e-3, rtol=1e-3)), "attention weights mismatch"

    print("KERNEL_OK")
</pallas_src>

<mosaic_0001>
module attributes {stable_mosaic.version = 11 : i64} {
  func.func @self_attention_kernel(%arg0: i32, %arg1: memref<512x1xi32, #tpu.memory_space<vmem>>, %arg2: memref<16x128xf32, #tpu.memory_space<vmem>>, %arg3: memref<256x256xf32, #tpu.memory_space<vmem>>, %arg4: memref<256x8xf32, #tpu.memory_space<vmem>>, %arg5: memref<512x16xf32, #tpu.memory_space<vmem>>, %arg6: memref<2xf32, #tpu.memory_space<smem>>, %arg7: memref<512x128xf32, #tpu.memory_space<vmem>>) attributes {dimension_semantics = [#tpu.dimension_semantics<parallel>], iteration_bounds = array<i64: 2>, scalar_prefetch = 0 : i64, scratch_operands = 0 : i64, tpu.core_type = #tpu.core_type<tc>, window_params = [{transform_indices = @transform_0, window_bounds = array<i64: 512, 1>}, {pipeline_mode = #tpu.pipeline_mode<synchronous>, transform_indices = @transform_1, window_bounds = array<i64: 16, 128>}, {pipeline_mode = #tpu.pipeline_mode<synchronous>, transform_indices = @transform_2, window_bounds = array<i64: 256, 256>}, {pipeline_mode = #tpu.pipeline_mode<synchronous>, transform_indices = @transform_3, window_bounds = array<i64: 256, 8>}, {pipeline_mode = #tpu.pipeline_mode<synchronous>, transform_indices = @transform_4, window_bounds = array<i64: 512, 16>}, {transform_indices = @transform_5, window_bounds = array<i64: 2>}, {transform_indices = @transform_6, window_bounds = array<i64: 512, 128>}]} {
    %c0 = arith.constant 0 : index
    %c0_0 = arith.constant 0 : index
    %0 = vector.load %arg1[%c0, %c0_0] : memref<512x1xi32, #tpu.memory_space<vmem>>, vector<512x1xi32>
    %1 = tpu.iota {dimensions = array<i32: 1>} : vector<512x16xi32>
    %2 = vector.broadcast %0 : vector<512x1xi32> to vector<512x16xi32>
    %3 = arith.cmpi eq, %2, %1 : vector<512x16xi32>
    %4 = arith.extui %3 : vector<512x16xi1> to vector<512x16xi32>
    %5 = arith.sitofp %4 : vector<512x16xi32> to vector<512x16xf32>
    %c0_1 = arith.constant 0 : index
    %c0_2 = arith.constant 0 : index
    %6 = vector.load %arg2[%c0_1, %c0_2] : memref<16x128xf32, #tpu.memory_space<vmem>>, vector<16x128xf32>
    %cst = arith.constant dense<0.000000e+00> : vector<512x128xf32>
    %7 = tpu.matmul %5, %6, %cst {dimension_numbers = #tpu.dot_dimension_numbers<[1], [0], [0], [1], [0, 0, 1, 1], [], []>} : vector<512x16xf32>, vector<16x128xf32>, vector<512x128xf32> -> vector<512x128xf32>
    %8 = vector.extract_strided_slice %7 {offsets = [0, 0], sizes = [512, 16], strides = [1, 1]} : vector<512x128xf32> to vector<512x16xf32>
    %9 = vector.extract_strided_slice %7 {offsets = [0, 16], sizes = [512, 16], strides = [1, 1]} : vector<512x128xf32> to vector<512x16xf32>
    %10 = vector.extract_strided_slice %7 {offsets = [0, 32], sizes = [512, 8], strides = [1, 1]} : vector<512x128xf32> to vector<512x8xf32>
    %c0_3 = arith.constant 0 : index
    %c0_4 = arith.constant 0 : index
    %11 = vector.load %arg3[%c0_3, %c0_4] : memref<256x256xf32, #tpu.memory_space<vmem>>, vector<256x256xf32>
    %c0_5 = arith.constant 0 : index
    %c0_6 = arith.constant 0 : index
    %12 = vector.load %arg4[%c0_5, %c0_6] : memref<256x8xf32, #tpu.memory_space<vmem>>, vector<256x8xf32>
    %13 = vector.extract_strided_slice %8 {offsets = [0, 0], sizes = [256, 16], strides = [1, 1]} : vector<512x16xf32> to vector<256x16xf32>
    %14 = vector.extract_strided_slice %9 {offsets = [0, 0], sizes = [256, 16], strides = [1, 1]} : vector<512x16xf32> to vector<256x16xf32>
    %15 = vector.extract_strided_slice %10 {offsets = [0, 0], sizes = [256, 8], strides = [1, 1]} : vector<512x8xf32> to vector<256x8xf32>
    %cst_7 = arith.constant dense<0.000000e+00> : vector<256x256xf32>
    %16 = tpu.matmul %13, %14, %cst_7 {dimension_numbers = #tpu.dot_dimension_numbers<[1], [1], [0], [0], [0, 0, 1, 0], [], []>} : vector<256x16xf32>, vector<256x16xf32>, vector<256x256xf32> -> vector<256x256xf32>
    %cst_8 = arith.constant 2.500000e-01 : f32
    %17 = vector.broadcast %cst_8 : f32 to vector<256x256xf32>
    %18 = arith.mulf %16, %17 : vector<256x256xf32>
    %19 = arith.addf %18, %11 : vector<256x256xf32>
    %cst_9 = arith.constant dense<0xFF800000> : vector<256xf32>
    %20 = vector.multi_reduction <maximumf>, %19, %cst_9 [1] : vector<256x256xf32> to vector<256xf32>
    %21 = vector.shape_cast %20 : vector<256xf32> to vector<256x1xf32>
    %22 = vector.broadcast %21 : vector<256x1xf32> to vector<256x256xf32>
    %23 = arith.subf %19, %22 : vector<256x256xf32>
    %24 = math.exp %23 : vector<256x256xf32>
    %cst_10 = arith.constant dense<0.000000e+00> : vector<256xf32>
    %25 = vector.multi_reduction <add>, %24, %cst_10 [1] : vector<256x256xf32> to vector<256xf32>
    %26 = vector.shape_cast %25 : vector<256xf32> to vector<256x1xf32>
    %27 = tpu.reciprocal %26 {approx = true} : vector<256x1xf32> -> vector<256x1xf32>
    %28 = vector.broadcast %27 : vector<256x1xf32> to vector<256x256xf32>
    %29 = arith.mulf %24, %28 : vector<256x256xf32>
    %cst_11 = arith.constant dense<0.000000e+00> : vector<256x8xf32>
    %30 = tpu.matmul %29, %15, %cst_11 {dimension_numbers = #tpu.dot_dimension_numbers<[1], [0], [0], [1], [0, 0, 1, 1], [], []>} : vector<256x256xf32>, vector<256x8xf32>, vector<256x8xf32> -> vector<256x8xf32>
    %cst_12 = arith.constant dense<0.000000e+00> : vector<256x8xf32>
    %31 = tpu.matmul %29, %12, %cst_12 {dimension_numbers = #tpu.dot_dimension_numbers<[1], [0], [0], [1], [0, 0, 1, 1], [], []>} : vector<256x256xf32>, vector<256x8xf32>, vector<256x8xf32> -> vector<256x8xf32>
    %32 = vector.extract_strided_slice %8 {offsets = [256, 0], sizes = [256, 16], strides = [1, 1]} : vector<512x16xf32> to vector<256x16xf32>
    %33 = vector.extract_strided_slice %9 {offsets = [256, 0], sizes = [256, 16], strides = [1, 1]} : vector<512x16xf32> to vector<256x16xf32>
    %34 = vector.extract_strided_slice %10 {offsets = [256, 0], sizes = [256, 8], strides = [1, 1]} : vector<512x8xf32> to vector<256x8xf32>
    %cst_13 = arith.constant dense<0.000000e+00> : vector<256x256xf32>
    %35 = tpu.matmul %32, %33, %cst_13 {dimension_numbers = #tpu.dot_dimension_numbers<[1], [1], [0], [0], [0, 0, 1, 0], [], []>} : vector<256x16xf32>, vector<256x16xf32>, vector<256x256xf32> -> vector<256x256xf32>
    %cst_14 = arith.constant 2.500000e-01 : f32
    %36 = vector.broadcast %cst_14 : f32 to vector<256x256xf32>
    %37 = arith.mulf %35, %36 : vector<256x256xf32>
    %38 = arith.addf %37, %11 : vector<256x256xf32>
    %cst_15 = arith.constant dense<0xFF800000> : vector<256xf32>
    %39 = vector.multi_reduction <maximumf>, %38, %cst_15 [1] : vector<256x256xf32> to vector<256xf32>
    %40 = vector.shape_cast %39 : vector<256xf32> to vector<256x1xf32>
    %41 = vector.broadcast %40 : vector<256x1xf32> to vector<256x256xf32>
    %42 = arith.subf %38, %41 : vector<256x256xf32>
    %43 = math.exp %42 : vector<256x256xf32>
    %cst_16 = arith.constant dense<0.000000e+00> : vector<256xf32>
    %44 = vector.multi_reduction <add>, %43, %cst_16 [1] : vector<256x256xf32> to vector<256xf32>
    %45 = vector.shape_cast %44 : vector<256xf32> to vector<256x1xf32>
    %46 = tpu.reciprocal %45 {approx = true} : vector<256x1xf32> -> vector<256x1xf32>
    %47 = vector.broadcast %46 : vector<256x1xf32> to vector<256x256xf32>
    %48 = arith.mulf %43, %47 : vector<256x256xf32>
    %cst_17 = arith.constant dense<0.000000e+00> : vector<256x8xf32>
    %49 = tpu.matmul %48, %34, %cst_17 {dimension_numbers = #tpu.dot_dimension_numbers<[1], [0], [0], [1], [0, 0, 1, 1], [], []>} : vector<256x256xf32>, vector<256x8xf32>, vector<256x8xf32> -> vector<256x8xf32>
    %cst_18 = arith.constant dense<0.000000e+00> : vector<256x8xf32>
    %50 = tpu.matmul %48, %12, %cst_18 {dimension_numbers = #tpu.dot_dimension_numbers<[1], [0], [0], [1], [0, 0, 1, 1], [], []>} : vector<256x256xf32>, vector<256x8xf32>, vector<256x8xf32> -> vector<256x8xf32>
    %51 = tpu.concatenate %30, %49 in 0 : vector<256x8xf32>, vector<256x8xf32> -> vector<512x8xf32>
    %52 = tpu.concatenate %31, %50 in 0 : vector<256x8xf32>, vector<256x8xf32> -> vector<512x8xf32>
    %c0_19 = arith.constant 0 : index
    %c0_20 = arith.constant 0 : index
    %53 = vector.load %arg5[%c0_19, %c0_20] : memref<512x16xf32, #tpu.memory_space<vmem>>, vector<512x8xf32>
    %c0_21 = arith.constant 0 : index
    %c8 = arith.constant 8 : index
    %54 = vector.load %arg5[%c0_21, %c8] : memref<512x16xf32, #tpu.memory_space<vmem>>, vector<512x8xf32>
    %55 = arith.mulf %51, %53 : vector<512x8xf32>
    %cst_22 = arith.constant dense<0.000000e+00> : vector<512xf32>
    %56 = vector.multi_reduction <add>, %55, %cst_22 [1] : vector<512x8xf32> to vector<512xf32>
    %57 = vector.shape_cast %56 : vector<512xf32> to vector<512x1xf32>
    %58 = arith.mulf %51, %54 : vector<512x8xf32>
    %cst_23 = arith.constant dense<0.000000e+00> : vector<512xf32>
    %59 = vector.multi_reduction <add>, %58, %cst_23 [1] : vector<512x8xf32> to vector<512xf32>
    %60 = vector.shape_cast %59 : vector<512xf32> to vector<512x1xf32>
    %61 = tpu.concatenate %57, %60 in 1 : vector<512x1xf32>, vector<512x1xf32> -> vector<512x2xf32>
    %62 = vector.shape_cast %61 : vector<512x2xf32> to vector<64x8x2xf32>
    %cst_24 = arith.constant dense<0.000000e+00> : vector<64x2xf32>
    %63 = vector.multi_reduction <add>, %62, %cst_24 [1] : vector<64x8x2xf32> to vector<64x2xf32>
    %c0_25 = arith.constant 0 : index
    %64 = memref.load %arg6[%c0_25] : memref<2xf32, #tpu.memory_space<smem>>
    %c1 = arith.constant 1 : index
    %65 = memref.load %arg6[%c1] : memref<2xf32, #tpu.memory_space<smem>>
    %66 = vector.broadcast %64 : f32 to vector<64x1xf32>
    %67 = vector.broadcast %65 : f32 to vector<64x1xf32>
    %68 = tpu.concatenate %66, %67 in 1 : vector<64x1xf32>, vector<64x1xf32> -> vector<64x2xf32>
    %69 = arith.addf %63, %68 : vector<64x2xf32>
    %cst_26 = arith.constant dense<0xFF800000> : vector<64xf32>
    %70 = vector.multi_reduction <maximumf>, %69, %cst_26 [1] : vector<64x2xf32> to vector<64xf32>
    %71 = vector.shape_cast %70 : vector<64xf32> to vector<64x1xf32>
    %72 = vector.broadcast %71 : vector<64x1xf32> to vector<64x2xf32>
    %73 = arith.subf %69, %72 : vector<64x2xf32>
    %74 = math.exp %73 : vector<64x2xf32>
    %cst_27 = arith.constant dense<0.000000e+00> : vector<64xf32>
    %75 = vector.multi_reduction <add>, %74, %cst_27 [1] : vector<64x2xf32> to vector<64xf32>
    %76 = vector.shape_cast %75 : vector<64xf32> to vector<64x1xf32>
    %77 = math.log %76 : vector<64x1xf32>
    %78 = arith.addf %71, %77 : vector<64x1xf32>
    %79 = vector.broadcast %78 : vector<64x1xf32> to vector<64x2xf32>
    %80 = arith.subf %69, %79 : vector<64x2xf32>
    %81 = vector.shape_cast %80 : vector<64x2xf32> to vector<64x1x2xf32>
    %82 = vector.shape_cast %81 : vector<64x1x2xf32> to vector<64x1x2xf32>
    %83 = vector.broadcast %82 : vector<64x1x2xf32> to vector<64x8x2xf32>
    %84 = vector.shape_cast %83 : vector<64x8x2xf32> to vector<512x2xf32>
    %cst_28 = arith.constant 0.000000e+00 : f32
    %85 = vector.broadcast %cst_28 : f32 to vector<512x110xf32>
    %86 = tpu.concatenate %51, %52, %84, %85 in 1 : vector<512x8xf32>, vector<512x8xf32>, vector<512x2xf32>, vector<512x110xf32> -> vector<512x128xf32>
    %c0_29 = arith.constant 0 : index
    %c0_30 = arith.constant 0 : index
    %87 = vector.load %arg7[%c0_29, %c0_30] : memref<512x128xf32, #tpu.memory_space<vmem>>, vector<512x128xf32>
    tpu.vector_store %arg7[%c0_29, %c0_30], %86 {strides = array<i32>} : memref<512x128xf32, #tpu.memory_space<vmem>>, vector<512x128xf32>,
    return
  }
  func.func @transform_0(%arg0: i32) -> (i32, i32) {
    %c0_i32 = arith.constant 0 : i32
    %c0_i32_0 = arith.constant 0 : i32
    return %arg0, %c0_i32 : i32, i32
  }
  func.func @transform_1(%arg0: i32) -> (i32, i32) {
    %c0_i32 = arith.constant 0 : i32
    %c0_i32_0 = arith.constant 0 : i32
    %c0_i32_1 = arith.constant 0 : i32
    return %c0_i32, %c0_i32_0 : i32, i32
  }
  func.func @transform_2(%arg0: i32) -> (i32, i32) {
    %c0_i32 = arith.constant 0 : i32
    %c0_i32_0 = arith.constant 0 : i32
    %c0_i32_1 = arith.constant 0 : i32
    return %c0_i32, %c0_i32_0 : i32, i32
  }
  func.func @transform_3(%arg0: i32) -> (i32, i32) {
    %c0_i32 = arith.constant 0 : i32
    %c0_i32_0 = arith.constant 0 : i32
    %c0_i32_1 = arith.constant 0 : i32
    return %c0_i32, %c0_i32_0 : i32, i32
  }
  func.func @transform_4(%arg0: i32) -> (i32, i32) {
    %c0_i32 = arith.constant 0 : i32
    %c0_i32_0 = arith.constant 0 : i32
    %c0_i32_1 = arith.constant 0 : i32
    return %c0_i32, %c0_i32_0 : i32, i32
  }
  func.func @transform_5(%arg0: i32) -> i32 {
    %c0_i32 = arith.constant 0 : i32
    %c0_i32_0 = arith.constant 0 : i32
    return %c0_i32 : i32
  }
  func.func @transform_6(%arg0: i32) -> (i32, i32) {
    %c0_i32 = arith.constant 0 : i32
    %c0_i32_0 = arith.constant 0 : i32
    return %arg0, %c0_i32 : i32, i32
  }
}

</mosaic_0001>

<bundles_post_ra>
// kernel: tpu_custom_call.1
= control target key start
LH: loop header
LB: loop body
LE: loop exit
PB: predicated region body
PF: predicated region fallthrough
CT: control target
= control target key end

     0   :  { %11 = vsyncpa [#allocation4], 0  ;;  %s16189_s0 = inlined_call_operand.vmem [shape: s32[1024,1], index: 0, kind: input, shape index: {}]   ;;  %s16190_s1 = inlined_call_operand.vmem [shape: f32[16,128], index: 1, kind: input, shape index: {}]   ;;  %s16191_s2 = inlined_call_operand.vmem [shape: f32[256,256], index: 2, kind: input, shape index: {}]   ;;  %s16192_s3 = inlined_call_operand.vmem [shape: f32[256,8], index: 3, kind: input, shape index: {}]   ;;  %s16193_s4 = inlined_call_operand.vmem [shape: f32[512,16], index: 4, kind: input, shape index: {}]   ;;  %s16194_s5 = inlined_call_operand.vmem [shape: f32[2], index: 5, kind: input, shape index: {}]   ;;  %s16195_s6 = inlined_call_operand.hbm [shape: f32[1024,128], index: 6, kind: output, shape index: {}]  }
   0x1   :  { %12 = vsyncpa [#allocation3], 0 }
   0x2   :  { %14 = vsyncpa [#allocation3 + $0x1], 0  ;;  %s10251_s21 = smov 0   ;;  %s10253_s22 = smov 0  }
   0x3   :  { %s10255_s23 = smov 0   ;;  %s10257_s24 = smov 0  }
   0x4 LB: > { %s10272_s25 = sadd.s32 4294967295, %s10203_s24   ;;  %s8167_s26 = sadd.s32 4294967294, %s10203_s24   ;;  %s10203_s24 = sphi %s10257_s24, %s17559_s24   ;;  %s10199_s23 = sphi %s10255_s23, %s17558_s23   ;;  %s10195_s22 = sphi %s10253_s22, %s17557_s22   ;;  %s10191_s21 = sphi %s10251_s21, %s17556_s21  }
   0x5   : > { %s10276_s27 = sadd.s32 1, %s10203_s24   ;;  %s158_s28 = sadd.s32 1, %s10199_s23 }
   0x6   : > { %s155_s29 = ssub.s32 %s10203_s24, %s10276_s27  ;;  %p168_p0 = scmp.ne.s32.totalorder %s10199_s23, %s10195_s22 }
   0x7   : > { %p156_p1 = scmp.eq.s32.totalorder %s155_s29, 0  ;;  %p169_p2 = scmp.eq.s32.totalorder %s10272_s25, 1 }
   0x8   : > { %p174_p3 = scmp.ne.s32.totalorder %s10195_s22, %s10191_s21  ;;  %p175_p4 = scmp.eq.s32.totalorder %s8167_s26, 1 }
   0x9   : > { %s10287_s30 = scalar_select %p156_p1, %s10199_s23, %s158_s28  }
   0xa   : > { %p10289_p5 = por %p169_p2, %p168_p0  ;;  %p10293_p6 = por %p175_p4, %p174_p3 }
   0xb   : > { %p8168_p7 = scmp.ge.s32.totalorder %s10203_s24, 1  ;;  %p182_p8 = scmp.lt.s32.totalorder %s10203_s24, 3 }
   0xc   : > { %p9105_p9 = scmp.eq.s32.totalorder %s10272_s25, 0  ;;  %s207_s12 = sshll.u32 %s16194_s5, 4  ;;  %s208_s12 = int_to_ptr.vmem [resolvable:$true] %s207_s12 }
   0xd   : > { %p10300_p10 = pnand %p8168_p7, %p182_p8  ;;  %s10122_s13 = scalar_lea.vmem %s208_s12, 16 }
   0xe   : > { %p10123_p13 = scmp.ne.s32.totalorder %s208_s12, %s10122_s13  ;;  %p10130_p3 = scmp.lt.s32.totalorder %s208_s12, %s208_s12 }
   0xf   : > { %p9097_p11 = pneg %p10300_p10  ;;  %p10131_p4 = scmp.lt.s32.totalorder %s10122_s13, %s10122_s13 }
  0x11   : > { %p9098_p12 = pnand %p9105_p9, %p9097_p11  ;;  %p10132_p7 = por %p10131_p4, %p10130_p3 }
  0x13   : > { %p10124_p0 = pneg %p9098_p12 }
  0x15   : > { %p10125_p1 = pnand %p10124_p0, %p10123_p13 }
  0x17   : > { %p10126_p2 = pneg %p10125_p1 }
  0x19   : > { %p10133_p8 = pnand %p10132_p7, %p10126_p2 }
  0x1b   : > { %10136 = shalt.err (!%p10133_p8)
}
  0x1c   : > { %s10205_s14 = smov [#allocation2]   ;;  %229 = sbr.rel (%p10300_p10) target bundleno = 3496 (0xda8), region = 44 }
  0x1d   : > { %9100 = dma.vmem_to_smem (!%p9098_p12), %s208_s12, 16, %s10205_s14, [#allocation4]  }
  0x23   : > { %10182 = dma.done.wait (%p9105_p9), [#allocation4], 16  }
  0x24   : > { %10184 = vsyncadd (%p9105_p9), [#allocation4], 4294967280 }
  0x25   : > { %235 = sfence }
  0x26   : > { %s8174_s15 = sshll.u32 %s10272_s25, 6  ;;  %v10206_v0 = vmov 0   ;;  %v717_v13 = vld [vmem:[%s16190_s1] sm:$0xff]  ;;  %v718_v14 = vld [vmem:[%s16190_s1 + $0x8] sm:$0xff]  ;;  %v16196_v60 = vlaneseq  ;;  %vm719_vm0 = vcmask 130048   ;;  %s10208_s9 = smov 112  }
  0x27   : > { %9151 = vset.pattern.permute.xlu1 %v10206_v0  ;;  %9150 = vset.pattern.permute.xlu0 %v10206_v0  ;;  %p261_p11 = scmp.lt.s32.totalorder %s8174_s15, 127  ;;  %v8797_v15 = vpack.c.bf16 %v718_v14, %v717_v13  ;;  %s10210_s10 = smov 96  }
  0x28   : > { %v10387_v62 = vand.u32 127, %v16196_v60  ;;  %s10211_s13 = smov 120   ;;  %s257_s26 = sand.u32 1, %s10195_s22  }
  0x29   : > { %s17561_s15 = smov (!%p261_p11, %s8174_s15), 127  ;;  %8798 = vmatprep.subr.bf16.mxu0 %v8797_v15  ;;  %9089 = vmatprep.subr.bf16.mxu1 %v8797_v15  ;;  %s8173_s28 = sshll.u32 %s257_s26, 9 }
  0x2a   : > { %s8175_s16 = sshll.u32 %s17561_s15, 3  ;;  %8800 = vmatpush3.bf16.msra.mxu0 %v8797_v15  ;;  %9090 = vmatpush3.bf16.msra.mxu1 %v8797_v15  ;;  %s15199_s29 = scalar_lea.vmem [#allocation5], %s8173_s28 }
  0x2b   : > { %s10321_s19 = scalar_lea.vmem %s16189_s0, %s8175_s16  ;;  %s10214_s16 = smov [#allocation5]  }
  0x2c   : > { %v269_v1 = vld [vmem:[%s10321_s19 + $0x10] sm:$0xff]  ;;  %v267_v2 = vld [vmem:[%s10321_s19] sm:$0xff]  ;;  %v270_v3 = vld [vmem:[%s10321_s19 + $0x18] sm:$0xff]  ;;  %s10141_s17 = sshll.u32 %s10214_s16, 4  ;;  %s10142_s17 = int_to_ptr.vmem [resolvable:$false] %s10141_s17 }
  0x2d   : > { %340 = vperm.xlu1 %9151, %v269_v1   ;;  %334 = vperm.xlu0 %9150, %v267_v2   ;;  %v268_v4 = vld [vmem:[%s10321_s19 + $0x8] sm:$0xff]  ;;  %v271_v6 = vld [vmem:[%s10321_s19 + $0x20] sm:$0xff]  ;;  %v274_v7 = vld [vmem:[%s10321_s19 + $0x38] sm:$0xff]  ;;  %v10207_v2 = vmov 0.0   ;;  %s10143_s18 = scalar_lea.vmem %s10142_s17, 16384 }
  0x2e   : > { %v272_v5 = vld [vmem:[%s10321_s19 + $0x28] sm:$0xff]  ;;  %v273_v8 = vld [vmem:[%s10321_s19 + $0x30] sm:$0xff]  ;;  %v275_v10 = vld [vmem:[%s10321_s19 + $0x40] sm:$0xff] }
  0x2f   : > { %v276_v9 = vld [vmem:[%s10321_s19 + $0x48] sm:$0xff]  ;;  %v278_v11 = vld [vmem:[%s10321_s19 + $0x58] sm:$0xff]  ;;  %v277_v12 = vld [vmem:[%s10321_s19 + $0x50] sm:$0xff] }
  0x30   : > { %v280_v16 = vld [vmem:[%s10321_s19 + $0x68] sm:$0xff]  ;;  %v279_v17 = vld [vmem:[%s10321_s19 + $0x60] sm:$0xff]  ;;  %v282_v18 = vld [vmem:[%s10321_s19 + $0x78] sm:$0xff] }
  0x31   : > { %343 = vperm.xlu1 %9151, %v270_v3   ;;  %337 = vperm.xlu0 %9150, %v268_v4   ;;  %v281_v19 = vld [vmem:[%s10321_s19 + $0x70] sm:$0xff]  ;;  %v284_v20 = vld [vmem:[%s10321_s19 + $0x88] sm:$0xff]  ;;  %v283_v21 = vld [vmem:[%s10321_s19 + $0x80] sm:$0xff] }
  0x32   : > { %v286_v22 = vld [vmem:[%s10321_s19 + $0x98] sm:$0xff]  ;;  %v285_v23 = vld [vmem:[%s10321_s19 + $0x90] sm:$0xff]  ;;  %v288_v24 = vld [vmem:[%s10321_s19 + $0xa8] sm:$0xff] }
  0x33   : > { %v287_v25 = vld [vmem:[%s10321_s19 + $0xa0] sm:$0xff]  ;;  %v290_v26 = vld [vmem:[%s10321_s19 + $0xb8] sm:$0xff]  ;;  %v289_v27 = vld [vmem:[%s10321_s19 + $0xb0] sm:$0xff] }
  0x34   : > { %v292_v28 = vld [vmem:[%s10321_s19 + $0xc8] sm:$0xff]  ;;  %v291_v29 = vld [vmem:[%s10321_s19 + $0xc0] sm:$0xff]  ;;  %v294_v30 = vld [vmem:[%s10321_s19 + $0xd8] sm:$0xff] }
  0x35   : > { %349 = vperm.xlu1 %9151, %v272_v5   ;;  %346 = vperm.xlu0 %9150, %v271_v6   ;;  %v293_v31 = vld [vmem:[%s10321_s19 + $0xd0] sm:$0xff]  ;;  %v296_v32 = vld [vmem:[%s10321_s19 + $0xe8] sm:$0xff]  ;;  %v295_v33 = vld [vmem:[%s10321_s19 + $0xe0] sm:$0xff] }
  0x36   : > { %v298_v34 = vld [vmem:[%s10321_s19 + $0xf8] sm:$0xff]  ;;  %v297_v35 = vld [vmem:[%s10321_s19 + $0xf0] sm:$0xff]  ;;  %v300_v36 = vld [vmem:[%s10321_s19 + $0x108] sm:$0xff] }
  0x37   : > { %v299_v37 = vld [vmem:[%s10321_s19 + $0x100] sm:$0xff]  ;;  %v302_v38 = vld [vmem:[%s10321_s19 + $0x118] sm:$0xff]  ;;  %v301_v39 = vld [vmem:[%s10321_s19 + $0x110] sm:$0xff] }
  0x38   : > { %v306_v40 = vld [vmem:[%s10321_s19 + $0x138] sm:$0xff]  ;;  %v303_v41 = vld [vmem:[%s10321_s19 + $0x120] sm:$0xff]  ;;  %v304_v43 = vld [vmem:[%s10321_s19 + $0x128] sm:$0xff] }
  0x39   : > { %355 = vperm.xlu1 %9151, %v274_v7   ;;  %352 = vperm.xlu0 %9150, %v273_v8   ;;  %v310_v42 = vld [vmem:[%s10321_s19 + $0x158] sm:$0xff]  ;;  %v305_v45 = vld [vmem:[%s10321_s19 + $0x130] sm:$0xff]  ;;  %v307_v47 = vld [vmem:[%s10321_s19 + $0x140] sm:$0xff] }
  0x3a   : > { %v314_v44 = vld [vmem:[%s10321_s19 + $0x178] sm:$0xff]  ;;  %v308_v49 = vld [vmem:[%s10321_s19 + $0x148] sm:$0xff]  ;;  %v309_v51 = vld [vmem:[%s10321_s19 + $0x150] sm:$0xff] }
  0x3b   : > { %v318_v46 = vld [vmem:[%s10321_s19 + $0x198] sm:$0xff]  ;;  %v311_v53 = vld [vmem:[%s10321_s19 + $0x160] sm:$0xff]  ;;  %v312_v54 = vld [vmem:[%s10321_s19 + $0x168] sm:$0xff] }
  0x3c   : > { %v322_v48 = vld [vmem:[%s10321_s19 + $0x1b8] sm:$0xff]  ;;  %v313_v55 = vld [vmem:[%s10321_s19 + $0x170] sm:$0xff]  ;;  %v315_v56 = vld [vmem:[%s10321_s19 + $0x180] sm:$0xff] }
  0x3d   : > { %361 = vperm.xlu1 %9151, %v276_v9   ;;  %358 = vperm.xlu0 %9150, %v275_v10   ;;  %v326_v50 = vld [vmem:[%s10321_s19 + $0x1d8] sm:$0xff]  ;;  %v316_v57 = vld [vmem:[%s10321_s19 + $0x188] sm:$0xff]  ;;  %v317_v58 = vld [vmem:[%s10321_s19 + $0x190] sm:$0xff] }
  0x3e   : > { %v330_v52 = vld [vmem:[%s10321_s19 + $0x1f8] sm:$0xff]  ;;  %v319_v59 = vld [vmem:[%s10321_s19 + $0x1a0] sm:$0xff]  ;;  %v320_v61 = vld [vmem:[%s10321_s19 + $0x1a8] sm:$0xff] }
  0x3f   : > { %v321_v63 = vld [vmem:[%s10321_s19 + $0x1b0] sm:$0xff]  ;;  %v323_v4 = vld [vmem:[%s10321_s19 + $0x1c0] sm:$0xff]  ;;  %v324_v9 = vld [vmem:[%s10321_s19 + $0x1c8] sm:$0xff] }
  0x40   : > { %v325_v14 = vld [vmem:[%s10321_s19 + $0x1d0] sm:$0xff] }
  0x41   : > { %367 = vperm.xlu1 %9151, %v278_v11   ;;  %364 = vperm.xlu0 %9150, %v277_v12  }
  0x45   : > { %373 = vperm.xlu1 %9151, %v280_v16   ;;  %370 = vperm.xlu0 %9150, %v279_v17  }
  0x49   : > { %379 = vperm.xlu1 %9151, %v282_v18   ;;  %376 = vperm.xlu0 %9150, %v281_v19   ;;  %v327_v19 = vld [vmem:[%s10321_s19 + $0x1e0] sm:$0xff] }
  0x4d   : > { %385 = vperm.xlu1 %9151, %v284_v20   ;;  %382 = vperm.xlu0 %9150, %v283_v21  }
  0x51   : > { %391 = vperm.xlu1 %9151, %v286_v22   ;;  %388 = vperm.xlu0 %9150, %v285_v23  }
  0x55   : > { %397 = vperm.xlu1 %9151, %v288_v24   ;;  %394 = vperm.xlu0 %9150, %v287_v25   ;;  %v328_v24 = vld [vmem:[%s10321_s19 + $0x1e8] sm:$0xff] }
  0x59   : > { %403 = vperm.xlu1 %9151, %v290_v26   ;;  %400 = vperm.xlu0 %9150, %v289_v27  }
  0x5d   : > { %409 = vperm.xlu1 %9151, %v292_v28   ;;  %406 = vperm.xlu0 %9150, %v291_v29   ;;  %v329_v29 = vld [vmem:[%s10321_s19 + $0x1f0] sm:$0xff] }
  0x61   : > { %415 = vperm.xlu1 %9151, %v294_v30   ;;  %412 = vperm.xlu0 %9150, %v293_v31  }
  0x65   : > { %421 = vperm.xlu1 %9151, %v296_v32   ;;  %418 = vperm.xlu0 %9150, %v295_v33  }
  0x69   : > { %427 = vperm.xlu1 %9151, %v298_v34   ;;  %424 = vperm.xlu0 %9150, %v297_v35  }
  0x6d   : > { %433 = vperm.xlu1 %9151, %v300_v36   ;;  %430 = vperm.xlu0 %9150, %v299_v37  }
  0x71   : > { %439 = vperm.xlu1 %9151, %v302_v38   ;;  %436 = vperm.xlu0 %9150, %v301_v39  }
  0x75   : > { %451 = vperm.xlu1 %9151, %v306_v40   ;;  %442 = vperm.xlu0 %9150, %v303_v41  }
  0x79   : > { %463 = vperm.xlu1 %9151, %v310_v42   ;;  %445 = vperm.xlu0 %9150, %v304_v43  }
  0x7d   : > { %475 = vperm.xlu1 %9151, %v314_v44   ;;  %448 = vperm.xlu0 %9150, %v305_v45  }
  0x81   : > { %487 = vperm.xlu1 %9151, %v318_v46   ;;  %454 = vperm.xlu0 %9150, %v307_v47  }
  0x85   : > { %499 = vperm.xlu1 %9151, %v322_v48   ;;  %457 = vperm.xlu0 %9150, %v308_v49  }
  0x89   : > { %511 = vperm.xlu1 %9151, %v326_v50   ;;  %460 = vperm.xlu0 %9150, %v309_v51  }
  0x8d   : > { %523 = vperm.xlu1 %9151, %v330_v52   ;;  %466 = vperm.xlu0 %9150, %v311_v53  }
  0x91   : > { %469 = vperm.xlu0 %9150, %v312_v54  }
  0x95   : > { %472 = vperm.xlu0 %9150, %v313_v55  }
  0x99   : > { %478 = vperm.xlu0 %9150, %v315_v56  }
  0x9d   : > { %481 = vperm.xlu0 %9150, %v316_v57  }
  0xa1   : > { %484 = vperm.xlu0 %9150, %v317_v58  }
  0xa5   : > { %490 = vperm.xlu0 %9150, %v319_v59  }
  0xa9   : > { %493 = vperm.xlu0 %9150, %v320_v61  }
  0xac   : > { %v341_v0 = vpop.permute.xlu1 %340  ;;  %v335_v1 = vpop.permute.xlu0 %334 }
  0xad   : > { %496 = vperm.xlu0 %9150, %v321_v63   ;;  %vm525_vm1 = vcmp.eq.s32.totalorder %v335_v1, %v10387_v62  ;;  %vm527_vm2 = vcmp.eq.s32.totalorder %v341_v0, %v10387_v62 }
  0xae   : > { %v8176_v3 = vsel %vm525_vm1, 1.0, %v10207_v2  ;;  %v8178_v7 = vsel %vm527_vm2, 1.0, %v10207_v2 }
  0xaf   : > { %8701 = vmatprep.mubr.msk.f32.mxu0 %vm719_vm0, %v8176_v3 }
  0xb0   : > { %v344_v5 = vpop.permute.xlu1 %343  ;;  %v338_v6 = vpop.permute.xlu0 %337 }
  0xb1   : > { %vm526_vm3 = vcmp.eq.s32.totalorder %v338_v6, %v10387_v62  ;;  %502 = vperm.xlu0 %9150, %v323_v4   ;;  %vm528_vm4 = vcmp.eq.s32.totalorder %v344_v5, %v10387_v62 }
  0xb2   : > { %v8177_v8 = vsel %vm526_vm3, 1.0, %v10207_v2  ;;  %v8179_v12 = vsel %vm528_vm4, 1.0, %v10207_v2 }
  0xb3   : > { %8702 = vmatmul.mubr.msk.f32.vlgmr.msra.gmra.mrb[0].mxu0 %vm719_vm0, %v8177_v8 }
  0xb4   : > { %v350_v10 = vpop.permute.xlu1 %349  ;;  %8704 = vmatprep.mubr.msk.f32.mxu0 %vm719_vm0, %v8178_v7  ;;  %v347_v11 = vpop.permute.xlu0 %346 }
  0xb5   : > { %vm529_vm5 = vcmp.eq.s32.totalorder %v347_v11, %v10387_v62  ;;  %505 = vperm.xlu0 %9150, %v324_v9   ;;  %vm530_vm6 = vcmp.eq.s32.totalorder %v350_v10, %v10387_v62 }
  0xb6   : > { %v8180_v13 = vsel %vm529_vm5, 1.0, %v10207_v2  ;;  %v8181_v17 = vsel %vm530_vm6, 1.0, %v10207_v2 }
  0xb7   : > { %8705 = vmatmul.mubr.msk.f32.gmra.mrb[2].mxu0 %vm719_vm0, %v8179_v12 }
  0xb8   : > { %v356_v15 = vpop.permute.xlu1 %355  ;;  %8707 = vmatprep.mubr.msk.f32.mxu0 %vm719_vm0, %v8180_v13  ;;  %v353_v16 = vpop.permute.xlu0 %352 }
  0xb9   : > { %vm531_vm7 = vcmp.eq.s32.totalorder %v353_v16, %v10387_v62  ;;  %508 = vperm.xlu0 %9150, %v325_v14   ;;  %vm532_vm8 = vcmp.eq.s32.totalorder %v356_v15, %v10387_v62 }
  0xba   : > { %v8182_v18 = vsel %vm531_vm7, 1.0, %v10207_v2  ;;  %v8183_v22 = vsel %vm532_vm8, 1.0, %v10207_v2 }
  0xbb   : > { %8708 = vmatmul.mubr.msk.f32.gmra.mrb[4].mxu0 %vm719_vm0, %v8181_v17 }
  0xbc   : > { %v362_v20 = vpop.permute.xlu1 %361  ;;  %8710 = vmatprep.mubr.msk.f32.mxu0 %vm719_vm0, %v8182_v18  ;;  %v359_v21 = vpop.permute.xlu0 %358 }
  0xbd   : > { %vm533_vm9 = vcmp.eq.s32.totalorder %v359_v21, %v10387_v62  ;;  %514 = vperm.xlu0 %9150, %v327_v19   ;;  %vm534_vm10 = vcmp.eq.s32.totalorder %v362_v20, %v10387_v62 }
  0xbe   : > { %v8184_v23 = vsel %vm533_vm9, 1.0, %v10207_v2  ;;  %v8185_v27 = vsel %vm534_vm10, 1.0, %v10207_v2 }
  0xbf   : > { %8711 = vmatmul.mubr.msk.f32.gmra.mrb[6].mxu0 %vm719_vm0, %v8183_v22 }
  0xc0   : > { %v368_v25 = vpop.permute.xlu1 %367  ;;  %8713 = vmatprep.mubr.msk.f32.mxu0 %vm719_vm0, %v8184_v23  ;;  %v365_v26 = vpop.permute.xlu0 %364 }
  0xc1   : > { %vm535_vm11 = vcmp.eq.s32.totalorder %v365_v26, %v10387_v62  ;;  %517 = vperm.xlu0 %9150, %v328_v24   ;;  %vm536_vm12 = vcmp.eq.s32.totalorder %v368_v25, %v10387_v62 }
  0xc2   : > { %v8186_v28 = vsel %vm535_vm11, 1.0, %v10207_v2  ;;  %v8187_v32 = vsel %vm536_vm12, 1.0, %v10207_v2 }
  0xc3   : > { %8714 = vmatmul.mubr.msk.f32.gmra.mrb[8].mxu0 %vm719_vm0, %v8185_v27 }
  0xc4   : > { %v374_v30 = vpop.permute.xlu1 %373  ;;  %8716 = vmatprep.mubr.msk.f32.mxu0 %vm719_vm0, %v8186_v28  ;;  %v371_v31 = vpop.permute.xlu0 %370 }
  0xc5   : > { %vm537_vm13 = vcmp.eq.s32.totalorder %v371_v31, %v10387_v62  ;;  %520 = vperm.xlu0 %9150, %v329_v29   ;;  %vm538_vm14 = vcmp.eq.s32.totalorder %v374_v30, %v10387_v62 }
  0xc6   : > { %v8188_v33 = vsel %vm537_vm13, 1.0, %v10207_v2  ;;  %v8189_v36 = vsel %vm538_vm14, 1.0, %v10207_v2 }
  0xc7   : > { %8717 = vmatmul.mubr.msk.f32.gmra.mrb[10].mxu0 %vm719_vm0, %v8187_v32 }
  0xc8   : > { %v380_v34 = vpop.permute.xlu1 %379  ;;  %8719 = vmatprep.mubr.msk.f32.mxu0 %vm719_vm0, %v8188_v33  ;;  %v377_v35 = vpop.permute.xlu0 %376 }
  0xc9   : > { %vm539_vm15 = vcmp.eq.s32.totalorder %v377_v35, %v10387_v62  ;;  %vm540_vm1 = vcmp.eq.s32.totalorder %v380_v34, %v10387_v62 }
  0xca   : > { %v8190_v37 = vsel %vm539_vm15, 1.0, %v10207_v2  ;;  %v8191_v40 = vsel %vm540_vm1, 1.0, %v10207_v2 }
  0xcb   : > { %8720 = vmatmul.mubr.msk.f32.gmra.mrb[12].mxu0 %vm719_vm0, %v8189_v36 }
  0xcc   : > { %v386_v38 = vpop.permute.xlu1 %385  ;;  %8722 = vmatprep.mubr.msk.f32.mxu0 %vm719_vm0, %v8190_v37  ;;  %v383_v39 = vpop.permute.xlu0 %382 }
  0xcd   : > { %vm541_vm2 = vcmp.eq.s32.totalorder %v383_v39, %v10387_v62  ;;  %vm542_vm3 = vcmp.eq.s32.totalorder %v386_v38, %v10387_v62 }
  0xce   : > { %v8192_v41 = vsel %vm541_vm2, 1.0, %v10207_v2  ;;  %v8193_v44 = vsel %vm542_vm3, 1.0, %v10207_v2 }
  0xcf   : > { %8723 = vmatmul.mubr.msk.f32.gmra.mrb[14].mxu0 %vm719_vm0, %v8191_v40 }
  0xd0   : > { %v392_v42 = vpop.permute.xlu1 %391  ;;  %8725 = vmatprep.mubr.msk.f32.mxu0 %vm719_vm0, %v8192_v41  ;;  %v389_v43 = vpop.permute.xlu0 %388 }
  0xd1   : > { %vm543_vm4 = vcmp.eq.s32.totalorder %v389_v43, %v10387_v62  ;;  %vm544_vm5 = vcmp.eq.s32.totalorder %v392_v42, %v10387_v62 }
  0xd2   : > { %v8194_v45 = vsel %vm543_vm4, 1.0, %v10207_v2  ;;  %v8195_v48 = vsel %vm544_vm5, 1.0, %v10207_v2 }
  0xd3   : > { %8726 = vmatmul.mubr.msk.f32.gmra.mrb[16].mxu0 %vm719_vm0, %v8193_v44 }
  0xd4   : > { %v398_v46 = vpop.permute.xlu1 %397  ;;  %8728 = vmatprep.mubr.msk.f32.mxu0 %vm719_vm0, %v8194_v45  ;;  %v395_v47 = vpop.permute.xlu0 %394 }
  0xd5   : > { %vm545_vm6 = vcmp.eq.s32.totalorder %v395_v47, %v10387_v62  ;;  %vm546_vm7 = vcmp.eq.s32.totalorder %v398_v46, %v10387_v62 }
  0xd6   : > { %v8196_v49 = vsel %vm545_vm6, 1.0, %v10207_v2  ;;  %v8197_v52 = vsel %vm546_vm7, 1.0, %v10207_v2 }
  0xd7   : > { %8729 = vmatmul.mubr.msk.f32.gmra.mrb[18].mxu0 %vm719_vm0, %v8195_v48 }
  0xd8   : > { %v404_v50 = vpop.permute.xlu1 %403  ;;  %8731 = vmatprep.mubr.msk.f32.mxu0 %vm719_vm0, %v8196_v49  ;;  %v401_v51 = vpop.permute.xlu0 %400 }
  0xd9   : > { %vm547_vm8 = vcmp.eq.s32.totalorder %v401_v51, %v10387_v62  ;;  %vm548_vm9 = vcmp.eq.s32.totalorder %v404_v50, %v10387_v62 }
  0xda   : > { %v8198_v53 = vsel %vm547_vm8, 1.0, %v10207_v2  ;;  %v8199_v56 = vsel %vm548_vm9, 1.0, %v10207_v2 }
  0xdb   : > { %8732 = vmatmul.mubr.msk.f32.gmra.mrb[20].mxu0 %vm719_vm0, %v8197_v52 }
  0xdc   : > { %v410_v54 = vpop.permute.xlu1 %409  ;;  %8734 = vmatprep.mubr.msk.f32.mxu0 %vm719_vm0, %v8198_v53  ;;  %v407_v55 = vpop.permute.xlu0 %406 }
  0xdd   : > { %vm549_vm10 = vcmp.eq.s32.totalorder %v407_v55, %v10387_v62  ;;  %vm550_vm11 = vcmp.eq.s32.totalorder %v410_v54, %v10387_v62 }
  0xde   : > { %v8200_v57 = vsel %vm549_vm10, 1.0, %v10207_v2  ;;  %v8201_v61 = vsel %vm550_vm11, 1.0, %v10207_v2 }
  0xdf   : > { %8735 = vmatmul.mubr.msk.f32.gmra.mrb[22].mxu0 %vm719_vm0, %v8199_v56 }
  0xe0   : > { %v416_v58 = vpop.permute.xlu1 %415  ;;  %8737 = vmatprep.mubr.msk.f32.mxu0 %vm719_vm0, %v8200_v57  ;;  %v413_v59 = vpop.permute.xlu0 %412 }
  0xe1   : > { %vm551_vm12 = vcmp.eq.s32.totalorder %v413_v59, %v10387_v62  ;;  %vm552_vm13 = vcmp.eq.s32.totalorder %v416_v58, %v10387_v62 }
  0xe2   : > { %v8202_v63 = vsel %vm551_vm12, 1.0, %v10207_v2  ;;  %v8203_v3 = vsel %vm552_vm13, 1.0, %v10207_v2 }
  0xe3   : > { %8738 = vmatmul.mubr.msk.f32.gmra.mrb[24].mxu0 %vm719_vm0, %v8201_v61 }
  0xe4   : > { %v422_v0 = vpop.permute.xlu1 %421  ;;  %8740 = vmatprep.mubr.msk.f32.mxu0 %vm719_vm0, %v8202_v63  ;;  %v419_v1 = vpop.permute.xlu0 %418 }
  0xe5   : > { %vm553_vm14 = vcmp.eq.s32.totalorder %v419_v1, %v10387_v62  ;;  %vm554_vm15 = vcmp.eq.s32.totalorder %v422_v0, %v10387_v62 }
  0xe6   : > { %v8204_v4 = vsel %vm553_vm14, 1.0, %v10207_v2  ;;  %v8205_v7 = vsel %vm554_vm15, 1.0, %v10207_v2 }
  0xe7   : > { %8741 = vmatmul.mubr.msk.f32.gmra.mrb[26].mxu0 %vm719_vm0, %v8203_v3 }
  0xe8   : > { %v428_v5 = vpop.permute.xlu1 %427  ;;  %8743 = vmatprep.mubr.msk.f32.mxu0 %vm719_vm0, %v8204_v4  ;;  %v425_v6 = vpop.permute.xlu0 %424 }
  0xe9   : > { %vm555_vm1 = vcmp.eq.s32.totalorder %v425_v6, %v10387_v62  ;;  %vm556_vm2 = vcmp.eq.s32.totalorder %v428_v5, %v10387_v62 }
  0xea   : > { %v8206_v8 = vsel %vm555_vm1, 1.0, %v10207_v2  ;;  %v8207_v11 = vsel %vm556_vm2, 1.0, %v10207_v2 }
  0xeb   : > { %8744 = vmatmul.mubr.msk.f32.gmra.mrb[28].mxu0 %vm719_vm0, %v8205_v7 }
  0xec   : > { %v434_v9 = vpop.permute.xlu1 %433  ;;  %8746 = vmatprep.mubr.msk.f32.mxu0 %vm719_vm0, %v8206_v8  ;;  %v431_v10 = vpop.permute.xlu0 %430 }
  0xed   : > { %vm558_vm3 = vcmp.eq.s32.totalorder %v434_v9, %v10387_v62  ;;  %vm557_vm4 = vcmp.eq.s32.totalorder %v431_v10, %v10387_v62 }
  0xee   : > { %v8209_v12 = vsel %vm558_vm3, 1.0, %v10207_v2  ;;  %v8208_v13 = vsel %vm557_vm4, 1.0, %v10207_v2 }
  0xef   : > { %8747 = vmatmul.mubr.msk.f32.gmra.mrb[30].mxu0 %vm719_vm0, %v8207_v11  ;;  %8749 = vmatprep.mubr.msk.f32.mxu1 %vm719_vm0, %v8208_v13 }
  0xf0   : > { %v440_v14 = vpop.permute.xlu1 %439  ;;  %8750 = vmatmul.mubr.msk.f32.vlgmr.msra.gmra.mrb[0].mxu1 %vm719_vm0, %v8209_v12  ;;  %v437_v15 = vpop.permute.xlu0 %436 }
  0xf1   : > { %vm560_vm5 = vcmp.eq.s32.totalorder %v440_v14, %v10387_v62  ;;  %vm559_vm6 = vcmp.eq.s32.totalorder %v437_v15, %v10387_v62 }
  0xf2   : > { %v8211_v16 = vsel %vm560_vm5, 1.0, %v10207_v2  ;;  %v8210_v17 = vsel %vm559_vm6, 1.0, %v10207_v2 }
  0xf3   : > { %8752 = vmatprep.mubr.msk.f32.mxu1 %vm719_vm0, %v8210_v17 }
  0xf4   : > { %8753 = vmatmul.mubr.msk.f32.gmra.mrb[2].mxu1 %vm719_vm0, %v8211_v16  ;;  %v443_v18 = vpop.permute.xlu0 %442  ;;  %v452_v21 = vpop.permute.xlu1 %451 }
  0xf5   : > { %vm561_vm7 = vcmp.eq.s32.totalorder %v443_v18, %v10387_v62  ;;  %vm564_vm9 = vcmp.eq.s32.totalorder %v452_v21, %v10387_v62 }
  0xf6   : > { %v8212_v19 = vsel %vm561_vm7, 1.0, %v10207_v2  ;;  %v8215_v25 = vsel %vm564_vm9, 1.0, %v10207_v2 }
  0xf7   : > { %8755 = vmatprep.mubr.msk.f32.mxu1 %vm719_vm0, %v8212_v19 }
  0xf8   : > { %v446_v20 = vpop.permute.xlu0 %445  ;;  %v464_v29 = vpop.permute.xlu1 %463 }
  0xf9   : > { %vm562_vm8 = vcmp.eq.s32.totalorder %v446_v20, %v10387_v62  ;;  %vm568_vm13 = vcmp.eq.s32.totalorder %v464_v29, %v10387_v62 }
  0xfa   : > { %v8213_v22 = vsel %vm562_vm8, 1.0, %v10207_v2  ;;  %v8219_v33 = vsel %vm568_vm13, 1.0, %v10207_v2 }
  0xfb   : > { %8756 = vmatmul.mubr.msk.f32.gmra.mrb[4].mxu1 %vm719_vm0, %v8213_v22 }
  0xfc   : > { %v449_v23 = vpop.permute.xlu0 %448  ;;  %v476_v37 = vpop.permute.xlu1 %475 }
  0xfd   : > { %vm563_vm10 = vcmp.eq.s32.totalorder %v449_v23, %v10387_v62  ;;  %vm572_vm2 = vcmp.eq.s32.totalorder %v476_v37, %v10387_v62 }
  0xfe   : > { %v8214_v24 = vsel %vm563_vm10, 1.0, %v10207_v2  ;;  %v8223_v41 = vsel %vm572_vm2, 1.0, %v10207_v2 }
  0xff   : > { %8758 = vmatprep.mubr.msk.f32.mxu1 %vm719_vm0, %v8214_v24 }
 0x100   : > { %8759 = vmatmul.mubr.msk.f32.gmra.mrb[6].mxu1 %vm719_vm0, %v8215_v25  ;;  %v455_v26 = vpop.permute.xlu0 %454  ;;  %v488_v45 = vpop.permute.xlu1 %487 }
 0x101   : > { %vm565_vm11 = vcmp.eq.s32.totalorder %v455_v26, %v10387_v62  ;;  %vm576_vm6 = vcmp.eq.s32.totalorder %v488_v45, %v10387_v62 }
 0x102   : > { %v8216_v27 = vsel %vm565_vm11, 1.0, %v10207_v2  ;;  %v8227_v49 = vsel %vm576_vm6, 1.0, %v10207_v2  ;;  %vm4791_vm6 = vcmask 64512  }
 0x103   : > { %8761 = vmatprep.mubr.msk.f32.mxu1 %vm719_vm0, %v8216_v27 }
 0x104   : > { %v458_v28 = vpop.permute.xlu0 %457  ;;  %v500_v53 = vpop.permute.xlu1 %499 }
 0x105   : > { %vm566_vm12 = vcmp.eq.s32.totalorder %v458_v28, %v10387_v62  ;;  %vm580_vm10 = vcmp.eq.s32.totalorder %v500_v53, %v10387_v62 }
 0x106   : > { %v8217_v30 = vsel %vm566_vm12, 1.0, %v10207_v2  ;;  %v8231_v57 = vsel %vm580_vm10, 1.0, %v10207_v2  ;;  %vm6163_vm10 = vcmask 1042434  }
 0x107   : > { %8762 = vmatmul.mubr.msk.f32.gmra.mrb[8].mxu1 %vm719_vm0, %v8217_v30 }
 0x108   : > { %v461_v31 = vpop.permute.xlu0 %460  ;;  %v512_v63 = vpop.permute.xlu1 %511 }
 0x109   : > { %vm567_vm14 = vcmp.eq.s32.totalorder %v461_v31, %v10387_v62 }
 0x10a   : > { %v8218_v32 = vsel %vm567_vm14, 1.0, %v10207_v2  ;;  %vm584_vm14 = vcmp.eq.s32.totalorder %v512_v63, %v10387_v62 }
 0x10b   : > { %8764 = vmatprep.mubr.msk.f32.mxu1 %vm719_vm0, %v8218_v32  ;;  %v8235_v4 = vsel %vm584_vm14, 1.0, %v10207_v2  ;;  %vm6178_vm14 = vcmask 1047559  }
 0x10c   : > { %8765 = vmatmul.mubr.msk.f32.gmra.mrb[10].mxu1 %vm719_vm0, %v8219_v33  ;;  %v467_v34 = vpop.permute.xlu0 %466  ;;  %v524_v8 = vpop.permute.xlu1 %523 }
 0x10d   : > { %vm569_vm15 = vcmp.eq.s32.totalorder %v467_v34, %v10387_v62 }
 0x10e   : > { %v8220_v35 = vsel %vm569_vm15, 1.0, %v10207_v2 }
 0x10f   : > { %8767 = vmatprep.mubr.msk.f32.mxu1 %vm719_vm0, %v8220_v35 }
 0x110   : > { %v470_v36 = vpop.permute.xlu0 %469 }
 0x111   : > { %vm570_vm1 = vcmp.eq.s32.totalorder %v470_v36, %v10387_v62 }
 0x112   : > { %v8221_v38 = vsel %vm570_vm1, 1.0, %v10207_v2 }
 0x113   : > { %8768 = vmatmul.mubr.msk.f32.gmra.mrb[12].mxu1 %vm719_vm0, %v8221_v38 }
 0x114   : > { %v473_v39 = vpop.permute.xlu0 %472 }
 0x115   : > { %vm571_vm3 = vcmp.eq.s32.totalorder %v473_v39, %v10387_v62 }
 0x116   : > { %v8222_v40 = vsel %vm571_vm3, 1.0, %v10207_v2  ;;  %vm588_vm3 = vcmp.eq.s32.totalorder %v524_v8, %v10387_v62 }
 0x117   : > { %8770 = vmatprep.mubr.msk.f32.mxu1 %vm719_vm0, %v8222_v40  ;;  %v8239_v12 = vsel %vm588_vm3, 1.0, %v10207_v2 }
 0x118   : > { %8771 = vmatmul.mubr.msk.f32.gmra.mrb[14].mxu1 %vm719_vm0, %v8223_v41  ;;  %v479_v42 = vpop.permute.xlu0 %478 }
 0x119   : > { %vm573_vm4 = vcmp.eq.s32.totalorder %v479_v42, %v10387_v62 }
 0x11a   : > { %v8224_v43 = vsel %vm573_vm4, 1.0, %v10207_v2 }
 0x11b   : > { %8773 = vmatprep.mubr.msk.f32.mxu1 %vm719_vm0, %v8224_v43 }
 0x11c   : > { %v482_v44 = vpop.permute.xlu0 %481 }
 0x11d   : > { %vm574_vm5 = vcmp.eq.s32.totalorder %v482_v44, %v10387_v62 }
 0x11e   : > { %v8225_v46 = vsel %vm574_vm5, 1.0, %v10207_v2  ;;  %vm10892_vm5 = vmpackc.low %vm719_vm0, %vm719_vm0 }
 0x11f   : > { %8774 = vmatmul.mubr.msk.f32.gmra.mrb[16].mxu1 %vm719_vm0, %v8225_v46 }
 0x120   : > { %v485_v47 = vpop.permute.xlu0 %484 }
 0x121   : > { %vm575_vm7 = vcmp.eq.s32.totalorder %v485_v47, %v10387_v62 }
 0x122   : > { %v8226_v48 = vsel %vm575_vm7, 1.0, %v10207_v2  ;;  %vm5496_vm7 = vcmask 7168  }
 0x123   : > { %8776 = vmatprep.mubr.msk.f32.mxu1 %vm719_vm0, %v8226_v48 }
 0x124   : > { %8777 = vmatmul.mubr.msk.f32.gmra.mrb[18].mxu1 %vm719_vm0, %v8227_v49  ;;  %v491_v50 = vpop.permute.xlu0 %490 }
 0x125   : > { %vm577_vm8 = vcmp.eq.s32.totalorder %v491_v50, %v10387_v62 }
 0x126   : > { %v8228_v51 = vsel %vm577_vm8, 1.0, %v10207_v2  ;;  %vm5561_vm8 = vcmask 15360  }
 0x127   : > { %8779 = vmatprep.mubr.msk.f32.mxu1 %vm719_vm0, %v8228_v51 }
 0x128   : > { %v494_v52 = vpop.permute.xlu0 %493 }
 0x129   : > { %vm578_vm9 = vcmp.eq.s32.totalorder %v494_v52, %v10387_v62 }
 0x12a   : > { %v8229_v54 = vsel %vm578_vm9, 1.0, %v10207_v2  ;;  %vm6160_vm9 = vcmask 1041409  }
 0x12b   : > { %8780 = vmatmul.mubr.msk.f32.gmra.mrb[20].mxu1 %vm719_vm0, %v8229_v54 }
 0x12c   : > { %v497_v55 = vpop.permute.xlu0 %496 }
 0x12d   : > { %vm579_vm11 = vcmp.eq.s32.totalorder %v497_v55, %v10387_v62 }
 0x12e   : > { %v8230_v56 = vsel %vm579_vm11, 1.0, %v10207_v2  ;;  %vm6166_vm11 = vcmask 1043459  }
 0x12f   : > { %8782 = vmatprep.mubr.msk.f32.mxu1 %vm719_vm0, %v8230_v56  ;;  %v16197_v56 = vmov 0.0|0.0  }
 0x130   : > { %8783 = vmatmul.mubr.msk.f32.gmra.mrb[22].mxu1 %vm719_vm0, %v8231_v57  ;;  %v503_v58 = vpop.permute.xlu0 %502  ;;  %8849 = vmatprep.subr.bf16.mxu0 %v16197_v56 }
 0x131   : > { %vm581_vm12 = vcmp.eq.s32.totalorder %v503_v58, %v10387_v62 }
 0x132   : > { %v8232_v59 = vsel %vm581_vm12, 1.0, %v10207_v2  ;;  %vm6169_vm12 = vcmask 1044484  }
 0x133   : > { %8785 = vmatprep.mubr.msk.f32.mxu1 %vm719_vm0, %v8232_v59 }
 0x134   : > { %v506_v61 = vpop.permute.xlu0 %505 }
 0x135   : > { %vm582_vm13 = vcmp.eq.s32.totalorder %v506_v61, %v10387_v62 }
 0x136   : > { %v8233_v0 = vsel %vm582_vm13, 1.0, %v10207_v2  ;;  %vm6172_vm13 = vcmask 1045509  }
 0x137   : > { %8786 = vmatmul.mubr.msk.f32.gmra.mrb[24].mxu1 %vm719_vm0, %v8233_v0 }
 0x138   : > { %v509_v1 = vpop.permute.xlu0 %508 }
 0x139   : > { %vm583_vm15 = vcmp.eq.s32.totalorder %v509_v1, %v10387_v62 }
 0x13a   : > { %v8234_v3 = vsel %vm583_vm15, 1.0, %v10207_v2  ;;  %vm6175_vm15 = vcmask 1046534  }
 0x13b   : > { %8788 = vmatprep.mubr.msk.f32.mxu1 %vm719_vm0, %v8234_v3 }
 0x13c   : > { %8789 = vmatmul.mubr.msk.f32.gmra.mrb[26].mxu1 %vm719_vm0, %v8235_v4  ;;  %v515_v5 = vpop.permute.xlu0 %514 }
 0x13d   : > { %vm585_vm1 = vcmp.eq.s32.totalorder %v515_v5, %v10387_v62 }
 0x13e   : > { %v8236_v6 = vsel %vm585_vm1, 1.0, %v10207_v2  ;;  %vm7950_vm1 = vcmask 146432  }
 0x13f   : > { %8791 = vmatprep.mubr.msk.f32.mxu1 %vm719_vm0, %v8236_v6 }
 0x140   : > { %v518_v7 = vpop.permute.xlu0 %517 }
 0x141   : > { %vm586_vm2 = vcmp.eq.s32.totalorder %v518_v7, %v10387_v62 }
 0x142   : > { %v8237_v9 = vsel %vm586_vm2, 1.0, %v10207_v2 }
 0x143   : > { %8792 = vmatmul.mubr.msk.f32.gmra.mrb[28].mxu1 %vm719_vm0, %v8237_v9 }
 0x144   : > { %v521_v10 = vpop.permute.xlu0 %520 }
 0x145   : > { %vm587_vm4 = vcmp.eq.s32.totalorder %v521_v10, %v10387_v62 }
 0x146   : > { %v8238_v11 = vsel %vm587_vm4, 1.0, %v10207_v2 }
 0x147   : > { %8794 = vmatprep.mubr.msk.f32.mxu1 %vm719_vm0, %v8238_v11 }
 0x148   : > { %8795 = vmatmul.mubr.msk.f32.gmra.mrb[30].mxu1 %vm719_vm0, %v8239_v12 }
 0x186   : > { %v10588_v13 = vpop.f32.mrb[0].mxu0 }
 0x187   : > { %v10590_v14 = vpop.f32.mrb[1].mxu0 }
 0x188   : > { %8537 = vmatprep.mubr.msk.f32.mxu1 %vm719_vm0, %v10590_v14  ;;  %v10596_v15 = vpack.i.bf16 %v10588_v13, %v10590_v14 }
 0x18a   : > { %9153 = vrot.lane.b32.xlu1 %v10596_v15, %s10208_s9  ;;  %v10600_v62 = vpop.f32.mrb[2].mxu0 }
 0x18b   : > { %v10602_v2 = vpop.f32.mrb[3].mxu0 }
 0x18c   : > { %v10606_v16 = vpack.i.bf16 %v10600_v62, %v10602_v2 }
 0x18e   : > { %9158 = vrot.lane.b32.xlu1 %v10606_v16, %s10208_s9  ;;  %v10610_v17 = vpop.f32.mrb[4].mxu0 }
 0x18f   : > { %v10612_v18 = vpop.f32.mrb[5].mxu0 }
 0x190   : > { %v10616_v19 = vpack.i.bf16 %v10610_v17, %v10612_v18 }
 0x192   : > { %9163 = vrot.lane.b32.xlu1 %v10616_v19, %s10208_s9  ;;  %v10620_v20 = vpop.f32.mrb[6].mxu0 }
 0x193   : > { %v10622_v21 = vpop.f32.mrb[7].mxu0 }
 0x194   : > { %v9167_v22 = vpack.i.bf16 %v10620_v20, %v10622_v21 }
 0x196   : > { %9168 = vrot.lane.b32.xlu1 %v9167_v22, %s10208_s9  ;;  %v10627_v23 = vpop.f32.mrb[8].mxu0 }
 0x197   : > { %v10629_v24 = vpop.f32.mrb[9].mxu0 }
 0x198   : > { %v9172_v25 = vpack.i.bf16 %v10627_v23, %v10629_v24 }
 0x19a   : > { %9173 = vrot.lane.b32.xlu1 %v9172_v25, %s10208_s9  ;;  %v10634_v26 = vpop.f32.mrb[10].mxu0 }
 0x19b   : > { %v10636_v27 = vpop.f32.mrb[11].mxu0 }
 0x19c   : > { %v10640_v28 = vpack.i.bf16 %v10634_v26, %v10636_v27 }
 0x19e   : > { %9178 = vrot.lane.b32.xlu1 %v10640_v28, %s10208_s9  ;;  %v10644_v29 = vpop.f32.mrb[12].mxu0 }
 0x19f   : > { %v10646_v30 = vpop.f32.mrb[13].mxu0 }
 0x1a0   : > { %v9182_v31 = vpack.i.bf16 %v10644_v29, %v10646_v30 }
 0x1a2   : > { %9183 = vrot.lane.b32.xlu1 %v9182_v31, %s10208_s9  ;;  %v10651_v32 = vpop.f32.mrb[14].mxu0 }
 0x1a3   : > { %v10653_v33 = vpop.f32.mrb[15].mxu0 }
 0x1a4   : > { %v9227_v34 = vpack.i.bf16 %v10651_v32, %v10653_v33 }
 0x1a6   : > { %v10657_v35 = vpop.f32.mrb[16].mxu0 }
 0x1a7   : > { %v10659_v36 = vpop.f32.mrb[17].mxu0 }
 0x1a8   : > { %v9187_v37 = vpack.i.bf16 %v10657_v35, %v10659_v36 }
 0x1aa   : > { %9188 = vrot.lane.b32.xlu1 %v9187_v37, %s10208_s9  ;;  %v10664_v38 = vpop.f32.mrb[18].mxu0 }
 0x1ab   : > { %v10666_v39 = vpop.f32.mrb[19].mxu0 }
 0x1ac   : > { %v9192_v40 = vpack.i.bf16 %v10664_v38, %v10666_v39 }
 0x1ae   : > { %9193 = vrot.lane.b32.xlu1 %v9192_v40, %s10208_s9  ;;  %v10671_v41 = vpop.f32.mrb[20].mxu0 }
 0x1af   : > { %v10673_v42 = vpop.f32.mrb[21].mxu0 }
 0x1b0   : > { %v9197_v43 = vpack.i.bf16 %v10671_v41, %v10673_v42 }
 0x1b2   : > { %9198 = vrot.lane.b32.xlu1 %v9197_v43, %s10208_s9  ;;  %v10678_v44 = vpop.f32.mrb[22].mxu0 }
 0x1b3   : > { %v10680_v45 = vpop.f32.mrb[23].mxu0 }
 0x1b4   : > { %v9202_v46 = vpack.i.bf16 %v10678_v44, %v10680_v45 }
 0x1b6   : > { %9203 = vrot.lane.b32.xlu1 %v9202_v46, %s10208_s9  ;;  %v10685_v47 = vpop.f32.mrb[24].mxu0 }
 0x1b7   : > { %v10687_v48 = vpop.f32.mrb[25].mxu0 }
 0x1b8   : > { %v9207_v49 = vpack.i.bf16 %v10685_v47, %v10687_v48 }
 0x1ba   : > { %9208 = vrot.lane.b32.xlu1 %v9207_v49, %s10208_s9  ;;  %v10692_v50 = vpop.f32.mrb[26].mxu0 }
 0x1bb   : > { %v10694_v51 = vpop.f32.mrb[27].mxu0 }
 0x1bc   : > { %v9212_v52 = vpack.i.bf16 %v10692_v50, %v10694_v51 }
 0x1be   : > { %9213 = vrot.lane.b32.xlu1 %v9212_v52, %s10208_s9  ;;  %v10699_v53 = vpop.f32.mrb[28].mxu0 }
 0x1bf   : > { %v10701_v54 = vpop.f32.mrb[29].mxu0 }
 0x1c0   : > { %v9217_v55 = vpack.i.bf16 %v10699_v53, %v10701_v54 }
 0x1c2   : > { %9218 = vrot.lane.b32.xlu1 %v9217_v55, %s10208_s9  ;;  %v10707_v57 = vpop.f32.mrb[30].mxu0 }
 0x1c3   : > { %v10709_v58 = vpop.f32.mrb[31].mxu0  ;;  %v10711_v59 = vpop.f32.mrb[0].mxu1 }
 0x1c4   : > { %16584 = vst [vmem:[#allocation8_spill] sm:$0xff] %v10711_v59  ;;  %v10715_v61 = vpack.i.bf16 %v10707_v57, %v10709_v58  ;;  %v10717_v63 = vpop.f32.mrb[1].mxu1 }
 0x1c5   : > { %16585 = vst [vmem:[#allocation9_spill] sm:$0xff] %v10717_v63  ;;  %v9392_v0 = vpack.i.bf16 %v10711_v59, %v10717_v63 }
 0x1c6   : > { %9228 = vrot.lane.b32.xlu1 %v9227_v34, %s10208_s9  ;;  %9223 = vrot.lane.b32.xlu0 %v10715_v61, %s10208_s9 }
 0x1c7   : > { %v10724_v1 = vpop.f32.mrb[2].mxu1 }
 0x1c8   : > { %16586 = vst [vmem:[#allocation10_spill] sm:$0xff] %v10724_v1  ;;  %v10726_v3 = vpop.f32.mrb[3].mxu1 }
 0x1c9   : > { %16587 = vst [vmem:[#allocation11_spill] sm:$0xff] %v10726_v3  ;;  %v10730_v4 = vpack.i.bf16 %v10724_v1, %v10726_v3 }
 0x1ca   : > { %9233 = vrot.lane.b32.xlu1 %v10596_v15, %s10210_s10  ;;  %9238 = vrot.lane.b32.xlu0 %v10606_v16, %s10210_s10 }
 0x1ce   : > { %9248 = vrot.lane.b32.xlu1 %v9167_v22, %s10210_s10  ;;  %9243 = vrot.lane.b32.xlu0 %v10616_v19, %s10210_s10  ;;  %v10739_v5 = vpop.f32.mrb[4].mxu1 }
 0x1cf   : > { %16588 = vst [vmem:[#allocation12_spill] sm:$0xff] %v10739_v5  ;;  %v10741_v6 = vpop.f32.mrb[5].mxu1 }
 0x1d0   : > { %16589 = vst [vmem:[#allocation13_spill] sm:$0xff] %v10741_v6  ;;  %v10745_v7 = vpack.i.bf16 %v10739_v5, %v10741_v6 }
 0x1d2   : > { %9263 = vrot.lane.b32.xlu1 %v9182_v31, %s10210_s10  ;;  %9253 = vrot.lane.b32.xlu0 %v9172_v25, %s10210_s10 }
 0x1d3   : > { %v10749_v8 = vpop.f32.mrb[6].mxu1 }
 0x1d4   : > { %16590 = vst [vmem:[#allocation14_spill] sm:$0xff] %v10749_v8  ;;  %v10751_v9 = vpop.f32.mrb[7].mxu1 }
 0x1d5   : > { %16591 = vst [vmem:[#allocation15_spill] sm:$0xff] %v10751_v9  ;;  %v9407_v10 = vpack.i.bf16 %v10749_v8, %v10751_v9 }
 0x1d6   : > { %9273 = vrot.lane.b32.xlu1 %v9187_v37, %s10210_s10  ;;  %9258 = vrot.lane.b32.xlu0 %v10640_v28, %s10210_s10 }
 0x1da   : > { %9283 = vrot.lane.b32.xlu1 %v9197_v43, %s10210_s10  ;;  %9268 = vrot.lane.b32.xlu0 %v9227_v34, %s10210_s10  ;;  %v10760_v11 = vpop.f32.mrb[8].mxu1 }
 0x1db   : > { %16592 = vst [vmem:[#allocation16_spill] sm:$0xff] %v10760_v11  ;;  %v10762_v12 = vpop.f32.mrb[9].mxu1 }
 0x1dc   : > { %16593 = vst [vmem:[#allocation17_spill] sm:$0xff] %v10762_v12  ;;  %v10766_v15 = vpack.i.bf16 %v10760_v11, %v10762_v12 }
 0x1de   : > { %9293 = vrot.lane.b32.xlu1 %v9207_v49, %s10210_s10  ;;  %9278 = vrot.lane.b32.xlu0 %v9192_v40, %s10210_s10 }
 0x1df   : > { %v10770_v16 = vpop.f32.mrb[10].mxu1 }
 0x1e0   : > { %16594 = vst [vmem:[#allocation18_spill] sm:$0xff] %v10770_v16  ;;  %v10772_v19 = vpop.f32.mrb[11].mxu1 }
 0x1e1   : > { %16595 = vst [vmem:[#allocation19_spill] sm:$0xff] %v10772_v19  ;;  %v10776_v22 = vpack.i.bf16 %v10770_v16, %v10772_v19 }
 0x1e2   : > { %9303 = vrot.lane.b32.xlu1 %v9217_v55, %s10210_s10  ;;  %9288 = vrot.lane.b32.xlu0 %v9202_v46, %s10210_s10 }
 0x1e6   : > { %9298 = vrot.lane.b32.xlu0 %v9212_v52, %s10210_s10  ;;  %9313 = vrot.lane.b32.xlu1 %v9392_v0, %s10208_s9  ;;  %v10782_v25 = vpop.f32.mrb[12].mxu1 }
 0x1e7   : > { %16596 = vst [vmem:[#allocation20_spill] sm:$0xff] %v10782_v25  ;;  %v10784_v28 = vpop.f32.mrb[13].mxu1 }
 0x1e8   : > { %16597 = vst [vmem:[#allocation21_spill] sm:$0xff] %v10784_v28  ;;  %v9422_v31 = vpack.i.bf16 %v10782_v25, %v10784_v28 }
 0x1ea   : > { %9323 = vrot.lane.b32.xlu1 %v10730_v4, %s10208_s9 }
 0x1eb   : > { %v10790_v34 = vpop.f32.mrb[14].mxu1 }
 0x1ec   : > { %16598 = vst [vmem:[#allocation22_spill] sm:$0xff] %v10790_v34  ;;  %v10792_v37 = vpop.f32.mrb[15].mxu1 }
 0x1ed   : > { %16599 = vst [vmem:[#allocation23_spill] sm:$0xff] %v10792_v37  ;;  %v10796_v40 = vpack.i.bf16 %v10790_v34, %v10792_v37 }
 0x1ee   : > { %9333 = vrot.lane.b32.xlu1 %v10745_v7, %s10208_s9 }
 0x1f2   : > { %9343 = vrot.lane.b32.xlu1 %v9407_v10, %s10208_s9  ;;  %v10801_v43 = vpop.f32.mrb[16].mxu1 }
 0x1f3   : > { %16600 = vst [vmem:[#allocation24_spill] sm:$0xff] %v10801_v43  ;;  %v10803_v46 = vpop.f32.mrb[17].mxu1 }
 0x1f4   : > { %16601 = vst [vmem:[#allocation25_spill] sm:$0xff] %v10803_v46  ;;  %v9432_v49 = vpack.i.bf16 %v10801_v43, %v10803_v46 }
 0x1f6   : > { %9358 = vrot.lane.b32.xlu1 %v10766_v15, %s10208_s9  ;;  %9308 = vrot.lane.b32.xlu0 %v9432_v49, %s10208_s9 }
 0x1f7   : > { %v10810_v52 = vpop.f32.mrb[18].mxu1 }
 0x1f8   : > { %16602 = vst [vmem:[#allocation26_spill] sm:$0xff] %v10810_v52  ;;  %v10812_v55 = vpop.f32.mrb[19].mxu1 }
 0x1f9   : > { %16603 = vst [vmem:[#allocation27_spill] sm:$0xff] %v10812_v55  ;;  %v10816_v60 = vpack.i.bf16 %v10810_v52, %v10812_v55 }
 0x1fa   : > { %9393 = vrot.lane.b32.xlu1 %v9392_v0, %s10210_s10 }
 0x1fb   : > { %9318 = vrot.lane.b32.xlu0 %v10816_v60, %s10208_s9 }
 0x1fc   : > { %v9154_v56 = vpop.permute.xlu1 %9153 }
 0x1fd   : > { %v9155_v19 = vunpack.i.l.bf16 %v9154_v56 }
 0x1fe   : > { %9408 = vrot.lane.b32.xlu1 %v9407_v10, %s10210_s10  ;;  %v10822_v43 = vpop.f32.mrb[20].mxu1 }
 0x1ff   : > { %16604 = vst [vmem:[#allocation28_spill] sm:$0xff] %v10822_v43  ;;  %v10824_v46 = vpop.f32.mrb[21].mxu1 }
 0x200   : > { %16605 = vst [vmem:[#allocation29_spill] sm:$0xff] %v10824_v46  ;;  %v9442_v34 = vpack.i.bf16 %v10822_v43, %v10824_v46  ;;  %v9159_v37 = vpop.permute.xlu1 %9158 }
 0x202   : > { %9423 = vrot.lane.b32.xlu1 %v9422_v31, %s10210_s10  ;;  %9328 = vrot.lane.b32.xlu0 %v9442_v34, %s10208_s9 }
 0x203   : > { %v10830_v52 = vpop.f32.mrb[22].mxu1 }
 0x204   : > { %16606 = vst [vmem:[#allocation30_spill] sm:$0xff] %v10830_v52  ;;  %v10832_v0 = vpop.permute.xlu1 %9163  ;;  %v10834_v55 = vpop.f32.mrb[23].mxu1 }
 0x205   : > { %16607 = vst [vmem:[#allocation31_spill] sm:$0xff] %v10834_v55  ;;  %v10838_v10 = vpack.i.bf16 %v10830_v52, %v10834_v55 }
 0x206   : > { %9433 = vrot.lane.b32.xlu1 %v9432_v49, %s10210_s10 }
 0x207   : > { %9338 = vrot.lane.b32.xlu0 %v10838_v10, %s10208_s9 }
 0x208   : > { %v10843_v43 = vpop.permute.xlu1 %9168 }
 0x20a   : > { %9443 = vrot.lane.b32.xlu1 %v9442_v34, %s10210_s10  ;;  %v10846_v46 = vpop.f32.mrb[24].mxu1 }
 0x20b   : > { %16608 = vst [vmem:[#allocation32_spill] sm:$0xff] %v10846_v46  ;;  %9348 = vrot.lane.b32.xlu0 %v10715_v61, %s10210_s10  ;;  %v10850_v25 = vpop.f32.mrb[25].mxu1 }
 0x20c   : > { %16609 = vst [vmem:[#allocation33_spill] sm:$0xff] %v10850_v25  ;;  %v9452_v52 = vpack.i.bf16 %v10846_v46, %v10850_v25  ;;  %v10854_v55 = vpop.permute.xlu1 %9173 }
 0x20e   : > { %9453 = vrot.lane.b32.xlu1 %v9452_v52, %s10210_s10 }
 0x20f   : > { %9353 = vrot.lane.b32.xlu0 %v9452_v52, %s10208_s9  ;;  %v10858_v49 = vpop.f32.mrb[26].mxu1 }
 0x210   : > { %16610 = vst [vmem:[#allocation34_spill] sm:$0xff] %v10858_v49  ;;  %v10860_v28 = vpop.f32.mrb[27].mxu1  ;;  %v10866_v61 = vpop.permute.xlu1 %9178 }
 0x211   : > { %16611 = vst [vmem:[#allocation35_spill] sm:$0xff] %v10860_v28  ;;  %v10864_v34 = vpack.i.bf16 %v10858_v49, %v10860_v28  ;;  %v9156_v28 = vunpack.i.h.bf16 %v9154_v56 }
 0x213   : > { %9363 = vrot.lane.b32.xlu0 %v10864_v34, %s10208_s9 }
 0x214   : > { %v10876_v52 = vpop.permute.xlu1 %9183 }
 0x216   : > { %v10870_v46 = vpop.f32.mrb[28].mxu1 }
 0x217   : > { %16612 = vst [vmem:[#allocation36_spill] sm:$0xff] %v10870_v46  ;;  %9368 = vrot.lane.b32.xlu0 %v10776_v22, %s10208_s9  ;;  %v10874_v25 = vpop.f32.mrb[29].mxu1 }
 0x218   : > { %16613 = vst [vmem:[#allocation37_spill] sm:$0xff] %v10874_v25  ;;  %v9462_v16 = vpack.i.bf16 %v10870_v46, %v10874_v25  ;;  %v16616_v46 = vmov 0  ;;  %v8804_v25 = vpack.c.bf16 %v9156_v28, %v9155_v19 }
 0x219   : > { %v16617_v46 = vsel %vm10892_vm5, 4294967295, %v16616_v46 }
 0x21a   : > { %9463 = vrot.lane.b32.xlu1 %v9462_v16, %s10210_s10  ;;  %16618 = vst [vmem:[#allocation40_spill] sm:$0xff] %v16617_v46 }
 0x21b   : > { %9373 = vrot.lane.b32.xlu0 %v9462_v16, %s10208_s9  ;;  %v10882_v49 = vpop.f32.mrb[30].mxu1 }
 0x21c   : > { %16614 = vst [vmem:[#allocation38_spill] sm:$0xff] %v10882_v49  ;;  %v9189_v11 = vpop.permute.xlu1 %9188  ;;  %v10884_v12 = vpop.f32.mrb[31].mxu1 }
 0x21d   : > { %16615 = vst [vmem:[#allocation39_spill] sm:$0xff] %v10884_v12  ;;  %v9191_v8 = vunpack.i.h.bf16 %v9189_v11  ;;  %v9190_v9 = vunpack.i.l.bf16 %v9189_v11  ;;  %v10888_v5 = vpack.i.bf16 %v10882_v49, %v10884_v12  ;;  %v9161_v49 = vunpack.i.h.bf16 %v9159_v37 }
 0x21e   : > { %v9160_v12 = vunpack.i.l.bf16 %v9159_v37 }
 0x21f   : > { %v8801_v16 = vpack.c.bf16 %v9191_v8, %v9190_v9  ;;  %9378 = vrot.lane.b32.xlu0 %v9422_v31, %s10208_s9 }
 0x220   : > { %v9194_v56 = vpop.permute.xlu1 %9193  ;;  %v8810_v19 = vpack.c.bf16 %v9161_v49, %v9160_v12 }
 0x221   : > { %v9196_v6 = vunpack.i.h.bf16 %v9194_v56  ;;  %v9195_v1 = vunpack.i.l.bf16 %v9194_v56  ;;  %8803 = vmatprep.subr.msk.bf16.mxu1 %vm10892_vm5, %v8801_v16 }
 0x222   : > { %8806 = vmatpush3.bf16.xpose.msk.msra.mxu1 %vm10892_vm5, %v8804_v25 }
 0x223   : > { %v8807_v11 = vpack.c.bf16 %v9196_v6, %v9195_v1  ;;  %9383 = vrot.lane.b32.xlu0 %v10888_v5, %s10208_s9  ;;  %v9166_v1 = vunpack.i.h.bf16 %v10832_v0 }
 0x224   : > { %v9199_v3 = vpop.permute.xlu1 %9198 }
 0x225   : > { %v9201_v8 = vunpack.i.h.bf16 %v9199_v3  ;;  %v9200_v9 = vunpack.i.l.bf16 %v9199_v3  ;;  %8809 = vmatprep.subr.msk.bf16.mxu1 %vm10892_vm5, %v8807_v11  ;;  %v9165_v3 = vunpack.i.l.bf16 %v10832_v0  ;;  %v9170_v0 = vunpack.i.l.bf16 %v10843_v43 }
 0x227   : > { %9388 = vrot.lane.b32.xlu0 %v10796_v40, %s10208_s9  ;;  %v8813_v31 = vpack.c.bf16 %v9201_v8, %v9200_v9  ;;  %v8816_v12 = vpack.c.bf16 %v9166_v1, %v9165_v3  ;;  %s13716_s9 = sld [smem:[#allocation2 + $0x1]] }
 0x228   : > { %v9204_v28 = vpop.permute.xlu1 %9203 }
 0x229   : > { %v9206_v25 = vunpack.i.h.bf16 %v9204_v28  ;;  %v9205_v37 = vunpack.i.l.bf16 %v9204_v28 }
 0x22a   : > { %8812 = vmatpush3.bf16.xpose.msk.msra.mxu1 %vm10892_vm5, %v8810_v19 }
 0x22b   : > { %8815 = vmatprep.subr.msk.bf16.mxu1 %vm10892_vm5, %v8813_v31  ;;  %9398 = vrot.lane.b32.xlu0 %v10730_v4, %s10210_s10  ;;  %v8819_v16 = vpack.c.bf16 %v9206_v25, %v9205_v37  ;;  %v9171_v4 = vunpack.i.h.bf16 %v10843_v43  ;;  %v9175_v43 = vunpack.i.l.bf16 %v10854_v55 }
 0x22c   : > { %v9209_v6 = vpop.permute.xlu1 %9208 }
 0x22d   : > { %v9211_v11 = vunpack.i.h.bf16 %v9209_v6  ;;  %v9210_v8 = vunpack.i.l.bf16 %v9209_v6 }
 0x22f   : > { %9403 = vrot.lane.b32.xlu0 %v10745_v7, %s10210_s10  ;;  %v8822_v7 = vpack.c.bf16 %v9171_v4, %v9170_v0  ;;  %v8825_v28 = vpack.c.bf16 %v9211_v11, %v9210_v8 }
 0x230   : > { %v9214_v49 = vpop.permute.xlu1 %9213 }
 0x231   : > { %v9216_v1 = vunpack.i.h.bf16 %v9214_v49  ;;  %v9215_v3 = vunpack.i.l.bf16 %v9214_v49 }
 0x232   : > { %8818 = vmatpush3.bf16.xpose.msk.msra.mxu1 %vm10892_vm5, %v8816_v12 }
 0x233   : > { %8821 = vmatprep.subr.msk.bf16.mxu1 %vm10892_vm5, %v8819_v16  ;;  %9413 = vrot.lane.b32.xlu0 %v10766_v15, %s10210_s10  ;;  %v9176_v15 = vunpack.i.h.bf16 %v10854_v55  ;;  %v8831_v11 = vpack.c.bf16 %v9216_v1, %v9215_v3 }
 0x234   : > { %v9219_v56 = vpop.permute.xlu1 %9218 }
 0x235   : > { %v8828_v4 = vpack.c.bf16 %v9176_v15, %v9175_v43  ;;  %v9221_v15 = vunpack.i.h.bf16 %v9219_v56  ;;  %v9220_v43 = vunpack.i.l.bf16 %v9219_v56 }
 0x237   : > { %9418 = vrot.lane.b32.xlu0 %v10776_v22, %s10210_s10 }
 0x238   : > { %v10927_v9 = vpop.permute.xlu1 %9228  ;;  %v10929_v19 = vpop.permute.xlu0 %9223 }
 0x23a   : > { %8824 = vmatpush3.bf16.xpose.msk.msra.mxu1 %vm10892_vm5, %v8822_v7  ;;  %v9180_v7 = vunpack.i.l.bf16 %v10866_v61 }
 0x23b   : > { %8827 = vmatprep.subr.msk.bf16.mxu1 %vm10892_vm5, %v8825_v28  ;;  %9428 = vrot.lane.b32.xlu0 %v10796_v40, %s10210_s10  ;;  %v16619_v40 = vmov 0.0|0.0  }
 0x23c   : > { %v9234_v22 = vpop.permute.xlu1 %9233  ;;  %v9239_v31 = vpop.permute.xlu0 %9238 }
 0x23d   : > { %v9236_v6 = vunpack.i.h.bf16 %v9234_v22  ;;  %v9235_v25 = vunpack.i.l.bf16 %v9234_v22  ;;  %v9241_v12 = vunpack.i.h.bf16 %v9239_v31  ;;  %v9240_v16 = vunpack.i.l.bf16 %v9239_v31 }
 0x23f   : > { %v8850_v37 = vpack.c.bf16 %v9236_v6, %v9235_v25  ;;  %9438 = vrot.lane.b32.xlu0 %v10816_v60, %s10210_s10  ;;  %v8853_v55 = vpack.c.bf16 %v9241_v12, %v9240_v16  ;;  %v9181_v60 = vunpack.i.h.bf16 %v10866_v61  ;;  %v8837_v25 = vpack.c.bf16 %v9221_v15, %v9220_v43 }
 0x240   : > { %v9244_v0 = vpop.permute.xlu0 %9243  ;;  %v9249_v28 = vpop.permute.xlu1 %9248  ;;  %v9226_v16 = vunpack.i.h.bf16 %v10929_v19 }
 0x241   : > { %8851 = vmatpush1.bf16.msra.mxu0 %v8850_v37  ;;  %v9246_v8 = vunpack.i.h.bf16 %v9244_v0  ;;  %v9245_v49 = vunpack.i.l.bf16 %v9244_v0  ;;  %v9251_v31 = vunpack.i.h.bf16 %v9249_v28  ;;  %v9250_v1 = vunpack.i.l.bf16 %v9249_v28 }
 0x242   : > { %8830 = vmatpush3.bf16.xpose.msk.msra.mxu1 %vm10892_vm5, %v8828_v4  ;;  %8852 = vmatprep.subr.bf16.mxu0 %v16619_v40  ;;  %v8834_v6 = vpack.c.bf16 %v9181_v60, %v9180_v7  ;;  %v9186_v37 = vunpack.i.h.bf16 %v10876_v52  ;;  %v9225_v4 = vunpack.i.l.bf16 %v10929_v19  ;;  %v9231_v19 = vunpack.i.h.bf16 %v10927_v9 }
 0x243   : > { %8833 = vmatprep.subr.msk.bf16.mxu1 %vm10892_vm5, %v8831_v11  ;;  %9448 = vrot.lane.b32.xlu0 %v10838_v10, %s10210_s10  ;;  %v8856_v3 = vpack.c.bf16 %v9246_v8, %v9245_v49  ;;  %v8859_v10 = vpack.c.bf16 %v9251_v31, %v9250_v1  ;;  %v9230_v28 = vunpack.i.l.bf16 %v10927_v9  ;;  %v4664_v9 = vld [vmem:[%s16193_s4 + $0x8] sm:$0xff] }
 0x244   : > { %v9254_v22 = vpop.permute.xlu0 %9253  ;;  %v9264_v49 = vpop.permute.xlu1 %9263  ;;  %v8843_v60 = vpack.c.bf16 %v9226_v16, %v9225_v4  ;;  %5050 = vrot.lane.b32.xlu1 %v4664_v9, %s10211_s13 }
 0x245   : > { %8854 = vmatpush1.bf16.msra.mxu0 %v8853_v55  ;;  %v9256_v61 = vunpack.i.h.bf16 %v9254_v22  ;;  %v9255_v56 = vunpack.i.l.bf16 %v9254_v22  ;;  %v8846_v1 = vpack.c.bf16 %v9231_v19, %v9230_v28 }
 0x246   : > { %8855 = vmatprep.subr.bf16.mxu0 %v16619_v40 }
 0x247   : > { %9458 = vrot.lane.b32.xlu0 %v10864_v34, %s10210_s10  ;;  %v9185_v34 = vunpack.i.l.bf16 %v10876_v52  ;;  %v8862_v0 = vpack.c.bf16 %v9256_v61, %v9255_v56  ;;  %v9265_v52 = vunpack.i.l.bf16 %v9264_v49 }
 0x248   : > { %v9259_v12 = vpop.permute.xlu0 %9258 }
 0x249   : > { %8857 = vmatpush1.bf16.msra.mxu0 %v8856_v3  ;;  %v9261_v11 = vunpack.i.h.bf16 %v9259_v12  ;;  %v9260_v55 = vunpack.i.l.bf16 %v9259_v12  ;;  %v8840_v8 = vpack.c.bf16 %v9186_v37, %v9185_v34  ;;  %v9274_v3 = vpop.permute.xlu1 %9273 }
 0x24a   : > { %8836 = vmatpush3.bf16.xpose.msk.msra.mxu1 %vm10892_vm5, %v8834_v6  ;;  %8858 = vmatprep.subr.bf16.mxu0 %v16619_v40 }
 0x24b   : > { %8839 = vmatprep.subr.msk.bf16.mxu1 %vm10892_vm5, %v8837_v25  ;;  %9468 = vrot.lane.b32.xlu0 %v10888_v5, %s10210_s10  ;;  %v9266_v5 = vunpack.i.h.bf16 %v9264_v49  ;;  %v8865_v7 = vpack.c.bf16 %v9261_v11, %v9260_v55  ;;  %v9276_v25 = vunpack.i.h.bf16 %v9274_v3  ;;  %s10212_s10 = smov 8  }
 0x24c   : > { %v9269_v15 = vpop.permute.xlu0 %9268 }
 0x24d   : > { %8860 = vmatpush1.bf16.msra.mxu0 %v8859_v10  ;;  %v8868_v43 = vpack.c.bf16 %v9266_v5, %v9265_v52  ;;  %v9271_v22 = vunpack.i.h.bf16 %v9269_v15  ;;  %v9270_v31 = vunpack.i.l.bf16 %v9269_v15  ;;  %v9275_v10 = vunpack.i.l.bf16 %v9274_v3  ;;  %v9284_v12 = vpop.permute.xlu1 %9283 }
 0x24e   : > { %8861 = vmatprep.subr.bf16.mxu0 %v16619_v40  ;;  %v9286_v4 = vunpack.i.h.bf16 %v9284_v12 }
 0x24f   : > { %v8871_v61 = vpack.c.bf16 %v9271_v22, %v9270_v31  ;;  %v8874_v56 = vpack.c.bf16 %v9276_v25, %v9275_v10 }
 0x250   : > { %v9279_v6 = vpop.permute.xlu0 %9278 }
 0x251   : > { %8863 = vmatpush1.bf16.msra.mxu0 %v8862_v0  ;;  %v9281_v37 = vunpack.i.h.bf16 %v9279_v6  ;;  %v9280_v34 = vunpack.i.l.bf16 %v9279_v6  ;;  %v9285_v0 = vunpack.i.l.bf16 %v9284_v12 }
 0x252   : > { %8842 = vmatpush3.bf16.xpose.msk.msra.mxu1 %vm10892_vm5, %v8840_v8  ;;  %8864 = vmatprep.subr.bf16.mxu0 %v16619_v40 }
 0x253   : > { %8845 = vmatprep.subr.msk.bf16.mxu1 %vm10892_vm5, %v8843_v60  ;;  %v8877_v11 = vpack.c.bf16 %v9281_v37, %v9280_v34  ;;  %v9294_v60 = vpop.permute.xlu1 %9293  ;;  %v1303_v37 = vld [vmem:[%s16191_s2 + $0x30] sm:$0xff] }
 0x254   : > { %v9289_v16 = vpop.permute.xlu0 %9288  ;;  %v9295_v52 = vunpack.i.l.bf16 %v9294_v60 }
 0x255   : > { %8866 = vmatpush1.bf16.msra.mxu0 %v8865_v7  ;;  %v9291_v8 = vunpack.i.h.bf16 %v9289_v16  ;;  %v9290_v49 = vunpack.i.l.bf16 %v9289_v16  ;;  %v1304_v16 = vld [vmem:[%s16191_s2 + $0x38] sm:$0xff] }
 0x256   : > { %8867 = vmatprep.subr.bf16.mxu0 %v16619_v40 }
 0x257   : > { %v8883_v7 = vpack.c.bf16 %v9291_v8, %v9290_v49  ;;  %v9304_v15 = vpop.permute.xlu1 %9303  ;;  %v1305_v8 = vld [vmem:[%s16191_s2 + $0x40] sm:$0xff] }
 0x258   : > { %v9299_v55 = vpop.permute.xlu0 %9298  ;;  %v9305_v22 = vunpack.i.l.bf16 %v9304_v15 }
 0x259   : > { %8869 = vmatpush1.bf16.msra.mxu0 %v8868_v43  ;;  %v9301_v19 = vunpack.i.h.bf16 %v9299_v55  ;;  %v9300_v28 = vunpack.i.l.bf16 %v9299_v55 }
 0x25a   : > { %8848 = vmatpush3.bf16.xpose.msk.msra.mxu1 %vm10892_vm5, %v8846_v1  ;;  %8870 = vmatprep.subr.bf16.mxu0 %v16619_v40 }
 0x25b   : > { %8897 = vmatprep.subr.bf16.mxu1 %v16619_v40  ;;  %v8889_v31 = vpack.c.bf16 %v9301_v19, %v9300_v28  ;;  %v1307_v28 = vld [vmem:[%s16191_s2 + $0x50] sm:$0xff] }
 0x25d   : > { %8872 = vmatpush1.bf16.msra.mxu0 %v8871_v61 }
 0x25e   : > { %8873 = vmatprep.subr.bf16.mxu0 %v16619_v40 }
 0x261   : > { %8538 = vmatmul.mubr.msk.f32.vlgmr.msra.gmra.mrb[32].mxu1 %vm719_vm0, %v10590_v14  ;;  %8875 = vmatpush1.bf16.msra.mxu0 %v8874_v56  ;;  %v8880_v14 = vpack.c.bf16 %v9286_v4, %v9285_v0 }
 0x262   : > { %8539 = vmatprep.mubr.msk.f32.mxu1 %vm719_vm0, %v10588_v13  ;;  %8876 = vmatprep.subr.bf16.mxu0 %v16619_v40 }
 0x265   : > { %8540 = vmatmul.mubr.msk.f32.gmra.mrb[34].mxu1 %vm719_vm0, %v10588_v13  ;;  %8878 = vmatpush1.bf16.msra.mxu0 %v8877_v11  ;;  %v9296_v13 = vunpack.i.h.bf16 %v9294_v60 }
 0x266   : > { %8541 = vmatprep.mubr.msk.f32.mxu1 %vm719_vm0, %v10602_v2  ;;  %8879 = vmatprep.subr.bf16.mxu0 %v16619_v40 }
 0x268   : > { %v9309_v5 = vpop.permute.xlu0 %9308 }
 0x269   : > { %8542 = vmatmul.mubr.msk.f32.gmra.mrb[36].mxu1 %vm719_vm0, %v10602_v2  ;;  %8881 = vmatpush1.bf16.msra.mxu0 %v8880_v14  ;;  %v8886_v2 = vpack.c.bf16 %v9296_v13, %v9295_v52  ;;  %v9311_v6 = vunpack.i.h.bf16 %v9309_v5 }
 0x26a   : > { %8543 = vmatprep.mubr.msk.f32.mxu1 %vm719_vm0, %v10600_v62  ;;  %8882 = vmatprep.subr.bf16.mxu0 %v16619_v40 }
 0x26d   : > { %8544 = vmatmul.mubr.msk.f32.gmra.mrb[38].mxu1 %vm719_vm0, %v10600_v62  ;;  %8884 = vmatpush1.bf16.msra.mxu0 %v8883_v7  ;;  %v11002_v43 = vpop.permute.xlu0 %9318  ;;  %v9306_v62 = vunpack.i.h.bf16 %v9304_v15 }
 0x26e   : > { %8545 = vmatprep.mubr.msk.f32.mxu1 %vm719_vm0, %v10612_v18  ;;  %8885 = vmatprep.subr.bf16.mxu0 %v16619_v40  ;;  %16620 = vst [vmem:[#allocation41_spill] sm:$0xff] %v11002_v43 }
 0x271   : > { %8546 = vmatmul.mubr.msk.f32.gmra.mrb[40].mxu1 %vm719_vm0, %v10612_v18  ;;  %8887 = vmatpush1.bf16.msra.mxu0 %v8886_v2  ;;  %v8892_v18 = vpack.c.bf16 %v9306_v62, %v9305_v22  ;;  %v1308_v22 = vld [vmem:[%s16191_s2 + $0x58] sm:$0xff] }
 0x272   : > { %8547 = vmatprep.mubr.msk.f32.mxu1 %vm719_vm0, %v10610_v17  ;;  %8888 = vmatprep.subr.bf16.mxu0 %v16619_v40 }
 0x274   : > { %v11009_v1 = vpop.permute.xlu0 %9328 }
 0x275   : > { %16621 = vst [vmem:[#allocation42_spill] sm:$0xff] %v11009_v1  ;;  %8548 = vmatmul.mubr.msk.f32.gmra.mrb[42].mxu1 %vm719_vm0, %v10610_v17  ;;  %8890 = vmatpush1.bf16.msra.mxu0 %v8889_v31  ;;  %v9310_v17 = vunpack.i.l.bf16 %v9309_v5  ;;  %v1306_v5 = vld [vmem:[%s16191_s2 + $0x48] sm:$0xff] }
 0x276   : > { %8549 = vmatprep.mubr.msk.f32.mxu1 %vm719_vm0, %v10622_v21  ;;  %8891 = vmatprep.subr.bf16.mxu0 %v16619_v40 }
 0x277   : > { %v8945_v56 = vpack.c.bf16 %v9311_v6, %v9310_v17 }
 0x279   : > { %v11016_v3 = vpop.permute.xlu0 %9338  ;;  %8550 = vmatmul.mubr.msk.f32.gmra.mrb[44].mxu1 %vm719_vm0, %v10622_v21  ;;  %8893 = vmatpush1.bf16.msra.mxu0 %v8892_v18 }
 0x27a   : > { %16622 = vst [vmem:[#allocation43_spill] sm:$0xff] %v11016_v3  ;;  %8551 = vmatprep.mubr.msk.f32.mxu1 %vm719_vm0, %v10620_v20  ;;  %8894 = vmatprep.subr.bf16.mxu0 %v16619_v40 }
 0x27d   : > { %v9349_v25 = vpop.permute.xlu0 %9348  ;;  %8552 = vmatmul.mubr.msk.f32.gmra.mrb[46].mxu1 %vm719_vm0, %v10620_v20  ;;  %v1297_v20 = vld [vmem:[%s16191_s2] sm:$0xff] }
 0x27e   : > { %v9351_v10 = vunpack.i.h.bf16 %v9349_v25  ;;  %v9350_v61 = vunpack.i.l.bf16 %v9349_v25  ;;  %8553 = vmatprep.mubr.msk.f32.mxu1 %vm719_vm0, %v10629_v24 }
 0x280   : > { %v8895_v9 = vpack.c.bf16 %v9351_v10, %v9350_v61  ;;  %v1309_v10 = vld [vmem:[%s16191_s2 + $0x60] sm:$0xff] }
 0x281   : > { %8554 = vmatmul.mubr.msk.f32.gmra.mrb[48].mxu1 %vm719_vm0, %v10629_v24  ;;  %v1298_v24 = vld [vmem:[%s16191_s2 + $0x8] sm:$0xff] }
 0x282   : > { %8555 = vmatprep.mubr.msk.f32.mxu1 %vm719_vm0, %v10627_v23  ;;  %8896 = vmatpush1.bf16.msra.mxu0 %v8895_v9 }
 0x283   : > { %8947 = vmatprep.subr.msk.bf16.mxu0 %vm10892_vm5, %v8945_v56  ;;  %v1310_v56 = vld [vmem:[%s16191_s2 + $0x68] sm:$0xff] }
 0x285   : > { %8556 = vmatmul.mubr.msk.f32.gmra.mrb[50].mxu1 %vm719_vm0, %v10627_v23 }
 0x286   : > { %8557 = vmatprep.mubr.msk.f32.mxu1 %vm719_vm0, %v10636_v27 }
 0x289   : > { %8558 = vmatmul.mubr.msk.f32.gmra.mrb[52].mxu1 %vm719_vm0, %v10636_v27 }
 0x28a   : > { %8559 = vmatprep.mubr.msk.f32.mxu1 %vm719_vm0, %v10634_v26 }
 0x28d   : > { %8560 = vmatmul.mubr.msk.f32.gmra.mrb[54].mxu1 %vm719_vm0, %v10634_v26 }
 0x28e   : > { %8561 = vmatprep.mubr.msk.f32.mxu1 %vm719_vm0, %v10646_v30 }
 0x291   : > { %8562 = vmatmul.mubr.msk.f32.gmra.mrb[56].mxu1 %vm719_vm0, %v10646_v30 }
 0x292   : > { %8563 = vmatprep.mubr.msk.f32.mxu1 %vm719_vm0, %v10644_v29 }
 0x295   : > { %8564 = vmatmul.mubr.msk.f32.gmra.mrb[58].mxu1 %vm719_vm0, %v10644_v29 }
 0x296   : > { %8565 = vmatprep.mubr.msk.f32.mxu1 %vm719_vm0, %v10653_v33 }
 0x299   : > { %8566 = vmatmul.mubr.msk.f32.gmra.mrb[60].mxu1 %vm719_vm0, %v10653_v33 }
 0x29a   : > { %8567 = vmatprep.mubr.msk.f32.mxu1 %vm719_vm0, %v10651_v32 }
 0x29d   : > { %8568 = vmatmul.mubr.msk.f32.gmra.mrb[62].mxu1 %vm719_vm0, %v10651_v32  ;;  %v1299_v32 = vld [vmem:[%s16191_s2 + $0x10] sm:$0xff] }
 0x29e   : > { %8569 = vmatprep.mubr.msk.f32.mxu1 %vm719_vm0, %v10659_v36 }
 0x2a1   : > { %8570 = vmatmul.mubr.msk.f32.gmra.mrb[64].mxu1 %vm719_vm0, %v10659_v36  ;;  %v1300_v36 = vld [vmem:[%s16191_s2 + $0x18] sm:$0xff] }
 0x2a2   : > { %8571 = vmatprep.mubr.msk.f32.mxu1 %vm719_vm0, %v10657_v35 }
 0x2a5   : > { %8572 = vmatmul.mubr.msk.f32.gmra.mrb[66].mxu1 %vm719_vm0, %v10657_v35 }
 0x2a6   : > { %8573 = vmatprep.mubr.msk.f32.mxu1 %vm719_vm0, %v10666_v39 }
 0x2a9   : > { %8574 = vmatmul.mubr.msk.f32.gmra.mrb[68].mxu1 %vm719_vm0, %v10666_v39 }
 0x2aa   : > { %8575 = vmatprep.mubr.msk.f32.mxu1 %vm719_vm0, %v10664_v38 }
 0x2ad   : > { %8576 = vmatmul.mubr.msk.f32.gmra.mrb[70].mxu1 %vm719_vm0, %v10664_v38 }
 0x2ae   : > { %8577 = vmatprep.mubr.msk.f32.mxu1 %vm719_vm0, %v10673_v42 }
 0x2b1   : > { %8578 = vmatmul.mubr.msk.f32.gmra.mrb[72].mxu1 %vm719_vm0, %v10673_v42 }
 0x2b2   : > { %8579 = vmatprep.mubr.msk.f32.mxu1 %vm719_vm0, %v10671_v41 }
 0x2b5   : > { %8580 = vmatmul.mubr.msk.f32.gmra.mrb[74].mxu1 %vm719_vm0, %v10671_v41 }
 0x2b6   : > { %8581 = vmatprep.mubr.msk.f32.mxu1 %vm719_vm0, %v10680_v45 }
 0x2b9   : > { %8582 = vmatmul.mubr.msk.f32.gmra.mrb[76].mxu1 %vm719_vm0, %v10680_v45  ;;  %v1301_v45 = vld [vmem:[%s16191_s2 + $0x20] sm:$0xff] }
 0x2ba   : > { %8583 = vmatprep.mubr.msk.f32.mxu1 %vm719_vm0, %v10678_v44 }
 0x2bd   : > { %8584 = vmatmul.mubr.msk.f32.gmra.mrb[78].mxu1 %vm719_vm0, %v10678_v44 }
 0x2be   : > { %8585 = vmatprep.mubr.msk.f32.mxu1 %vm719_vm0, %v10687_v48 }
 0x2c1   : > { %8586 = vmatmul.mubr.msk.f32.gmra.mrb[80].mxu1 %vm719_vm0, %v10687_v48 }
 0x2c2   : > { %8587 = vmatprep.mubr.msk.f32.mxu1 %vm719_vm0, %v10685_v47 }
 0x2c5   : > { %8588 = vmatmul.mubr.msk.f32.gmra.mrb[82].mxu1 %vm719_vm0, %v10685_v47 }
 0x2c6   : > { %8589 = vmatprep.mubr.msk.f32.mxu1 %vm719_vm0, %v10694_v51 }
 0x2c9   : > { %8590 = vmatmul.mubr.msk.f32.gmra.mrb[84].mxu1 %vm719_vm0, %v10694_v51 }
 0x2ca   : > { %8591 = vmatprep.mubr.msk.f32.mxu1 %vm719_vm0, %v10692_v50 }
 0x2cd   : > { %8592 = vmatmul.mubr.msk.f32.gmra.mrb[86].mxu1 %vm719_vm0, %v10692_v50  ;;  %v1302_v50 = vld [vmem:[%s16191_s2 + $0x28] sm:$0xff] }
 0x2ce   : > { %8593 = vmatprep.mubr.msk.f32.mxu1 %vm719_vm0, %v10701_v54 }
 0x2d1   : > { %8594 = vmatmul.mubr.msk.f32.gmra.mrb[88].mxu1 %vm719_vm0, %v10701_v54 }
 0x2d2   : > { %8595 = vmatprep.mubr.msk.f32.mxu1 %vm719_vm0, %v10699_v53 }
 0x2d5   : > { %8596 = vmatmul.mubr.msk.f32.gmra.mrb[90].mxu1 %vm719_vm0, %v10699_v53 }
 0x2d6   : > { %8597 = vmatprep.mubr.msk.f32.mxu1 %vm719_vm0, %v10709_v58 }
 0x2d9   : > { %8598 = vmatmul.mubr.msk.f32.gmra.mrb[92].mxu1 %vm719_vm0, %v10709_v58 }
 0x2da   : > { %8599 = vmatprep.mubr.msk.f32.mxu1 %vm719_vm0, %v10707_v57 }
 0x2dd   : > { %8600 = vmatmul.mubr.msk.f32.gmra.mrb[94].mxu1 %vm719_vm0, %v10707_v57 }
 0x334   : > { %v1683_v21 = vpop.f32.mrb[32].mxu1 }
 0x335   : > { %v1874_v23 = vmul.f32 0.25, %v1683_v21  ;;  %v1685_v26 = vpop.f32.mrb[33].mxu1 }
 0x336   : > { %v1875_v27 = vmul.f32 0.25, %v1685_v26 }
 0x337   : > { %v11129_v29 = vadd.f32 %v1874_v23, %v1297_v20 }
 0x338   : > { %v11131_v30 = vadd.f32 %v1875_v27, %v1298_v24  ;;  %v1689_v33 = vpop.f32.mrb[34].mxu1  ;;  %v1311_v27 = vld [vmem:[%s16191_s2 + $0x70] sm:$0xff] }
 0x339   : > { %v1876_v35 = vmul.f32 0.25, %v1689_v33  ;;  %v1691_v38 = vpop.f32.mrb[35].mxu1 }
 0x33a   : > { %v1877_v39 = vmul.f32 0.25, %v1691_v38  ;;  %v2002_v41 = vmax.f32 %v11129_v29, %v11131_v30 }
 0x33b   : > { %v11141_v42 = vadd.f32 %v1876_v35, %v1299_v32  ;;  %v1312_v35 = vld [vmem:[%s16191_s2 + $0x78] sm:$0xff] }
 0x33c   : > { %v11143_v44 = vadd.f32 %v1877_v39, %v1300_v36  ;;  %2003 = vmax.xlane.f32.xlu0 %v2002_v41  ;;  %v1695_v47 = vpop.f32.mrb[36].mxu1 }
 0x33d   : > { %v1878_v48 = vmul.f32 0.25, %v1695_v47  ;;  %v1697_v51 = vpop.f32.mrb[37].mxu1  ;;  %v1313_v47 = vld [vmem:[%s16191_s2 + $0x80] sm:$0xff] }
 0x33e   : > { %v1879_v53 = vmul.f32 0.25, %v1697_v51  ;;  %v2005_v54 = vmax.f32 %v11141_v42, %v11143_v44  ;;  %v1314_v51 = vld [vmem:[%s16191_s2 + $0x88] sm:$0xff] }
 0x33f   : > { %v11153_v57 = vadd.f32 %v1878_v48, %v1301_v45 }
 0x340   : > { %v11155_v58 = vadd.f32 %v1879_v53, %v1302_v50  ;;  %2006 = vmax.xlane.f32.xlu1 %v2005_v54  ;;  %v1701_v34 = vpop.f32.mrb[38].mxu1 }
 0x341   : > { %v1880_v12 = vmul.f32 0.25, %v1701_v34  ;;  %v1703_v4 = vpop.f32.mrb[39].mxu1 }
 0x342   : > { %v1881_v0 = vmul.f32 0.25, %v1703_v4  ;;  %v2008_v11 = vmax.f32 %v11153_v57, %v11155_v58 }
 0x343   : > { %v11165_v55 = vadd.f32 %v1880_v12, %v1303_v37 }
 0x344   : > { %v11167_v14 = vadd.f32 %v1881_v0, %v1304_v16  ;;  %2009 = vmax.xlane.f32.xlu0 %v2008_v11  ;;  %v1707_v49 = vpop.f32.mrb[40].mxu1  ;;  %v1315_v16 = vld [vmem:[%s16191_s2 + $0x90] sm:$0xff]  ;;  %v1316_v11 = vld [vmem:[%s16191_s2 + $0x98] sm:$0xff] }
 0x345   : > { %v1882_v60 = vmul.f32 0.25, %v1707_v49  ;;  %v1709_v13 = vpop.f32.mrb[41].mxu1 }
 0x346   : > { %v1883_v52 = vmul.f32 0.25, %v1709_v13  ;;  %v2011_v7 = vmax.f32 %v11165_v55, %v11167_v14 }
 0x347   : > { %v11177_v2 = vadd.f32 %v1882_v60, %v1305_v8 }
 0x348   : > { %v11179_v19 = vadd.f32 %v1883_v52, %v1306_v5  ;;  %2012 = vmax.xlane.f32.xlu0 %v2011_v7  ;;  %v1713_v15 = vpop.f32.mrb[42].mxu1  ;;  %v1317_v52 = vld [vmem:[%s16191_s2 + $0xa0] sm:$0xff] }
 0x349   : > { %v1884_v62 = vmul.f32 0.25, %v1713_v15  ;;  %v1715_v31 = vpop.f32.mrb[43].mxu1  ;;  %v1318_v15 = vld [vmem:[%s16191_s2 + $0xa8] sm:$0xff] }
 0x34a   : > { %v1885_v18 = vmul.f32 0.25, %v1715_v31  ;;  %v2014_v6 = vmax.f32 %v11177_v2, %v11179_v19 }
 0x34b   : > { %v11189_v17 = vadd.f32 %v1884_v62, %v1307_v28 }
 0x34c   : > { %v11191_v25 = vadd.f32 %v1885_v18, %v1308_v22  ;;  %2015 = vmax.xlane.f32.xlu1 %v2014_v6  ;;  %v1719_v61 = vpop.f32.mrb[44].mxu1 }
 0x34d   : > { %v1886_v9 = vmul.f32 0.25, %v1719_v61  ;;  %v1721_v20 = vpop.f32.mrb[45].mxu1 }
 0x34e   : > { %v1887_v21 = vmul.f32 0.25, %v1721_v20  ;;  %v2017_v23 = vmax.f32 %v11189_v17, %v11191_v25 }
 0x34f   : > { %v11201_v24 = vadd.f32 %v1886_v9, %v1309_v10  ;;  %v1319_v10 = vld [vmem:[%s16191_s2 + $0xb0] sm:$0xff] }
 0x350   : > { %v11203_v26 = vadd.f32 %v1887_v21, %v1310_v56  ;;  %2018 = vmax.xlane.f32.xlu0 %v2017_v23  ;;  %v1725_v32 = vpop.f32.mrb[46].mxu1  ;;  %v1320_v56 = vld [vmem:[%s16191_s2 + $0xb8] sm:$0xff] }
 0x351   : > { %v1888_v33 = vmul.f32 0.25, %v1725_v32  ;;  %v1727_v36 = vpop.f32.mrb[47].mxu1 }
 0x352   : > { %v1889_v38 = vmul.f32 0.25, %v1727_v36  ;;  %v2020_v39 = vmax.f32 %v11201_v24, %v11203_v26 }
 0x353   : > { %v11213_v41 = vadd.f32 %v1888_v33, %v1311_v27  ;;  %v1321_v33 = vld [vmem:[%s16191_s2 + $0xc0] sm:$0xff] }
 0x354   : > { %v11215_v45 = vadd.f32 %v1889_v38, %v1312_v35  ;;  %2021 = vmax.xlane.f32.xlu1 %v2020_v39  ;;  %v1731_v48 = vpop.f32.mrb[48].mxu1  ;;  %v1322_v38 = vld [vmem:[%s16191_s2 + $0xc8] sm:$0xff] }
 0x355   : > { %v1890_v50 = vmul.f32 0.25, %v1731_v48  ;;  %v1733_v53 = vpop.f32.mrb[49].mxu1 }
 0x356   : > { %v1891_v54 = vmul.f32 0.25, %v1733_v53  ;;  %v2023_v37 = vmax.f32 %v11213_v41, %v11215_v45  ;;  %v1323_v53 = vld [vmem:[%s16191_s2 + $0xd0] sm:$0xff] }
 0x357   : > { %v11225_v34 = vadd.f32 %v1890_v50, %v1313_v47 }
 0x358   : > { %v11227_v12 = vadd.f32 %v1891_v54, %v1314_v51  ;;  %2024 = vmax.xlane.f32.xlu0 %v2023_v37  ;;  %v1737_v4 = vpop.f32.mrb[50].mxu1 }
 0x359   : > { %v1892_v0 = vmul.f32 0.25, %v1737_v4  ;;  %v1739_v8 = vpop.f32.mrb[51].mxu1 }
 0x35a   : > { %v1893_v49 = vmul.f32 0.25, %v1739_v8  ;;  %v2026_v60 = vmax.f32 %v11225_v34, %v11227_v12  ;;  %v11285_v8 = vpop.permute.xlu0 %9353 }
 0x35b   : > { %v11237_v5 = vadd.f32 %v1892_v0, %v1315_v16  ;;  %v1324_v16 = vld [vmem:[%s16191_s2 + $0xd8] sm:$0xff]  ;;  %16623 = vst [vmem:[#allocation44_spill] sm:$0xff] %v11285_v8 }
 0x35c   : > { %v11239_v13 = vadd.f32 %v1893_v49, %v1316_v11  ;;  %2027 = vmax.xlane.f32.xlu1 %v2026_v60  ;;  %v1743_v7 = vpop.f32.mrb[52].mxu1 }
 0x35d   : > { %v1894_v28 = vmul.f32 0.25, %v1743_v7  ;;  %v1745_v62 = vpop.f32.mrb[53].mxu1 }
 0x35e   : > { %v1895_v22 = vmul.f32 0.25, %v1745_v62  ;;  %v2029_v31 = vmax.f32 %v11237_v5, %v11239_v13 }
 0x35f   : > { %v11249_v18 = vadd.f32 %v1894_v28, %v1317_v52  ;;  %v1325_v52 = vld [vmem:[%s16191_s2 + $0xe0] sm:$0xff] }
 0x360   : > { %v11251_v6 = vadd.f32 %v1895_v22, %v1318_v15  ;;  %2030 = vmax.xlane.f32.xlu0 %v2029_v31  ;;  %v1749_v61 = vpop.f32.mrb[54].mxu1  ;;  %v1326_v15 = vld [vmem:[%s16191_s2 + $0xe8] sm:$0xff] }
 0x361   : > { %v1896_v9 = vmul.f32 0.25, %v1749_v61  ;;  %v1751_v20 = vpop.f32.mrb[55].mxu1 }
 0x362   : > { %v1897_v21 = vmul.f32 0.25, %v1751_v20  ;;  %v2032_v23 = vmax.f32 %v11249_v18, %v11251_v6  ;;  %v11306_v20 = vpop.permute.xlu0 %9363 }
 0x363   : > { %v11261_v27 = vadd.f32 %v1896_v9, %v1319_v10  ;;  %v1327_v9 = vld [vmem:[%s16191_s2 + $0xf0] sm:$0xff]  ;;  %16624 = vst [vmem:[#allocation45_spill] sm:$0xff] %v11306_v20 }
 0x364   : > { %v11263_v32 = vadd.f32 %v1897_v21, %v1320_v56  ;;  %2033 = vmax.xlane.f32.xlu1 %v2032_v23  ;;  %v1755_v35 = vpop.f32.mrb[56].mxu1  ;;  %v1328_v23 = vld [vmem:[%s16191_s2 + $0xf8] sm:$0xff] }
 0x365   : > { %v1898_v36 = vmul.f32 0.25, %v1755_v35  ;;  %v1757_v39 = vpop.f32.mrb[57].mxu1 }
 0x366   : > { %v1899_v47 = vmul.f32 0.25, %v1757_v39  ;;  %v2035_v48 = vmax.f32 %v11261_v27, %v11263_v32 }
 0x367   : > { %v11273_v50 = vadd.f32 %v1898_v36, %v1321_v33 }
 0x368   : > { %v11275_v51 = vadd.f32 %v1899_v47, %v1322_v38  ;;  %2036 = vmax.xlane.f32.xlu0 %v2035_v48  ;;  %v1761_v54 = vpop.f32.mrb[58].mxu1  ;;  %v1329_v47 = vld [vmem:[%s16191_s2 + $0x100] sm:$0xff] }
 0x369   : > { %v1900_v37 = vmul.f32 0.25, %v1761_v54  ;;  %v1763_v4 = vpop.f32.mrb[59].mxu1  ;;  %v1330_v54 = vld [vmem:[%s16191_s2 + $0x108] sm:$0xff] }
 0x36a   : > { %v1901_v0 = vmul.f32 0.25, %v1763_v4  ;;  %v2038_v11 = vmax.f32 %v11273_v50, %v11275_v51 }
 0x36b   : > { %v11287_v49 = vadd.f32 %v1900_v37, %v1323_v53 }
 0x36c   : > { %v11289_v60 = vadd.f32 %v1901_v0, %v1324_v16  ;;  %2039 = vmax.xlane.f32.xlu1 %v2038_v11  ;;  %v1767_v7 = vpop.f32.mrb[60].mxu1  ;;  %v11325_v0 = vpop.permute.xlu0 %9368 }
 0x36d   : > { %v1902_v28 = vmul.f32 0.25, %v1767_v7  ;;  %v1769_v62 = vpop.f32.mrb[61].mxu1  ;;  %16625 = vst [vmem:[#allocation46_spill] sm:$0xff] %v11325_v0  ;;  %v1331_v7 = vld [vmem:[%s16191_s2 + $0x110] sm:$0xff] }
 0x36e   : > { %v1903_v22 = vmul.f32 0.25, %v1769_v62  ;;  %v2041_v31 = vmax.f32 %v11287_v49, %v11289_v60  ;;  %v1332_v62 = vld [vmem:[%s16191_s2 + $0x118] sm:$0xff] }
 0x36f   : > { %v11299_v10 = vadd.f32 %v1902_v28, %v1325_v52 }
 0x370   : > { %v11301_v61 = vadd.f32 %v1903_v22, %v1326_v15  ;;  %2042 = vmax.xlane.f32.xlu0 %v2041_v31  ;;  %v1773_v56 = vpop.f32.mrb[62].mxu1 }
 0x371   : > { %v1904_v21 = vmul.f32 0.25, %v1773_v56  ;;  %v1775_v33 = vpop.f32.mrb[63].mxu1 }
 0x372   : > { %v1905_v35 = vmul.f32 0.25, %v1775_v33  ;;  %v2044_v36 = vmax.f32 %v11299_v10, %v11301_v61 }
 0x373   : > { %v11313_v38 = vadd.f32 %v1904_v21, %v1327_v9 }
 0x374   : > { %v11315_v39 = vadd.f32 %v1905_v35, %v1328_v23  ;;  %2045 = vmax.xlane.f32.xlu0 %v2044_v36  ;;  %v1779_v48 = vpop.f32.mrb[64].mxu1  ;;  %v1333_v23 = vld [vmem:[%s16191_s2 + $0x120] sm:$0xff]  ;;  %v11346_v35 = vpop.permute.xlu0 %9373 }
 0x375   : > { %v1906_v53 = vmul.f32 0.25, %v1779_v48  ;;  %v1781_v37 = vpop.f32.mrb[65].mxu1  ;;  %16626 = vst [vmem:[#allocation47_spill] sm:$0xff] %v11346_v35 }
 0x376   : > { %v1907_v16 = vmul.f32 0.25, %v1781_v37  ;;  %v2047_v4 = vmax.f32 %v11313_v38, %v11315_v39 }
 0x377   : > { %v11327_v11 = vadd.f32 %v1906_v53, %v1329_v47  ;;  %v1334_v47 = vld [vmem:[%s16191_s2 + $0x128] sm:$0xff] }
 0x378   : > { %v11329_v52 = vadd.f32 %v1907_v16, %v1330_v54  ;;  %2048 = vmax.xlane.f32.xlu1 %v2047_v4  ;;  %v1785_v28 = vpop.f32.mrb[66].mxu1  ;;  %v1335_v4 = vld [vmem:[%s16191_s2 + $0x130] sm:$0xff] }
 0x379   : > { %v1908_v15 = vmul.f32 0.25, %v1785_v28  ;;  %v1787_v22 = vpop.f32.mrb[67].mxu1 }
 0x37a   : > { %v1909_v31 = vmul.f32 0.25, %v1787_v22  ;;  %v2050_v9 = vmax.f32 %v11327_v11, %v11329_v52 }
 0x37b   : > { %v11339_v56 = vadd.f32 %v1908_v15, %v1331_v7  ;;  %v1336_v15 = vld [vmem:[%s16191_s2 + $0x138] sm:$0xff] }
 0x37c   : > { %v11341_v21 = vadd.f32 %v1909_v31, %v1332_v62  ;;  %2051 = vmax.xlane.f32.xlu0 %v2050_v9  ;;  %v1791_v33 = vpop.f32.mrb[68].mxu1  ;;  %v11365_v9 = vpop.permute.xlu0 %9378 }
 0x37d   : > { %v1910_v36 = vmul.f32 0.25, %v1791_v33  ;;  %v1793_v48 = vpop.f32.mrb[69].mxu1  ;;  %16627 = vst [vmem:[#allocation48_spill] sm:$0xff] %v11365_v9 }
 0x37e   : > { %v1911_v53 = vmul.f32 0.25, %v1793_v48  ;;  %v2053_v54 = vmax.f32 %v11339_v56, %v11341_v21  ;;  %v11374_v48 = vpop.permute.xlu1 %9313 }
 0x37f   : > { %v11353_v37 = vadd.f32 %v1910_v36, %v1333_v23  ;;  %v1337_v36 = vld [vmem:[%s16191_s2 + $0x140] sm:$0xff]  ;;  %16628 = vst [vmem:[#allocation49_spill] sm:$0xff] %v11374_v48 }
 0x380   : > { %v11355_v16 = vadd.f32 %v1911_v53, %v1334_v47  ;;  %2054 = vmax.xlane.f32.xlu0 %v2053_v54  ;;  %v1797_v7 = vpop.f32.mrb[70].mxu1  ;;  %v1338_v54 = vld [vmem:[%s16191_s2 + $0x148] sm:$0xff] }
 0x381   : > { %v1912_v28 = vmul.f32 0.25, %v1797_v7  ;;  %v1799_v62 = vpop.f32.mrb[71].mxu1 }
 0x382   : > { %v1913_v22 = vmul.f32 0.25, %v1799_v62  ;;  %v2056_v31 = vmax.f32 %v11353_v37, %v11355_v16 }
 0x383   : > { %v11367_v23 = vadd.f32 %v1912_v28, %v1335_v4 }
 0x384   : > { %v11369_v33 = vadd.f32 %v1913_v22, %v1336_v15  ;;  %2057 = vmax.xlane.f32.xlu1 %v2056_v31  ;;  %v1803_v47 = vpop.f32.mrb[72].mxu1  ;;  %v1339_v22 = vld [vmem:[%s16191_s2 + $0x150] sm:$0xff] }
 0x385   : > { %v1914_v53 = vmul.f32 0.25, %v1803_v47  ;;  %v1805_v7 = vpop.f32.mrb[73].mxu1  ;;  %v11388_v47 = vpop.permute.xlu0 %9383 }
 0x386   : > { %v1915_v62 = vmul.f32 0.25, %v1805_v7  ;;  %v2059_v4 = vmax.f32 %v11367_v23, %v11369_v33  ;;  %16629 = vst [vmem:[#allocation50_spill] sm:$0xff] %v11388_v47  ;;  %v1340_v7 = vld [vmem:[%s16191_s2 + $0x158] sm:$0xff] }
 0x387   : > { %v11381_v28 = vadd.f32 %v1914_v53, %v1337_v36  ;;  %v11395_v53 = vpop.permute.xlu1 %9323 }
 0x388   : > { %v11383_v15 = vadd.f32 %v1915_v62, %v1338_v54  ;;  %2060 = vmax.xlane.f32.xlu0 %v2059_v4  ;;  %v1809_v31 = vpop.f32.mrb[74].mxu1  ;;  %16630 = vst [vmem:[#allocation51_spill] sm:$0xff] %v11395_v53  ;;  %v1341_v4 = vld [vmem:[%s16191_s2 + $0x160] sm:$0xff] }
 0x389   : > { %v1916_v59 = vmul.f32 0.25, %v1809_v31  ;;  %v1811_v63 = vpop.f32.mrb[75].mxu1 }
 0x38a   : > { %v1917_v9 = vmul.f32 0.25, %v1811_v63  ;;  %v2062_v36 = vmax.f32 %v11381_v28, %v11383_v15  ;;  %v1342_v63 = vld [vmem:[%s16191_s2 + $0x168] sm:$0xff] }
 0x38b   : > { %v11397_v54 = vadd.f32 %v1916_v59, %v1339_v22  ;;  %v11409_v59 = vpop.permute.xlu0 %9388 }
 0x38c   : > { %v11399_v62 = vadd.f32 %v1917_v9, %v1340_v7  ;;  %2063 = vmax.xlane.f32.xlu1 %v2062_v36  ;;  %v1815_v31 = vpop.f32.mrb[76].mxu1  ;;  %16631 = vst [vmem:[#allocation52_spill] sm:$0xff] %v11409_v59  ;;  %v1343_v7 = vld [vmem:[%s16191_s2 + $0x170] sm:$0xff] }
 0x38d   : > { %v1918_v47 = vmul.f32 0.25, %v1815_v31  ;;  %v1817_v35 = vpop.f32.mrb[77].mxu1  ;;  %v11418_v31 = vpop.permute.xlu1 %9333 }
 0x38e   : > { %v1919_v0 = vmul.f32 0.25, %v1817_v35  ;;  %v2065_v20 = vmax.f32 %v11397_v54, %v11399_v62  ;;  %16632 = vst [vmem:[#allocation53_spill] sm:$0xff] %v11418_v31  ;;  %v1344_v35 = vld [vmem:[%s16191_s2 + $0x178] sm:$0xff] }
 0x38f   : > { %v11411_v9 = vadd.f32 %v1918_v47, %v1341_v4  ;;  %v1345_v4 = vld [vmem:[%s16191_s2 + $0x180] sm:$0xff] }
 0x390   : > { %v11413_v22 = vadd.f32 %v1919_v0, %v1342_v63  ;;  %2066 = vmax.xlane.f32.xlu0 %v2065_v20  ;;  %v1821_v36 = vpop.f32.mrb[78].mxu1 }
 0x391   : > { %v1920_v8 = vmul.f32 0.25, %v1821_v36  ;;  %v1823_v3 = vpop.f32.mrb[79].mxu1  ;;  %v11432_v36 = vpop.permute.xlu0 %9398 }
 0x392   : > { %v1921_v1 = vmul.f32 0.25, %v1823_v3  ;;  %v2068_v47 = vmax.f32 %v11411_v9, %v11413_v22  ;;  %16634 = vst [vmem:[#allocation55_spill] sm:$0xff] %v11432_v36  ;;  %v1346_v3 = vld [vmem:[%s16191_s2 + $0x188] sm:$0xff] }
 0x393   : > { %v11425_v0 = vadd.f32 %v1920_v8, %v1343_v7 }
 0x394   : > { %v11427_v20 = vadd.f32 %v1921_v1, %v1344_v35  ;;  %2069 = vmax.xlane.f32.xlu1 %v2068_v47  ;;  %v1827_v63 = vpop.f32.mrb[80].mxu1  ;;  %v11439_v1 = vpop.permute.xlu1 %9343  ;;  %v1347_v47 = vld [vmem:[%s16191_s2 + $0x190] sm:$0xff] }
 0x395   : > { %v1922_v59 = vmul.f32 0.25, %v1827_v63  ;;  %v1829_v31 = vpop.f32.mrb[81].mxu1  ;;  %16635 = vst [vmem:[#allocation56_spill] sm:$0xff] %v11439_v1 }
 0x396   : > { %16633 = vst [vmem:[#allocation54_spill] sm:$0xff] %v11427_v20  ;;  %v1923_v53 = vmul.f32 0.25, %v1829_v31  ;;  %v2071_v8 = vmax.f32 %v11425_v0, %v11427_v20  ;;  %v1348_v31 = vld [vmem:[%s16191_s2 + $0x198] sm:$0xff] }
 0x397   : > { %v11441_v7 = vadd.f32 %v1922_v59, %v1345_v4  ;;  %v11453_v59 = vpop.permute.xlu0 %9403 }
 0x398   : > { %v11443_v35 = vadd.f32 %v1923_v53, %v1346_v3  ;;  %2072 = vmax.xlane.f32.xlu1 %v2071_v8  ;;  %v1833_v63 = vpop.f32.mrb[82].mxu1  ;;  %16638 = vst [vmem:[#allocation59_spill] sm:$0xff] %v11453_v59  ;;  %v1349_v3 = vld [vmem:[%s16191_s2 + $0x1a0] sm:$0xff] }
 0x399   : > { %16636 = vst [vmem:[#allocation57_spill] sm:$0xff] %v11441_v7  ;;  %v1924_v46 = vmul.f32 0.25, %v1833_v63  ;;  %v1835_v36 = vpop.f32.mrb[83].mxu1  ;;  %v11462_v63 = vpop.permute.xlu1 %9358 }
 0x39a   : > { %16637 = vst [vmem:[#allocation58_spill] sm:$0xff] %v11443_v35  ;;  %v1925_v43 = vmul.f32 0.25, %v1835_v36  ;;  %v2074_v1 = vmax.f32 %v11441_v7, %v11443_v35  ;;  %16641 = vst [vmem:[#allocation62_spill] sm:$0xff] %v11462_v63  ;;  %v1350_v36 = vld [vmem:[%s16191_s2 + $0x1a8] sm:$0xff] }
 0x39b   : > { %v11455_v53 = vadd.f32 %v1924_v46, %v1347_v47  ;;  %v1351_v47 = vld [vmem:[%s16191_s2 + $0x1b0] sm:$0xff] }
 0x39c   : > { %v11457_v4 = vadd.f32 %v1925_v43, %v1348_v31  ;;  %2075 = vmax.xlane.f32.xlu1 %v2074_v1  ;;  %v1839_v8 = vpop.f32.mrb[84].mxu1 }
 0x39d   : > { %16639 = vst [vmem:[#allocation60_spill] sm:$0xff] %v11455_v53  ;;  %v1926_v48 = vmul.f32 0.25, %v1839_v8  ;;  %v1841_v35 = vpop.f32.mrb[85].mxu1  ;;  %v11476_v8 = vpop.permute.xlu0 %9413 }
 0x39e   : > { %16640 = vst [vmem:[#allocation61_spill] sm:$0xff] %v11457_v4  ;;  %v1927_v7 = vmul.f32 0.25, %v1841_v35  ;;  %v2077_v46 = vmax.f32 %v11455_v53, %v11457_v4  ;;  %16644 = vst [vmem:[#allocation65_spill] sm:$0xff] %v11476_v8  ;;  %v1352_v35 = vld [vmem:[%s16191_s2 + $0x1b8] sm:$0xff] }
 0x39f   : > { %v11469_v43 = vadd.f32 %v1926_v48, %v1349_v3 }
 0x3a0   : > { %v11471_v1 = vadd.f32 %v1927_v7, %v1350_v36  ;;  %2078 = vmax.xlane.f32.xlu1 %v2077_v46  ;;  %v1845_v31 = vpop.f32.mrb[86].mxu1  ;;  %v11483_v7 = vpop.permute.xlu1 %9393  ;;  %v1353_v46 = vld [vmem:[%s16191_s2 + $0x1c0] sm:$0xff] }
 0x3a1   : > { %16642 = vst [vmem:[#allocation63_spill] sm:$0xff] %v11469_v43  ;;  %v1928_v63 = vmul.f32 0.25, %v1845_v31  ;;  %v1847_v59 = vpop.f32.mrb[87].mxu1  ;;  %16645 = vst [vmem:[#allocation66_spill] sm:$0xff] %v11483_v7 }
 0x3a2   : > { %16643 = vst [vmem:[#allocation64_spill] sm:$0xff] %v11471_v1  ;;  %v1929_v20 = vmul.f32 0.25, %v1847_v59  ;;  %v2080_v48 = vmax.f32 %v11469_v43, %v11471_v1  ;;  %v1354_v59 = vld [vmem:[%s16191_s2 + $0x1c8] sm:$0xff] }
 0x3a3   : > { %v11485_v3 = vadd.f32 %v1928_v63, %v1351_v47  ;;  %v11497_v63 = vpop.permute.xlu0 %9418 }
 0x3a4   : > { %v11487_v36 = vadd.f32 %v1929_v20, %v1352_v35  ;;  %2081 = vmax.xlane.f32.xlu1 %v2080_v48  ;;  %v1851_v31 = vpop.f32.mrb[88].mxu1  ;;  %16648 = vst [vmem:[#allocation69_spill] sm:$0xff] %v11497_v63  ;;  %v1355_v35 = vld [vmem:[%s16191_s2 + $0x1d0] sm:$0xff] }
 0x3a5   : > { %16646 = vst [vmem:[#allocation67_spill] sm:$0xff] %v11485_v3  ;;  %v1930_v8 = vmul.f32 0.25, %v1851_v31  ;;  %v1853_v4 = vpop.f32.mrb[89].mxu1  ;;  %v11506_v31 = vpop.permute.xlu1 %9408 }
 0x3a6   : > { %16647 = vst [vmem:[#allocation68_spill] sm:$0xff] %v11487_v36  ;;  %v1931_v53 = vmul.f32 0.25, %v1853_v4  ;;  %v2083_v7 = vmax.f32 %v11485_v3, %v11487_v36  ;;  %16651 = vst [vmem:[#allocation72_spill] sm:$0xff] %v11506_v31  ;;  %v1356_v4 = vld [vmem:[%s16191_s2 + $0x1d8] sm:$0xff] }
 0x3a7   : > { %v11499_v20 = vadd.f32 %v1930_v8, %v1353_v46  ;;  %v1357_v46 = vld [vmem:[%s16191_s2 + $0x1e0] sm:$0xff] }
 0x3a8   : > { %v11501_v47 = vadd.f32 %v1931_v53, %v1354_v59  ;;  %2084 = vmax.xlane.f32.xlu1 %v2083_v7  ;;  %v1857_v48 = vpop.f32.mrb[90].mxu1 }
 0x3a9   : > { %16649 = vst [vmem:[#allocation70_spill] sm:$0xff] %v11499_v20  ;;  %v1932_v1 = vmul.f32 0.25, %v1857_v48  ;;  %v1859_v36 = vpop.f32.mrb[91].mxu1  ;;  %v11520_v48 = vpop.permute.xlu0 %9428 }
 0x3aa   : > { %16650 = vst [vmem:[#allocation71_spill] sm:$0xff] %v11501_v47  ;;  %v1933_v3 = vmul.f32 0.25, %v1859_v36  ;;  %v2086_v8 = vmax.f32 %v11499_v20, %v11501_v47  ;;  %16652 = vst [vmem:[#allocation73_spill] sm:$0xff] %v11520_v48  ;;  %v1358_v36 = vld [vmem:[%s16191_s2 + $0x1e8] sm:$0xff] }
 0x3ab   : > { %v11513_v53 = vadd.f32 %v1932_v1, %v1355_v35 }
 0x3ac   : > { %v11515_v7 = vadd.f32 %v1933_v3, %v1356_v4  ;;  %2087 = vmax.xlane.f32.xlu1 %v2086_v8  ;;  %v1863_v59 = vpop.f32.mrb[92].mxu1  ;;  %v11527_v3 = vpop.permute.xlu1 %9423  ;;  %v1359_v8 = vld [vmem:[%s16191_s2 + $0x1f0] sm:$0xff] }
 0x3ad   : > { %v1934_v63 = vmul.f32 0.25, %v1863_v59  ;;  %v1865_v31 = vpop.f32.mrb[93].mxu1  ;;  %16653 = vst [vmem:[#allocation74_spill] sm:$0xff] %v11527_v3 }
 0x3ae   : > { %v1935_v43 = vmul.f32 0.25, %v1865_v31  ;;  %v2089_v1 = vmax.f32 %v11513_v53, %v11515_v7  ;;  %v1360_v31 = vld [vmem:[%s16191_s2 + $0x1f8] sm:$0xff] }
 0x3af   : > { %v11529_v35 = vadd.f32 %v1934_v63, %v1357_v46  ;;  %v11541_v63 = vpop.permute.xlu0 %9438 }
 0x3b0   : > { %v11531_v4 = vadd.f32 %v1935_v43, %v1358_v36  ;;  %2090 = vmax.xlane.f32.xlu1 %v2089_v1  ;;  %v1869_v59 = vpop.f32.mrb[94].mxu1  ;;  %16655 = vst [vmem:[#allocation76_spill] sm:$0xff] %v11541_v63  ;;  %v11547_v36 = vpop.permute.xlu1 %9433  ;;  %v1361_v1 = vld [vmem:[%s16192_s3] sm:$0xff]  ;;  %v1374_v63 = vld [vmem:[%s16192_s3 + $0x68] sm:$0xff] }
 0x3b1   : > { %v1936_v48 = vmul.f32 0.25, %v1869_v59  ;;  %v1871_v47 = vpop.f32.mrb[95].mxu1  ;;  %16656 = vst [vmem:[#allocation77_spill] sm:$0xff] %v11547_v36 }
 0x3b2   : > { %16654 = vst [vmem:[#allocation75_spill] sm:$0xff] %v11531_v4  ;;  %v1937_v20 = vmul.f32 0.25, %v1871_v47  ;;  %v2092_v3 = vmax.f32 %v11529_v35, %v11531_v4  ;;  %v1362_v47 = vld [vmem:[%s16192_s3 + $0x8] sm:$0xff] }
 0x3b3   : > { %v11543_v43 = vadd.f32 %v1936_v48, %v1359_v8  ;;  %v11557_v4 = vpack.c.bf16 %v1362_v47, %v1361_v1  ;;  %v1363_v48 = vld [vmem:[%s16192_s3 + $0x10] sm:$0xff]  ;;  %v1365_v1 = vld [vmem:[%s16192_s3 + $0x20] sm:$0xff]  ;;  %v1366_v47 = vld [vmem:[%s16192_s3 + $0x28] sm:$0xff] }
 0x3b4   : > { %v11545_v46 = vadd.f32 %v1937_v20, %v1360_v31  ;;  %2093 = vmax.xlane.f32.xlu1 %v2092_v3  ;;  %v11560_v20 = vpop.permute.xlu0 %9448  ;;  %v1364_v3 = vld [vmem:[%s16192_s3 + $0x18] sm:$0xff]  ;;  %v11571_v31 = vpop.permute.xlu1 %9443 }
 0x3b5   : > { %16657 = vst [vmem:[#allocation78_spill] sm:$0xff] %v11557_v4  ;;  %8899 = vmatpush1.bf16.msra.mxu1 %v11557_v4  ;;  %16658 = vst [vmem:[#allocation79_spill] sm:$0xff] %v11560_v20  ;;  %v11569_v8 = vpack.c.bf16 %v1364_v3, %v1363_v48  ;;  %v1367_v3 = vld [vmem:[%s16192_s3 + $0x30] sm:$0xff] }
 0x3b6   : > { %v2095_v59 = vmax.f32 %v11543_v43, %v11545_v46  ;;  %8900 = vmatprep.subr.bf16.mxu1 %v16619_v40  ;;  %16660 = vst [vmem:[#allocation81_spill] sm:$0xff] %v11571_v31 }
 0x3b7   : > { %16659 = vst [vmem:[#allocation80_spill] sm:$0xff] %v11569_v8 }
 0x3b8   : > { %2096 = vmax.xlane.f32.xlu1 %v2095_v59  ;;  %v11581_v59 = vpack.c.bf16 %v1366_v47, %v1365_v1  ;;  %v11583_v4 = vpop.permute.xlu0 %9458  ;;  %v11586_v48 = vpop.permute.xlu1 %9453 }
 0x3b9   : > { %8902 = vmatpush1.bf16.msra.mxu1 %v11569_v8  ;;  %16662 = vst [vmem:[#allocation83_spill] sm:$0xff] %v11583_v4  ;;  %16663 = vst [vmem:[#allocation84_spill] sm:$0xff] %v11586_v48  ;;  %v1368_v8 = vld [vmem:[%s16192_s3 + $0x38] sm:$0xff]  ;;  %v1370_v4 = vld [vmem:[%s16192_s3 + $0x48] sm:$0xff] }
 0x3ba   : > { %8903 = vmatprep.subr.bf16.mxu1 %v16619_v40  ;;  %16661 = vst [vmem:[#allocation82_spill] sm:$0xff] %v11581_v59  ;;  %v11595_v20 = vpack.c.bf16 %v1368_v8, %v1367_v3 }
 0x3bc   : > { %16664 = vst [vmem:[#allocation85_spill] sm:$0xff] %v11595_v20  ;;  %v11598_v1 = vpop.permute.xlu1 %9463  ;;  %v11600_v47 = vpop.permute.xlu0 %9468 }
 0x3bd   : > { %8905 = vmatpush1.bf16.msra.mxu1 %v11581_v59  ;;  %16665 = vst [vmem:[#allocation86_spill] sm:$0xff] %v11598_v1  ;;  %16666 = vst [vmem:[#allocation87_spill] sm:$0xff] %v11600_v47  ;;  %v1369_v59 = vld [vmem:[%s16192_s3 + $0x40] sm:$0xff]  ;;  %v1372_v47 = vld [vmem:[%s16192_s3 + $0x58] sm:$0xff] }
 0x3be   : > { %8906 = vmatprep.subr.bf16.mxu1 %v16619_v40  ;;  %v11609_v48 = vpack.c.bf16 %v1370_v4, %v1369_v59 }
 0x3c0   : > { %16667 = vst [vmem:[#allocation88_spill] sm:$0xff] %v11609_v48  ;;  %v11612_v8 = vpop.permute.xlu1 %5050 }
 0x3c1   : > { %8908 = vmatpush1.bf16.msra.mxu1 %v11595_v20  ;;  %16668 = vst [vmem:[#allocation89_spill] sm:$0xff] %v11612_v8  ;;  %v1371_v20 = vld [vmem:[%s16192_s3 + $0x50] sm:$0xff]  ;;  %v1373_v8 = vld [vmem:[%s16192_s3 + $0x60] sm:$0xff] }
 0x3c2   : > { %8909 = vmatprep.subr.bf16.mxu1 %v16619_v40  ;;  %v11623_v59 = vpack.c.bf16 %v1372_v47, %v1371_v20 }
 0x3c4   : > { %16669 = vst [vmem:[#allocation90_spill] sm:$0xff] %v11623_v59 }
 0x3c5   : > { %8911 = vmatpush1.bf16.msra.mxu1 %v11609_v48 }
 0x3c6   : > { %8912 = vmatprep.subr.bf16.mxu1 %v16619_v40 }
 0x3c9   : > { %v2004_v3 = vpop.xlane.xlu0 %2003  ;;  %8914 = vmatpush1.bf16.msra.mxu1 %v11623_v59 }
 0x3ca   : > { %v2098_v1 = vsub.f32 %v11129_v29, %v2004_v3  ;;  %v2099_v4 = vsub.f32 %v11131_v30, %v2004_v3  ;;  %8915 = vmatprep.subr.bf16.mxu1 %v16619_v40  ;;  %v11633_v29 = vpack.c.bf16 %v1374_v63, %v1373_v8  ;;  %v1375_v3 = vld [vmem:[%s16192_s3 + $0x70] sm:$0xff]  ;;  %v1377_v8 = vld [vmem:[%s16192_s3 + $0x80] sm:$0xff] }
 0x3cc   : > { %v2162_v48 = vmul.f32 1.442695, %v2098_v1  ;;  %v2164_v31 = vmul.f32 1.442695, %v2099_v4  ;;  %16670 = vst [vmem:[#allocation91_spill] sm:$0xff] %v11633_v29  ;;  %v1376_v4 = vld [vmem:[%s16192_s3 + $0x78] sm:$0xff] }
 0x3cd   : > { %v2007_v36 = vpop.xlane.xlu1 %2006  ;;  %8917 = vmatpush1.bf16.msra.mxu1 %v11633_v29 }
 0x3ce   : > { %9472 = vpow2.f32 %v2162_v48  ;;  %v2100_v30 = vsub.f32 %v11141_v42, %v2007_v36  ;;  %v2101_v20 = vsub.f32 %v11143_v44, %v2007_v36  ;;  %8918 = vmatprep.subr.bf16.mxu1 %v16619_v40  ;;  %v11645_v48 = vpack.c.bf16 %v1376_v4, %v1375_v3 }
 0x3cf   : > { %9474 = vpow2.f32 %v2164_v31 }
 0x3d0   : > { %v2166_v1 = vmul.f32 1.442695, %v2100_v30  ;;  %v2168_v47 = vmul.f32 1.442695, %v2101_v20  ;;  %16671 = vst [vmem:[#allocation92_spill] sm:$0xff] %v11645_v48  ;;  %v1378_v30 = vld [vmem:[%s16192_s3 + $0x88] sm:$0xff] }
 0x3d1   : > { %v2010_v63 = vpop.xlane.xlu0 %2009  ;;  %8920 = vmatpush1.bf16.msra.mxu1 %v11645_v48 }
 0x3d2   : > { %9476 = vpow2.f32 %v2166_v1  ;;  %v2102_v42 = vsub.f32 %v11153_v57, %v2010_v63  ;;  %v2103_v44 = vsub.f32 %v11155_v58, %v2010_v63  ;;  %8921 = vmatprep.subr.bf16.mxu1 %v16619_v40  ;;  %v11657_v1 = vpack.c.bf16 %v1378_v30, %v1377_v8  ;;  %v1379_v57 = vld [vmem:[%s16192_s3 + $0x90] sm:$0xff]  ;;  %v1380_v58 = vld [vmem:[%s16192_s3 + $0x98] sm:$0xff] }
 0x3d3   : > { %9478 = vpow2.f32 %v2168_v47 }
 0x3d4   : > { %v2170_v36 = vmul.f32 1.442695, %v2102_v42  ;;  %v2172_v31 = vmul.f32 1.442695, %v2103_v44  ;;  %16672 = vst [vmem:[#allocation93_spill] sm:$0xff] %v11657_v1  ;;  %v11670_v44 = vpack.c.bf16 %v1380_v58, %v1379_v57 }
 0x3d5   : > { %v2013_v20 = vpop.xlane.xlu0 %2012  ;;  %8923 = vmatpush1.bf16.msra.mxu1 %v11657_v1 }
 0x3d6   : > { %9480 = vpow2.f32 %v2170_v36  ;;  %v2104_v47 = vsub.f32 %v11165_v55, %v2013_v20  ;;  %v2105_v3 = vsub.f32 %v11167_v14, %v2013_v20  ;;  %16673 = vst [vmem:[#allocation94_spill] sm:$0xff] %v11670_v44  ;;  %8924 = vmatprep.subr.bf16.mxu1 %v16619_v40  ;;  %v1381_v55 = vld [vmem:[%s16192_s3 + $0xa0] sm:$0xff]  ;;  %v1382_v14 = vld [vmem:[%s16192_s3 + $0xa8] sm:$0xff] }
 0x3d7   : > { %9482 = vpow2.f32 %v2172_v31 }
 0x3d8   : > { %v11667_v4 = vpop.eup %9472  ;;  %v2174_v63 = vmul.f32 1.442695, %v2104_v47  ;;  %v2176_v42 = vmul.f32 1.442695, %v2105_v3  ;;  %v11688_v3 = vpack.c.bf16 %v1382_v14, %v1381_v55 }
 0x3d9   : > { %v11672_v8 = vpop.eup %9474  ;;  %v2016_v30 = vpop.xlane.xlu1 %2015  ;;  %8926 = vmatpush1.bf16.msra.mxu1 %v11670_v44 }
 0x3da   : > { %9484 = vpow2.f32 %v2174_v63  ;;  %v2106_v36 = vsub.f32 %v11177_v2, %v2016_v30  ;;  %v2107_v31 = vsub.f32 %v11179_v19, %v2016_v30  ;;  %v2290_v20 = vadd.f32 %v11672_v8, %v11667_v4  ;;  %16674 = vst [vmem:[#allocation95_spill] sm:$0xff] %v11688_v3  ;;  %8927 = vmatprep.subr.bf16.mxu1 %v16619_v40 }
 0x3db   : > { %9486 = vpow2.f32 %v2176_v42 }
 0x3dc   : > { %v11685_v57 = vpop.eup %9476  ;;  %v2178_v58 = vmul.f32 1.442695, %v2106_v36  ;;  %v2180_v47 = vmul.f32 1.442695, %v2107_v31  ;;  %2291 = vadd.xlane.f32.xlu0 %v2290_v20 }
 0x3dd   : > { %v11690_v1 = vpop.eup %9478  ;;  %v2019_v63 = vpop.xlane.xlu0 %2018  ;;  %8929 = vmatpush1.bf16.msra.mxu1 %v11688_v3 }
 0x3de   : > { %9488 = vpow2.f32 %v2178_v58  ;;  %v2108_v2 = vsub.f32 %v11189_v17, %v2019_v63  ;;  %v2109_v19 = vsub.f32 %v11191_v25, %v2019_v63  ;;  %v2293_v42 = vadd.f32 %v11690_v1, %v11685_v57  ;;  %8930 = vmatprep.subr.bf16.mxu1 %v16619_v40  ;;  %v1383_v17 = vld [vmem:[%s16192_s3 + $0xb0] sm:$0xff]  ;;  %v1384_v25 = vld [vmem:[%s16192_s3 + $0xb8] sm:$0xff] }
 0x3df   : > { %9490 = vpow2.f32 %v2180_v47  ;;  %v11713_v63 = vpack.c.bf16 %v1384_v25, %v1383_v17 }
 0x3e0   : > { %v11697_v30 = vpop.eup %9480  ;;  %v2182_v36 = vmul.f32 1.442695, %v2108_v2  ;;  %v2184_v31 = vmul.f32 1.442695, %v2109_v19  ;;  %2294 = vadd.xlane.f32.xlu0 %v2293_v42 }
 0x3e1   : > { %v11700_v55 = vpop.eup %9482  ;;  %v2022_v14 = vpop.xlane.xlu1 %2021  ;;  %16675 = vst [vmem:[#allocation96_spill] sm:$0xff] %v11713_v63  ;;  %8932 = vmatpush1.bf16.msra.mxu1 %v11713_v63 }
 0x3e2   : > { %9492 = vpow2.f32 %v2182_v36  ;;  %v2110_v20 = vsub.f32 %v11201_v24, %v2022_v14  ;;  %v2111_v58 = vsub.f32 %v11203_v26, %v2022_v14  ;;  %v2296_v47 = vadd.f32 %v11700_v55, %v11697_v30  ;;  %v1385_v24 = vld [vmem:[%s16192_s3 + $0xc0] sm:$0xff]  ;;  %v1386_v26 = vld [vmem:[%s16192_s3 + $0xc8] sm:$0xff]  ;;  %8933 = vmatprep.subr.bf16.mxu1 %v16619_v40 }
 0x3e3   : > { %9494 = vpow2.f32 %v2184_v31  ;;  %v11731_v17 = vpack.c.bf16 %v1386_v26, %v1385_v24 }
 0x3e4   : > { %v11715_v2 = vpop.eup %9484  ;;  %v2186_v19 = vmul.f32 1.442695, %v2110_v20  ;;  %v2188_v42 = vmul.f32 1.442695, %v2111_v58  ;;  %2297 = vadd.xlane.f32.xlu0 %v2296_v47 }
 0x3e5   : > { %v11717_v3 = vpop.eup %9486  ;;  %v2025_v44 = vpop.xlane.xlu0 %2024  ;;  %16676 = vst [vmem:[#allocation97_spill] sm:$0xff] %v11731_v17  ;;  %8935 = vmatpush1.bf16.msra.mxu1 %v11731_v17 }
 0x3e6   : > { %9496 = vpow2.f32 %v2186_v19  ;;  %v2112_v36 = vsub.f32 %v11213_v41, %v2025_v44  ;;  %v2113_v31 = vsub.f32 %v11215_v45, %v2025_v44  ;;  %v2299_v14 = vadd.f32 %v11717_v3, %v11715_v2  ;;  %v1387_v41 = vld [vmem:[%s16192_s3 + $0xd0] sm:$0xff]  ;;  %v1388_v45 = vld [vmem:[%s16192_s3 + $0xd8] sm:$0xff]  ;;  %8936 = vmatprep.subr.bf16.mxu1 %v16619_v40 }
 0x3e7   : > { %9498 = vpow2.f32 %v2188_v42  ;;  %v11749_v26 = vpack.c.bf16 %v1388_v45, %v1387_v41 }
 0x3e8   : > { %v11733_v25 = vpop.eup %9488  ;;  %v2190_v20 = vmul.f32 1.442695, %v2112_v36  ;;  %v2192_v58 = vmul.f32 1.442695, %v2113_v31  ;;  %2300 = vadd.xlane.f32.xlu0 %v2299_v14 }
 0x3e9   : > { %v11735_v47 = vpop.eup %9490  ;;  %v2028_v19 = vpop.xlane.xlu1 %2027  ;;  %16677 = vst [vmem:[#allocation98_spill] sm:$0xff] %v11749_v26  ;;  %8938 = vmatpush1.bf16.msra.mxu1 %v11749_v26 }
 0x3ea   : > { %9500 = vpow2.f32 %v2190_v20  ;;  %v2114_v44 = vsub.f32 %v11225_v34, %v2028_v19  ;;  %v2115_v42 = vsub.f32 %v11227_v12, %v2028_v19  ;;  %v2302_v24 = vadd.f32 %v11735_v47, %v11733_v25  ;;  %v1389_v34 = vld [vmem:[%s16192_s3 + $0xe0] sm:$0xff]  ;;  %v1390_v12 = vld [vmem:[%s16192_s3 + $0xe8] sm:$0xff]  ;;  %8939 = vmatprep.subr.bf16.mxu1 %v16619_v40 }
 0x3eb   : > { %9502 = vpow2.f32 %v2192_v58  ;;  %v11767_v45 = vpack.c.bf16 %v1390_v12, %v1389_v34 }
 0x3ec   : > { %v11751_v36 = vpop.eup %9492  ;;  %v2194_v31 = vmul.f32 1.442695, %v2114_v44  ;;  %v2196_v14 = vmul.f32 1.442695, %v2115_v42  ;;  %2303 = vadd.xlane.f32.xlu0 %v2302_v24 }
 0x3ed   : > { %v11753_v17 = vpop.eup %9494  ;;  %v2031_v20 = vpop.xlane.xlu0 %2030  ;;  %16678 = vst [vmem:[#allocation99_spill] sm:$0xff] %v11767_v45  ;;  %8941 = vmatpush1.bf16.msra.mxu1 %v11767_v45 }
 0x3ee   : > { %9504 = vpow2.f32 %v2194_v31  ;;  %v2116_v58 = vsub.f32 %v11237_v5, %v2031_v20  ;;  %v2117_v19 = vsub.f32 %v11239_v13, %v2031_v20  ;;  %v2305_v41 = vadd.f32 %v11753_v17, %v11751_v36  ;;  %v1391_v5 = vld [vmem:[%s16192_s3 + $0xf0] sm:$0xff]  ;;  %v1392_v13 = vld [vmem:[%s16192_s3 + $0xf8] sm:$0xff]  ;;  %8942 = vmatprep.subr.bf16.mxu1 %v16619_v40 }
 0x3ef   : > { %9506 = vpow2.f32 %v2196_v14  ;;  %v11785_v12 = vpack.c.bf16 %v1392_v13, %v1391_v5 }
 0x3f0   : > { %v11769_v44 = vpop.eup %9496  ;;  %v2198_v42 = vmul.f32 1.442695, %v2116_v58  ;;  %v2200_v24 = vmul.f32 1.442695, %v2117_v19  ;;  %2306 = vadd.xlane.f32.xlu0 %v2305_v41 }
 0x3f1   : > { %v11771_v26 = vpop.eup %9498  ;;  %v2034_v31 = vpop.xlane.xlu1 %2033  ;;  %16679 = vst [vmem:[#allocation100_spill] sm:$0xff] %v11785_v12  ;;  %8944 = vmatpush1.bf16.msra.mxu1 %v11785_v12 }
 0x3f2   : > { %9508 = vpow2.f32 %v2198_v42  ;;  %v2118_v14 = vsub.f32 %v11249_v18, %v2034_v31  ;;  %v2119_v20 = vsub.f32 %v11251_v6, %v2034_v31  ;;  %v2308_v34 = vadd.f32 %v11771_v26, %v11769_v44  ;;  %8993 = vmatprep.subr.bf16.mxu1 %v16619_v40 }
 0x3f3   : > { %9510 = vpow2.f32 %v2200_v24 }
 0x3f4   : > { %v11787_v58 = vpop.eup %9500  ;;  %v2202_v19 = vmul.f32 1.442695, %v2118_v14  ;;  %v2204_v41 = vmul.f32 1.442695, %v2119_v20  ;;  %2309 = vadd.xlane.f32.xlu0 %v2308_v34 }
 0x3f5   : > { %v11789_v45 = vpop.eup %9502  ;;  %v2037_v42 = vpop.xlane.xlu0 %2036 }
 0x3f6   : > { %9512 = vpow2.f32 %v2202_v19  ;;  %v2120_v18 = vsub.f32 %v11261_v27, %v2037_v42  ;;  %v2121_v6 = vsub.f32 %v11263_v32, %v2037_v42  ;;  %v2311_v24 = vadd.f32 %v11789_v45, %v11787_v58 }
 0x3f7   : > { %9514 = vpow2.f32 %v2204_v41 }
 0x3f8   : > { %v11797_v31 = vpop.eup %9504  ;;  %v2206_v5 = vmul.f32 1.442695, %v2120_v18  ;;  %v2208_v13 = vmul.f32 1.442695, %v2121_v6  ;;  %2312 = vadd.xlane.f32.xlu1 %v2311_v24 }
 0x3f9   : > { %v11799_v14 = vpop.eup %9506  ;;  %v2040_v20 = vpop.xlane.xlu1 %2039 }
 0x3fa   : > { %9516 = vpow2.f32 %v2206_v5  ;;  %v2122_v34 = vsub.f32 %v11273_v50, %v2040_v20  ;;  %v2123_v27 = vsub.f32 %v11275_v51, %v2040_v20  ;;  %v2314_v32 = vadd.f32 %v11799_v14, %v11797_v31 }
 0x3fb   : > { %9518 = vpow2.f32 %v2208_v13 }
 0x3fc   : > { %v11805_v19 = vpop.eup %9508  ;;  %v2210_v41 = vmul.f32 1.442695, %v2122_v34  ;;  %v2212_v42 = vmul.f32 1.442695, %v2123_v27  ;;  %2315 = vadd.xlane.f32.xlu1 %v2314_v32 }
 0x3fd   : > { %v11807_v18 = vpop.eup %9510  ;;  %v2043_v6 = vpop.xlane.xlu0 %2042 }
 0x3fe   : > { %9520 = vpow2.f32 %v2210_v41  ;;  %v2124_v24 = vsub.f32 %v11287_v49, %v2043_v6  ;;  %v2125_v5 = vsub.f32 %v11289_v60, %v2043_v6  ;;  %v2317_v50 = vadd.f32 %v11807_v18, %v11805_v19 }
 0x3ff   : > { %9522 = vpow2.f32 %v2212_v42 }
 0x400   : > { %v11813_v51 = vpop.eup %9512  ;;  %v2214_v13 = vmul.f32 1.442695, %v2124_v24  ;;  %v2216_v20 = vmul.f32 1.442695, %v2125_v5  ;;  %2318 = vadd.xlane.f32.xlu0 %v2317_v50 }
 0x401   : > { %v11815_v34 = vpop.eup %9514  ;;  %v2046_v27 = vpop.xlane.xlu0 %2045 }
 0x402   : > { %9524 = vpow2.f32 %v2214_v13  ;;  %v2126_v32 = vsub.f32 %v11299_v10, %v2046_v27  ;;  %v2127_v41 = vsub.f32 %v11301_v61, %v2046_v27  ;;  %v2320_v49 = vadd.f32 %v11815_v34, %v11813_v51 }
 0x403   : > { %9526 = vpow2.f32 %v2216_v20 }
 0x404   : > { %v11821_v60 = vpop.eup %9516  ;;  %v2218_v42 = vmul.f32 1.442695, %v2126_v32  ;;  %v2220_v6 = vmul.f32 1.442695, %v2127_v41  ;;  %2321 = vadd.xlane.f32.xlu1 %v2320_v49 }
 0x405   : > { %v11823_v24 = vpop.eup %9518  ;;  %v2049_v5 = vpop.xlane.xlu1 %2048 }
 0x406   : > { %9528 = vpow2.f32 %v2218_v42  ;;  %v2128_v50 = vsub.f32 %v11313_v38, %v2049_v5  ;;  %v2129_v13 = vsub.f32 %v11315_v39, %v2049_v5  ;;  %v2323_v10 = vadd.f32 %v11823_v24, %v11821_v60 }
 0x407   : > { %9530 = vpow2.f32 %v2220_v6 }
 0x408   : > { %v11829_v61 = vpop.eup %9520  ;;  %v2222_v20 = vmul.f32 1.442695, %v2128_v50  ;;  %v2224_v27 = vmul.f32 1.442695, %v2129_v13  ;;  %2324 = vadd.xlane.f32.xlu0 %v2323_v10 }
 0x409   : > { %v11831_v32 = vpop.eup %9522  ;;  %v2052_v41 = vpop.xlane.xlu0 %2051 }
 0x40a   : > { %9532 = vpow2.f32 %v2222_v20  ;;  %v2130_v49 = vsub.f32 %v11327_v11, %v2052_v41  ;;  %v2131_v42 = vsub.f32 %v11329_v52, %v2052_v41  ;;  %v2326_v38 = vadd.f32 %v11831_v32, %v11829_v61 }
 0x40b   : > { %9534 = vpow2.f32 %v2224_v27 }
 0x40c   : > { %v11837_v39 = vpop.eup %9524  ;;  %v2226_v6 = vmul.f32 1.442695, %v2130_v49  ;;  %v2228_v5 = vmul.f32 1.442695, %v2131_v42  ;;  %2327 = vadd.xlane.f32.xlu1 %v2326_v38 }
 0x40d   : > { %v11839_v50 = vpop.eup %9526  ;;  %v2055_v13 = vpop.xlane.xlu0 %2054 }
 0x40e   : > { %9536 = vpow2.f32 %v2226_v6  ;;  %v2132_v10 = vsub.f32 %v11339_v56, %v2055_v13  ;;  %v2133_v20 = vsub.f32 %v11341_v21, %v2055_v13  ;;  %v2329_v11 = vadd.f32 %v11839_v50, %v11837_v39 }
 0x40f   : > { %9538 = vpow2.f32 %v2228_v5 }
 0x410   : > { %v11845_v52 = vpop.eup %9528  ;;  %v2230_v27 = vmul.f32 1.442695, %v2132_v10  ;;  %v2232_v41 = vmul.f32 1.442695, %v2133_v20  ;;  %2330 = vadd.xlane.f32.xlu0 %v2329_v11 }
 0x411   : > { %v11847_v49 = vpop.eup %9530  ;;  %v2058_v42 = vpop.xlane.xlu1 %2057 }
 0x412   : > { %9540 = vpow2.f32 %v2230_v27  ;;  %v2134_v38 = vsub.f32 %v11353_v37, %v2058_v42  ;;  %v2135_v6 = vsub.f32 %v11355_v16, %v2058_v42  ;;  %v2332_v56 = vadd.f32 %v11847_v49, %v11845_v52 }
 0x413   : > { %9542 = vpow2.f32 %v2232_v41 }
 0x414   : > { %v11853_v21 = vpop.eup %9532  ;;  %v2234_v5 = vmul.f32 1.442695, %v2134_v38  ;;  %v2236_v13 = vmul.f32 1.442695, %v2135_v6  ;;  %2333 = vadd.xlane.f32.xlu1 %v2332_v56 }
 0x415   : > { %v11855_v10 = vpop.eup %9534  ;;  %v2061_v20 = vpop.xlane.xlu0 %2060 }
 0x416   : > { %9544 = vpow2.f32 %v2234_v5  ;;  %v2136_v11 = vsub.f32 %v11367_v23, %v2061_v20  ;;  %v2137_v27 = vsub.f32 %v11369_v33, %v2061_v20  ;;  %v2335_v37 = vadd.f32 %v11855_v10, %v11853_v21 }
 0x417   : > { %9546 = vpow2.f32 %v2236_v13 }
 0x418   : > { %v11861_v16 = vpop.eup %9536  ;;  %v2238_v41 = vmul.f32 1.442695, %v2136_v11  ;;  %v2240_v42 = vmul.f32 1.442695, %v2137_v27  ;;  %2336 = vadd.xlane.f32.xlu0 %v2335_v37 }
 0x419   : > { %v11863_v38 = vpop.eup %9538  ;;  %v2064_v6 = vpop.xlane.xlu1 %2063 }
 0x41a   : > { %9548 = vpow2.f32 %v2238_v41  ;;  %v2138_v56 = vsub.f32 %v11381_v28, %v2064_v6  ;;  %v2139_v5 = vsub.f32 %v11383_v15, %v2064_v6  ;;  %v2338_v23 = vadd.f32 %v11863_v38, %v11861_v16 }
 0x41b   : > { %9550 = vpow2.f32 %v2240_v42 }
 0x41c   : > { %v11869_v33 = vpop.eup %9540  ;;  %v2242_v13 = vmul.f32 1.442695, %v2138_v56  ;;  %v2244_v20 = vmul.f32 1.442695, %v2139_v5  ;;  %2339 = vadd.xlane.f32.xlu1 %v2338_v23 }
 0x41d   : > { %v11871_v11 = vpop.eup %9542  ;;  %v2067_v27 = vpop.xlane.xlu0 %2066 }
 0x41e   : > { %9552 = vpow2.f32 %v2242_v13  ;;  %v2140_v37 = vsub.f32 %v11397_v54, %v2067_v27  ;;  %v2141_v41 = vsub.f32 %v11399_v62, %v2067_v27  ;;  %v2341_v28 = vadd.f32 %v11871_v11, %v11869_v33 }
 0x41f   : > { %9554 = vpow2.f32 %v2244_v20 }
 0x420   : > { %v11877_v15 = vpop.eup %9544  ;;  %v2246_v42 = vmul.f32 1.442695, %v2140_v37  ;;  %v2248_v6 = vmul.f32 1.442695, %v2141_v41  ;;  %2342 = vadd.xlane.f32.xlu0 %v2341_v28 }
 0x421   : > { %v11879_v56 = vpop.eup %9546  ;;  %v2070_v5 = vpop.xlane.xlu1 %2069 }
 0x422   : > { %9556 = vpow2.f32 %v2246_v42  ;;  %v2142_v23 = vsub.f32 %v11411_v9, %v2070_v5  ;;  %v2143_v13 = vsub.f32 %v11413_v22, %v2070_v5  ;;  %v2344_v54 = vadd.f32 %v11879_v56, %v11877_v15  ;;  %v16680_v42 = vld [vmem:[#allocation54_spill] sm:$0xff] }
 0x423   : > { %9558 = vpow2.f32 %v2248_v6 }
 0x424   : > { %v11885_v62 = vpop.eup %9548  ;;  %v2250_v20 = vmul.f32 1.442695, %v2142_v23  ;;  %v2252_v27 = vmul.f32 1.442695, %v2143_v13  ;;  %2345 = vadd.xlane.f32.xlu1 %v2344_v54  ;;  %v16683_v54 = vld [vmem:[#allocation57_spill] sm:$0xff] }
 0x425   : > { %v11887_v37 = vpop.eup %9550  ;;  %v2073_v41 = vpop.xlane.xlu1 %2072 }
 0x426   : > { %9560 = vpow2.f32 %v2250_v20  ;;  %v2144_v28 = vsub.f32 %v11425_v0, %v2073_v41  ;;  %v2145_v12 = vsub.f32 %v16680_v42, %v2073_v41  ;;  %v2347_v9 = vadd.f32 %v11887_v37, %v11885_v62  ;;  %v16684_v20 = vld [vmem:[#allocation58_spill] sm:$0xff] }
 0x427   : > { %9562 = vpow2.f32 %v2252_v27 }
 0x428   : > { %v11893_v22 = vpop.eup %9552  ;;  %v2254_v6 = vmul.f32 1.442695, %v2144_v28  ;;  %v2256_v5 = vmul.f32 1.442695, %v2145_v12  ;;  %2348 = vadd.xlane.f32.xlu0 %v2347_v9  ;;  %v16687_v9 = vld [vmem:[#allocation60_spill] sm:$0xff] }
 0x429   : > { %16681 = vst [vmem:[#allocation54_spill] sm:$0xff] %v11893_v22  ;;  %v11895_v23 = vpop.eup %9554  ;;  %v2076_v13 = vpop.xlane.xlu1 %2075 }
 0x42a   : > { %16682 = vst [vmem:[#allocation101_spill] sm:$0xff] %v11895_v23  ;;  %9564 = vpow2.f32 %v2254_v6  ;;  %v2146_v63 = vsub.f32 %v16683_v54, %v2076_v13  ;;  %v2147_v48 = vsub.f32 %v16684_v20, %v2076_v13  ;;  %v2350_v0 = vadd.f32 %v11895_v23, %v11893_v22  ;;  %v16688_v6 = vld [vmem:[#allocation61_spill] sm:$0xff] }
 0x42b   : > { %9566 = vpow2.f32 %v2256_v5 }
 0x42c   : > { %v11901_v41 = vpop.eup %9556  ;;  %v2258_v27 = vmul.f32 1.442695, %v2146_v63  ;;  %v2260_v42 = vmul.f32 1.442695, %v2147_v48  ;;  %2351 = vadd.xlane.f32.xlu1 %v2350_v0  ;;  %v16691_v0 = vld [vmem:[#allocation63_spill] sm:$0xff] }
 0x42d   : > { %16685 = vst [vmem:[#allocation57_spill] sm:$0xff] %v11901_v41  ;;  %v11903_v28 = vpop.eup %9558  ;;  %v2079_v12 = vpop.xlane.xlu1 %2078 }
 0x42e   : > { %16686 = vst [vmem:[#allocation58_spill] sm:$0xff] %v11903_v28  ;;  %9568 = vpow2.f32 %v2258_v27  ;;  %v2148_v29 = vsub.f32 %v16687_v9, %v2079_v12  ;;  %v2149_v59 = vsub.f32 %v16688_v6, %v2079_v12  ;;  %v2353_v13 = vadd.f32 %v11903_v28, %v11901_v41  ;;  %v16692_v27 = vld [vmem:[#allocation64_spill] sm:$0xff] }
 0x42f   : > { %9570 = vpow2.f32 %v2260_v42 }
 0x430   : > { %v11909_v54 = vpop.eup %9560  ;;  %v2262_v5 = vmul.f32 1.442695, %v2148_v29  ;;  %v2264_v20 = vmul.f32 1.442695, %v2149_v59  ;;  %2354 = vadd.xlane.f32.xlu0 %v2353_v13  ;;  %v16694_v13 = vld [vmem:[#allocation67_spill] sm:$0xff] }
 0x431   : > { %16689 = vst [vmem:[#allocation60_spill] sm:$0xff] %v11909_v54  ;;  %v11911_v63 = vpop.eup %9562  ;;  %v2082_v48 = vpop.xlane.xlu1 %2081 }
 0x432   : > { %16690 = vst [vmem:[#allocation61_spill] sm:$0xff] %v11911_v63  ;;  %9572 = vpow2.f32 %v2262_v5  ;;  %v2150_v22 = vsub.f32 %v16691_v0, %v2082_v48  ;;  %v2151_v23 = vsub.f32 %v16692_v27, %v2082_v48  ;;  %v2356_v12 = vadd.f32 %v11911_v63, %v11909_v54  ;;  %v16695_v5 = vld [vmem:[#allocation68_spill] sm:$0xff] }
 0x433   : > { %9574 = vpow2.f32 %v2264_v20 }
 0x434   : > { %v11917_v9 = vpop.eup %9564  ;;  %v2266_v42 = vmul.f32 1.442695, %v2150_v22  ;;  %v2268_v6 = vmul.f32 1.442695, %v2151_v23  ;;  %2357 = vadd.xlane.f32.xlu1 %v2356_v12  ;;  %v16698_v12 = vld [vmem:[#allocation70_spill] sm:$0xff] }
 0x435   : > { %16693 = vst [vmem:[#allocation63_spill] sm:$0xff] %v11917_v9  ;;  %v11919_v29 = vpop.eup %9566  ;;  %v2085_v59 = vpop.xlane.xlu1 %2084 }
 0x436   : > { %9576 = vpow2.f32 %v2266_v42  ;;  %v2152_v41 = vsub.f32 %v16694_v13, %v2085_v59  ;;  %v2153_v28 = vsub.f32 %v16695_v5, %v2085_v59  ;;  %v2359_v48 = vadd.f32 %v11919_v29, %v11917_v9  ;;  %v16699_v42 = vld [vmem:[#allocation71_spill] sm:$0xff]  ;;  %v4703_v9 = vld [vmem:[%s16193_s4 + $0x140] sm:$0xff] }
 0x437   : > { %9578 = vpow2.f32 %v2268_v6 }
 0x438   : > { %v11925_v0 = vpop.eup %9568  ;;  %v2270_v20 = vmul.f32 1.442695, %v2152_v41  ;;  %v2272_v27 = vmul.f32 1.442695, %v2153_v28  ;;  %2360 = vadd.xlane.f32.xlu1 %v2359_v48 }
 0x439   : > { %16696 = vst [vmem:[#allocation64_spill] sm:$0xff] %v11925_v0  ;;  %v11927_v22 = vpop.eup %9570  ;;  %v2088_v23 = vpop.xlane.xlu1 %2087 }
 0x43a   : > { %16697 = vst [vmem:[#allocation67_spill] sm:$0xff] %v11927_v22  ;;  %9580 = vpow2.f32 %v2270_v20  ;;  %v2154_v54 = vsub.f32 %v16698_v12, %v2088_v23  ;;  %v2155_v63 = vsub.f32 %v16699_v42, %v2088_v23  ;;  %v2362_v59 = vadd.f32 %v11927_v22, %v11925_v0 }
 0x43b   : > { %9582 = vpow2.f32 %v2272_v27 }
 0x43c   : > { %v11933_v13 = vpop.eup %9572  ;;  %v2274_v6 = vmul.f32 1.442695, %v2154_v54  ;;  %v2276_v5 = vmul.f32 1.442695, %v2155_v63  ;;  %2363 = vadd.xlane.f32.xlu0 %v2362_v59 }
 0x43d   : > { %16700 = vst [vmem:[#allocation68_spill] sm:$0xff] %v11933_v13  ;;  %v11935_v41 = vpop.eup %9574  ;;  %v2091_v28 = vpop.xlane.xlu1 %2090 }
 0x43e   : > { %16701 = vst [vmem:[#allocation70_spill] sm:$0xff] %v11935_v41  ;;  %9584 = vpow2.f32 %v2274_v6  ;;  %v2156_v48 = vsub.f32 %v11513_v53, %v2091_v28  ;;  %v2157_v20 = vsub.f32 %v11515_v7, %v2091_v28  ;;  %v2365_v23 = vadd.f32 %v11935_v41, %v11933_v13  ;;  %v16704_v6 = vld [vmem:[#allocation75_spill] sm:$0xff] }
 0x43f   : > { %9586 = vpow2.f32 %v2276_v5 }
 0x440   : > { %v11941_v12 = vpop.eup %9576  ;;  %v2278_v27 = vmul.f32 1.442695, %v2156_v48  ;;  %v2280_v42 = vmul.f32 1.442695, %v2157_v20  ;;  %2366 = vadd.xlane.f32.xlu1 %v2365_v23 }
 0x441   : > { %16702 = vst [vmem:[#allocation71_spill] sm:$0xff] %v11941_v12  ;;  %v11943_v54 = vpop.eup %9578  ;;  %v2094_v63 = vpop.xlane.xlu1 %2093 }
 0x442   : > { %16703 = vst [vmem:[#allocation102_spill] sm:$0xff] %v11943_v54  ;;  %9588 = vpow2.f32 %v2278_v27  ;;  %v2158_v59 = vsub.f32 %v11529_v35, %v2094_v63  ;;  %v2159_v0 = vsub.f32 %v16704_v6, %v2094_v63  ;;  %v2368_v53 = vadd.f32 %v11943_v54, %v11941_v12 }
 0x443   : > { %9590 = vpow2.f32 %v2280_v42 }
 0x444   : > { %v11949_v7 = vpop.eup %9580  ;;  %v2282_v5 = vmul.f32 1.442695, %v2158_v59  ;;  %v2284_v28 = vmul.f32 1.442695, %v2159_v0  ;;  %2369 = vadd.xlane.f32.xlu0 %v2368_v53 }
 0x445   : > { %16705 = vst [vmem:[#allocation75_spill] sm:$0xff] %v11949_v7  ;;  %v11951_v48 = vpop.eup %9582 }
 0x446   : > { %16706 = vst [vmem:[#allocation103_spill] sm:$0xff] %v11951_v48  ;;  %9592 = vpow2.f32 %v2282_v5  ;;  %v2371_v20 = vadd.f32 %v11951_v48, %v11949_v7  ;;  %v4680_v5 = vld [vmem:[%s16193_s4 + $0x88] sm:$0xff] }
 0x447   : > { %9594 = vpow2.f32 %v2284_v28  ;;  %v4688_v28 = vld [vmem:[%s16193_s4 + $0xc8] sm:$0xff] }
 0x448   : > { %v11955_v23 = vpop.eup %9584  ;;  %2372 = vadd.xlane.f32.xlu1 %v2371_v20  ;;  %v4704_v20 = vld [vmem:[%s16193_s4 + $0x148] sm:$0xff] }
 0x449   : > { %16707 = vst [vmem:[#allocation104_spill] sm:$0xff] %v11955_v23  ;;  %v11957_v35 = vpop.eup %9586 }
 0x44a   : > { %16708 = vst [vmem:[#allocation105_spill] sm:$0xff] %v11957_v35  ;;  %v2374_v27 = vadd.f32 %v11957_v35, %v11955_v23  ;;  %v16715_v35 = vld [vmem:[#allocation41_spill] sm:$0xff] }
 0x44b   : > { %v9321_v7 = vunpack.i.h.bf16 %v16715_v35 }
 0x44c   : > { %v11961_v42 = vpop.eup %9588  ;;  %2375 = vadd.xlane.f32.xlu0 %v2374_v27  ;;  %v4672_v27 = vld [vmem:[%s16193_s4 + $0x48] sm:$0xff] }
 0x44d   : > { %16709 = vst [vmem:[#allocation106_spill] sm:$0xff] %v11961_v42  ;;  %v11963_v0 = vpop.eup %9590 }
 0x44e   : > { %16710 = vst [vmem:[#allocation107_spill] sm:$0xff] %v11963_v0  ;;  %v2377_v63 = vadd.f32 %v11963_v0, %v11961_v42 }
 0x450   : > { %v11967_v59 = vpop.eup %9592  ;;  %2378 = vadd.xlane.f32.xlu1 %v2377_v63 }
 0x451   : > { %16711 = vst [vmem:[#allocation108_spill] sm:$0xff] %v11967_v59  ;;  %v11969_v6 = vpop.eup %9594 }
 0x452   : > { %16712 = vst [vmem:[#allocation109_spill] sm:$0xff] %v11969_v6  ;;  %v2380_v53 = vadd.f32 %v11969_v6, %v11967_v59  ;;  %v4673_v59 = vld [vmem:[%s16193_s4 + $0x50] sm:$0xff] }
 0x454   : > { %2381 = vadd.xlane.f32.xlu0 %v2380_v53  ;;  %v4720_v53 = vld [vmem:[%s16193_s4 + $0x1c8] sm:$0xff] }
 0x461   : > { %5082 = vrot.lane.b32.xlu1 %v4680_v5, %s10211_s13  ;;  %v4696_v5 = vld [vmem:[%s16193_s4 + $0x108] sm:$0xff] }
 0x465   : > { %5098 = vrot.lane.b32.xlu1 %v4688_v28, %s10211_s13 }
 0x469   : > { %v2292_v63 = vpop.xlane.xlu0 %2291  ;;  %5130 = vrot.lane.b32.xlu1 %v4704_v20, %s10211_s13  ;;  %v4712_v20 = vld [vmem:[%s16193_s4 + $0x188] sm:$0xff] }
 0x46a   : > { %9596 = vrcp.f32 %v2292_v63  ;;  %5066 = vrot.lane.b32.xlu0 %v4672_v27, %s10211_s13  ;;  %v16713_v27 = vld [vmem:[#allocation49_spill] sm:$0xff] }
 0x46b   : > { %v9316_v6 = vunpack.i.h.bf16 %v16713_v27 }
 0x46d   : > { %v2295_v28 = vpop.xlane.xlu0 %2294  ;;  %5162 = vrot.lane.b32.xlu1 %v4720_v53, %s10211_s13  ;;  %v9315_v53 = vunpack.i.l.bf16 %v16713_v27 }
 0x46e   : > { %9598 = vrcp.f32 %v2295_v28  ;;  %5114 = vrot.lane.b32.xlu0 %v4696_v5, %s10211_s13  ;;  %v16714_v28 = vld [vmem:[#allocation66_spill] sm:$0xff] }
 0x46f   : > { %v9396_v42 = vunpack.i.h.bf16 %v16714_v28  ;;  %v9395_v0 = vunpack.i.l.bf16 %v16714_v28  ;;  %v4665_v5 = vld [vmem:[%s16193_s4 + $0x10] sm:$0xff]  ;;  %v8948_v27 = vpack.c.bf16 %v9316_v6, %v9315_v53  ;;  %v16716_v28 = vld [vmem:[#allocation55_spill] sm:$0xff] }
 0x470   : > { %v9401_v54 = vunpack.i.h.bf16 %v16716_v28  ;;  %v9400_v13 = vunpack.i.l.bf16 %v16716_v28  ;;  %v16719_v6 = vld [vmem:[#allocation59_spill] sm:$0xff]  ;;  %v16721_v28 = vld [vmem:[#allocation72_spill] sm:$0xff] }
 0x471   : > { %v2298_v63 = vpop.xlane.xlu0 %2297  ;;  %5068 = vrot.lane.b32.xlu1 %v4673_v59, %s10211_s13  ;;  %v9320_v59 = vunpack.i.l.bf16 %v16715_v35  ;;  %v8994_v12 = vpack.c.bf16 %v9396_v42, %v9395_v0  ;;  %v2097_v35 = vpop.xlane.xlu1 %2096  ;;  %v16718_v42 = vld [vmem:[#allocation51_spill] sm:$0xff]  ;;  %v9406_v53 = vunpack.i.h.bf16 %v16719_v6 }
 0x472   : > { %9600 = vrcp.f32 %v2298_v63  ;;  %5146 = vrot.lane.b32.xlu0 %v4712_v20, %s10211_s13  ;;  %v9326_v0 = vunpack.i.h.bf16 %v16718_v42 }
 0x473   : > { %v8951_v22 = vpack.c.bf16 %v9321_v7, %v9320_v59  ;;  %v4681_v7 = vld [vmem:[%s16193_s4 + $0x90] sm:$0xff]  ;;  %v2160_v59 = vsub.f32 %v11543_v43, %v2097_v35  ;;  %v9410_v43 = vunpack.i.l.bf16 %v16721_v28 }
 0x474   : > { %v9597_v23 = vpop.eup %9596 }
 0x475   : > { %v2301_v63 = vpop.xlane.xlu0 %2300  ;;  %v2419_v20 = vmul.f32 %v9597_v23, %v11672_v8  ;;  %v2418_v48 = vmul.f32 %v9597_v23, %v11667_v4 }
 0x476   : > { %9602 = vrcp.f32 %v2301_v63  ;;  %5052 = vrot.lane.b32.xlu0 %v4665_v5, %s10211_s13  ;;  %v2161_v63 = vsub.f32 %v11545_v46, %v2097_v35 }
 0x477   : > { %2642 = vmatprep.mubr.f32.mxu0 %v2419_v20  ;;  %2867 = vmatprep.mubr.f32.mxu1 %v2419_v20 }
 0x478   : > { %v9599_v41 = vpop.eup %9598  ;;  %2643 = vmatmul.mubr.f32.vlgmr.msra.gmra.mrb[32].mxu0 %v2418_v48  ;;  %2868 = vmatmul.mubr.f32.vlgmr.msra.gmra.mrb[96].mxu1 %v2418_v48  ;;  %v9325_v48 = vunpack.i.l.bf16 %v16718_v42 }
 0x479   : > { %8950 = vmatpush3.bf16.xpose.msk.msra.mxu0 %vm10892_vm5, %v8948_v27  ;;  %8995 = vmatpush1.bf16.msra.mxu1 %v8994_v12  ;;  %v2304_v4 = vpop.xlane.xlu0 %2303  ;;  %v2421_v8 = vmul.f32 %v9599_v41, %v11690_v1  ;;  %v2420_v23 = vmul.f32 %v9599_v41, %v11685_v57  ;;  %v8997_v12 = vpack.c.bf16 %v9401_v54, %v9400_v13  ;;  %v9405_v1 = vunpack.i.l.bf16 %v16719_v6  ;;  %v16720_v41 = vld [vmem:[#allocation42_spill] sm:$0xff] }
 0x47a   : > { %8953 = vmatprep.subr.msk.bf16.mxu0 %vm10892_vm5, %v8951_v22  ;;  %9604 = vrcp.f32 %v2304_v4  ;;  %8996 = vmatprep.subr.bf16.mxu1 %v16619_v40  ;;  %v9331_v5 = vunpack.i.h.bf16 %v16720_v41  ;;  %v9330_v22 = vunpack.i.l.bf16 %v16720_v41  ;;  %v8954_v27 = vpack.c.bf16 %v9326_v0, %v9325_v48  ;;  %v16724_v41 = vld [vmem:[#allocation43_spill] sm:$0xff] }
 0x47b   : > { %2647 = vmatprep.mubr.f32.mxu0 %v2421_v8  ;;  %2872 = vmatprep.mubr.f32.mxu1 %v2421_v8  ;;  %v9411_v4 = vunpack.i.h.bf16 %v16721_v28  ;;  %v9000_v8 = vpack.c.bf16 %v9406_v53, %v9405_v1  ;;  %v16723_v1 = vld [vmem:[#allocation65_spill] sm:$0xff] }
 0x47c   : > { %v9601_v57 = vpop.eup %9600  ;;  %2648 = vmatmul.mubr.f32.gmra.mrb[34].mxu0 %v2420_v23  ;;  %2873 = vmatmul.mubr.f32.gmra.mrb[98].mxu1 %v2420_v23  ;;  %v8957_v35 = vpack.c.bf16 %v9331_v5, %v9330_v22  ;;  %v2286_v23 = vmul.f32 1.442695, %v2160_v59  ;;  %v9341_v5 = vunpack.i.h.bf16 %v16724_v41  ;;  %v9340_v22 = vunpack.i.l.bf16 %v16724_v41 }
 0x47d   : > { %8998 = vmatpush1.bf16.msra.mxu1 %v8997_v12  ;;  %v2307_v20 = vpop.xlane.xlu0 %2306  ;;  %v2423_v13 = vmul.f32 %v9601_v57, %v11700_v55  ;;  %v2422_v54 = vmul.f32 %v9601_v57, %v11697_v30  ;;  %5084 = vrot.lane.b32.xlu0 %v4681_v7, %s10211_s13  ;;  %v2288_v55 = vmul.f32 1.442695, %v2161_v63  ;;  %v16722_v7 = vld [vmem:[#allocation53_spill] sm:$0xff]  ;;  %v4697_v12 = vld [vmem:[%s16193_s4 + $0x110] sm:$0xff]  ;;  %v9003_v53 = vpack.c.bf16 %v9411_v4, %v9410_v43 }
 0x47e   : > { %9606 = vrcp.f32 %v2307_v20  ;;  %8999 = vmatprep.subr.bf16.mxu1 %v16619_v40  ;;  %v9336_v48 = vunpack.i.h.bf16 %v16722_v7  ;;  %v9335_v6 = vunpack.i.l.bf16 %v16722_v7  ;;  %v9416_v57 = vunpack.i.h.bf16 %v16723_v1 }
 0x47f   : > { %2652 = vmatprep.mubr.f32.mxu0 %v2423_v13  ;;  %2877 = vmatprep.mubr.f32.mxu1 %v2423_v13 }
 0x480   : > { %v9603_v46 = vpop.eup %9602  ;;  %2653 = vmatmul.mubr.f32.gmra.mrb[36].mxu0 %v2422_v54  ;;  %2878 = vmatmul.mubr.f32.gmra.mrb[100].mxu1 %v2422_v54  ;;  %v8960_v13 = vpack.c.bf16 %v9336_v48, %v9335_v6  ;;  %v16728_v48 = vld [vmem:[#allocation44_spill] sm:$0xff] }
 0x481   : > { %8956 = vmatpush3.bf16.xpose.msk.msra.mxu0 %vm10892_vm5, %v8954_v27  ;;  %9001 = vmatpush1.bf16.msra.mxu1 %v9000_v8  ;;  %v2310_v30 = vpop.xlane.xlu0 %2309  ;;  %v2425_v42 = vmul.f32 %v9603_v46, %v11717_v3  ;;  %v2424_v0 = vmul.f32 %v9603_v46, %v11715_v2  ;;  %v9415_v3 = vunpack.i.l.bf16 %v16723_v1  ;;  %v16725_v27 = vld [vmem:[#allocation69_spill] sm:$0xff]  ;;  %v8963_v8 = vpack.c.bf16 %v9341_v5, %v9340_v22 }
 0x482   : > { %8959 = vmatprep.subr.msk.bf16.mxu0 %vm10892_vm5, %v8957_v35  ;;  %9608 = vrcp.f32 %v2310_v30  ;;  %9002 = vmatprep.subr.bf16.mxu1 %v16619_v40  ;;  %v9421_v28 = vunpack.i.h.bf16 %v16725_v27  ;;  %v9420_v4 = vunpack.i.l.bf16 %v16725_v27  ;;  %v16726_v35 = vld [vmem:[#allocation56_spill] sm:$0xff]  ;;  %v9355_v6 = vunpack.i.l.bf16 %v16728_v48  ;;  %v16729_v22 = vld [vmem:[#allocation73_spill] sm:$0xff]  ;;  %v16730_v27 = vld [vmem:[#allocation62_spill] sm:$0xff] }
 0x483   : > { %2657 = vmatprep.mubr.f32.mxu0 %v2425_v42  ;;  %2882 = vmatprep.mubr.f32.mxu1 %v2425_v42  ;;  %9610 = vpow2.f32 %v2286_v23  ;;  %v9006_v54 = vpack.c.bf16 %v9416_v57, %v9415_v3  ;;  %v9346_v23 = vunpack.i.h.bf16 %v16726_v35  ;;  %v9345_v30 = vunpack.i.l.bf16 %v16726_v35  ;;  %v16727_v42 = vld [vmem:[#allocation74_spill] sm:$0xff]  ;;  %v16732_v35 = vld [vmem:[#allocation45_spill] sm:$0xff] }
 0x484   : > { %v9605_v2 = vpop.eup %9604  ;;  %2658 = vmatmul.mubr.f32.gmra.mrb[38].mxu0 %v2424_v0  ;;  %2883 = vmatmul.mubr.f32.gmra.mrb[102].mxu1 %v2424_v0  ;;  %9612 = vpow2.f32 %v2288_v55  ;;  %v4713_v55 = vld [vmem:[%s16193_s4 + $0x190] sm:$0xff]  ;;  %v9426_v0 = vunpack.i.h.bf16 %v16727_v42  ;;  %v9009_v7 = vpack.c.bf16 %v9421_v28, %v9420_v4  ;;  %v9361_v28 = vunpack.i.h.bf16 %v16730_v27 }
 0x485   : > { %9004 = vmatpush1.bf16.msra.mxu1 %v9003_v53  ;;  %v2313_v59 = vpop.xlane.xlu1 %2312  ;;  %v2427_v63 = vmul.f32 %v9605_v2, %v11735_v47  ;;  %v2426_v20 = vmul.f32 %v9605_v2, %v11733_v25  ;;  %5116 = vrot.lane.b32.xlu0 %v4697_v12, %s10211_s13  ;;  %v9356_v12 = vunpack.i.h.bf16 %v16728_v48  ;;  %v8966_v41 = vpack.c.bf16 %v9346_v23, %v9345_v30 }
 0x486   : > { %9614 = vrcp.f32 %v2313_v59  ;;  %9005 = vmatprep.subr.bf16.mxu1 %v16619_v40  ;;  %v9431_v59 = vunpack.i.h.bf16 %v16729_v22  ;;  %v9360_v4 = vunpack.i.l.bf16 %v16730_v27  ;;  %v9366_v23 = vunpack.i.h.bf16 %v16732_v35 }
 0x487   : > { %2662 = vmatprep.mubr.f32.mxu0 %v2427_v63  ;;  %2887 = vmatprep.mubr.f32.mxu1 %v2427_v63  ;;  %v9430_v63 = vunpack.i.l.bf16 %v16729_v22 }
 0x488   : > { %v9607_v43 = vpop.eup %9606  ;;  %2663 = vmatmul.mubr.f32.gmra.mrb[40].mxu0 %v2426_v20  ;;  %2888 = vmatmul.mubr.f32.gmra.mrb[104].mxu1 %v2426_v20  ;;  %v8969_v20 = vpack.c.bf16 %v9356_v12, %v9355_v6 }
 0x489   : > { %8962 = vmatpush3.bf16.xpose.msk.msra.mxu0 %vm10892_vm5, %v8960_v13  ;;  %9007 = vmatpush1.bf16.msra.mxu1 %v9006_v54  ;;  %v2316_v25 = vpop.xlane.xlu1 %2315  ;;  %v2429_v47 = vmul.f32 %v9607_v43, %v11753_v17  ;;  %v2428_v46 = vmul.f32 %v9607_v43, %v11751_v36  ;;  %v9425_v17 = vunpack.i.l.bf16 %v16727_v42  ;;  %v16731_v43 = vld [vmem:[#allocation77_spill] sm:$0xff] }
 0x48a   : > { %8965 = vmatprep.subr.msk.bf16.mxu0 %vm10892_vm5, %v8963_v8  ;;  %9616 = vrcp.f32 %v2316_v25  ;;  %9008 = vmatprep.subr.bf16.mxu1 %v16619_v40  ;;  %v9436_v8 = vunpack.i.h.bf16 %v16731_v43  ;;  %v9435_v25 = vunpack.i.l.bf16 %v16731_v43 }
 0x48b   : > { %2667 = vmatprep.mubr.f32.mxu0 %v2429_v47  ;;  %2892 = vmatprep.mubr.f32.mxu1 %v2429_v47  ;;  %v9012_v5 = vpack.c.bf16 %v9426_v0, %v9425_v17  ;;  %v9015_v47 = vpack.c.bf16 %v9431_v59, %v9430_v63  ;;  %v8972_v17 = vpack.c.bf16 %v9361_v28, %v9360_v4  ;;  %v16735_v59 = vld [vmem:[#allocation46_spill] sm:$0xff] }
 0x48c   : > { %v9609_v36 = vpop.eup %9608  ;;  %2668 = vmatmul.mubr.f32.gmra.mrb[42].mxu0 %v2428_v46  ;;  %2893 = vmatmul.mubr.f32.gmra.mrb[106].mxu1 %v2428_v46  ;;  %v9371_v63 = vunpack.i.h.bf16 %v16735_v59 }
 0x48d   : > { %9010 = vmatpush1.bf16.msra.mxu1 %v9009_v7  ;;  %v2319_v53 = vpop.xlane.xlu0 %2318  ;;  %v2431_v1 = vmul.f32 %v9609_v36, %v11771_v26  ;;  %v2430_v57 = vmul.f32 %v9609_v36, %v11769_v44  ;;  %5148 = vrot.lane.b32.xlu0 %v4713_v55, %s10211_s13  ;;  %v12084_v3 = vpop.eup %9610  ;;  %v9365_v55 = vunpack.i.l.bf16 %v16732_v35  ;;  %v9018_v7 = vpack.c.bf16 %v9436_v8, %v9435_v25  ;;  %v16733_v36 = vld [vmem:[#allocation76_spill] sm:$0xff]  ;;  %v16737_v8 = vld [vmem:[#allocation79_spill] sm:$0xff] }
 0x48e   : > { %9618 = vrcp.f32 %v2319_v53  ;;  %9011 = vmatprep.subr.bf16.mxu1 %v16619_v40  ;;  %v12087_v2 = vpop.eup %9612  ;;  %v9441_v48 = vunpack.i.h.bf16 %v16733_v36  ;;  %v9440_v12 = vunpack.i.l.bf16 %v16733_v36  ;;  %v9451_v25 = vunpack.i.h.bf16 %v16737_v8 }
 0x48f   : > { %2672 = vmatprep.mubr.f32.mxu0 %v2431_v1  ;;  %2897 = vmatprep.mubr.f32.mxu1 %v2431_v1  ;;  %v8975_v53 = vpack.c.bf16 %v9366_v23, %v9365_v55  ;;  %v16738_v23 = vld [vmem:[#allocation84_spill] sm:$0xff] }
 0x490   : > { %v9615_v26 = vpop.eup %9614  ;;  %2673 = vmatmul.mubr.f32.gmra.mrb[44].mxu0 %v2430_v57  ;;  %2898 = vmatmul.mubr.f32.gmra.mrb[108].mxu1 %v2430_v57  ;;  %v16734_v57 = vld [vmem:[#allocation81_spill] sm:$0xff]  ;;  %v9456_v55 = vunpack.i.h.bf16 %v16738_v23 }
 0x491   : > { %8968 = vmatpush3.bf16.xpose.msk.msra.mxu0 %vm10892_vm5, %v8966_v41  ;;  %9013 = vmatpush1.bf16.msra.mxu1 %v9012_v5  ;;  %v2322_v44 = vpop.xlane.xlu1 %2321  ;;  %v2433_v13 = vmul.f32 %v9615_v26, %v11789_v45  ;;  %v2432_v54 = vmul.f32 %v9615_v26, %v11787_v58  ;;  %v2383_v45 = vadd.f32 %v12087_v2, %v12084_v3  ;;  %v12107_v58 = vld [vmem:[%s16193_s4] sm:$0xff]  ;;  %v9446_v41 = vunpack.i.h.bf16 %v16734_v57 }
 0x492   : > { %8971 = vmatprep.subr.msk.bf16.mxu0 %vm10892_vm5, %v8969_v20  ;;  %9620 = vrcp.f32 %v2322_v44  ;;  %9014 = vmatprep.subr.bf16.mxu1 %v16619_v40  ;;  %v12129_v5 = vld [vmem:[%s16193_s4 + $0x40] sm:$0xff]  ;;  %v9445_v22 = vunpack.i.l.bf16 %v16734_v57  ;;  %v16736_v20 = vld [vmem:[#allocation47_spill] sm:$0xff] }
 0x493   : > { %2677 = vmatprep.mubr.f32.mxu0 %v2433_v13  ;;  %2902 = vmatprep.mubr.f32.mxu1 %v2433_v13  ;;  %v9376_v44 = vunpack.i.h.bf16 %v16736_v20  ;;  %v9375_v13 = vunpack.i.l.bf16 %v16736_v20 }
 0x494   : > { %v9617_v46 = vpop.eup %9616  ;;  %2678 = vmatmul.mubr.f32.gmra.mrb[46].mxu0 %v2432_v54  ;;  %2903 = vmatmul.mubr.f32.gmra.mrb[110].mxu1 %v2432_v54  ;;  %v9024_v4 = vpack.c.bf16 %v9446_v41, %v9445_v22  ;;  %v16741_v41 = vld [vmem:[#allocation83_spill] sm:$0xff] }
 0x495   : > { %9016 = vmatpush1.bf16.msra.mxu1 %v9015_v47  ;;  %v2325_v30 = vpop.xlane.xlu0 %2324  ;;  %2384 = vadd.xlane.f32.xlu1 %v2383_v45  ;;  %v2435_v42 = vmul.f32 %v9617_v46, %v11799_v14  ;;  %v2434_v0 = vmul.f32 %v9617_v46, %v11797_v31  ;;  %v9450_v47 = vunpack.i.l.bf16 %v16737_v8  ;;  %v8981_v46 = vpack.c.bf16 %v9376_v44, %v9375_v13  ;;  %v4687_v44 = vld [vmem:[%s16193_s4 + $0xc0] sm:$0xff] }
 0x496   : > { %9622 = vrcp.f32 %v2325_v30  ;;  %9017 = vmatprep.subr.bf16.mxu1 %v16619_v40  ;;  %5048 = vrot.lane.b32.xlu0 %v12107_v58, %s10211_s13  ;;  %v4679_v30 = vld [vmem:[%s16193_s4 + $0x80] sm:$0xff]  ;;  %v9461_v22 = vunpack.i.h.bf16 %v16741_v41 }
 0x497   : > { %2682 = vmatprep.mubr.f32.mxu0 %v2435_v42  ;;  %2907 = vmatprep.mubr.f32.mxu1 %v2435_v42  ;;  %v9455_v42 = vunpack.i.l.bf16 %v16738_v23 }
 0x498   : > { %v9619_v6 = vpop.eup %9618  ;;  %2683 = vmatmul.mubr.f32.gmra.mrb[48].mxu0 %v2434_v0  ;;  %2908 = vmatmul.mubr.f32.gmra.mrb[112].mxu1 %v2434_v0  ;;  %v16739_v0 = vld [vmem:[#allocation48_spill] sm:$0xff] }
 0x499   : > { %8974 = vmatpush3.bf16.xpose.msk.msra.mxu0 %vm10892_vm5, %v8972_v17  ;;  %9019 = vmatpush1.bf16.msra.mxu1 %v9018_v7  ;;  %v2328_v31 = vpop.xlane.xlu1 %2327  ;;  %v2437_v14 = vmul.f32 %v9619_v6, %v11807_v18  ;;  %v2436_v1 = vmul.f32 %v9619_v6, %v11805_v19  ;;  %v9370_v18 = vunpack.i.l.bf16 %v16735_v59  ;;  %v9021_v19 = vpack.c.bf16 %v9441_v48, %v9440_v12  ;;  %v16740_v48 = vld [vmem:[#allocation50_spill] sm:$0xff] }
 0x49a   : > { %8977 = vmatprep.subr.msk.bf16.mxu0 %vm10892_vm5, %v8975_v53  ;;  %9624 = vrcp.f32 %v2328_v31  ;;  %9020 = vmatprep.subr.bf16.mxu1 %v16619_v40  ;;  %v9381_v17 = vunpack.i.h.bf16 %v16739_v0  ;;  %v9027_v7 = vpack.c.bf16 %v9451_v25, %v9450_v47  ;;  %v9386_v12 = vunpack.i.h.bf16 %v16740_v48 }
 0x49b   : > { %2687 = vmatprep.mubr.f32.mxu0 %v2437_v14  ;;  %2912 = vmatprep.mubr.f32.mxu1 %v2437_v14  ;;  %v8978_v43 = vpack.c.bf16 %v9371_v63, %v9370_v18  ;;  %v9385_v6 = vunpack.i.l.bf16 %v16740_v48  ;;  %v9460_v59 = vunpack.i.l.bf16 %v16741_v41  ;;  %v12229_v48 = vld [vmem:[%s16193_s4 + $0x58] sm:$0xff] }
 0x49c   : > { %v9621_v26 = vpop.eup %9620  ;;  %2688 = vmatmul.mubr.f32.gmra.mrb[50].mxu0 %v2436_v1  ;;  %2913 = vmatmul.mubr.f32.gmra.mrb[114].mxu1 %v2436_v1  ;;  %v9030_v1 = vpack.c.bf16 %v9456_v55, %v9455_v42  ;;  %v12255_v41 = vld [vmem:[%s16193_s4 + $0xd8] sm:$0xff] }
 0x49d   : > { %9022 = vmatpush1.bf16.msra.mxu1 %v9021_v19  ;;  %v2331_v54 = vpop.xlane.xlu0 %2330  ;;  %v2439_v27 = vmul.f32 %v9621_v26, %v11815_v34  ;;  %v2438_v28 = vmul.f32 %v9621_v26, %v11813_v51  ;;  %5064 = vrot.lane.b32.xlu0 %v12129_v5, %s10211_s13  ;;  %v8987_v18 = vpack.c.bf16 %v9386_v12, %v9385_v6  ;;  %v16742_v26 = vld [vmem:[#allocation86_spill] sm:$0xff]  ;;  %v4719_v12 = vld [vmem:[%s16193_s4 + $0x1c0] sm:$0xff] }
 0x49e   : > { %9626 = vrcp.f32 %v2331_v54  ;;  %9023 = vmatprep.subr.bf16.mxu1 %v16619_v40  ;;  %v9466_v20 = vunpack.i.h.bf16 %v16742_v26  ;;  %v9465_v13 = vunpack.i.l.bf16 %v16742_v26  ;;  %v16743_v54 = vld [vmem:[#allocation52_spill] sm:$0xff] }
 0x49f   : > { %2692 = vmatprep.mubr.f32.mxu0 %v2439_v27  ;;  %2917 = vmatprep.mubr.f32.mxu1 %v2439_v27  ;;  %v9391_v27 = vunpack.i.h.bf16 %v16743_v54 }
 0x4a0   : > { %v9623_v45 = vpop.eup %9622  ;;  %2693 = vmatmul.mubr.f32.gmra.mrb[52].mxu0 %v2438_v28  ;;  %2918 = vmatmul.mubr.f32.gmra.mrb[116].mxu1 %v2438_v28  ;;  %v9033_v28 = vpack.c.bf16 %v9461_v22, %v9460_v59  ;;  %v9036_v47 = vpack.c.bf16 %v9466_v20, %v9465_v13  ;;  %v4683_v22 = vld [vmem:[%s16193_s4 + $0xa0] sm:$0xff]  ;;  %v16745_v59 = vld [vmem:[#allocation101_spill] sm:$0xff] }
 0x4a1   : > { %8980 = vmatpush3.bf16.xpose.msk.msra.mxu0 %vm10892_vm5, %v8978_v43  ;;  %9025 = vmatpush1.bf16.msra.mxu1 %v9024_v4  ;;  %v2334_v51 = vpop.xlane.xlu1 %2333  ;;  %v2441_v34 = vmul.f32 %v9623_v45, %v11823_v24  ;;  %v2440_v35 = vmul.f32 %v9623_v45, %v11821_v60  ;;  %v9380_v24 = vunpack.i.l.bf16 %v16739_v0  ;;  %v4689_v60 = vld [vmem:[%s16193_s4 + $0xd0] sm:$0xff] }
 0x4a2   : > { %8983 = vmatprep.subr.msk.bf16.mxu0 %vm10892_vm5, %v8981_v46  ;;  %9628 = vrcp.f32 %v2334_v51  ;;  %9026 = vmatprep.subr.bf16.mxu1 %v16619_v40  ;;  %v16744_v46 = vld [vmem:[#allocation87_spill] sm:$0xff] }
 0x4a3   : > { %2697 = vmatprep.mubr.f32.mxu0 %v2441_v34  ;;  %2922 = vmatprep.mubr.f32.mxu1 %v2441_v34  ;;  %v8984_v57 = vpack.c.bf16 %v9381_v17, %v9380_v24  ;;  %v9471_v51 = vunpack.i.h.bf16 %v16744_v46  ;;  %v9470_v34 = vunpack.i.l.bf16 %v16744_v46  ;;  %v12215_v24 = vld [vmem:[%s16193_s4 + $0x18] sm:$0xff]  ;;  %v4668_v46 = vld [vmem:[%s16193_s4 + $0x28] sm:$0xff] }
 0x4a4   : > { %v9625_v36 = vpop.eup %9624  ;;  %2698 = vmatmul.mubr.f32.gmra.mrb[54].mxu0 %v2440_v35  ;;  %2923 = vmatmul.mubr.f32.gmra.mrb[118].mxu1 %v2440_v35 }
 0x4a5   : > { %9028 = vmatpush1.bf16.msra.mxu1 %v9027_v7  ;;  %v2337_v53 = vpop.xlane.xlu0 %2336  ;;  %v2443_v31 = vmul.f32 %v9625_v36, %v11831_v32  ;;  %v2442_v14 = vmul.f32 %v9625_v36, %v11829_v61  ;;  %5080 = vrot.lane.b32.xlu0 %v4679_v30, %s10211_s13  ;;  %v4721_v30 = vld [vmem:[%s16193_s4 + $0x1d0] sm:$0xff]  ;;  %v9039_v42 = vpack.c.bf16 %v9471_v51, %v9470_v34 }
 0x4a6   : > { %9630 = vrcp.f32 %v2337_v53  ;;  %9029 = vmatprep.subr.bf16.mxu1 %v16619_v40  ;;  %5100 = vrot.lane.b32.xlu1 %v4689_v60, %s10211_s13 }
 0x4a7   : > { %2702 = vmatprep.mubr.f32.mxu0 %v2443_v31  ;;  %2927 = vmatprep.mubr.f32.mxu1 %v2443_v31  ;;  %v12242_v31 = vld [vmem:[%s16193_s4 + $0x98] sm:$0xff] }
 0x4a8   : > { %v9627_v63 = vpop.eup %9626  ;;  %2703 = vmatmul.mubr.f32.gmra.mrb[56].mxu0 %v2442_v14  ;;  %2928 = vmatmul.mubr.f32.gmra.mrb[120].mxu1 %v2442_v14  ;;  %v4667_v14 = vld [vmem:[%s16193_s4 + $0x20] sm:$0xff] }
 0x4a9   : > { %8986 = vmatpush3.bf16.xpose.msk.msra.mxu0 %vm10892_vm5, %v8984_v57  ;;  %9031 = vmatpush1.bf16.msra.mxu1 %v9030_v1  ;;  %v2340_v61 = vpop.xlane.xlu1 %2339  ;;  %v2445_v32 = vmul.f32 %v9627_v63, %v11839_v50  ;;  %v2444_v19 = vmul.f32 %v9627_v63, %v11837_v39  ;;  %v9390_v50 = vunpack.i.l.bf16 %v16743_v54  ;;  %v4705_v39 = vld [vmem:[%s16193_s4 + $0x150] sm:$0xff]  ;;  %v16748_v54 = vld [vmem:[#allocation57_spill] sm:$0xff] }
 0x4aa   : > { %8989 = vmatprep.subr.msk.bf16.mxu0 %vm10892_vm5, %v8987_v18  ;;  %9632 = vrcp.f32 %v2340_v61  ;;  %9032 = vmatprep.subr.bf16.mxu1 %v16619_v40  ;;  %v16746_v18 = vld [vmem:[#allocation54_spill] sm:$0xff] }
 0x4ab   : > { %2707 = vmatprep.mubr.f32.mxu0 %v2445_v32  ;;  %2932 = vmatprep.mubr.f32.mxu1 %v2445_v32  ;;  %v8990_v45 = vpack.c.bf16 %v9391_v27, %v9390_v50  ;;  %v4698_v32 = vld [vmem:[%s16193_s4 + $0x118] sm:$0xff] }
 0x4ac   : > { %v9629_v4 = vpop.eup %9628  ;;  %2708 = vmatmul.mubr.f32.gmra.mrb[58].mxu0 %v2444_v19  ;;  %2933 = vmatmul.mubr.f32.gmra.mrb[122].mxu1 %v2444_v19  ;;  %v4699_v19 = vld [vmem:[%s16193_s4 + $0x120] sm:$0xff]  ;;  %v4706_v50 = vld [vmem:[%s16193_s4 + $0x158] sm:$0xff] }
 0x4ad   : > { %9034 = vmatpush1.bf16.msra.mxu1 %v9033_v28  ;;  %v2343_v43 = vpop.xlane.xlu0 %2342  ;;  %v2447_v8 = vmul.f32 %v9629_v4, %v11847_v49  ;;  %v2446_v25 = vmul.f32 %v9629_v4, %v11845_v52  ;;  %5096 = vrot.lane.b32.xlu0 %v4687_v44, %s10211_s13  ;;  %v4695_v49 = vld [vmem:[%s16193_s4 + $0x100] sm:$0xff]  ;;  %v16747_v44 = vld [vmem:[#allocation58_spill] sm:$0xff] }
 0x4ae   : > { %9634 = vrcp.f32 %v2343_v43  ;;  %9035 = vmatprep.subr.bf16.mxu1 %v16619_v40  ;;  %5132 = vrot.lane.b32.xlu1 %v4705_v39, %s10211_s13  ;;  %v4715_v28 = vld [vmem:[%s16193_s4 + $0x1a0] sm:$0xff]  ;;  %v16749_v43 = vld [vmem:[#allocation61_spill] sm:$0xff] }
 0x4af   : > { %2712 = vmatprep.mubr.f32.mxu0 %v2447_v8  ;;  %2937 = vmatprep.mubr.f32.mxu1 %v2447_v8 }
 0x4b0   : > { %v9631_v52 = vpop.eup %9630  ;;  %2713 = vmatmul.mubr.f32.gmra.mrb[60].mxu0 %v2446_v25  ;;  %2938 = vmatmul.mubr.f32.gmra.mrb[124].mxu1 %v2446_v25  ;;  %v16750_v25 = vld [vmem:[#allocation60_spill] sm:$0xff] }
 0x4b1   : > { %8992 = vmatpush3.bf16.xpose.msk.msra.mxu0 %vm10892_vm5, %v8990_v45  ;;  %9037 = vmatpush1.bf16.msra.mxu1 %v9036_v47  ;;  %v2346_v35 = vpop.xlane.xlu1 %2345  ;;  %v2449_v23 = vmul.f32 %v9631_v52, %v11855_v10  ;;  %v2448_v55 = vmul.f32 %v9631_v52, %v11853_v21  ;;  %v4714_v45 = vld [vmem:[%s16193_s4 + $0x198] sm:$0xff] }
 0x4b2   : > { %9636 = vrcp.f32 %v2346_v35  ;;  %9038 = vmatprep.subr.bf16.mxu1 %v16619_v40  ;;  %5112 = vrot.lane.b32.xlu0 %v4695_v49, %s10211_s13  ;;  %v16751_v52 = vld [vmem:[#allocation63_spill] sm:$0xff] }
 0x4b3   : > { %2717 = vmatprep.mubr.f32.mxu0 %v2449_v23  ;;  %2942 = vmatprep.mubr.f32.mxu1 %v2449_v23  ;;  %v4722_v23 = vld [vmem:[%s16193_s4 + $0x1d8] sm:$0xff] }
 0x4b4   : > { %v9633_v0 = vpop.eup %9632  ;;  %2718 = vmatmul.mubr.f32.gmra.mrb[62].mxu0 %v2448_v55  ;;  %2943 = vmatmul.mubr.f32.gmra.mrb[126].mxu1 %v2448_v55  ;;  %v4684_v55 = vld [vmem:[%s16193_s4 + $0xa8] sm:$0xff] }
 0x4b5   : > { %9040 = vmatpush1.bf16.msra.mxu1 %v9039_v42  ;;  %v2349_v21 = vpop.xlane.xlu0 %2348  ;;  %v2451_v10 = vmul.f32 %v9633_v0, %v11863_v38  ;;  %v2450_v17 = vmul.f32 %v9633_v0, %v11861_v16  ;;  %5164 = vrot.lane.b32.xlu1 %v4721_v30, %s10211_s13  ;;  %v4711_v38 = vld [vmem:[%s16193_s4 + $0x180] sm:$0xff]  ;;  %v16752_v42 = vld [vmem:[#allocation67_spill] sm:$0xff] }
 0x4b6   : > { %9638 = vrcp.f32 %v2349_v21  ;;  %5128 = vrot.lane.b32.xlu0 %v4703_v9, %s10211_s13  ;;  %9041 = vmatprep.subr.bf16.mxu0 %v16619_v40  ;;  %v16753_v0 = vld [vmem:[#allocation64_spill] sm:$0xff] }
 0x4b7   : > { %2722 = vmatprep.mubr.f32.mxu0 %v2451_v10  ;;  %2947 = vmatprep.mubr.f32.mxu1 %v2451_v10  ;;  %v4675_v10 = vld [vmem:[%s16193_s4 + $0x60] sm:$0xff] }
 0x4b8   : > { %v9635_v7 = vpop.eup %9634  ;;  %2723 = vmatmul.mubr.f32.gmra.mrb[64].mxu0 %v2450_v17  ;;  %2948 = vmatmul.mubr.f32.gmra.mrb[128].mxu1 %v2450_v17  ;;  %v4700_v17 = vld [vmem:[%s16193_s4 + $0x128] sm:$0xff] }
 0x4b9   : > { %v2352_v16 = vpop.xlane.xlu1 %2351  ;;  %v2453_v60 = vmul.f32 %v9635_v7, %v11871_v11  ;;  %v2452_v36 = vmul.f32 %v9635_v7, %v11869_v33  ;;  %5054 = vrot.lane.b32.xlu1 %v12215_v24, %s10211_s13 }
 0x4ba   : > { %9640 = vrcp.f32 %v2352_v16  ;;  %5144 = vrot.lane.b32.xlu0 %v4711_v38, %s10211_s13  ;;  %v16754_v16 = vld [vmem:[#allocation70_spill] sm:$0xff] }
 0x4bb   : > { %2727 = vmatprep.mubr.f32.mxu0 %v2453_v60  ;;  %2952 = vmatprep.mubr.f32.mxu1 %v2453_v60 }
 0x4bc   : > { %v9637_v11 = vpop.eup %9636  ;;  %2728 = vmatmul.mubr.f32.gmra.mrb[66].mxu0 %v2452_v36  ;;  %2953 = vmatmul.mubr.f32.gmra.mrb[130].mxu1 %v2452_v36  ;;  %v16755_v36 = vld [vmem:[#allocation68_spill] sm:$0xff] }
 0x4bd   : > { %v2355_v33 = vpop.xlane.xlu0 %2354  ;;  %v2455_v6 = vmul.f32 %v9637_v11, %v11879_v56  ;;  %v2454_v53 = vmul.f32 %v9637_v11, %v11877_v15  ;;  %5070 = vrot.lane.b32.xlu1 %v12229_v48, %s10211_s13  ;;  %v4691_v11 = vld [vmem:[%s16193_s4 + $0xe0] sm:$0xff] }
 0x4be   : > { %9642 = vrcp.f32 %v2355_v33  ;;  %5160 = vrot.lane.b32.xlu0 %v4719_v12, %s10211_s13  ;;  %v4716_v33 = vld [vmem:[%s16193_s4 + $0x1a8] sm:$0xff] }
 0x4bf   : > { %2732 = vmatprep.mubr.f32.mxu0 %v2455_v6  ;;  %2957 = vmatprep.mubr.f32.mxu1 %v2455_v6 }
 0x4c0   : > { %v9639_v56 = vpop.eup %9638  ;;  %2733 = vmatmul.mubr.f32.gmra.mrb[68].mxu0 %v2454_v53  ;;  %2958 = vmatmul.mubr.f32.gmra.mrb[132].mxu1 %v2454_v53 }
 0x4c1   : > { %v2358_v15 = vpop.xlane.xlu1 %2357  ;;  %v2457_v1 = vmul.f32 %v9639_v56, %v11887_v37  ;;  %v2456_v57 = vmul.f32 %v9639_v56, %v11885_v62  ;;  %5086 = vrot.lane.b32.xlu1 %v12242_v31, %s10211_s13 }
 0x4c2   : > { %9644 = vrcp.f32 %v2358_v15  ;;  %5056 = vrot.lane.b32.xlu0 %v4667_v14, %s10211_s13  ;;  %v16756_v14 = vld [vmem:[#allocation102_spill] sm:$0xff]  ;;  %v16757_v15 = vld [vmem:[#allocation71_spill] sm:$0xff] }
 0x4c3   : > { %2737 = vmatprep.mubr.f32.mxu0 %v2457_v1  ;;  %2962 = vmatprep.mubr.f32.mxu1 %v2457_v1 }
 0x4c4   : > { %v9641_v37 = vpop.eup %9640  ;;  %2738 = vmatmul.mubr.f32.gmra.mrb[70].mxu0 %v2456_v57  ;;  %2963 = vmatmul.mubr.f32.gmra.mrb[134].mxu1 %v2456_v57  ;;  %v4707_v57 = vld [vmem:[%s16193_s4 + $0x160] sm:$0xff] }
 0x4c5   : > { %v2361_v62 = vpop.xlane.xlu1 %2360  ;;  %v2459_v63 = vmul.f32 %v9641_v37, %v16745_v59  ;;  %v2458_v61 = vmul.f32 %v9641_v37, %v16746_v18  ;;  %5102 = vrot.lane.b32.xlu1 %v12255_v41, %s10211_s13  ;;  %v16758_v59 = vld [vmem:[#allocation103_spill] sm:$0xff] }
 0x4c6   : > { %9646 = vrcp.f32 %v2361_v62  ;;  %5088 = vrot.lane.b32.xlu0 %v4683_v22, %s10211_s13  ;;  %v4669_v22 = vld [vmem:[%s16193_s4 + $0x30] sm:$0xff]  ;;  %v16759_v18 = vld [vmem:[#allocation75_spill] sm:$0xff] }
 0x4c7   : > { %2742 = vmatprep.mubr.f32.mxu0 %v2459_v63  ;;  %2967 = vmatprep.mubr.f32.mxu1 %v2459_v63 }
 0x4c8   : > { %v9643_v26 = vpop.eup %9642  ;;  %2743 = vmatmul.mubr.f32.gmra.mrb[72].mxu0 %v2458_v61  ;;  %2968 = vmatmul.mubr.f32.gmra.mrb[136].mxu1 %v2458_v61 }
 0x4c9   : > { %v2364_v20 = vpop.xlane.xlu0 %2363  ;;  %v2461_v13 = vmul.f32 %v9643_v26, %v16747_v44  ;;  %v2460_v27 = vmul.f32 %v9643_v26, %v16748_v54  ;;  %5118 = vrot.lane.b32.xlu1 %v4698_v32, %s10211_s13  ;;  %v4723_v32 = vld [vmem:[%s16193_s4 + $0x1e0] sm:$0xff] }
 0x4ca   : > { %9648 = vrcp.f32 %v2364_v20  ;;  %5120 = vrot.lane.b32.xlu0 %v4699_v19, %s10211_s13  ;;  %v4685_v19 = vld [vmem:[%s16193_s4 + $0xb0] sm:$0xff]  ;;  %v16760_v20 = vld [vmem:[#allocation105_spill] sm:$0xff] }
 0x4cb   : > { %2747 = vmatprep.mubr.f32.mxu0 %v2461_v13  ;;  %2972 = vmatprep.mubr.f32.mxu1 %v2461_v13  ;;  %v16761_v13 = vld [vmem:[#allocation104_spill] sm:$0xff] }
 0x4cc   : > { %v9645_v39 = vpop.eup %9644  ;;  %2748 = vmatmul.mubr.f32.gmra.mrb[74].mxu0 %v2460_v27  ;;  %2973 = vmatmul.mubr.f32.gmra.mrb[138].mxu1 %v2460_v27  ;;  %v4676_v27 = vld [vmem:[%s16193_s4 + $0x68] sm:$0xff] }
 0x4cd   : > { %v2367_v4 = vpop.xlane.xlu1 %2366  ;;  %v2463_v8 = vmul.f32 %v9645_v39, %v16749_v43  ;;  %v2462_v47 = vmul.f32 %v9645_v39, %v16750_v25  ;;  %5134 = vrot.lane.b32.xlu1 %v4706_v50, %s10211_s13  ;;  %v4701_v50 = vld [vmem:[%s16193_s4 + $0x130] sm:$0xff]  ;;  %v16762_v39 = vld [vmem:[#allocation107_spill] sm:$0xff]  ;;  %v4692_v25 = vld [vmem:[%s16193_s4 + $0xe8] sm:$0xff] }
 0x4ce   : > { %9650 = vrcp.f32 %v2367_v4  ;;  %5152 = vrot.lane.b32.xlu0 %v4715_v28, %s10211_s13  ;;  %v16763_v43 = vld [vmem:[#allocation106_spill] sm:$0xff] }
 0x4cf   : > { %2752 = vmatprep.mubr.f32.mxu0 %v2463_v8  ;;  %2977 = vmatprep.mubr.f32.mxu1 %v2463_v8 }
 0x4d0   : > { %v9647_v51 = vpop.eup %9646  ;;  %2753 = vmatmul.mubr.f32.gmra.mrb[76].mxu0 %v2462_v47  ;;  %2978 = vmatmul.mubr.f32.gmra.mrb[140].mxu1 %v2462_v47  ;;  %v4717_v47 = vld [vmem:[%s16193_s4 + $0x1b0] sm:$0xff] }
 0x4d1   : > { %v2370_v34 = vpop.xlane.xlu0 %2369  ;;  %v2465_v49 = vmul.f32 %v9647_v51, %v11919_v29  ;;  %v2464_v35 = vmul.f32 %v9647_v51, %v16751_v52  ;;  %5150 = vrot.lane.b32.xlu1 %v4714_v45, %s10211_s13  ;;  %v4708_v52 = vld [vmem:[%s16193_s4 + $0x168] sm:$0xff] }
 0x4d2   : > { %9652 = vrcp.f32 %v2370_v34  ;;  %5058 = vrot.lane.b32.xlu0 %v4668_v46, %s10211_s13  ;;  %v16764_v46 = vld [vmem:[#allocation109_spill] sm:$0xff]  ;;  %v16765_v34 = vld [vmem:[#allocation108_spill] sm:$0xff] }
 0x4d3   : > { %2757 = vmatprep.mubr.f32.mxu0 %v2465_v49  ;;  %2982 = vmatprep.mubr.f32.mxu1 %v2465_v49 }
 0x4d4   : > { %v9649_v30 = vpop.eup %9648  ;;  %2758 = vmatmul.mubr.f32.gmra.mrb[78].mxu0 %v2464_v35  ;;  %2983 = vmatmul.mubr.f32.gmra.mrb[142].mxu1 %v2464_v35  ;;  %v4670_v35 = vld [vmem:[%s16193_s4 + $0x38] sm:$0xff] }
 0x4d5   : > { %v2373_v29 = vpop.xlane.xlu1 %2372  ;;  %v2467_v9 = vmul.f32 %v9649_v30, %v16752_v42  ;;  %v2466_v21 = vmul.f32 %v9649_v30, %v16753_v0  ;;  %5166 = vrot.lane.b32.xlu1 %v4722_v23, %s10211_s13  ;;  %v4724_v23 = vld [vmem:[%s16193_s4 + $0x1e8] sm:$0xff]  ;;  %v4677_v30 = vld [vmem:[%s16193_s4 + $0x70] sm:$0xff] }
 0x4d6   : > { %9654 = vrcp.f32 %v2373_v29  ;;  %5090 = vrot.lane.b32.xlu0 %v4684_v55, %s10211_s13  ;;  %v4686_v55 = vld [vmem:[%s16193_s4 + $0xb8] sm:$0xff]  ;;  %v4693_v42 = vld [vmem:[%s16193_s4 + $0xf0] sm:$0xff] }
 0x4d7   : > { %2762 = vmatprep.mubr.f32.mxu0 %v2467_v9  ;;  %2987 = vmatprep.mubr.f32.mxu1 %v2467_v9  ;;  %v4702_v29 = vld [vmem:[%s16193_s4 + $0x138] sm:$0xff]  ;;  %v4709_v0 = vld [vmem:[%s16193_s4 + $0x170] sm:$0xff] }
 0x4d8   : > { %v9651_v38 = vpop.eup %9650  ;;  %2763 = vmatmul.mubr.f32.gmra.mrb[80].mxu0 %v2466_v21  ;;  %2988 = vmatmul.mubr.f32.gmra.mrb[144].mxu1 %v2466_v21  ;;  %v4718_v9 = vld [vmem:[%s16193_s4 + $0x1b8] sm:$0xff]  ;;  %v4725_v21 = vld [vmem:[%s16193_s4 + $0x1f0] sm:$0xff] }
 0x4d9   : > { %v2376_v7 = vpop.xlane.xlu0 %2375  ;;  %v2469_v60 = vmul.f32 %v9651_v38, %v16754_v16  ;;  %v2468_v12 = vmul.f32 %v9651_v38, %v16755_v36  ;;  %5072 = vrot.lane.b32.xlu1 %v4675_v10, %s10211_s13  ;;  %v4694_v38 = vld [vmem:[%s16193_s4 + $0xf8] sm:$0xff] }
 0x4da   : > { %9656 = vrcp.f32 %v2376_v7  ;;  %5122 = vrot.lane.b32.xlu0 %v4700_v17, %s10211_s13  ;;  %v4678_v17 = vld [vmem:[%s16193_s4 + $0x78] sm:$0xff] }
 0x4db   : > { %2767 = vmatprep.mubr.f32.mxu0 %v2469_v60  ;;  %2992 = vmatprep.mubr.f32.mxu1 %v2469_v60  ;;  %v4710_v16 = vld [vmem:[%s16193_s4 + $0x178] sm:$0xff] }
 0x4dc   : > { %v9653_v6 = vpop.eup %9652  ;;  %2768 = vmatmul.mubr.f32.gmra.mrb[82].mxu0 %v2468_v12  ;;  %2993 = vmatmul.mubr.f32.gmra.mrb[146].mxu1 %v2468_v12  ;;  %v4726_v36 = vld [vmem:[%s16193_s4 + $0x1f8] sm:$0xff] }
 0x4dd   : > { %v2379_v53 = vpop.xlane.xlu1 %2378  ;;  %v2471_v56 = vmul.f32 %v9653_v6, %v16756_v14  ;;  %v2470_v1 = vmul.f32 %v9653_v6, %v16757_v15  ;;  %5104 = vrot.lane.b32.xlu1 %v4691_v11, %s10211_s13 }
 0x4de   : > { %9658 = vrcp.f32 %v2379_v53  ;;  %5154 = vrot.lane.b32.xlu0 %v4716_v33, %s10211_s13 }
 0x4df   : > { %2772 = vmatprep.mubr.f32.mxu0 %v2471_v56  ;;  %2997 = vmatprep.mubr.f32.mxu1 %v2471_v56 }
 0x4e0   : > { %v9655_v37 = vpop.eup %9654  ;;  %2773 = vmatmul.mubr.f32.gmra.mrb[84].mxu0 %v2470_v1  ;;  %2998 = vmatmul.mubr.f32.gmra.mrb[148].mxu1 %v2470_v1 }
 0x4e1   : > { %v2382_v62 = vpop.xlane.xlu0 %2381  ;;  %v2473_v63 = vmul.f32 %v9655_v37, %v16758_v59  ;;  %v2472_v61 = vmul.f32 %v9655_v37, %v16759_v18  ;;  %5136 = vrot.lane.b32.xlu1 %v4707_v57, %s10211_s13  ;;  %v12405_v10 = vpop.permute.xlu1 %5082  ;;  %v16770_v57 = vld [vmem:[#allocation9_spill] sm:$0xff]  ;;  %v16771_v37 = vld [vmem:[#allocation8_spill] sm:$0xff]  ;;  %v16776_v18 = vld [vmem:[#allocation82_spill] sm:$0xff] }
 0x4e2   : > { %9660 = vrcp.f32 %v2382_v62  ;;  %5060 = vrot.lane.b32.xlu0 %v4669_v22, %s10211_s13  ;;  %v16774_v62 = vld [vmem:[#allocation80_spill] sm:$0xff] }
 0x4e3   : > { %2777 = vmatprep.mubr.f32.mxu0 %v2473_v63  ;;  %3002 = vmatprep.mubr.f32.mxu1 %v2473_v63  ;;  %v16775_v63 = vld [vmem:[#allocation10_spill] sm:$0xff] }
 0x4e4   : > { %v9657_v26 = vpop.eup %9656  ;;  %2778 = vmatmul.mubr.f32.gmra.mrb[86].mxu0 %v2472_v61  ;;  %3003 = vmatmul.mubr.f32.gmra.mrb[150].mxu1 %v2472_v61 }
 0x4e5   : > { %v2475_v44 = vmul.f32 %v9657_v26, %v16760_v20  ;;  %v2474_v54 = vmul.f32 %v9657_v26, %v16761_v13  ;;  %5168 = vrot.lane.b32.xlu1 %v4723_v32, %s10211_s13  ;;  %v12414_v7 = vpop.permute.xlu1 %5098  ;;  %v12431_v6 = vpop.permute.xlu0 %5066  ;;  %v16778_v32 = vld [vmem:[#allocation13_spill] sm:$0xff]  ;;  %v16780_v20 = vld [vmem:[#allocation12_spill] sm:$0xff] }
 0x4e6   : > { %5092 = vrot.lane.b32.xlu0 %v4685_v19, %s10211_s13  ;;  %v16779_v19 = vld [vmem:[#allocation85_spill] sm:$0xff] }
 0x4e7   : > { %2782 = vmatprep.mubr.f32.mxu0 %v2475_v44  ;;  %3007 = vmatprep.mubr.f32.mxu1 %v2475_v44  ;;  %v16781_v44 = vld [vmem:[#allocation88_spill] sm:$0xff] }
 0x4e8   : > { %v9659_v28 = vpop.eup %9658  ;;  %2783 = vmatmul.mubr.f32.gmra.mrb[88].mxu0 %v2474_v54  ;;  %3008 = vmatmul.mubr.f32.gmra.mrb[152].mxu1 %v2474_v54 }
 0x4e9   : > { %v2477_v4 = vmul.f32 %v9659_v28, %v16762_v39  ;;  %v2476_v8 = vmul.f32 %v9659_v28, %v16763_v43  ;;  %5074 = vrot.lane.b32.xlu1 %v4676_v27, %s10211_s13  ;;  %v12421_v60 = vpop.permute.xlu1 %5130  ;;  %v12433_v53 = vpop.permute.xlu0 %5114  ;;  %v16784_v27 = vld [vmem:[#allocation15_spill] sm:$0xff] }
 0x4ea   : > { %5124 = vrot.lane.b32.xlu0 %v4701_v50, %s10211_s13  ;;  %16766 = vst [vmem:[#allocation49_spill] sm:$0xff] %v12421_v60  ;;  %16768 = vst [vmem:[#allocation41_spill] sm:$0xff] %v12433_v53  ;;  %v16785_v50 = vld [vmem:[#allocation90_spill] sm:$0xff] }
 0x4eb   : > { %2787 = vmatprep.mubr.f32.mxu0 %v2477_v4  ;;  %3012 = vmatprep.mubr.f32.mxu1 %v2477_v4 }
 0x4ec   : > { %v9661_v45 = vpop.eup %9660  ;;  %2788 = vmatmul.mubr.f32.gmra.mrb[90].mxu0 %v2476_v8  ;;  %3013 = vmatmul.mubr.f32.gmra.mrb[154].mxu1 %v2476_v8 }
 0x4ed   : > { %v2479_v51 = vmul.f32 %v9661_v45, %v16764_v46  ;;  %v2478_v49 = vmul.f32 %v9661_v45, %v16765_v34  ;;  %5106 = vrot.lane.b32.xlu1 %v4692_v25, %s10211_s13  ;;  %v12427_v12 = vpop.permute.xlu1 %5162  ;;  %v12437_v1 = vpop.permute.xlu0 %5146  ;;  %v16788_v45 = vld [vmem:[#allocation14_spill] sm:$0xff] }
 0x4ee   : > { %5156 = vrot.lane.b32.xlu0 %v4717_v47, %s10211_s13  ;;  %16767 = vst [vmem:[#allocation66_spill] sm:$0xff] %v12427_v12  ;;  %16769 = vst [vmem:[#allocation55_spill] sm:$0xff] %v12437_v1 }
 0x4ef   : > { %2792 = vmatprep.mubr.f32.mxu0 %v2479_v51  ;;  %3017 = vmatprep.mubr.f32.mxu1 %v2479_v51  ;;  %v16789_v51 = vld [vmem:[#allocation91_spill] sm:$0xff] }
 0x4f0   : > { %2793 = vmatmul.mubr.f32.gmra.mrb[92].mxu0 %v2478_v49  ;;  %3018 = vmatmul.mubr.f32.gmra.mrb[156].mxu1 %v2478_v49 }
 0x4f1   : > { %5138 = vrot.lane.b32.xlu1 %v4708_v52, %s10211_s13  ;;  %v12429_v11 = vpop.permute.xlu1 %5068  ;;  %v12441_v22 = vpop.permute.xlu0 %5052 }
 0x4f2   : > { %5062 = vrot.lane.b32.xlu0 %v4670_v35, %s10211_s13 }
 0x4f5   : > { %5170 = vrot.lane.b32.xlu1 %v4724_v23, %s10211_s13  ;;  %v12454_v59 = vpop.permute.xlu0 %5084 }
 0x4f6   : > { %5094 = vrot.lane.b32.xlu0 %v4686_v55, %s10211_s13 }
 0x4f9   : > { %5076 = vrot.lane.b32.xlu1 %v4677_v30, %s10211_s13  ;;  %v12463_v61 = vpop.permute.xlu0 %5116  ;;  %v16793_v30 = vld [vmem:[#allocation89_spill] sm:$0xff] }
 0x4fa   : > { %5126 = vrot.lane.b32.xlu0 %v4702_v29, %s10211_s13  ;;  %16777 = vst [vmem:[#allocation40_spill] sm:$0xff] %v12463_v61 }
 0x4fd   : > { %5108 = vrot.lane.b32.xlu1 %v4693_v42, %s10211_s13  ;;  %v16794_v42 = vld [vmem:[#allocation17_spill] sm:$0xff] }
 0x4fe   : > { %5158 = vrot.lane.b32.xlu0 %v4718_v9, %s10211_s13 }
 0x4ff   : > { %v12478_v13 = vpop.permute.xlu0 %5148 }
 0x500   : > { %16782 = vst [vmem:[#allocation51_spill] sm:$0xff] %v12478_v13 }
 0x501   : > { %5140 = vrot.lane.b32.xlu1 %v4709_v0, %s10211_s13 }
 0x505   : > { %5172 = vrot.lane.b32.xlu1 %v4725_v21, %s10211_s13  ;;  %v16795_v21 = vld [vmem:[#allocation92_spill] sm:$0xff] }
 0x508   : > { %v5049_v25 = vpop.permute.xlu0 %5048 }
 0x509   : > { %5078 = vrot.lane.b32.xlu1 %v4678_v17, %s10211_s13 }
 0x50d   : > { %5110 = vrot.lane.b32.xlu1 %v4694_v38, %s10211_s13 }
 0x511   : > { %5142 = vrot.lane.b32.xlu1 %v4710_v16, %s10211_s13 }
 0x515   : > { %5174 = vrot.lane.b32.xlu1 %v4726_v36, %s10211_s13  ;;  %s13710_s13 = sld [smem:[#allocation2]] }
 0x522   : > { %v2385_v33 = vpop.xlane.xlu1 %2384 }
 0x523   : > { %9662 = vrcp.f32 %v2385_v33  ;;  %v10001_v33 = vld [vmem:[%s16193_s4 + $0x10] sm:$0xff] }
 0x526   : > { %v12471_v26 = vpop.permute.xlu1 %5100 }
 0x52a   : > { %v12483_v54 = vpop.permute.xlu1 %5132 }
 0x52b   : > { %16783 = vst [vmem:[#allocation59_spill] sm:$0xff] %v12483_v54 }
 0x52d   : > { %v9663_v14 = vpop.eup %9662 }
 0x52e   : > { %v2481_v56 = vmul.f32 %v9663_v14, %v12087_v2  ;;  %v2480_v15 = vmul.f32 %v9663_v14, %v12084_v3  ;;  %v16772_v2 = vld [vmem:[#allocation78_spill] sm:$0xff]  ;;  %v16773_v3 = vld [vmem:[#allocation11_spill] sm:$0xff]  ;;  %v12513_v55 = vpop.permute.xlu1 %5164 }
 0x52f   : > { %16792 = vst [vmem:[#allocation43_spill] sm:$0xff] %v12513_v55 }
 0x530   : > { %2797 = vmatprep.mubr.f32.mxu0 %v2481_v56  ;;  %3022 = vmatprep.mubr.f32.mxu1 %v2481_v56  ;;  %v16798_v56 = vld [vmem:[#allocation16_spill] sm:$0xff] }
 0x531   : > { %2798 = vmatmul.mubr.f32.gmra.mrb[94].mxu0 %v2480_v15  ;;  %3023 = vmatmul.mubr.f32.gmra.mrb[158].mxu1 %v2480_v15 }
 0x532   : > { %8633 = vmatprep.mubr.msk.f32.mxu0 %vm719_vm0, %v16770_v57 }
 0x535   : > { %8634 = vmatmul.mubr.msk.f32.vlgmr.msra.gmra.mrb[96].mxu0 %vm719_vm0, %v16770_v57  ;;  %v16799_v57 = vld [vmem:[#allocation93_spill] sm:$0xff] }
 0x536   : > { %8635 = vmatprep.mubr.msk.f32.mxu0 %vm719_vm0, %v16771_v37  ;;  %9043 = vmatpush1.bf16.msra.mxu0 %v16772_v2 }
 0x537   : > { %9044 = vmatprep.subr.bf16.mxu0 %v16619_v40 }
 0x539   : > { %8636 = vmatmul.mubr.msk.f32.gmra.mrb[98].mxu0 %vm719_vm0, %v16771_v37 }
 0x53a   : > { %8637 = vmatprep.mubr.msk.f32.mxu0 %vm719_vm0, %v16773_v3  ;;  %9046 = vmatpush1.bf16.msra.mxu0 %v16774_v62 }
 0x53b   : > { %9047 = vmatprep.subr.bf16.mxu0 %v16619_v40 }
 0x53d   : > { %8638 = vmatmul.mubr.msk.f32.gmra.mrb[100].mxu0 %vm719_vm0, %v16773_v3 }
 0x53e   : > { %8639 = vmatprep.mubr.msk.f32.mxu0 %vm719_vm0, %v16775_v63  ;;  %9049 = vmatpush1.bf16.msra.mxu0 %v16776_v18  ;;  %v5055_v18 = vpop.permute.xlu1 %5054 }
 0x53f   : > { %9050 = vmatprep.subr.bf16.mxu0 %v16619_v40 }
 0x541   : > { %8640 = vmatmul.mubr.msk.f32.gmra.mrb[102].mxu0 %vm719_vm0, %v16775_v63 }
 0x542   : > { %8641 = vmatprep.mubr.msk.f32.mxu0 %vm719_vm0, %v16778_v32  ;;  %9052 = vmatpush1.bf16.msra.mxu0 %v16779_v19 }
 0x543   : > { %9053 = vmatprep.subr.bf16.mxu0 %v16619_v40 }
 0x545   : > { %8642 = vmatmul.mubr.msk.f32.gmra.mrb[104].mxu0 %vm719_vm0, %v16778_v32 }
 0x546   : > { %8643 = vmatprep.mubr.msk.f32.mxu0 %vm719_vm0, %v16780_v20  ;;  %9055 = vmatpush1.bf16.msra.mxu0 %v16781_v44 }
 0x547   : > { %9056 = vmatprep.subr.bf16.mxu0 %v16619_v40 }
 0x549   : > { %8644 = vmatmul.mubr.msk.f32.gmra.mrb[106].mxu0 %vm719_vm0, %v16780_v20  ;;  %v16802_v20 = vld [vmem:[#allocation19_spill] sm:$0xff] }
 0x54a   : > { %8645 = vmatprep.mubr.msk.f32.mxu0 %vm719_vm0, %v16784_v27  ;;  %9058 = vmatpush1.bf16.msra.mxu0 %v16785_v50  ;;  %v16803_v50 = vld [vmem:[#allocation94_spill] sm:$0xff] }
 0x54b   : > { %v12488_v28 = vpop.f32.mrb[32].mxu0  ;;  %v12490_v39 = vpop.f32.mrb[96].mxu1  ;;  %9059 = vmatprep.subr.bf16.mxu0 %v16619_v40 }
 0x54c   : > { %16786 = vst [vmem:[#allocation42_spill] sm:$0xff] %v12488_v28  ;;  %16787 = vst [vmem:[#allocation72_spill] sm:$0xff] %v12490_v39  ;;  %v4727_v4 = vmul.f32 %v12107_v58, %v12488_v28  ;;  %v2646_v43 = vpop.f32.mrb[33].mxu0  ;;  %v2871_v8 = vpop.f32.mrb[97].mxu1  ;;  %v5240_v47 = vmul.f32 %v5049_v25, %v12488_v28  ;;  %v10000_v58 = vld [vmem:[%s16193_s4 + $0x8] sm:$0xff] }
 0x54d   : > { %8646 = vmatmul.mubr.msk.f32.gmra.mrb[108].mxu0 %vm719_vm0, %v16784_v27 }
 0x54e   : > { %8647 = vmatprep.mubr.msk.f32.mxu0 %vm719_vm0, %v16788_v45  ;;  %v4792_v46 = vsel %vm4791_vm6, %v4727_v4, 0.0  ;;  %9061 = vmatpush1.bf16.msra.mxu0 %v16789_v51  ;;  %v5304_v0 = vsel %vm4791_vm6, %v5240_v47, 0.0 }
 0x54f   : > { %v12502_v34 = vpop.f32.mrb[34].mxu0  ;;  %v12504_v49 = vpop.f32.mrb[98].mxu1  ;;  %4793 = vadd.xlane.f32.xlu1 %v4792_v46  ;;  %9062 = vmatprep.subr.bf16.mxu0 %v16619_v40 }
 0x550   : > { %16790 = vst [vmem:[#allocation53_spill] sm:$0xff] %v12502_v34  ;;  %16791 = vst [vmem:[#allocation65_spill] sm:$0xff] %v12504_v49  ;;  %v4728_v52 = vmul.f32 %v10000_v58, %v12502_v34  ;;  %v2651_v35 = vpop.f32.mrb[35].mxu0  ;;  %v2876_v23 = vpop.f32.mrb[99].mxu1  ;;  %v5241_v29 = vmul.f32 %v16793_v30, %v12502_v34 }
 0x551   : > { %8648 = vmatmul.mubr.msk.f32.gmra.mrb[110].mxu0 %vm719_vm0, %v16788_v45  ;;  %v16807_v45 = vld [vmem:[#allocation95_spill] sm:$0xff]  ;;  %v16810_v35 = vld [vmem:[#allocation21_spill] sm:$0xff]  ;;  %v16811_v23 = vld [vmem:[#allocation96_spill] sm:$0xff] }
 0x552   : > { %8649 = vmatprep.mubr.msk.f32.mxu0 %vm719_vm0, %v16794_v42  ;;  %v4795_v9 = vsel %vm4791_vm6, %v4728_v52, 0.0  ;;  %9064 = vmatpush1.bf16.msra.mxu0 %v16795_v21  ;;  %v5307_v15 = vsel %vm4791_vm6, %v5241_v29, 0.0  ;;  %v16815_v21 = vld [vmem:[#allocation97_spill] sm:$0xff] }
 0x553   : > { %v12522_v17 = vpop.f32.mrb[36].mxu0  ;;  %4796 = vadd.xlane.f32.xlu0 %v4795_v9  ;;  %v12524_v38 = vpop.f32.mrb[100].mxu1  ;;  %5305 = vadd.xlane.f32.xlu1 %v5304_v0  ;;  %v16814_v0 = vld [vmem:[#allocation20_spill] sm:$0xff] }
 0x554   : > { %16796 = vst [vmem:[#allocation69_spill] sm:$0xff] %v12522_v17  ;;  %16797 = vst [vmem:[#allocation56_spill] sm:$0xff] %v12524_v38  ;;  %v2656_v16 = vpop.f32.mrb[37].mxu0  ;;  %v2881_v36 = vpop.f32.mrb[101].mxu1  ;;  %9065 = vmatprep.subr.bf16.mxu0 %v16619_v40  ;;  %v4729_v14 = vmul.f32 %v10001_v33, %v12522_v17  ;;  %v5242_v32 = vmul.f32 %v12441_v22, %v12522_v17  ;;  %v16806_v22 = vld [vmem:[#allocation18_spill] sm:$0xff] }
 0x555   : > { %8650 = vmatmul.mubr.msk.f32.gmra.mrb[112].mxu0 %vm719_vm0, %v16794_v42 }
 0x556   : > { %8651 = vmatprep.mubr.msk.f32.mxu0 %vm719_vm0, %v16798_v56  ;;  %9067 = vmatpush1.bf16.msra.mxu0 %v16799_v57  ;;  %v4798_v27 = vsel %vm4791_vm6, %v4729_v14, 0.0  ;;  %v5310_v25 = vsel %vm4791_vm6, %v5242_v32, 0.0  ;;  %v5065_v32 = vpop.permute.xlu0 %5064 }
 0x557   : > { %v12537_v37 = vpop.f32.mrb[38].mxu0  ;;  %v12539_v2 = vpop.f32.mrb[102].mxu1  ;;  %5308 = vadd.xlane.f32.xlu1 %v5307_v15  ;;  %9068 = vmatprep.subr.bf16.mxu0 %v16619_v40  ;;  %v16819_v15 = vld [vmem:[#allocation98_spill] sm:$0xff] }
 0x558   : > { %16800 = vst [vmem:[#allocation74_spill] sm:$0xff] %v12537_v37  ;;  %16801 = vst [vmem:[#allocation44_spill] sm:$0xff] %v12539_v2  ;;  %v4730_v3 = vmul.f32 %v12215_v24, %v12537_v37  ;;  %v2661_v62 = vpop.f32.mrb[39].mxu0  ;;  %v2886_v63 = vpop.f32.mrb[103].mxu1  ;;  %v5243_v19 = vmul.f32 %v5055_v18, %v12537_v37  ;;  %v10008_v37 = vld [vmem:[%s16193_s4 + $0xc8] sm:$0xff] }
 0x559   : > { %8652 = vmatmul.mubr.msk.f32.gmra.mrb[114].mxu0 %vm719_vm0, %v16798_v56  ;;  %v16818_v56 = vld [vmem:[#allocation23_spill] sm:$0xff] }
 0x55a   : > { %8653 = vmatprep.mubr.msk.f32.mxu0 %vm719_vm0, %v16802_v20  ;;  %v4801_v44 = vsel %vm4791_vm6, %v4730_v3, 0.0  ;;  %9070 = vmatpush1.bf16.msra.mxu0 %v16803_v50  ;;  %v5313_v47 = vsel %vm4791_vm6, %v5243_v19, 0.0 }
 0x55b   : > { %v12554_v24 = vpop.f32.mrb[40].mxu0  ;;  %4802 = vadd.xlane.f32.xlu0 %v4801_v44  ;;  %v12556_v4 = vpop.f32.mrb[104].mxu1  ;;  %4799 = vadd.xlane.f32.xlu1 %v4798_v27  ;;  %v16823_v27 = vld [vmem:[#allocation99_spill] sm:$0xff] }
 0x55c   : > { %16804 = vst [vmem:[#allocation73_spill] sm:$0xff] %v12554_v24  ;;  %16805 = vst [vmem:[#allocation62_spill] sm:$0xff] %v12556_v4  ;;  %v2666_v43 = vpop.f32.mrb[41].mxu0  ;;  %v2891_v8 = vpop.f32.mrb[105].mxu1  ;;  %9071 = vmatprep.subr.bf16.mxu0 %v16619_v40 }
 0x55d   : > { %8654 = vmatmul.mubr.msk.f32.gmra.mrb[116].mxu0 %vm719_vm0, %v16802_v20  ;;  %v16822_v20 = vld [vmem:[#allocation22_spill] sm:$0xff] }
 0x55e   : > { %8655 = vmatprep.mubr.msk.f32.mxu0 %vm719_vm0, %v16806_v22  ;;  %9073 = vmatpush1.bf16.msra.mxu0 %v16807_v45  ;;  %v16826_v45 = vld [vmem:[#allocation25_spill] sm:$0xff] }
 0x55f   : > { %v12566_v46 = vpop.f32.mrb[42].mxu0  ;;  %v12568_v51 = vpop.f32.mrb[106].mxu1  ;;  %5311 = vadd.xlane.f32.xlu1 %v5310_v25  ;;  %5314 = vadd.xlane.f32.xlu0 %v5313_v47  ;;  %v10002_v25 = vld [vmem:[%s16193_s4 + $0x48] sm:$0xff] }
 0x560   : > { %16808 = vst [vmem:[#allocation77_spill] sm:$0xff] %v12566_v46  ;;  %16809 = vst [vmem:[#allocation45_spill] sm:$0xff] %v12568_v51  ;;  %v2671_v58 = vpop.f32.mrb[43].mxu0  ;;  %v2896_v52 = vpop.f32.mrb[107].mxu1  ;;  %9074 = vmatprep.subr.bf16.mxu0 %v16619_v40 }
 0x561   : > { %8656 = vmatmul.mubr.msk.f32.gmra.mrb[118].mxu0 %vm719_vm0, %v16806_v22  ;;  %v16827_v52 = vld [vmem:[#allocation100_spill] sm:$0xff] }
 0x562   : > { %8657 = vmatprep.mubr.msk.f32.mxu0 %vm719_vm0, %v16810_v35  ;;  %9076 = vmatpush1.bf16.msra.mxu0 %v16811_v23  ;;  %v10003_v23 = vld [vmem:[%s16193_s4 + $0x50] sm:$0xff] }
 0x563   : > { %v12576_v30 = vpop.f32.mrb[44].mxu0  ;;  %v12578_v29 = vpop.f32.mrb[108].mxu1  ;;  %9077 = vmatprep.subr.bf16.mxu0 %v16619_v40 }
 0x564   : > { %16812 = vst [vmem:[#allocation76_spill] sm:$0xff] %v12576_v30  ;;  %16813 = vst [vmem:[#allocation81_spill] sm:$0xff] %v12578_v29  ;;  %v2676_v42 = vpop.f32.mrb[45].mxu0  ;;  %v2901_v9 = vpop.f32.mrb[109].mxu1 }
 0x565   : > { %8658 = vmatmul.mubr.msk.f32.gmra.mrb[120].mxu0 %vm719_vm0, %v16810_v35 }
 0x566   : > { %8659 = vmatprep.mubr.msk.f32.mxu0 %vm719_vm0, %v16814_v0  ;;  %9079 = vmatpush1.bf16.msra.mxu0 %v16815_v21 }
 0x567   : > { %v12586_v16 = vpop.f32.mrb[46].mxu0  ;;  %v12588_v36 = vpop.f32.mrb[110].mxu1  ;;  %9080 = vmatprep.subr.bf16.mxu0 %v16619_v40 }
 0x568   : > { %16816 = vst [vmem:[#allocation46_spill] sm:$0xff] %v12586_v16  ;;  %16817 = vst [vmem:[#allocation47_spill] sm:$0xff] %v12588_v36  ;;  %v2681_v33 = vpop.f32.mrb[47].mxu0  ;;  %v2906_v14 = vpop.f32.mrb[111].mxu1 }
 0x569   : > { %8660 = vmatmul.mubr.msk.f32.gmra.mrb[122].mxu0 %vm719_vm0, %v16814_v0  ;;  %v16830_v33 = vld [vmem:[#allocation24_spill] sm:$0xff] }
 0x56a   : > { %8661 = vmatprep.mubr.msk.f32.mxu0 %vm719_vm0, %v16818_v56  ;;  %9082 = vmatpush1.bf16.msra.mxu0 %v16819_v15 }
 0x56b   : > { %v12596_v57 = vpop.f32.mrb[48].mxu0  ;;  %v12598_v3 = vpop.f32.mrb[112].mxu1  ;;  %9083 = vmatprep.subr.bf16.mxu0 %v16619_v40 }
 0x56c   : > { %16820 = vst [vmem:[#allocation79_spill] sm:$0xff] %v12596_v57  ;;  %16821 = vst [vmem:[#allocation84_spill] sm:$0xff] %v12598_v3  ;;  %v4735_v62 = vmul.f32 %v12129_v5, %v12596_v57  ;;  %v2686_v63 = vpop.f32.mrb[49].mxu0  ;;  %v2911_v18 = vpop.f32.mrb[113].mxu1  ;;  %v5248_v19 = vmul.f32 %v5065_v32, %v12596_v57  ;;  %v16833_v32 = vld [vmem:[#allocation27_spill] sm:$0xff] }
 0x56d   : > { %8662 = vmatmul.mubr.msk.f32.gmra.mrb[124].mxu0 %vm719_vm0, %v16818_v56 }
 0x56e   : > { %8663 = vmatprep.mubr.msk.f32.mxu0 %vm719_vm0, %v16822_v20  ;;  %v4816_v44 = vsel %vm4791_vm6, %v4735_v62, 0.0  ;;  %9085 = vmatpush1.bf16.msra.mxu0 %v16823_v27  ;;  %v5328_v58 = vsel %vm4791_vm6, %v5248_v19, 0.0 }
 0x56f   : > { %v12610_v50 = vpop.f32.mrb[50].mxu0  ;;  %v12612_v43 = vpop.f32.mrb[114].mxu1  ;;  %4817 = vadd.xlane.f32.xlu1 %v4816_v44  ;;  %9086 = vmatprep.subr.bf16.mxu0 %v16619_v40 }
 0x570   : > { %16824 = vst [vmem:[#allocation48_spill] sm:$0xff] %v12610_v50  ;;  %16825 = vst [vmem:[#allocation50_spill] sm:$0xff] %v12612_v43  ;;  %v5249_v5 = vmul.f32 %v12431_v6, %v12610_v50  ;;  %v2691_v8 = vpop.f32.mrb[51].mxu0  ;;  %v2916_v22 = vpop.f32.mrb[115].mxu1  ;;  %v4736_v47 = vmul.f32 %v10002_v25, %v12610_v50  ;;  %v16836_v25 = vld [vmem:[#allocation26_spill] sm:$0xff] }
 0x571   : > { %8664 = vmatmul.mubr.msk.f32.gmra.mrb[126].mxu0 %vm719_vm0, %v16822_v20  ;;  %v5071_v8 = vpop.permute.xlu1 %5070 }
 0x572   : > { %8665 = vmatprep.mubr.msk.f32.mxu0 %vm719_vm0, %v16826_v45  ;;  %v5331_v40 = vsel %vm4791_vm6, %v5249_v5, 0.0  ;;  %9088 = vmatpush1.bf16.msra.mxu0 %v16827_v52  ;;  %v4819_v14 = vsel %vm4791_vm6, %v4736_v47, 0.0  ;;  %v16839_v52 = vld [vmem:[#allocation29_spill] sm:$0xff] }
 0x573   : > { %v12628_v6 = vpop.f32.mrb[52].mxu0  ;;  %v12630_v35 = vpop.f32.mrb[116].mxu1  ;;  %5329 = vadd.xlane.f32.xlu1 %v5328_v58  ;;  %5332 = vadd.xlane.f32.xlu0 %v5331_v40 }
 0x574   : > { %16828 = vst [vmem:[#allocation83_spill] sm:$0xff] %v12628_v6  ;;  %16829 = vst [vmem:[#allocation86_spill] sm:$0xff] %v12630_v35  ;;  %v4737_v42 = vmul.f32 %v10003_v23, %v12628_v6  ;;  %v2696_v9 = vpop.f32.mrb[53].mxu0  ;;  %v2921_v0 = vpop.f32.mrb[117].mxu1  ;;  %v5250_v21 = vmul.f32 %v12429_v11, %v12628_v6  ;;  %v10024_v35 = vld [vmem:[%s16191_s2 + $0x70] sm:$0xff] }
 0x575   : > { %8666 = vmatmul.mubr.msk.f32.gmra.mrb[128].mxu0 %vm719_vm0, %v16826_v45 }
 0x576   : > { %8667 = vmatprep.mubr.msk.f32.mxu0 %vm719_vm0, %v16830_v33  ;;  %v4822_v56 = vsel %vm4791_vm6, %v4737_v42, 0.0  ;;  %v5334_v19 = vsel %vm4791_vm6, %v5250_v21, 0.0 }
 0x577   : > { %v12644_v15 = vpop.f32.mrb[54].mxu0  ;;  %v12646_v62 = vpop.f32.mrb[118].mxu1  ;;  %4820 = vadd.xlane.f32.xlu1 %v4819_v14  ;;  %4823 = vadd.xlane.f32.xlu0 %v4822_v56 }
 0x578   : > { %16831 = vst [vmem:[#allocation52_spill] sm:$0xff] %v12644_v15  ;;  %16832 = vst [vmem:[#allocation87_spill] sm:$0xff] %v12646_v62  ;;  %v2701_v63 = vpop.f32.mrb[55].mxu0  ;;  %v2926_v18 = vpop.f32.mrb[119].mxu1  ;;  %v4738_v11 = vmul.f32 %v12229_v48, %v12644_v15  ;;  %v5251_v22 = vmul.f32 %v5071_v8, %v12644_v15 }
 0x579   : > { %8668 = vmatmul.mubr.msk.f32.gmra.mrb[130].mxu0 %vm719_vm0, %v16830_v33  ;;  %v16842_v33 = vld [vmem:[#allocation28_spill] sm:$0xff] }
 0x57a   : > { %8669 = vmatprep.mubr.msk.f32.mxu0 %vm719_vm0, %v16833_v32  ;;  %v4825_v48 = vsel %vm4791_vm6, %v4738_v11, 0.0  ;;  %v5337_v23 = vsel %vm4791_vm6, %v5251_v22, 0.0  ;;  %v16845_v11 = vld [vmem:[#allocation31_spill] sm:$0xff] }
 0x57b   : > { %v12655_v20 = vpop.f32.mrb[56].mxu0  ;;  %v12657_v44 = vpop.f32.mrb[120].mxu1  ;;  %5335 = vadd.xlane.f32.xlu0 %v5334_v19 }
 0x57c   : > { %16834 = vst [vmem:[#allocation101_spill] sm:$0xff] %v12655_v20  ;;  %16835 = vst [vmem:[#allocation54_spill] sm:$0xff] %v12657_v44  ;;  %v2706_v27 = vpop.f32.mrb[57].mxu0  ;;  %v2931_v5 = vpop.f32.mrb[121].mxu1 }
 0x57d   : > { %8670 = vmatmul.mubr.msk.f32.gmra.mrb[132].mxu0 %vm719_vm0, %v16833_v32  ;;  %v10004_v27 = vld [vmem:[%s16193_s4 + $0x80] sm:$0xff] }
 0x57e   : > { %8671 = vmatprep.mubr.msk.f32.mxu0 %vm719_vm0, %v16836_v25 }
 0x57f   : > { %v12665_v47 = vpop.f32.mrb[58].mxu0  ;;  %v12667_v45 = vpop.f32.mrb[122].mxu1  ;;  %4826 = vadd.xlane.f32.xlu0 %v4825_v48 }
 0x580   : > { %16837 = vst [vmem:[#allocation58_spill] sm:$0xff] %v12665_v47  ;;  %16838 = vst [vmem:[#allocation57_spill] sm:$0xff] %v12667_v45  ;;  %v2711_v58 = vpop.f32.mrb[59].mxu0  ;;  %v2936_v40 = vpop.f32.mrb[123].mxu1 }
 0x581   : > { %8672 = vmatmul.mubr.msk.f32.gmra.mrb[134].mxu0 %vm719_vm0, %v16836_v25  ;;  %v16848_v25 = vld [vmem:[#allocation30_spill] sm:$0xff] }
 0x582   : > { %8673 = vmatprep.mubr.msk.f32.mxu0 %vm719_vm0, %v16839_v52 }
 0x583   : > { %v12674_v42 = vpop.f32.mrb[60].mxu0  ;;  %v12676_v9 = vpop.f32.mrb[124].mxu1  ;;  %5338 = vadd.xlane.f32.xlu0 %v5337_v23 }
 0x584   : > { %16840 = vst [vmem:[#allocation61_spill] sm:$0xff] %v12674_v42  ;;  %16841 = vst [vmem:[#allocation60_spill] sm:$0xff] %v12676_v9  ;;  %v2716_v0 = vpop.f32.mrb[61].mxu0  ;;  %v2941_v21 = vpop.f32.mrb[125].mxu1 }
 0x585   : > { %8674 = vmatmul.mubr.msk.f32.gmra.mrb[136].mxu0 %vm719_vm0, %v16839_v52  ;;  %v10005_v52 = vld [vmem:[%s16193_s4 + $0x88] sm:$0xff] }
 0x586   : > { %8675 = vmatprep.mubr.msk.f32.mxu0 %vm719_vm0, %v16842_v33 }
 0x587   : > { %v12682_v14 = vpop.f32.mrb[62].mxu0  ;;  %v12684_v56 = vpop.f32.mrb[126].mxu1 }
 0x588   : > { %16843 = vst [vmem:[#allocation63_spill] sm:$0xff] %v12682_v14  ;;  %16844 = vst [vmem:[#allocation67_spill] sm:$0xff] %v12684_v56  ;;  %v2721_v63 = vpop.f32.mrb[63].mxu0  ;;  %v2946_v18 = vpop.f32.mrb[127].mxu1 }
 0x589   : > { %8676 = vmatmul.mubr.msk.f32.gmra.mrb[138].mxu0 %vm719_vm0, %v16842_v33  ;;  %v16851_v63 = vld [vmem:[#allocation33_spill] sm:$0xff] }
 0x58a   : > { %8677 = vmatprep.mubr.msk.f32.mxu0 %vm719_vm0, %v16845_v11 }
 0x58b   : > { %v12690_v32 = vpop.f32.mrb[64].mxu0  ;;  %v12692_v19 = vpop.f32.mrb[128].mxu1 }
 0x58c   : > { %16846 = vst [vmem:[#allocation64_spill] sm:$0xff] %v12690_v32  ;;  %16847 = vst [vmem:[#allocation70_spill] sm:$0xff] %v12692_v19  ;;  %v4743_v5 = vmul.f32 %v10004_v27, %v12690_v32  ;;  %v2726_v8 = vpop.f32.mrb[65].mxu0  ;;  %v2951_v22 = vpop.f32.mrb[129].mxu1 }
 0x58d   : > { %8678 = vmatmul.mubr.msk.f32.gmra.mrb[140].mxu0 %vm719_vm0, %v16845_v11 }
 0x58e   : > { %8679 = vmatprep.mubr.msk.f32.mxu0 %vm719_vm0, %v16848_v25  ;;  %v4840_v48 = vsel %vm4791_vm6, %v4743_v5, 0.0 }
 0x58f   : > { %v12703_v58 = vpop.f32.mrb[130].mxu1  ;;  %4841 = vadd.xlane.f32.xlu1 %v4840_v48  ;;  %v12705_v40 = vpop.f32.mrb[66].mxu0 }
 0x590   : > { %16849 = vst [vmem:[#allocation68_spill] sm:$0xff] %v12703_v58  ;;  %16850 = vst [vmem:[#allocation102_spill] sm:$0xff] %v12705_v40  ;;  %v4744_v23 = vmul.f32 %v10005_v52, %v12705_v40  ;;  %v5257_v0 = vmul.f32 %v12405_v10, %v12705_v40  ;;  %v2731_v21 = vpop.f32.mrb[67].mxu0  ;;  %v2956_v33 = vpop.f32.mrb[131].mxu1  ;;  %v10006_v10 = vld [vmem:[%s16193_s4 + $0x90] sm:$0xff]  ;;  %v16854_v52 = vld [vmem:[#allocation32_spill] sm:$0xff] }
 0x591   : > { %8680 = vmatmul.mubr.msk.f32.gmra.mrb[142].mxu0 %vm719_vm0, %v16848_v25  ;;  %v16869_v40 = vld [vmem:[#allocation39_spill] sm:$0xff] }
 0x592   : > { %8681 = vmatprep.mubr.msk.f32.mxu0 %vm719_vm0, %v16851_v63  ;;  %v5355_v18 = vsel %vm4791_vm6, %v5257_v0, 0.0  ;;  %v4843_v11 = vsel %vm4791_vm6, %v4744_v23, 0.0 }
 0x593   : > { %v12719_v27 = vpop.f32.mrb[68].mxu0  ;;  %v12721_v5 = vpop.f32.mrb[132].mxu1  ;;  %5356 = vadd.xlane.f32.xlu1 %v5355_v18  ;;  %4844 = vadd.xlane.f32.xlu0 %v4843_v11 }
 0x594   : > { %16852 = vst [vmem:[#allocation71_spill] sm:$0xff] %v12719_v27  ;;  %16853 = vst [vmem:[#allocation103_spill] sm:$0xff] %v12721_v5  ;;  %v4745_v8 = vmul.f32 %v10006_v10, %v12719_v27  ;;  %v2736_v22 = vpop.f32.mrb[69].mxu0  ;;  %v2961_v25 = vpop.f32.mrb[133].mxu1  ;;  %v5258_v48 = vmul.f32 %v12454_v59, %v12719_v27 }
 0x595   : > { %8682 = vmatmul.mubr.msk.f32.gmra.mrb[144].mxu0 %vm719_vm0, %v16851_v63  ;;  %v16857_v63 = vld [vmem:[#allocation35_spill] sm:$0xff] }
 0x596   : > { %8683 = vmatprep.mubr.msk.f32.mxu0 %vm719_vm0, %v16854_v52  ;;  %v4846_v23 = vsel %vm4791_vm6, %v4745_v8, 0.0  ;;  %v5358_v59 = vsel %vm4791_vm6, %v5258_v48, 0.0 }
 0x597   : > { %v12734_v0 = vpop.f32.mrb[70].mxu0  ;;  %v12736_v21 = vpop.f32.mrb[134].mxu1  ;;  %4847 = vadd.xlane.f32.xlu1 %v4846_v23  ;;  %v16860_v23 = vld [vmem:[#allocation34_spill] sm:$0xff] }
 0x598   : > { %16855 = vst [vmem:[#allocation75_spill] sm:$0xff] %v12734_v0  ;;  %16856 = vst [vmem:[#allocation105_spill] sm:$0xff] %v12736_v21  ;;  %v4746_v33 = vmul.f32 %v12242_v31, %v12734_v0  ;;  %v2741_v18 = vpop.f32.mrb[71].mxu0  ;;  %v2966_v11 = vpop.f32.mrb[135].mxu1 }
 0x599   : > { %8684 = vmatmul.mubr.msk.f32.gmra.mrb[146].mxu0 %vm719_vm0, %v16854_v52  ;;  %v16863_v11 = vld [vmem:[#allocation37_spill] sm:$0xff] }
 0x59a   : > { %8685 = vmatprep.mubr.msk.f32.mxu0 %vm719_vm0, %v16857_v63  ;;  %v4849_v10 = vsel %vm4791_vm6, %v4746_v33, 0.0 }
 0x59b   : > { %v12746_v8 = vpop.f32.mrb[72].mxu0  ;;  %v12748_v22 = vpop.f32.mrb[136].mxu1  ;;  %5359 = vadd.xlane.f32.xlu1 %v5358_v59  ;;  %4850 = vadd.xlane.f32.xlu0 %v4849_v10 }
 0x59c   : > { %16858 = vst [vmem:[#allocation104_spill] sm:$0xff] %v12746_v8  ;;  %16859 = vst [vmem:[#allocation107_spill] sm:$0xff] %v12748_v22  ;;  %v2746_v25 = vpop.f32.mrb[73].mxu0  ;;  %v2971_v31 = vpop.f32.mrb[137].mxu1 }
 0x59d   : > { %8686 = vmatmul.mubr.msk.f32.gmra.mrb[148].mxu0 %vm719_vm0, %v16857_v63  ;;  %v16866_v31 = vld [vmem:[#allocation36_spill] sm:$0xff] }
 0x59e   : > { %8687 = vmatprep.mubr.msk.f32.mxu0 %vm719_vm0, %v16860_v23 }
 0x59f   : > { %v12754_v52 = vpop.f32.mrb[74].mxu0  ;;  %v12756_v18 = vpop.f32.mrb[138].mxu1 }
 0x5a0   : > { %16861 = vst [vmem:[#allocation106_spill] sm:$0xff] %v12754_v52  ;;  %16862 = vst [vmem:[#allocation109_spill] sm:$0xff] %v12756_v18  ;;  %v2751_v48 = vpop.f32.mrb[75].mxu0  ;;  %v2976_v33 = vpop.f32.mrb[139].mxu1 }
 0x5a1   : > { %8688 = vmatmul.mubr.msk.f32.gmra.mrb[150].mxu0 %vm719_vm0, %v16860_v23 }
 0x5a2   : > { %8689 = vmatprep.mubr.msk.f32.mxu0 %vm719_vm0, %v16863_v11 }
 0x5a3   : > { %v12762_v59 = vpop.f32.mrb[76].mxu0  ;;  %v12764_v10 = vpop.f32.mrb[140].mxu1 }
 0x5a4   : > { %16864 = vst [vmem:[#allocation108_spill] sm:$0xff] %v12762_v59  ;;  %16865 = vst [vmem:[#allocation9_spill] sm:$0xff] %v12764_v10  ;;  %v2756_v63 = vpop.f32.mrb[77].mxu0  ;;  %v2981_v25 = vpop.f32.mrb[141].mxu1 }
 0x5a5   : > { %8690 = vmatmul.mubr.msk.f32.gmra.mrb[152].mxu0 %vm719_vm0, %v16863_v11  ;;  %v10007_v11 = vld [vmem:[%s16193_s4 + $0xc0] sm:$0xff] }
 0x5a6   : > { %8691 = vmatprep.mubr.msk.f32.mxu0 %vm719_vm0, %v16866_v31 }
 0x5a7   : > { %v12770_v48 = vpop.f32.mrb[78].mxu0  ;;  %v12772_v33 = vpop.f32.mrb[142].mxu1 }
 0x5a8   : > { %16867 = vst [vmem:[#allocation8_spill] sm:$0xff] %v12770_v48  ;;  %16868 = vst [vmem:[#allocation78_spill] sm:$0xff] %v12772_v33  ;;  %v2761_v23 = vpop.f32.mrb[79].mxu0  ;;  %v2986_v27 = vpop.f32.mrb[143].mxu1  ;;  %v10030_v48 = vld [vmem:[%s16191_s2 + $0xa0] sm:$0xff] }
 0x5a9   : > { %8692 = vmatmul.mubr.msk.f32.gmra.mrb[154].mxu0 %vm719_vm0, %v16866_v31  ;;  %v16872_v27 = vld [vmem:[#allocation38_spill] sm:$0xff] }
 0x5aa   : > { %8693 = vmatprep.mubr.msk.f32.mxu0 %vm719_vm0, %v16869_v40 }
 0x5ab   : > { %v12778_v63 = vpop.f32.mrb[80].mxu0  ;;  %v12780_v25 = vpop.f32.mrb[144].mxu1 }
 0x5ac   : > { %16870 = vst [vmem:[#allocation11_spill] sm:$0xff] %v12778_v63  ;;  %16871 = vst [vmem:[#allocation80_spill] sm:$0xff] %v12780_v25  ;;  %v4751_v6 = vmul.f32 %v10007_v11, %v12778_v63  ;;  %v2766_v57 = vpop.f32.mrb[81].mxu0  ;;  %v2991_v15 = vpop.f32.mrb[145].mxu1 }
 0x5ad   : > { %8694 = vmatmul.mubr.msk.f32.gmra.mrb[156].mxu0 %vm719_vm0, %v16869_v40 }
 0x5ae   : > { %8695 = vmatprep.mubr.msk.f32.mxu0 %vm719_vm0, %v16872_v27  ;;  %v4864_v31 = vsel %vm4791_vm6, %v4751_v6, 0.0 }
 0x5af   : > { %v12791_v23 = vpop.f32.mrb[82].mxu0  ;;  %v12793_v50 = vpop.f32.mrb[146].mxu1  ;;  %4865 = vadd.xlane.f32.xlu1 %v4864_v31 }
 0x5b0   : > { %16873 = vst [vmem:[#allocation10_spill] sm:$0xff] %v12791_v23  ;;  %16874 = vst [vmem:[#allocation82_spill] sm:$0xff] %v12793_v50  ;;  %v4752_v57 = vmul.f32 %v10008_v37, %v12791_v23  ;;  %v2771_v15 = vpop.f32.mrb[83].mxu0  ;;  %v2996_v11 = vpop.f32.mrb[147].mxu1  ;;  %v5265_v40 = vmul.f32 %v12414_v7, %v12791_v23  ;;  %v10009_v37 = vld [vmem:[%s16193_s4 + $0xd0] sm:$0xff] }
 0x5b1   : > { %8696 = vmatmul.mubr.msk.f32.gmra.mrb[158].mxu0 %vm719_vm0, %v16872_v27 }
 0x5b2   : > { %v4867_v6 = vsel %vm4791_vm6, %v4752_v57, 0.0  ;;  %v5379_v27 = vsel %vm4791_vm6, %v5265_v40, 0.0 }
 0x5b3   : > { %v12804_v34 = vpop.f32.mrb[84].mxu0  ;;  %v12806_v17 = vpop.f32.mrb[148].mxu1  ;;  %4868 = vadd.xlane.f32.xlu0 %v4867_v6 }
 0x5b4   : > { %16875 = vst [vmem:[#allocation13_spill] sm:$0xff] %v12804_v34  ;;  %16876 = vst [vmem:[#allocation85_spill] sm:$0xff] %v12806_v17  ;;  %v2776_v31 = vpop.f32.mrb[85].mxu0  ;;  %v3001_v28 = vpop.f32.mrb[149].mxu1  ;;  %v4753_v15 = vmul.f32 %v10009_v37, %v12804_v34  ;;  %v5266_v6 = vmul.f32 %v12471_v26, %v12804_v34 }
 0x5b6   : > { %v4870_v28 = vsel %vm4791_vm6, %v4753_v15, 0.0  ;;  %v5382_v55 = vsel %vm4791_vm6, %v5266_v6, 0.0  ;;  %v12840_v6 = vpop.permute.xlu1 %5086 }
 0x5b7   : > { %v12813_v11 = vpop.f32.mrb[86].mxu0  ;;  %v12815_v7 = vpop.f32.mrb[150].mxu1  ;;  %5380 = vadd.xlane.f32.xlu0 %v5379_v27 }
 0x5b8   : > { %16877 = vst [vmem:[#allocation12_spill] sm:$0xff] %v12813_v11  ;;  %16878 = vst [vmem:[#allocation88_spill] sm:$0xff] %v12815_v7  ;;  %v2781_v57 = vpop.f32.mrb[87].mxu0  ;;  %v3006_v23 = vpop.f32.mrb[151].mxu1  ;;  %v4754_v40 = vmul.f32 %v12255_v41, %v12813_v11 }
 0x5ba   : > { %v4873_v15 = vsel %vm4791_vm6, %v4754_v40, 0.0 }
 0x5bb   : > { %v12820_v31 = vpop.f32.mrb[88].mxu0  ;;  %v12822_v13 = vpop.f32.mrb[152].mxu1  ;;  %4871 = vadd.xlane.f32.xlu0 %v4870_v28 }
 0x5bc   : > { %16879 = vst [vmem:[#allocation15_spill] sm:$0xff] %v12820_v31  ;;  %16880 = vst [vmem:[#allocation90_spill] sm:$0xff] %v12822_v13  ;;  %v2786_v37 = vpop.f32.mrb[89].mxu0  ;;  %v3011_v1 = vpop.f32.mrb[153].mxu1 }
 0x5bd   : > { %v12836_v37 = vpop.permute.xlu0 %5080 }
 0x5bf   : > { %v12827_v27 = vpop.f32.mrb[90].mxu0  ;;  %v12829_v23 = vpop.f32.mrb[154].mxu1  ;;  %5383 = vadd.xlane.f32.xlu0 %v5382_v55 }
 0x5c0   : > { %16881 = vst [vmem:[#allocation14_spill] sm:$0xff] %v12827_v27  ;;  %16882 = vst [vmem:[#allocation91_spill] sm:$0xff] %v12829_v23  ;;  %v2791_v26 = vpop.f32.mrb[91].mxu0  ;;  %v3016_v57 = vpop.f32.mrb[155].mxu1 }
 0x5c1   : > { %v12838_v41 = vpop.permute.xlu0 %5096  ;;  %v12844_v55 = vpop.permute.xlu1 %5102 }
 0x5c3   : > { %v12832_v34 = vpop.f32.mrb[92].mxu0  ;;  %v12834_v12 = vpop.f32.mrb[156].mxu1  ;;  %4874 = vadd.xlane.f32.xlu0 %v4873_v15 }
 0x5c4   : > { %16883 = vst [vmem:[#allocation89_spill] sm:$0xff] %v12832_v34  ;;  %16884 = vst [vmem:[#allocation17_spill] sm:$0xff] %v12834_v12  ;;  %v2796_v1 = vpop.f32.mrb[93].mxu0  ;;  %v3021_v28 = vpop.f32.mrb[157].mxu1 }
 0x5c5   : > { %v12842_v54 = vpop.permute.xlu0 %5112  ;;  %v12848_v40 = vpop.permute.xlu1 %5118 }
 0x5c6   : > { %16885 = vst [vmem:[#allocation92_spill] sm:$0xff] %v12842_v54  ;;  %16887 = vst [vmem:[#allocation93_spill] sm:$0xff] %v12848_v40 }
 0x5c9   : > { %v12846_v26 = vpop.permute.xlu0 %5128  ;;  %v12852_v61 = vpop.permute.xlu1 %5134 }
 0x5ca   : > { %16886 = vst [vmem:[#allocation16_spill] sm:$0xff] %v12846_v26  ;;  %16889 = vst [vmem:[#allocation94_spill] sm:$0xff] %v12852_v61 }
 0x5cd   : > { %v12850_v57 = vpop.permute.xlu0 %5144  ;;  %v12856_v1 = vpop.permute.xlu1 %5150 }
 0x5ce   : > { %16888 = vst [vmem:[#allocation19_spill] sm:$0xff] %v12850_v57  ;;  %16891 = vst [vmem:[#allocation95_spill] sm:$0xff] %v12856_v1 }
 0x5d1   : > { %v12854_v15 = vpop.permute.xlu0 %5160  ;;  %v12860_v53 = vpop.permute.xlu1 %5166 }
 0x5d2   : > { %16890 = vst [vmem:[#allocation18_spill] sm:$0xff] %v12854_v15  ;;  %16892 = vst [vmem:[#allocation21_spill] sm:$0xff] %v12860_v53 }
 0x5d5   : > { %v12858_v28 = vpop.permute.xlu0 %5056  ;;  %v12864_v54 = vpop.permute.xlu1 %5072 }
 0x5d9   : > { %v12862_v60 = vpop.permute.xlu0 %5088  ;;  %v12868_v26 = vpop.permute.xlu1 %5104 }
 0x5dd   : > { %v12866_v23 = vpop.permute.xlu0 %5120  ;;  %v12876_v53 = vpop.permute.xlu1 %5136 }
 0x5de   : > { %16893 = vst [vmem:[#allocation96_spill] sm:$0xff] %v12866_v23  ;;  %16897 = vst [vmem:[#allocation98_spill] sm:$0xff] %v12876_v53  ;;  %v10010_v23 = vld [vmem:[%s16191_s2] sm:$0xff]  ;;  %v10012_v53 = vld [vmem:[%s16191_s2 + $0x10] sm:$0xff] }
 0x5e1   : > { %v12874_v61 = vpop.permute.xlu0 %5152 }
 0x5e2   : > { %16896 = vst [vmem:[#allocation23_spill] sm:$0xff] %v12874_v61  ;;  %v10011_v61 = vld [vmem:[%s16191_s2 + $0x8] sm:$0xff] }
 0x5e5   : > { %v12878_v21 = vpop.permute.xlu0 %5058 }
 0x604   : > { %v12870_v7 = vpop.f32.mrb[94].mxu0  ;;  %v12872_v57 = vpop.f32.mrb[158].mxu1 }
 0x605   : > { %16894 = vst [vmem:[#allocation20_spill] sm:$0xff] %v12870_v7  ;;  %16895 = vst [vmem:[#allocation97_spill] sm:$0xff] %v12872_v57  ;;  %v2801_v15 = vpop.f32.mrb[95].mxu0  ;;  %v3026_v1 = vpop.f32.mrb[159].mxu1 }
 0x608   : > { %v3318_v40 = vpop.f32.mrb[96].mxu0 }
 0x609   : > { %v3509_v50 = vmul.f32 0.25, %v3318_v40  ;;  %v3320_v33 = vpop.f32.mrb[97].mxu0 }
 0x60a   : > { %v3510_v18 = vmul.f32 0.25, %v3320_v33 }
 0x60b   : > { %v12883_v58 = vadd.f32 %v10010_v23, %v3509_v50  ;;  %v12897_v50 = vpop.permute.xlu1 %5168 }
 0x60c   : > { %v12888_v15 = vadd.f32 %v10011_v61, %v3510_v18  ;;  %v3324_v1 = vpop.f32.mrb[98].mxu0  ;;  %16898 = vst [vmem:[#allocation22_spill] sm:$0xff] %v12897_v50  ;;  %v10013_v61 = vld [vmem:[%s16191_s2 + $0x18] sm:$0xff] }
 0x60d   : > { %v3511_v40 = vmul.f32 0.25, %v3324_v1  ;;  %v3326_v57 = vpop.f32.mrb[99].mxu0 }
 0x60e   : > { %v3512_v56 = vmul.f32 0.25, %v3326_v57  ;;  %v3637_v33 = vmax.f32 %v12883_v58, %v12888_v15  ;;  %v12904_v57 = vpop.permute.xlu0 %5090 }
 0x60f   : > { %v12895_v45 = vadd.f32 %v10012_v53, %v3511_v40  ;;  %v10014_v53 = vld [vmem:[%s16191_s2 + $0x20] sm:$0xff] }
 0x610   : > { %v12902_v18 = vadd.f32 %v10013_v61, %v3512_v56  ;;  %v3330_v23 = vpop.f32.mrb[100].mxu0  ;;  %3638 = vmax.xlane.f32.xlu0 %v3637_v33  ;;  %v10015_v56 = vld [vmem:[%s16191_s2 + $0x28] sm:$0xff] }
 0x611   : > { %v3513_v1 = vmul.f32 0.25, %v3330_v23  ;;  %v3332_v62 = vpop.f32.mrb[101].mxu0 }
 0x612   : > { %v3514_v43 = vmul.f32 0.25, %v3332_v62  ;;  %v3640_v50 = vmax.f32 %v12895_v45, %v12902_v18  ;;  %v12918_v62 = vpop.permute.xlu1 %5074  ;;  %v12920_v13 = vpop.permute.xlu0 %5122 }
 0x613   : > { %v12909_v40 = vadd.f32 %v10014_v53, %v3513_v1  ;;  %16899 = vst [vmem:[#allocation99_spill] sm:$0xff] %v12920_v13  ;;  %v10016_v1 = vld [vmem:[%s16191_s2 + $0x30] sm:$0xff] }
 0x614   : > { %v12916_v61 = vadd.f32 %v10015_v56, %v3514_v43  ;;  %v3336_v33 = vpop.f32.mrb[102].mxu0  ;;  %3641 = vmax.xlane.f32.xlu1 %v3640_v50  ;;  %v10017_v43 = vld [vmem:[%s16191_s2 + $0x38] sm:$0xff] }
 0x615   : > { %v3515_v23 = vmul.f32 0.25, %v3336_v33  ;;  %v3338_v36 = vpop.f32.mrb[103].mxu0 }
 0x616   : > { %v3516_v12 = vmul.f32 0.25, %v3338_v36  ;;  %v3643_v17 = vmax.f32 %v12909_v40, %v12916_v61  ;;  %v12941_v10 = vpop.permute.xlu1 %5106 }
 0x617   : > { %v12925_v53 = vadd.f32 %v10016_v1, %v3515_v23  ;;  %v10018_v23 = vld [vmem:[%s16191_s2 + $0x40] sm:$0xff] }
 0x618   : > { %v12932_v50 = vadd.f32 %v10017_v43, %v3516_v12  ;;  %v3342_v56 = vpop.f32.mrb[104].mxu0  ;;  %3644 = vmax.xlane.f32.xlu1 %v3643_v17  ;;  %v10019_v12 = vld [vmem:[%s16191_s2 + $0x48] sm:$0xff] }
 0x619   : > { %v3517_v36 = vmul.f32 0.25, %v3342_v56  ;;  %v3344_v33 = vpop.f32.mrb[105].mxu0  ;;  %v12948_v56 = vpop.permute.xlu0 %5154 }
 0x61a   : > { %v3518_v13 = vmul.f32 0.25, %v3344_v33  ;;  %v3646_v25 = vmax.f32 %v12925_v53, %v12932_v50  ;;  %16900 = vst [vmem:[#allocation25_spill] sm:$0xff] %v12948_v56 }
 0x61b   : > { %v12939_v1 = vadd.f32 %v10018_v23, %v3517_v36  ;;  %v10020_v36 = vld [vmem:[%s16191_s2 + $0x50] sm:$0xff] }
 0x61c   : > { %v12946_v43 = vadd.f32 %v10019_v12, %v3518_v13  ;;  %v3348_v17 = vpop.f32.mrb[106].mxu0  ;;  %3647 = vmax.xlane.f32.xlu1 %v3646_v25  ;;  %v10021_v13 = vld [vmem:[%s16191_s2 + $0x58] sm:$0xff] }
 0x61d   : > { %v3519_v33 = vmul.f32 0.25, %v3348_v17  ;;  %v3350_v51 = vpop.f32.mrb[107].mxu0  ;;  %v12966_v9 = vpop.permute.xlu0 %5060 }
 0x61e   : > { %v3520_v2 = vmul.f32 0.25, %v3350_v51  ;;  %v3649_v22 = vmax.f32 %v12939_v1, %v12946_v43  ;;  %v12962_v51 = vpop.permute.xlu1 %5138 }
 0x61f   : > { %v12955_v23 = vadd.f32 %v10020_v36, %v3519_v33  ;;  %16901 = vst [vmem:[#allocation100_spill] sm:$0xff] %v12962_v51  ;;  %v10022_v33 = vld [vmem:[%s16191_s2 + $0x60] sm:$0xff] }
 0x620   : > { %v12960_v12 = vadd.f32 %v10021_v13, %v3520_v2  ;;  %v3354_v56 = vpop.f32.mrb[108].mxu0  ;;  %3650 = vmax.xlane.f32.xlu1 %v3649_v22  ;;  %v10023_v2 = vld [vmem:[%s16191_s2 + $0x68] sm:$0xff] }
 0x621   : > { %v3521_v25 = vmul.f32 0.25, %v3354_v56  ;;  %v3356_v17 = vpop.f32.mrb[109].mxu0 }
 0x622   : > { %v3522_v5 = vmul.f32 0.25, %v3356_v17  ;;  %v3652_v19 = vmax.f32 %v12955_v23, %v12960_v12 }
 0x623   : > { %v12971_v36 = vadd.f32 %v10022_v33, %v3521_v25  ;;  %v12985_v33 = vpop.permute.xlu1 %5170 }
 0x624   : > { %v12976_v22 = vadd.f32 %v10023_v2, %v3522_v5  ;;  %v3360_v56 = vpop.f32.mrb[110].mxu0  ;;  %3653 = vmax.xlane.f32.xlu1 %v3652_v19  ;;  %16902 = vst [vmem:[#allocation24_spill] sm:$0xff] %v12985_v33  ;;  %v10025_v5 = vld [vmem:[%s16191_s2 + $0x78] sm:$0xff] }
 0x625   : > { %v3523_v13 = vmul.f32 0.25, %v3360_v56  ;;  %v3362_v17 = vpop.f32.mrb[111].mxu0  ;;  %v12992_v56 = vpop.permute.xlu0 %5092 }
 0x626   : > { %v3524_v51 = vmul.f32 0.25, %v3362_v17  ;;  %v3655_v44 = vmax.f32 %v12971_v36, %v12976_v22 }
 0x627   : > { %v12983_v25 = vadd.f32 %v10024_v35, %v3523_v13  ;;  %v10026_v35 = vld [vmem:[%s16191_s2 + $0x80] sm:$0xff] }
 0x628   : > { %v12990_v2 = vadd.f32 %v10025_v5, %v3524_v51  ;;  %v3366_v19 = vpop.f32.mrb[112].mxu0  ;;  %3656 = vmax.xlane.f32.xlu1 %v3655_v44  ;;  %v10027_v51 = vld [vmem:[%s16191_s2 + $0x88] sm:$0xff] }
 0x629   : > { %v3525_v17 = vmul.f32 0.25, %v3366_v19  ;;  %v3368_v3 = vpop.f32.mrb[113].mxu0  ;;  %v13010_v39 = vpop.permute.xlu0 %5124 }
 0x62a   : > { %v3526_v29 = vmul.f32 0.25, %v3368_v3  ;;  %v3658_v4 = vmax.f32 %v12983_v25, %v12990_v2  ;;  %v13006_v3 = vpop.permute.xlu1 %5076  ;;  %16903 = vst [vmem:[#allocation27_spill] sm:$0xff] %v13010_v39 }
 0x62b   : > { %v12999_v13 = vadd.f32 %v10026_v35, %v3525_v17  ;;  %v10028_v17 = vld [vmem:[%s16191_s2 + $0x90] sm:$0xff] }
 0x62c   : > { %v13004_v5 = vadd.f32 %v10027_v51, %v3526_v29  ;;  %v3372_v33 = vpop.f32.mrb[114].mxu0  ;;  %3659 = vmax.xlane.f32.xlu0 %v3658_v4  ;;  %v10029_v4 = vld [vmem:[%s16191_s2 + $0x98] sm:$0xff] }
 0x62d   : > { %v3527_v44 = vmul.f32 0.25, %v3372_v33  ;;  %v3374_v19 = vpop.f32.mrb[115].mxu0 }
 0x62e   : > { %v3528_v38 = vmul.f32 0.25, %v3374_v19  ;;  %v3661_v49 = vmax.f32 %v12999_v13, %v13004_v5 }
 0x62f   : > { %v13015_v35 = vadd.f32 %v10028_v17, %v3527_v44  ;;  %v13029_v17 = vpop.permute.xlu1 %5108 }
 0x630   : > { %v13020_v29 = vadd.f32 %v10029_v4, %v3528_v38  ;;  %3662 = vmax.xlane.f32.xlu1 %v3661_v49  ;;  %v3378_v33 = vpop.f32.mrb[116].mxu0  ;;  %16906 = vst [vmem:[#allocation28_spill] sm:$0xff] %v13029_v17  ;;  %v10031_v38 = vld [vmem:[%s16191_s2 + $0xa8] sm:$0xff] }
 0x631   : > { %v3529_v51 = vmul.f32 0.25, %v3378_v33  ;;  %v3380_v19 = vpop.f32.mrb[117].mxu0  ;;  %v13036_v33 = vpop.permute.xlu0 %5156 }
 0x632   : > { %16904 = vst [vmem:[#allocation26_spill] sm:$0xff] %v13020_v29  ;;  %v3530_v7 = vmul.f32 0.25, %v3380_v19  ;;  %v3664_v39 = vmax.f32 %v13015_v35, %v13020_v29  ;;  %16908 = vst [vmem:[#allocation30_spill] sm:$0xff] %v13036_v33 }
 0x633   : > { %v13027_v44 = vadd.f32 %v10030_v48, %v3529_v51  ;;  %v10032_v48 = vld [vmem:[%s16191_s2 + $0xb0] sm:$0xff] }
 0x634   : > { %v13034_v49 = vadd.f32 %v10031_v38, %v3530_v7  ;;  %v3384_v4 = vpop.f32.mrb[118].mxu0  ;;  %3665 = vmax.xlane.f32.xlu0 %v3664_v39  ;;  %v10033_v7 = vld [vmem:[%s16191_s2 + $0xb8] sm:$0xff] }
 0x635   : > { %16905 = vst [vmem:[#allocation29_spill] sm:$0xff] %v13027_v44  ;;  %v3531_v19 = vmul.f32 0.25, %v3384_v4  ;;  %v3386_v14 = vpop.f32.mrb[119].mxu0 }
 0x636   : > { %16907 = vst [vmem:[#allocation31_spill] sm:$0xff] %v13034_v49  ;;  %v3532_v16 = vmul.f32 0.25, %v3386_v14  ;;  %v3667_v29 = vmax.f32 %v13027_v44, %v13034_v49  ;;  %v13050_v14 = vpop.permute.xlu1 %5140  ;;  %v13054_v44 = vpop.permute.xlu0 %5062 }
 0x637   : > { %v13043_v51 = vadd.f32 %v10032_v48, %v3531_v19  ;;  %16911 = vst [vmem:[#allocation35_spill] sm:$0xff] %v13050_v14  ;;  %16912 = vst [vmem:[#allocation34_spill] sm:$0xff] %v13054_v44  ;;  %v10034_v19 = vld [vmem:[%s16191_s2 + $0xc0] sm:$0xff] }
 0x638   : > { %v13048_v38 = vadd.f32 %v10033_v7, %v3532_v16  ;;  %3668 = vmax.xlane.f32.xlu1 %v3667_v29  ;;  %v3390_v39 = vpop.f32.mrb[120].mxu0  ;;  %v10035_v16 = vld [vmem:[%s16191_s2 + $0xc8] sm:$0xff] }
 0x639   : > { %16909 = vst [vmem:[#allocation33_spill] sm:$0xff] %v13043_v51  ;;  %v3533_v4 = vmul.f32 0.25, %v3390_v39  ;;  %v3392_v33 = vpop.f32.mrb[121].mxu0 }
 0x63a   : > { %16910 = vst [vmem:[#allocation32_spill] sm:$0xff] %v13048_v38  ;;  %v3534_v17 = vmul.f32 0.25, %v3392_v33  ;;  %v3670_v49 = vmax.f32 %v13043_v51, %v13048_v38  ;;  %v13068_v38 = vpop.permute.xlu0 %5094  ;;  %v13075_v51 = vpop.permute.xlu1 %5172 }
 0x63b   : > { %v13059_v48 = vadd.f32 %v10034_v19, %v3533_v4  ;;  %16915 = vst [vmem:[#allocation39_spill] sm:$0xff] %v13068_v38  ;;  %v10036_v4 = vld [vmem:[%s16191_s2 + $0xd0] sm:$0xff]  ;;  %16917 = vst [vmem:[#allocation110_spill] sm:$0xff] %v13075_v51 }
 0x63c   : > { %v13064_v29 = vadd.f32 %v10035_v16, %v3534_v17  ;;  %v3396_v7 = vpop.f32.mrb[122].mxu0  ;;  %3671 = vmax.xlane.f32.xlu0 %v3670_v49  ;;  %v10037_v17 = vld [vmem:[%s16191_s2 + $0xd8] sm:$0xff] }
 0x63d   : > { %16913 = vst [vmem:[#allocation37_spill] sm:$0xff] %v13059_v48  ;;  %v3535_v33 = vmul.f32 0.25, %v3396_v7  ;;  %v3398_v39 = vpop.f32.mrb[123].mxu0 }
 0x63e   : > { %16914 = vst [vmem:[#allocation36_spill] sm:$0xff] %v13064_v29  ;;  %v3536_v14 = vmul.f32 0.25, %v3398_v39  ;;  %v3673_v44 = vmax.f32 %v13059_v48, %v13064_v29  ;;  %v13084_v48 = vpop.permute.xlu0 %5126  ;;  %v13096_v51 = vpop.permute.xlu1 %5078 }
 0x63f   : > { %v13073_v19 = vadd.f32 %v10036_v4, %v3535_v33  ;;  %16919 = vst [vmem:[#allocation112_spill] sm:$0xff] %v13084_v48  ;;  %v10038_v33 = vld [vmem:[%s16191_s2 + $0xe0] sm:$0xff]  ;;  %16922 = vst [vmem:[#allocation115_spill] sm:$0xff] %v13096_v51 }
 0x640   : > { %v13080_v49 = vadd.f32 %v10037_v17, %v3536_v14  ;;  %3674 = vmax.xlane.f32.xlu1 %v3673_v44  ;;  %v3402_v16 = vpop.f32.mrb[124].mxu0  ;;  %v10039_v14 = vld [vmem:[%s16191_s2 + $0xe8] sm:$0xff] }
 0x641   : > { %16916 = vst [vmem:[#allocation38_spill] sm:$0xff] %v13073_v19  ;;  %v3537_v7 = vmul.f32 0.25, %v3402_v16  ;;  %v3404_v39 = vpop.f32.mrb[125].mxu0 }
 0x642   : > { %16918 = vst [vmem:[#allocation111_spill] sm:$0xff] %v13080_v49  ;;  %v3538_v29 = vmul.f32 0.25, %v3404_v39  ;;  %v3676_v38 = vmax.f32 %v13073_v19, %v13080_v49  ;;  %v13112_v19 = vpop.permute.xlu1 %5110 }
 0x643   : > { %v13089_v4 = vadd.f32 %v10038_v33, %v3537_v7  ;;  %v10040_v7 = vld [vmem:[%s16191_s2 + $0xf0] sm:$0xff]  ;;  %16926 = vst [vmem:[#allocation119_spill] sm:$0xff] %v13112_v19 }
 0x644   : > { %v13094_v44 = vadd.f32 %v10039_v14, %v3538_v29  ;;  %v3408_v17 = vpop.f32.mrb[126].mxu0  ;;  %3677 = vmax.xlane.f32.xlu0 %v3676_v38  ;;  %v10041_v29 = vld [vmem:[%s16191_s2 + $0xf8] sm:$0xff] }
 0x645   : > { %16920 = vst [vmem:[#allocation113_spill] sm:$0xff] %v13089_v4  ;;  %v3539_v16 = vmul.f32 0.25, %v3408_v17  ;;  %v3410_v39 = vpop.f32.mrb[127].mxu0  ;;  %v13110_v17 = vpop.permute.xlu0 %5158 }
 0x646   : > { %16921 = vst [vmem:[#allocation114_spill] sm:$0xff] %v13094_v44  ;;  %v3540_v49 = vmul.f32 0.25, %v3410_v39  ;;  %v3679_v48 = vmax.f32 %v13089_v4, %v13094_v44  ;;  %16925 = vst [vmem:[#allocation118_spill] sm:$0xff] %v13110_v17 }
 0x647   : > { %v13103_v33 = vadd.f32 %v10040_v7, %v3539_v16  ;;  %v10042_v16 = vld [vmem:[%s16191_s2 + $0x100] sm:$0xff] }
 0x648   : > { %v13108_v14 = vadd.f32 %v10041_v29, %v3540_v49  ;;  %v3414_v38 = vpop.f32.mrb[128].mxu0  ;;  %3680 = vmax.xlane.f32.xlu0 %v3679_v48  ;;  %v10043_v48 = vld [vmem:[%s16191_s2 + $0x108] sm:$0xff] }
 0x649   : > { %16923 = vst [vmem:[#allocation116_spill] sm:$0xff] %v13103_v33  ;;  %v3541_v39 = vmul.f32 0.25, %v3414_v38  ;;  %v3416_v51 = vpop.f32.mrb[129].mxu0 }
 0x64a   : > { %16924 = vst [vmem:[#allocation117_spill] sm:$0xff] %v13108_v14  ;;  %v3542_v44 = vmul.f32 0.25, %v3416_v51  ;;  %v3682_v4 = vmax.f32 %v13103_v33, %v13108_v14  ;;  %v13128_v14 = vpop.xlane.xlu0 %4796  ;;  %v13135_v33 = vpop.permute.xlu1 %5142 }
 0x64b   : > { %v13119_v7 = vadd.f32 %v10042_v16, %v3541_v39  ;;  %16929 = vst [vmem:[#allocation122_spill] sm:$0xff] %v13128_v14  ;;  %v10044_v39 = vld [vmem:[%s16191_s2 + $0x110] sm:$0xff]  ;;  %16931 = vst [vmem:[#allocation124_spill] sm:$0xff] %v13135_v33 }
 0x64c   : > { %v13124_v49 = vadd.f32 %v10043_v48, %v3542_v44  ;;  %v3420_v29 = vpop.f32.mrb[130].mxu0  ;;  %3683 = vmax.xlane.f32.xlu1 %v3682_v4  ;;  %v10045_v4 = vld [vmem:[%s16191_s2 + $0x118] sm:$0xff] }
 0x64d   : > { %16927 = vst [vmem:[#allocation120_spill] sm:$0xff] %v13119_v7  ;;  %v3543_v38 = vmul.f32 0.25, %v3420_v29  ;;  %v3422_v17 = vpop.f32.mrb[131].mxu0 }
 0x64e   : > { %16928 = vst [vmem:[#allocation121_spill] sm:$0xff] %v13124_v49  ;;  %v3544_v51 = vmul.f32 0.25, %v3422_v17  ;;  %v3685_v19 = vmax.f32 %v13119_v7, %v13124_v49  ;;  %v13144_v14 = vpop.xlane.xlu0 %4802  ;;  %v13156_v33 = vpop.permute.xlu1 %5174 }
 0x64f   : > { %v13133_v16 = vadd.f32 %v10044_v39, %v3543_v38  ;;  %16933 = vst [vmem:[#allocation126_spill] sm:$0xff] %v13144_v14  ;;  %v10046_v38 = vld [vmem:[%s16191_s2 + $0x120] sm:$0xff]  ;;  %16936 = vst [vmem:[#allocation129_spill] sm:$0xff] %v13156_v33 }
 0x650   : > { %v13140_v44 = vadd.f32 %v10045_v4, %v3544_v51  ;;  %v3426_v17 = vpop.f32.mrb[132].mxu0  ;;  %3686 = vmax.xlane.f32.xlu0 %v3685_v19  ;;  %v10047_v51 = vld [vmem:[%s16191_s2 + $0x128] sm:$0xff] }
 0x651   : > { %16930 = vst [vmem:[#allocation123_spill] sm:$0xff] %v13133_v16  ;;  %v3545_v48 = vmul.f32 0.25, %v3426_v17  ;;  %v3428_v29 = vpop.f32.mrb[133].mxu0 }
 0x652   : > { %16932 = vst [vmem:[#allocation125_spill] sm:$0xff] %v13140_v44  ;;  %v3546_v49 = vmul.f32 0.25, %v3428_v29  ;;  %v3688_v7 = vmax.f32 %v13133_v16, %v13140_v44 }
 0x653   : > { %v13149_v39 = vadd.f32 %v10046_v38, %v3545_v48  ;;  %v10048_v48 = vld [vmem:[%s16191_s2 + $0x130] sm:$0xff] }
 0x654   : > { %v13154_v4 = vadd.f32 %v10047_v51, %v3546_v49  ;;  %v3432_v19 = vpop.f32.mrb[134].mxu0  ;;  %3689 = vmax.xlane.f32.xlu0 %v3688_v7  ;;  %v10049_v49 = vld [vmem:[%s16191_s2 + $0x138] sm:$0xff] }
 0x655   : > { %16934 = vst [vmem:[#allocation127_spill] sm:$0xff] %v13149_v39  ;;  %v3547_v17 = vmul.f32 0.25, %v3432_v19  ;;  %v3434_v29 = vpop.f32.mrb[135].mxu0  ;;  %v13170_v19 = vpop.xlane.xlu0 %5314 }
 0x656   : > { %16935 = vst [vmem:[#allocation128_spill] sm:$0xff] %v13154_v4  ;;  %v3548_v44 = vmul.f32 0.25, %v3434_v29  ;;  %v3691_v16 = vmax.f32 %v13149_v39, %v13154_v4  ;;  %16939 = vst [vmem:[#allocation132_spill] sm:$0xff] %v13170_v19  ;;  %v13179_v39 = vpop.xlane.xlu1 %4793 }
 0x657   : > { %v13163_v38 = vadd.f32 %v10048_v48, %v3547_v17  ;;  %v10050_v17 = vld [vmem:[%s16191_s2 + $0x140] sm:$0xff]  ;;  %16941 = vst [vmem:[#allocation134_spill] sm:$0xff] %v13179_v39 }
 0x658   : > { %v13168_v51 = vadd.f32 %v10049_v49, %v3548_v44  ;;  %v3438_v7 = vpop.f32.mrb[136].mxu0  ;;  %3692 = vmax.xlane.f32.xlu1 %v3691_v16  ;;  %v10051_v16 = vld [vmem:[%s16191_s2 + $0x148] sm:$0xff] }
 0x659   : > { %16937 = vst [vmem:[#allocation130_spill] sm:$0xff] %v13163_v38  ;;  %v3549_v29 = vmul.f32 0.25, %v3438_v7  ;;  %v3440_v33 = vpop.f32.mrb[137].mxu0 }
 0x65a   : > { %16938 = vst [vmem:[#allocation131_spill] sm:$0xff] %v13168_v51  ;;  %v3550_v14 = vmul.f32 0.25, %v3440_v33  ;;  %v3694_v4 = vmax.f32 %v13163_v38, %v13168_v51  ;;  %v13186_v33 = vpop.xlane.xlu0 %5332 }
 0x65b   : > { %v13177_v48 = vadd.f32 %v10050_v17, %v3549_v29  ;;  %16943 = vst [vmem:[#allocation136_spill] sm:$0xff] %v13186_v33  ;;  %v10052_v29 = vld [vmem:[%s16191_s2 + $0x150] sm:$0xff] }
 0x65c   : > { %v13184_v44 = vadd.f32 %v10051_v16, %v3550_v14  ;;  %v3444_v49 = vpop.f32.mrb[138].mxu0  ;;  %3695 = vmax.xlane.f32.xlu0 %v3694_v4  ;;  %v10053_v14 = vld [vmem:[%s16191_s2 + $0x158] sm:$0xff] }
 0x65d   : > { %16940 = vst [vmem:[#allocation133_spill] sm:$0xff] %v13177_v48  ;;  %v3551_v7 = vmul.f32 0.25, %v3444_v49  ;;  %v3446_v51 = vpop.f32.mrb[139].mxu0 }
 0x65e   : > { %16942 = vst [vmem:[#allocation135_spill] sm:$0xff] %v13184_v44  ;;  %v3552_v38 = vmul.f32 0.25, %v3446_v51  ;;  %v3697_v19 = vmax.f32 %v13177_v48, %v13184_v44  ;;  %v13200_v51 = vpop.xlane.xlu1 %5305 }
 0x65f   : > { %v13193_v17 = vadd.f32 %v10052_v29, %v3551_v7  ;;  %16946 = vst [vmem:[#allocation139_spill] sm:$0xff] %v13200_v51  ;;  %v5259_v7 = vmul.f32 %v12840_v6, %v12734_v0  ;;  %v13206_v29 = vpop.xlane.xlu0 %4823  ;;  %v5267_v0 = vmul.f32 %v12844_v55, %v12813_v11 }
 0x660   : > { %v13198_v16 = vadd.f32 %v10053_v14, %v3552_v38  ;;  %v3450_v4 = vpop.f32.mrb[140].mxu0  ;;  %3698 = vmax.xlane.f32.xlu1 %v3697_v19  ;;  %16947 = vst [vmem:[#allocation140_spill] sm:$0xff] %v13206_v29  ;;  %v10054_v38 = vld [vmem:[%s16191_s2 + $0x160] sm:$0xff]  ;;  %v10055_v19 = vld [vmem:[%s16191_s2 + $0x168] sm:$0xff] }
 0x661   : > { %16944 = vst [vmem:[#allocation137_spill] sm:$0xff] %v13193_v17  ;;  %v3553_v49 = vmul.f32 0.25, %v3450_v4  ;;  %v3452_v39 = vpop.f32.mrb[141].mxu0 }
 0x662   : > { %16945 = vst [vmem:[#allocation138_spill] sm:$0xff] %v13198_v16  ;;  %v3554_v33 = vmul.f32 0.25, %v3452_v39  ;;  %v3700_v44 = vmax.f32 %v13193_v17, %v13198_v16 }
 0x663   : > { %v13211_v14 = vadd.f32 %v10054_v38, %v3553_v49  ;;  %v10056_v49 = vld [vmem:[%s16191_s2 + $0x170] sm:$0xff]  ;;  %v13235_v55 = vpop.xlane.xlu0 %5335 }
 0x664   : > { %v13216_v4 = vadd.f32 %v10055_v19, %v3554_v33  ;;  %v3456_v39 = vpop.f32.mrb[142].mxu0  ;;  %3701 = vmax.xlane.f32.xlu0 %v3700_v44  ;;  %v5361_v33 = vsel %vm4791_vm6, %v5259_v7, 0.0  ;;  %v13228_v19 = vpop.xlane.xlu1 %5308  ;;  %v10057_v44 = vld [vmem:[%s16191_s2 + $0x178] sm:$0xff]  ;;  %v10058_v7 = vld [vmem:[%s16193_s4 + $0x60] sm:$0xff] }
 0x665   : > { %16948 = vst [vmem:[#allocation141_spill] sm:$0xff] %v13211_v14  ;;  %v3555_v48 = vmul.f32 0.25, %v3456_v39  ;;  %v3458_v16 = vpop.f32.mrb[143].mxu0 }
 0x666   : > { %16949 = vst [vmem:[#allocation142_spill] sm:$0xff] %v13216_v4  ;;  %v3556_v17 = vmul.f32 0.25, %v3458_v16  ;;  %v3703_v6 = vmax.f32 %v13211_v14, %v13216_v4 }
 0x667   : > { %v13225_v38 = vadd.f32 %v10056_v49, %v3555_v48  ;;  %v4739_v49 = vmul.f32 %v10058_v7, %v12655_v20  ;;  %v13262_v29 = vpop.xlane.xlu0 %4826 }
 0x668   : > { %v13233_v16 = vadd.f32 %v10057_v44, %v3556_v17  ;;  %v3462_v39 = vpop.f32.mrb[144].mxu0  ;;  %3704 = vmax.xlane.f32.xlu1 %v3703_v6  ;;  %5362 = vadd.xlane.f32.xlu0 %v5361_v33  ;;  %v10059_v17 = vld [vmem:[%s16191_s2 + $0x180] sm:$0xff]  ;;  %v5385_v33 = vsel %vm4791_vm6, %v5267_v0, 0.0  ;;  %v13254_v7 = vpop.xlane.xlu1 %4799  ;;  %16954 = vst [vmem:[#allocation147_spill] sm:$0xff] %v13262_v29 }
 0x669   : > { %16950 = vst [vmem:[#allocation143_spill] sm:$0xff] %v13225_v38  ;;  %v3557_v11 = vmul.f32 0.25, %v3462_v39  ;;  %v3464_v4 = vpop.f32.mrb[145].mxu0  ;;  %v10061_v0 = vld [vmem:[%s16193_s4 + $0xe0] sm:$0xff] }
 0x66a   : > { %16951 = vst [vmem:[#allocation144_spill] sm:$0xff] %v13233_v16  ;;  %v3558_v14 = vmul.f32 0.25, %v3464_v4  ;;  %v3706_v48 = vmax.f32 %v13225_v38, %v13233_v16  ;;  %v10060_v4 = vld [vmem:[%s16191_s2 + $0x188] sm:$0xff] }
 0x66b   : > { %v13246_v6 = vadd.f32 %v10059_v17, %v3557_v11  ;;  %v4755_v17 = vmul.f32 %v10061_v0, %v12820_v31 }
 0x66c   : > { %v13252_v44 = vadd.f32 %v10060_v4, %v3558_v14  ;;  %v3468_v39 = vpop.f32.mrb[146].mxu0  ;;  %3707 = vmax.xlane.f32.xlu1 %v3706_v48  ;;  %5386 = vadd.xlane.f32.xlu0 %v5385_v33  ;;  %v10062_v14 = vld [vmem:[%s16191_s2 + $0x190] sm:$0xff]  ;;  %v4828_v33 = vsel %vm4791_vm6, %v4739_v49, 0.0  ;;  %v10064_v49 = vld [vmem:[%s16191_s2 + $0x1a0] sm:$0xff] }
 0x66d   : > { %16952 = vst [vmem:[#allocation145_spill] sm:$0xff] %v13246_v6  ;;  %v3559_v16 = vmul.f32 0.25, %v3468_v39  ;;  %v3470_v38 = vpop.f32.mrb[147].mxu0 }
 0x66e   : > { %16953 = vst [vmem:[#allocation146_spill] sm:$0xff] %v13252_v44  ;;  %v3560_v51 = vmul.f32 0.25, %v3470_v38  ;;  %v3709_v11 = vmax.f32 %v13246_v6, %v13252_v44  ;;  %v10063_v38 = vld [vmem:[%s16191_s2 + $0x198] sm:$0xff] }
 0x66f   : > { %v13267_v48 = vadd.f32 %v10062_v14, %v3559_v16  ;;  %v5252_v16 = vmul.f32 %v12864_v54, %v12655_v20  ;;  %v13292_v54 = vpop.xlane.xlu0 %5338 }
 0x670   : > { %v13273_v4 = vadd.f32 %v10063_v38, %v3560_v51  ;;  %v3474_v39 = vpop.f32.mrb[148].mxu0  ;;  %3710 = vmax.xlane.f32.xlu1 %v3709_v11  ;;  %4829 = vadd.xlane.f32.xlu0 %v4828_v33  ;;  %v4876_v51 = vsel %vm4791_vm6, %v4755_v17, 0.0  ;;  %v13285_v38 = vpop.xlane.xlu1 %5311  ;;  %v5268_v17 = vmul.f32 %v12868_v26, %v12820_v31 }
 0x671   : > { %16955 = vst [vmem:[#allocation148_spill] sm:$0xff] %v13267_v48  ;;  %v3561_v0 = vmul.f32 0.25, %v3474_v39  ;;  %v3476_v44 = vpop.f32.mrb[149].mxu0 }
 0x672   : > { %16956 = vst [vmem:[#allocation149_spill] sm:$0xff] %v13273_v4  ;;  %v3562_v6 = vmul.f32 0.25, %v3476_v44  ;;  %v3712_v29 = vmax.f32 %v13267_v48, %v13273_v4  ;;  %v10065_v44 = vld [vmem:[%s16191_s2 + $0x1a8] sm:$0xff] }
 0x673   : > { %v13282_v14 = vadd.f32 %v10064_v49, %v3561_v0  ;;  %v10066_v49 = vld [vmem:[%s16191_s2 + $0x1b0] sm:$0xff]  ;;  %v13311_v26 = vpop.xlane.xlu0 %4844 }
 0x674   : > { %v13290_v11 = vadd.f32 %v10065_v44, %v3562_v6  ;;  %v3480_v33 = vpop.f32.mrb[150].mxu0  ;;  %4877 = vadd.xlane.f32.xlu0 %v4876_v51  ;;  %3713 = vmax.xlane.f32.xlu1 %v3712_v29  ;;  %v5340_v51 = vsel %vm4791_vm6, %v5252_v16, 0.0  ;;  %v13304_v29 = vpop.xlane.xlu1 %4817  ;;  %16961 = vst [vmem:[#allocation154_spill] sm:$0xff] %v13311_v26  ;;  %v10068_v16 = vld [vmem:[%s16193_s4 + $0x68] sm:$0xff] }
 0x675   : > { %16957 = vst [vmem:[#allocation150_spill] sm:$0xff] %v13282_v14  ;;  %v3563_v39 = vmul.f32 0.25, %v3480_v33  ;;  %v3482_v20 = vpop.f32.mrb[151].mxu0 }
 0x676   : > { %16958 = vst [vmem:[#allocation151_spill] sm:$0xff] %v13290_v11  ;;  %v3564_v4 = vmul.f32 0.25, %v3482_v20  ;;  %v3715_v0 = vmax.f32 %v13282_v14, %v13290_v11  ;;  %v10067_v20 = vld [vmem:[%s16191_s2 + $0x1b8] sm:$0xff] }
 0x677   : > { %v13301_v6 = vadd.f32 %v10066_v49, %v3563_v39  ;;  %v4740_v49 = vmul.f32 %v10068_v16, %v12665_v47 }
 0x678   : > { %v13309_v44 = vadd.f32 %v10067_v20, %v3564_v4  ;;  %v3486_v33 = vpop.f32.mrb[152].mxu0  ;;  %3716 = vmax.xlane.f32.xlu1 %v3715_v0  ;;  %5341 = vadd.xlane.f32.xlu0 %v5340_v51  ;;  %v10069_v4 = vld [vmem:[%s16191_s2 + $0x1c0] sm:$0xff]  ;;  %v5388_v51 = vsel %vm4791_vm6, %v5268_v17, 0.0  ;;  %v13332_v48 = vpop.xlane.xlu1 %5329  ;;  %v10071_v17 = vld [vmem:[%s16193_s4 + $0xe8] sm:$0xff] }
 0x679   : > { %16959 = vst [vmem:[#allocation152_spill] sm:$0xff] %v13301_v6  ;;  %v3565_v31 = vmul.f32 0.25, %v3486_v33  ;;  %v3488_v11 = vpop.f32.mrb[153].mxu0 }
 0x67a   : > { %16960 = vst [vmem:[#allocation153_spill] sm:$0xff] %v13309_v44  ;;  %v3566_v14 = vmul.f32 0.25, %v3488_v11  ;;  %v3718_v39 = vmax.f32 %v13301_v6, %v13309_v44  ;;  %v10070_v11 = vld [vmem:[%s16191_s2 + $0x1c8] sm:$0xff]  ;;  %v13330_v44 = vpop.xlane.xlu0 %4850 }
 0x67b   : > { %v13322_v0 = vadd.f32 %v10069_v4, %v3565_v31  ;;  %16964 = vst [vmem:[#allocation157_spill] sm:$0xff] %v13330_v44 }
 0x67c   : > { %v13328_v20 = vadd.f32 %v10070_v11, %v3566_v14  ;;  %v3492_v33 = vpop.f32.mrb[154].mxu0  ;;  %3719 = vmax.xlane.f32.xlu1 %v3718_v39  ;;  %5389 = vadd.xlane.f32.xlu0 %v5388_v51  ;;  %v4756_v14 = vmul.f32 %v10071_v17, %v12827_v27  ;;  %v10072_v39 = vld [vmem:[%s16191_s2 + $0x1d0] sm:$0xff]  ;;  %v4831_v51 = vsel %vm4791_vm6, %v4740_v49, 0.0  ;;  %v5253_v49 = vmul.f32 %v12918_v62, %v12665_v47 }
 0x67d   : > { %16962 = vst [vmem:[#allocation155_spill] sm:$0xff] %v13322_v0  ;;  %v3567_v16 = vmul.f32 0.25, %v3492_v33  ;;  %v3494_v6 = vpop.f32.mrb[155].mxu0 }
 0x67e   : > { %16963 = vst [vmem:[#allocation156_spill] sm:$0xff] %v13328_v20  ;;  %v3568_v26 = vmul.f32 0.25, %v3494_v6  ;;  %v3721_v31 = vmax.f32 %v13322_v0, %v13328_v20  ;;  %v10073_v6 = vld [vmem:[%s16191_s2 + $0x1d8] sm:$0xff]  ;;  %v13351_v20 = vpop.xlane.xlu0 %4868 }
 0x67f   : > { %v13343_v4 = vadd.f32 %v10072_v39, %v3567_v16  ;;  %v10074_v39 = vld [vmem:[%s16191_s2 + $0x1e0] sm:$0xff] }
 0x680   : > { %v13349_v11 = vadd.f32 %v10073_v6, %v3568_v26  ;;  %v3498_v33 = vpop.f32.mrb[156].mxu0  ;;  %3722 = vmax.xlane.f32.xlu1 %v3721_v31  ;;  %4832 = vadd.xlane.f32.xlu0 %v4831_v51  ;;  %v4879_v31 = vsel %vm4791_vm6, %v4756_v14, 0.0  ;;  %v13363_v51 = vpop.xlane.xlu1 %4820  ;;  %v5269_v14 = vmul.f32 %v12941_v10, %v12827_v27 }
 0x681   : > { %16965 = vst [vmem:[#allocation158_spill] sm:$0xff] %v13343_v4  ;;  %v3569_v17 = vmul.f32 0.25, %v3498_v33  ;;  %v3500_v0 = vpop.f32.mrb[157].mxu0 }
 0x682   : > { %16966 = vst [vmem:[#allocation159_spill] sm:$0xff] %v13349_v11  ;;  %v3570_v44 = vmul.f32 0.25, %v3500_v0  ;;  %v3724_v16 = vmax.f32 %v13343_v4, %v13349_v11  ;;  %v10075_v0 = vld [vmem:[%s16191_s2 + $0x1e8] sm:$0xff]  ;;  %v10076_v4 = vld [vmem:[%s16191_s2 + $0x1f0] sm:$0xff] }
 0x683   : > { %v13360_v26 = vadd.f32 %v10074_v39, %v3569_v17  ;;  %v13374_v39 = vpop.xlane.xlu0 %5380 }
 0x684   : > { %v13368_v6 = vadd.f32 %v10075_v0, %v3570_v44  ;;  %v3504_v33 = vpop.f32.mrb[158].mxu0  ;;  %3725 = vmax.xlane.f32.xlu1 %v3724_v16  ;;  %4880 = vadd.xlane.f32.xlu0 %v4879_v31  ;;  %v5343_v16 = vsel %vm4791_vm6, %v5253_v49, 0.0  ;;  %v13382_v31 = vpop.xlane.xlu1 %4841  ;;  %v5256_v49 = vmul.f32 %v12836_v37, %v12690_v32 }
 0x685   : > { %16967 = vst [vmem:[#allocation160_spill] sm:$0xff] %v13360_v26  ;;  %v3571_v62 = vmul.f32 0.25, %v3504_v33  ;;  %v3506_v47 = vpop.f32.mrb[159].mxu0 }
 0x686   : > { %16968 = vst [vmem:[#allocation161_spill] sm:$0xff] %v13368_v6  ;;  %v3572_v11 = vmul.f32 0.25, %v3506_v47  ;;  %v3727_v17 = vmax.f32 %v13360_v26, %v13368_v6  ;;  %v10077_v47 = vld [vmem:[%s16191_s2 + $0x1f8] sm:$0xff]  ;;  %v5352_v27 = vsel %vm4791_vm6, %v5256_v49, 0.0 }
 0x687   : > { %v13379_v44 = vadd.f32 %v10076_v4, %v3571_v62  ;;  %v10078_v4 = vld [vmem:[%s16193_s4 + $0x70] sm:$0xff]  ;;  %v5391_v62 = vsel %vm4791_vm6, %v5269_v14, 0.0  ;;  %v10080_v14 = vld [vmem:[%s16193_s4 + $0x20] sm:$0xff] }
 0x688   : > { %v13387_v0 = vadd.f32 %v10077_v47, %v3572_v11  ;;  %3728 = vmax.xlane.f32.xlu1 %v3727_v17  ;;  %5344 = vadd.xlane.f32.xlu0 %v5343_v16  ;;  %v4741_v33 = vmul.f32 %v10078_v4, %v12674_v42  ;;  %v13398_v11 = vpop.xlane.xlu0 %4871  ;;  %v13400_v17 = vpop.xlane.xlu1 %5356  ;;  %v5264_v16 = vmul.f32 %v12838_v41, %v12778_v63  ;;  %v10079_v47 = vld [vmem:[%s16193_s4 + $0xf0] sm:$0xff] }
 0x689   : > { %16969 = vst [vmem:[#allocation162_spill] sm:$0xff] %v13379_v44  ;;  %v4757_v4 = vmul.f32 %v10079_v47, %v12832_v34  ;;  %v5254_v41 = vmul.f32 %v13006_v3, %v12674_v42 }
 0x68a   : > { %16970 = vst [vmem:[#allocation163_spill] sm:$0xff] %v13387_v0  ;;  %v3730_v10 = vmax.f32 %v13379_v44, %v13387_v0  ;;  %v4834_v37 = vsel %vm4791_vm6, %v4741_v33, 0.0  ;;  %v5376_v63 = vsel %vm4791_vm6, %v5264_v16, 0.0 }
 0x68b   : > { %v4882_v47 = vsel %vm4791_vm6, %v4757_v4, 0.0  ;;  %v5346_v3 = vsel %vm4791_vm6, %v5254_v41, 0.0  ;;  %v5260_v41 = vmul.f32 %v12862_v60, %v12746_v8 }
 0x68c   : > { %3731 = vmax.xlane.f32.xlu1 %v3730_v10  ;;  %5392 = vadd.xlane.f32.xlu0 %v5391_v62  ;;  %v4731_v10 = vmul.f32 %v10080_v14, %v12554_v24  ;;  %v13416_v62 = vpop.xlane.xlu0 %5383  ;;  %v13420_v49 = vpop.xlane.xlu1 %4847 }
 0x68d   : > { %v5364_v60 = vsel %vm4791_vm6, %v5260_v41, 0.0 }
 0x690   : > { %5353 = vadd.xlane.f32.xlu1 %v5352_v27  ;;  %4835 = vadd.xlane.f32.xlu0 %v4834_v37  ;;  %v10081_v27 = vld [vmem:[%s16193_s4 + $0xa0] sm:$0xff]  ;;  %v4804_v37 = vsel %vm4791_vm6, %v4731_v10, 0.0  ;;  %v13428_v14 = vpop.xlane.xlu0 %4874  ;;  %v13430_v16 = vpop.xlane.xlu1 %5359 }
 0x691   : > { %v4747_v33 = vmul.f32 %v10081_v27, %v12746_v8 }
 0x693   : > { %v4852_v4 = vsel %vm4791_vm6, %v4747_v33, 0.0 }
 0x694   : > { %5377 = vadd.xlane.f32.xlu1 %v5376_v63  ;;  %4883 = vadd.xlane.f32.xlu0 %v4882_v47  ;;  %v5244_v63 = vmul.f32 %v12858_v28, %v12554_v24  ;;  %v13435_v32 = vpop.xlane.xlu1 %4865  ;;  %v10082_v28 = vld [vmem:[%s16193_s4 + $0x28] sm:$0xff] }
 0x695   : > { %v4732_v33 = vmul.f32 %v10082_v28, %v12566_v46  ;;  %v5245_v28 = vmul.f32 %v12878_v21, %v12566_v46 }
 0x698   : > { %4805 = vadd.xlane.f32.xlu1 %v4804_v37  ;;  %5347 = vadd.xlane.f32.xlu0 %v5346_v3  ;;  %v5316_v37 = vsel %vm4791_vm6, %v5244_v63, 0.0 }
 0x69c   : > { %4853 = vadd.xlane.f32.xlu1 %v4852_v4 }
 0x69d   : > { %v3639_v47 = vpop.xlane.xlu0 %3638 }
 0x69e   : > { %v3733_v27 = vsub.f32 %v12883_v58, %v3639_v47  ;;  %v3734_v10 = vsub.f32 %v12888_v15, %v3639_v47 }
 0x6a0   : > { %v3797_v3 = vmul.f32 1.442695, %v3733_v27  ;;  %v3799_v42 = vmul.f32 1.442695, %v3734_v10  ;;  %5317 = vadd.xlane.f32.xlu1 %v5316_v37  ;;  %v4807_v10 = vsel %vm4791_vm6, %v4732_v33, 0.0  ;;  %v10083_v37 = vld [vmem:[%s16193_s4 + $0xa8] sm:$0xff] }
 0x6a1   : > { %v3642_v4 = vpop.xlane.xlu1 %3641 }
 0x6a2   : > { %9664 = vpow2.f32 %v3797_v3  ;;  %v3735_v58 = vsub.f32 %v12895_v45, %v3642_v4  ;;  %v3736_v15 = vsub.f32 %v12902_v18, %v3642_v4  ;;  %v4748_v3 = vmul.f32 %v10083_v37, %v12754_v52 }
 0x6a3   : > { %9666 = vpow2.f32 %v3799_v42 }
 0x6a4   : > { %5365 = vadd.xlane.f32.xlu1 %v5364_v60  ;;  %v3801_v63 = vmul.f32 1.442695, %v3735_v58  ;;  %v3803_v47 = vmul.f32 1.442695, %v3736_v15  ;;  %v4855_v15 = vsel %vm4791_vm6, %v4748_v3, 0.0 }
 0x6a5   : > { %v3645_v27 = vpop.xlane.xlu1 %3644 }
 0x6a6   : > { %9668 = vpow2.f32 %v3801_v63  ;;  %v3737_v42 = vsub.f32 %v12909_v40, %v3645_v27  ;;  %v3738_v45 = vsub.f32 %v12916_v61, %v3645_v27 }
 0x6a7   : > { %9670 = vpow2.f32 %v3803_v47  ;;  %v5261_v47 = vmul.f32 %v12904_v57, %v12754_v52  ;;  %v10084_v57 = vld [vmem:[%s16193_s4 + $0x30] sm:$0xff] }
 0x6a8   : > { %4808 = vadd.xlane.f32.xlu1 %v4807_v10  ;;  %v3805_v18 = vmul.f32 1.442695, %v3737_v42  ;;  %v3807_v41 = vmul.f32 1.442695, %v3738_v45  ;;  %v5319_v10 = vsel %vm4791_vm6, %v5245_v28, 0.0  ;;  %v17004_v52 = vld [vmem:[#allocation114_spill] sm:$0xff] }
 0x6a9   : > { %v3648_v4 = vpop.xlane.xlu1 %3647 }
 0x6aa   : > { %9672 = vpow2.f32 %v3805_v18  ;;  %v3739_v33 = vsub.f32 %v12925_v53, %v3648_v4  ;;  %v3740_v58 = vsub.f32 %v12932_v50, %v3648_v4  ;;  %v4733_v18 = vmul.f32 %v10084_v57, %v12576_v30 }
 0x6ab   : > { %9674 = vpow2.f32 %v3807_v41 }
 0x6ac   : > { %v13461_v60 = vpop.eup %9664  ;;  %4856 = vadd.xlane.f32.xlu1 %v4855_v15  ;;  %v3809_v61 = vmul.f32 1.442695, %v3739_v33  ;;  %v3811_v63 = vmul.f32 1.442695, %v3740_v58 }
 0x6ad   : > { %v13463_v40 = vpop.eup %9666  ;;  %v3651_v21 = vpop.xlane.xlu1 %3650 }
 0x6ae   : > { %v3925_v27 = vadd.f32 %v13463_v40, %v13461_v60  ;;  %9676 = vpow2.f32 %v3809_v61  ;;  %v3741_v53 = vsub.f32 %v12939_v1, %v3651_v21  ;;  %v3742_v50 = vsub.f32 %v12946_v43, %v3651_v21 }
 0x6af   : > { %9678 = vpow2.f32 %v3811_v63  ;;  %v5367_v43 = vsel %vm4791_vm6, %v5261_v47, 0.0  ;;  %v10085_v63 = vld [vmem:[%s16193_s4 + $0xb0] sm:$0xff] }
 0x6b0   : > { %3926 = vadd.xlane.f32.xlu0 %v3925_v27  ;;  %5320 = vadd.xlane.f32.xlu1 %v5319_v10  ;;  %v13472_v37 = vpop.eup %9668  ;;  %v3813_v3 = vmul.f32 1.442695, %v3741_v53  ;;  %v3815_v42 = vmul.f32 1.442695, %v3742_v50 }
 0x6b1   : > { %v13474_v45 = vpop.eup %9670  ;;  %v3654_v1 = vpop.xlane.xlu1 %3653 }
 0x6b2   : > { %9680 = vpow2.f32 %v3813_v3  ;;  %v3743_v41 = vsub.f32 %v12955_v23, %v3654_v1  ;;  %v3744_v28 = vsub.f32 %v12960_v12, %v3654_v1  ;;  %v3928_v4 = vadd.f32 %v13474_v45, %v13472_v37 }
 0x6b3   : > { %9682 = vpow2.f32 %v3815_v42  ;;  %v4749_v23 = vmul.f32 %v10085_v63, %v12762_v59  ;;  %v4810_v12 = vsel %vm4791_vm6, %v4733_v18, 0.0 }
 0x6b4   : > { %5368 = vadd.xlane.f32.xlu1 %v5367_v43  ;;  %v13485_v33 = vpop.eup %9672  ;;  %v3817_v58 = vmul.f32 1.442695, %v3743_v41  ;;  %v3819_v15 = vmul.f32 1.442695, %v3744_v28  ;;  %3929 = vadd.xlane.f32.xlu0 %v3928_v4 }
 0x6b5   : > { %16971 = vst [vmem:[#allocation164_spill] sm:$0xff] %v13485_v33  ;;  %v13487_v61 = vpop.eup %9674  ;;  %v3657_v47 = vpop.xlane.xlu1 %3656  ;;  %v4858_v43 = vsel %vm4791_vm6, %v4749_v23, 0.0 }
 0x6b6   : > { %16972 = vst [vmem:[#allocation165_spill] sm:$0xff] %v13487_v61  ;;  %9684 = vpow2.f32 %v3817_v58  ;;  %v3745_v21 = vsub.f32 %v12971_v36, %v3657_v47  ;;  %v3746_v27 = vsub.f32 %v12976_v22, %v3657_v47  ;;  %v3931_v53 = vadd.f32 %v13487_v61, %v13485_v33 }
 0x6b7   : > { %9686 = vpow2.f32 %v3819_v15  ;;  %v5246_v36 = vmul.f32 %v12966_v9, %v12576_v30  ;;  %v5262_v15 = vmul.f32 %v12992_v56, %v12762_v59  ;;  %v16999_v59 = vld [vmem:[#allocation111_spill] sm:$0xff]  ;;  %v17005_v30 = vld [vmem:[#allocation34_spill] sm:$0xff] }
 0x6b8   : > { %4811 = vadd.xlane.f32.xlu1 %v4810_v12  ;;  %v13498_v50 = vpop.eup %9676  ;;  %v3821_v10 = vmul.f32 1.442695, %v3745_v21  ;;  %v3823_v3 = vmul.f32 1.442695, %v3746_v27  ;;  %3932 = vadd.xlane.f32.xlu0 %v3931_v53 }
 0x6b9   : > { %16973 = vst [vmem:[#allocation166_spill] sm:$0xff] %v13498_v50  ;;  %v3660_v42 = vpop.xlane.xlu0 %3659  ;;  %v13500_v57 = vpop.eup %9678  ;;  %v5322_v23 = vsel %vm4791_vm6, %v5246_v36, 0.0 }
 0x6ba   : > { %16974 = vst [vmem:[#allocation167_spill] sm:$0xff] %v13500_v57  ;;  %v3747_v18 = vsub.f32 %v12983_v25, %v3660_v42  ;;  %v3748_v1 = vsub.f32 %v12990_v2, %v3660_v42  ;;  %9688 = vpow2.f32 %v3821_v10  ;;  %v3934_v22 = vadd.f32 %v13500_v57, %v13498_v50  ;;  %v10086_v10 = vld [vmem:[%s16193_s4 + $0x38] sm:$0xff] }
 0x6bb   : > { %9690 = vpow2.f32 %v3823_v3  ;;  %v16980_v3 = vld [vmem:[#allocation46_spill] sm:$0xff] }
 0x6bc   : > { %v3825_v41 = vmul.f32 1.442695, %v3747_v18  ;;  %v3827_v28 = vmul.f32 1.442695, %v3748_v1  ;;  %4859 = vadd.xlane.f32.xlu1 %v4858_v43  ;;  %v13509_v4 = vpop.eup %9680  ;;  %3935 = vadd.xlane.f32.xlu0 %v3934_v22  ;;  %v4734_v42 = vmul.f32 %v10086_v10, %v16980_v3  ;;  %v5370_v1 = vsel %vm4791_vm6, %v5262_v15, 0.0  ;;  %v16988_v10 = vld [vmem:[#allocation33_spill] sm:$0xff] }
 0x6bd   : > { %16975 = vst [vmem:[#allocation168_spill] sm:$0xff] %v13509_v4  ;;  %v3663_v58 = vpop.xlane.xlu1 %3662  ;;  %v13511_v25 = vpop.eup %9682  ;;  %v5247_v24 = vmul.f32 %v17005_v30, %v16980_v3 }
 0x6be   : > { %16976 = vst [vmem:[#allocation169_spill] sm:$0xff] %v13511_v25  ;;  %9692 = vpow2.f32 %v3825_v41  ;;  %v3749_v2 = vsub.f32 %v12999_v13, %v3663_v58  ;;  %v3750_v9 = vsub.f32 %v13004_v5, %v3663_v58  ;;  %v3937_v63 = vadd.f32 %v13511_v25, %v13509_v4  ;;  %v16979_v5 = vld [vmem:[#allocation26_spill] sm:$0xff] }
 0x6bf   : > { %9694 = vpow2.f32 %v3827_v28  ;;  %v16983_v28 = vld [vmem:[#allocation29_spill] sm:$0xff]  ;;  %v4813_v15 = vsel %vm4791_vm6, %v4734_v42, 0.0 }
 0x6c0   : > { %v3829_v47 = vmul.f32 1.442695, %v3749_v2  ;;  %v3831_v12 = vmul.f32 1.442695, %v3750_v9  ;;  %5323 = vadd.xlane.f32.xlu1 %v5322_v23  ;;  %v13520_v21 = vpop.eup %9684  ;;  %3938 = vadd.xlane.f32.xlu0 %v3937_v63  ;;  %v16984_v2 = vld [vmem:[#allocation31_spill] sm:$0xff] }
 0x6c1   : > { %16977 = vst [vmem:[#allocation170_spill] sm:$0xff] %v13520_v21  ;;  %v3666_v27 = vpop.xlane.xlu0 %3665  ;;  %v13522_v53 = vpop.eup %9686 }
 0x6c2   : > { %16978 = vst [vmem:[#allocation171_spill] sm:$0xff] %v13522_v53  ;;  %9696 = vpow2.f32 %v3829_v47  ;;  %v3751_v13 = vsub.f32 %v13015_v35, %v3666_v27  ;;  %v3752_v56 = vsub.f32 %v16979_v5, %v3666_v27  ;;  %v3940_v18 = vadd.f32 %v13522_v53, %v13520_v21  ;;  %v16986_v47 = vld [vmem:[#allocation28_spill] sm:$0xff] }
 0x6c3   : > { %9698 = vpow2.f32 %v3831_v12  ;;  %v5270_v12 = vmul.f32 %v16986_v47, %v12832_v34 }
 0x6c4   : > { %v3833_v36 = vmul.f32 1.442695, %v3751_v13  ;;  %v3835_v22 = vmul.f32 1.442695, %v3752_v56  ;;  %5371 = vadd.xlane.f32.xlu1 %v5370_v1  ;;  %v13533_v43 = vpop.eup %9688  ;;  %3941 = vadd.xlane.f32.xlu0 %v3940_v18  ;;  %v16989_v1 = vld [vmem:[#allocation32_spill] sm:$0xff] }
 0x6c5   : > { %16981 = vst [vmem:[#allocation26_spill] sm:$0xff] %v13533_v43  ;;  %v3669_v35 = vpop.xlane.xlu1 %3668  ;;  %v13535_v41 = vpop.eup %9690 }
 0x6c6   : > { %16982 = vst [vmem:[#allocation172_spill] sm:$0xff] %v13535_v41  ;;  %9700 = vpow2.f32 %v3833_v36  ;;  %v3753_v58 = vsub.f32 %v16983_v28, %v3669_v35  ;;  %v3754_v9 = vsub.f32 %v16984_v2, %v3669_v35  ;;  %v3943_v63 = vadd.f32 %v13535_v41, %v13533_v43  ;;  %v10087_v35 = vld [vmem:[%s16193_s4 + $0x78] sm:$0xff] }
 0x6c7   : > { %9702 = vpow2.f32 %v3835_v22  ;;  %v16991_v28 = vld [vmem:[#allocation63_spill] sm:$0xff] }
 0x6c8   : > { %v13542_v23 = vpop.eup %9692  ;;  %v3837_v27 = vmul.f32 1.442695, %v3753_v58  ;;  %v3839_v13 = vmul.f32 1.442695, %v3754_v9  ;;  %4814 = vadd.xlane.f32.xlu1 %v4813_v15  ;;  %3944 = vadd.xlane.f32.xlu0 %v3943_v63  ;;  %v4742_v58 = vmul.f32 %v10087_v35, %v16991_v28  ;;  %v5394_v63 = vsel %vm4791_vm6, %v5270_v12, 0.0 }
 0x6c9   : > { %16985 = vst [vmem:[#allocation29_spill] sm:$0xff] %v13542_v23  ;;  %v13546_v5 = vpop.eup %9694  ;;  %v3672_v56 = vpop.xlane.xlu0 %3671 }
 0x6ca   : > { %16987 = vst [vmem:[#allocation31_spill] sm:$0xff] %v13546_v5  ;;  %9704 = vpow2.f32 %v3837_v27  ;;  %v3755_v18 = vsub.f32 %v16988_v10, %v3672_v56  ;;  %v3756_v36 = vsub.f32 %v16989_v1, %v3672_v56  ;;  %v3946_v42 = vadd.f32 %v13546_v5, %v13542_v23  ;;  %v16993_v27 = vld [vmem:[#allocation37_spill] sm:$0xff]  ;;  %v16994_v56 = vld [vmem:[#allocation36_spill] sm:$0xff] }
 0x6cb   : > { %9706 = vpow2.f32 %v3839_v13 }
 0x6cc   : > { %v13552_v22 = vpop.eup %9696  ;;  %v3841_v2 = vmul.f32 1.442695, %v3755_v18  ;;  %v3843_v9 = vmul.f32 1.442695, %v3756_v36  ;;  %3947 = vadd.xlane.f32.xlu1 %v3946_v42  ;;  %5395 = vadd.xlane.f32.xlu0 %v5394_v63  ;;  %v10088_v18 = vld [vmem:[%s16193_s4 + $0xb8] sm:$0xff]  ;;  %v16995_v36 = vld [vmem:[#allocation8_spill] sm:$0xff] }
 0x6cd   : > { %16990 = vst [vmem:[#allocation28_spill] sm:$0xff] %v13552_v22  ;;  %v13559_v15 = vpop.eup %9698  ;;  %v3675_v47 = vpop.xlane.xlu1 %3674  ;;  %v4750_v35 = vmul.f32 %v10088_v18, %v16995_v36 }
 0x6ce   : > { %16992 = vst [vmem:[#allocation33_spill] sm:$0xff] %v13559_v15  ;;  %9708 = vpow2.f32 %v3841_v2  ;;  %v3757_v13 = vsub.f32 %v16993_v27, %v3675_v47  ;;  %v3758_v10 = vsub.f32 %v16994_v56, %v3675_v47  ;;  %v3949_v1 = vadd.f32 %v13559_v15, %v13552_v22  ;;  %v16998_v56 = vld [vmem:[#allocation38_spill] sm:$0xff] }
 0x6cf   : > { %9710 = vpow2.f32 %v3843_v9  ;;  %v4837_v2 = vsel %vm4791_vm6, %v4742_v58, 0.0  ;;  %v4861_v9 = vsel %vm4791_vm6, %v4750_v35, 0.0  ;;  %v10089_v58 = vld [vmem:[%s16193_s4 + $0xf8] sm:$0xff]  ;;  %v17039_v22 = vld [vmem:[#allocation154_spill] sm:$0xff] }
 0x6d0   : > { %v13569_v12 = vpop.eup %9700  ;;  %v3845_v42 = vmul.f32 1.442695, %v3757_v13  ;;  %v3847_v63 = vmul.f32 1.442695, %v3758_v10  ;;  %3950 = vadd.xlane.f32.xlu1 %v3949_v1  ;;  %4838 = vadd.xlane.f32.xlu0 %v4837_v2  ;;  %v17001_v10 = vld [vmem:[#allocation20_spill] sm:$0xff] }
 0x6d1   : > { %16996 = vst [vmem:[#allocation32_spill] sm:$0xff] %v13569_v12  ;;  %v13572_v27 = vpop.eup %9702  ;;  %v3678_v47 = vpop.xlane.xlu0 %3677  ;;  %v4758_v1 = vmul.f32 %v10089_v58, %v17001_v10 }
 0x6d2   : > { %16997 = vst [vmem:[#allocation37_spill] sm:$0xff] %v13572_v27  ;;  %9712 = vpow2.f32 %v3845_v42  ;;  %v3759_v34 = vsub.f32 %v16998_v56, %v3678_v47  ;;  %v3760_v8 = vsub.f32 %v16999_v59, %v3678_v47  ;;  %v3952_v18 = vadd.f32 %v13572_v27, %v13569_v12  ;;  %v17003_v47 = vld [vmem:[#allocation113_spill] sm:$0xff] }
 0x6d3   : > { %9714 = vpow2.f32 %v3847_v63 }
 0x6d4   : > { %v13579_v13 = vpop.eup %9704  ;;  %v3849_v2 = vmul.f32 1.442695, %v3759_v34  ;;  %v3851_v42 = vmul.f32 1.442695, %v3760_v8  ;;  %4862 = vadd.xlane.f32.xlu1 %v4861_v9  ;;  %3953 = vadd.xlane.f32.xlu0 %v3952_v18  ;;  %v4885_v9 = vsel %vm4791_vm6, %v4758_v1, 0.0  ;;  %v17011_v1 = vld [vmem:[#allocation115_spill] sm:$0xff] }
 0x6d5   : > { %17000 = vst [vmem:[#allocation36_spill] sm:$0xff] %v13579_v13  ;;  %v13585_v56 = vpop.eup %9706  ;;  %v3681_v59 = vpop.xlane.xlu0 %3680 }
 0x6d6   : > { %17002 = vst [vmem:[#allocation38_spill] sm:$0xff] %v13585_v56  ;;  %9716 = vpow2.f32 %v3849_v2  ;;  %v3761_v63 = vsub.f32 %v17003_v47, %v3681_v59  ;;  %v3762_v35 = vsub.f32 %v17004_v52, %v3681_v59  ;;  %v3955_v46 = vadd.f32 %v13585_v56, %v13579_v13  ;;  %v17008_v52 = vld [vmem:[#allocation116_spill] sm:$0xff]  ;;  %v17009_v47 = vld [vmem:[#allocation117_spill] sm:$0xff]  ;;  %v17036_v13 = vld [vmem:[#allocation134_spill] sm:$0xff] }
 0x6d7   : > { %9718 = vpow2.f32 %v3851_v42  ;;  %v5325_v42 = vsel %vm4791_vm6, %v5247_v24, 0.0 }
 0x6d8   : > { %v13593_v58 = vpop.eup %9708  ;;  %v3853_v34 = vmul.f32 1.442695, %v3761_v63  ;;  %v3855_v8 = vmul.f32 1.442695, %v3762_v35  ;;  %3956 = vadd.xlane.f32.xlu1 %v3955_v46  ;;  %4886 = vadd.xlane.f32.xlu0 %v4885_v9  ;;  %v5255_v46 = vmul.f32 %v17011_v1, %v16991_v28  ;;  %v17017_v1 = vld [vmem:[#allocation119_spill] sm:$0xff] }
 0x6d9   : > { %17006 = vst [vmem:[#allocation111_spill] sm:$0xff] %v13593_v58  ;;  %v13596_v18 = vpop.eup %9710  ;;  %v3684_v2 = vpop.xlane.xlu1 %3683 }
 0x6da   : > { %17007 = vst [vmem:[#allocation113_spill] sm:$0xff] %v13596_v18  ;;  %9720 = vpow2.f32 %v3853_v34  ;;  %v3763_v59 = vsub.f32 %v17008_v52, %v3684_v2  ;;  %v3764_v6 = vsub.f32 %v17009_v47, %v3684_v2  ;;  %v3958_v30 = vadd.f32 %v13596_v18, %v13593_v58  ;;  %v17013_v2 = vld [vmem:[#allocation39_spill] sm:$0xff] }
 0x6db   : > { %9722 = vpow2.f32 %v3855_v8  ;;  %v5263_v8 = vmul.f32 %v17013_v2, %v16995_v36  ;;  %v5349_v52 = vsel %vm4791_vm6, %v5255_v46, 0.0 }
 0x6dc   : > { %v13603_v63 = vpop.eup %9712  ;;  %v3857_v35 = vmul.f32 1.442695, %v3763_v59  ;;  %v3859_v3 = vmul.f32 1.442695, %v3764_v6  ;;  %5326 = vadd.xlane.f32.xlu1 %v5325_v42  ;;  %3959 = vadd.xlane.f32.xlu0 %v3958_v30 }
 0x6dd   : > { %17010 = vst [vmem:[#allocation114_spill] sm:$0xff] %v13603_v63  ;;  %v13607_v9 = vpop.eup %9714  ;;  %v13620_v59 = vpop.xlane.xlu0 %3686  ;;  %v5373_v30 = vsel %vm4791_vm6, %v5263_v8, 0.0 }
 0x6de   : > { %17012 = vst [vmem:[#allocation34_spill] sm:$0xff] %v13607_v9  ;;  %9724 = vpow2.f32 %v3857_v35  ;;  %v3961_v34 = vadd.f32 %v13607_v9, %v13603_v63  ;;  %v17033_v9 = vld [vmem:[#allocation126_spill] sm:$0xff] }
 0x6df   : > { %9726 = vpow2.f32 %v3859_v3  ;;  %v5271_v3 = vmul.f32 %v17017_v1, %v17001_v10 }
 0x6e0   : > { %v13613_v24 = vpop.eup %9716  ;;  %3962 = vadd.xlane.f32.xlu1 %v3961_v34  ;;  %5350 = vadd.xlane.f32.xlu0 %v5349_v52 }
 0x6e1   : > { %17014 = vst [vmem:[#allocation116_spill] sm:$0xff] %v13613_v24  ;;  %v13616_v47 = vpop.eup %9718  ;;  %v5397_v2 = vsel %vm4791_vm6, %v5271_v3, 0.0  ;;  %v13636_v8 = vpop.xlane.xlu0 %3689 }
 0x6e2   : > { %17015 = vst [vmem:[#allocation117_spill] sm:$0xff] %v13616_v47  ;;  %v3964_v6 = vadd.f32 %v13616_v47, %v13613_v24  ;;  %v17029_v24 = vld [vmem:[#allocation136_spill] sm:$0xff] }
 0x6e3   : > { %v17030_v47 = vld [vmem:[#allocation140_spill] sm:$0xff] }
 0x6e4   : > { %v13623_v42 = vpop.eup %9720  ;;  %5374 = vadd.xlane.f32.xlu1 %v5373_v30  ;;  %3965 = vadd.xlane.f32.xlu0 %v3964_v6 }
 0x6e5   : > { %17016 = vst [vmem:[#allocation115_spill] sm:$0xff] %v13623_v42  ;;  %v13627_v35 = vpop.eup %9722  ;;  %v13640_v30 = vpop.xlane.xlu1 %3692 }
 0x6e6   : > { %17018 = vst [vmem:[#allocation39_spill] sm:$0xff] %v13627_v35  ;;  %v3967_v46 = vadd.f32 %v13627_v35, %v13623_v42  ;;  %v17028_v42 = vld [vmem:[#allocation122_spill] sm:$0xff] }
 0x6e7   : > { %v5498_v35 = vsel %vm5496_vm7, %v17028_v42, %v13228_v19  ;;  %v17032_v42 = vld [vmem:[#allocation132_spill] sm:$0xff] }
 0x6e8   : > { %v13631_v34 = vpop.eup %9724  ;;  %3968 = vadd.xlane.f32.xlu1 %v3967_v46  ;;  %5398 = vadd.xlane.f32.xlu0 %v5397_v2 }
 0x6e9   : > { %17019 = vst [vmem:[#allocation119_spill] sm:$0xff] %v13631_v34  ;;  %v13634_v52 = vpop.eup %9726  ;;  %v13642_v10 = vpop.xlane.xlu0 %3695 }
 0x6ea   : > { %17020 = vst [vmem:[#allocation173_spill] sm:$0xff] %v13634_v52  ;;  %v3970_v1 = vadd.f32 %v13634_v52, %v13631_v34 }
 0x6ec   : > { %3971 = vadd.xlane.f32.xlu0 %v3970_v1 }
 0x6ed   : > { %v13644_v6 = vpop.xlane.xlu1 %3698 }
 0x6ee   : > { %17021 = vst [vmem:[#allocation174_spill] sm:$0xff] %v13644_v6 }
 0x6f1   : > { %v13646_v36 = vpop.xlane.xlu0 %3701 }
 0x6f5   : > { %v13648_v28 = vpop.xlane.xlu0 %5362  ;;  %v13650_v3 = vpop.xlane.xlu1 %3704 }
 0x6f6   : > { %17022 = vst [vmem:[#allocation175_spill] sm:$0xff] %v13650_v3 }
 0x6f9   : > { %v13652_v46 = vpop.xlane.xlu0 %5386  ;;  %v13654_v26 = vpop.xlane.xlu1 %3707 }
 0x6fd   : > { %v13656_v2 = vpop.xlane.xlu0 %4829  ;;  %v13658_v0 = vpop.xlane.xlu1 %3710 }
 0x6fe   : > { %17023 = vst [vmem:[#allocation176_spill] sm:$0xff] %v13658_v0  ;;  %v5499_v0 = vsel %vm5496_vm7, %v13254_v7, %v13285_v38  ;;  %v5500_v7 = vsel %vm5496_vm7, %v17033_v9, %v17032_v42 }
 0x6ff   : > { %v5576_v19 = vsel %vm5561_vm8, %v5499_v0, 0.0  ;;  %v5583_v9 = vsel %vm5561_vm8, %v5500_v7, 0.0 }
 0x701   : > { %v13660_v44 = vpop.xlane.xlu1 %3713  ;;  %v13662_v34 = vpop.xlane.xlu0 %4877 }
 0x702   : > { %17024 = vst [vmem:[#allocation177_spill] sm:$0xff] %v13660_v44 }
 0x705   : > { %v13664_v1 = vpop.xlane.xlu1 %3716  ;;  %v13666_v6 = vpop.xlane.xlu0 %5341 }
 0x706   : > { %17025 = vst [vmem:[#allocation178_spill] sm:$0xff] %v13664_v1  ;;  %v5506_v1 = vsel %vm5496_vm7, %v13363_v51, %v17029_v24  ;;  %v17034_v51 = vld [vmem:[#allocation147_spill] sm:$0xff] }
 0x707   : > { %v5625_v38 = vsel %vm5561_vm8, %v5506_v1, 0.0  ;;  %v5508_v24 = vsel %vm5496_vm7, %v17034_v51, %v13292_v54  ;;  %v5505_v1 = vsel %vm5496_vm7, %v13304_v29, %v13332_v48  ;;  %v5584_v51 = vrot.slane %v5583_v9, 4 }
 0x708   : > { %v5639_v56 = vsel %vm5561_vm8, %v5508_v24, 0.0  ;;  %v5618_v12 = vsel %vm5561_vm8, %v5505_v1, 0.0  ;;  %v5514_v24 = vsel %vm5496_vm7, %v17039_v22, %v13400_v17 }
 0x709   : > { %v13668_v52 = vpop.xlane.xlu1 %3719  ;;  %v13678_v44 = vpop.xlane.xlu0 %5389  ;;  %v5640_v27 = vrot.slane %v5639_v56, 4 }
 0x70a   : > { %17026 = vst [vmem:[#allocation179_spill] sm:$0xff] %v13668_v52  ;;  %v5569_v52 = vsel %vm5561_vm8, %v5498_v35, 0.0  ;;  %v17035_v35 = vld [vmem:[#allocation139_spill] sm:$0xff] }
 0x70b   : > { %v5570_v58 = vrot.slane %v5569_v52, 4  ;;  %v5641_v1 = vadd.f32 %v5640_v27, %v5639_v56  ;;  %v6013_v27 = vstv %s13716_s9  ;;  %s8093_s9 = sshll.u32 %s15199_s29, 4  ;;  %s16141_s9 = int_to_ptr.vmem [resolvable:$true] %s8093_s9 }
 0x70c   : > { %s10137_s15 = scalar_lea.vmem %s16141_s9, 8192  ;;  %p10144_p13 = scmp.lt.s32.totalorder %s16141_s9, %s10142_s17 }
 0x70d   : > { %v13670_v3 = vpop.xlane.xlu1 %3722  ;;  %p10138_p9 = scmp.ne.s32.totalorder %s16141_s9, %s10137_s15  ;;  %p10145_p0 = scmp.lt.s32.totalorder %s10143_s18, %s10137_s15 }
 0x70e   : > { %17027 = vst [vmem:[#allocation180_spill] sm:$0xff] %v13670_v3  ;;  %v5507_v3 = vsel %vm5496_vm7, %v17030_v47, %v13235_v55  ;;  %v5497_v55 = vsel %vm5496_vm7, %v17036_v13, %v17035_v35  ;;  %v5577_v47 = vrot.slane %v5576_v19, 4  ;;  %v5571_v13 = vadd.f32 %v5570_v58, %v5569_v52 }
 0x70f   : > { %v5632_v18 = vsel %vm5561_vm8, %v5507_v3, 0.0  ;;  %v5626_v3 = vrot.slane %v5625_v38, 4  ;;  %v5562_v54 = vsel %vm5561_vm8, %v5497_v55, 0.0  ;;  %v5619_v52 = vrot.slane %v5618_v12, 4  ;;  %p10139_p10 = pnand %p10138_p9, %p10289_p5  ;;  %p10146_p1 = por %p10145_p0, %p10144_p13 }
 0x710   : > { %v5633_v42 = vrot.slane %v5632_v18, 4  ;;  %v5578_v35 = vadd.f32 %v5577_v47, %v5576_v19  ;;  %v5563_v48 = vrot.slane %v5562_v54, 4  ;;  %v5572_v58 = vrot.slane %v5571_v13, 2 }
 0x711   : > { %v13687_v63 = vpop.xlane.xlu1 %3725  ;;  %v5627_v7 = vadd.f32 %v5626_v3, %v5625_v38  ;;  %v5515_v19 = vsel %vm5496_vm7, %v13420_v49, %v13430_v16  ;;  %v5585_v55 = vadd.f32 %v5584_v51, %v5583_v9  ;;  %v5522_v38 = vsel %vm5496_vm7, %v13351_v20, %v13374_v39  ;;  %p10140_p12 = pneg %p10139_p10 }
 0x712   : > { %17031 = vst [vmem:[#allocation122_spill] sm:$0xff] %v13687_v63  ;;  %v13701_v63 = vpop.xlane.xlu0 %4832  ;;  %v5634_v29 = vadd.f32 %v5633_v42, %v5632_v18  ;;  %v5579_v47 = vrot.slane %v5578_v35, 2  ;;  %v5523_v18 = vsel %vm5496_vm7, %v13398_v11, %v13416_v62  ;;  %v5681_v3 = vsel %vm5561_vm8, %v5514_v24, 0.0 }
 0x713   : > { %v5628_v22 = vrot.slane %v5627_v7, 2  ;;  %v5564_v42 = vadd.f32 %v5563_v48, %v5562_v54  ;;  %v5688_v49 = vsel %vm5561_vm8, %v5515_v19, 0.0  ;;  %v6012_v16 = vstv %s13710_s13  ;;  %s10213_s13 = smov 16   ;;  %p10147_p2 = pnand %p10146_p1, %p10140_p12 }
 0x714   : > { %v5620_v9 = vadd.f32 %v5619_v52, %v5618_v12  ;;  %v5737_v51 = vsel %vm5561_vm8, %v5522_v38, 0.0  ;;  %v5744_v20 = vsel %vm5561_vm8, %v5523_v18, 0.0  ;;  %v5573_v39 = vadd.f32 %v5572_v58, %v5571_v13 }
 0x715   : > { %v13703_v0 = vpop.xlane.xlu1 %3728  ;;  %v5586_v23 = vrot.slane %v5585_v55, 2  ;;  %v5580_v11 = vadd.f32 %v5579_v47, %v5578_v35  ;;  %v5682_v62 = vrot.slane %v5681_v3, 4  ;;  %v5629_v56 = vadd.f32 %v5628_v22, %v5627_v7 }
 0x716   : > { %17037 = vst [vmem:[#allocation136_spill] sm:$0xff] %v13703_v0  ;;  %v13721_v15 = vpop.xlane.xlu0 %4880  ;;  %v5642_v54 = vrot.slane %v5641_v1, 2  ;;  %v5689_v48 = vrot.slane %v5688_v49, 4  ;;  %v5565_v24 = vrot.slane %v5564_v42, 2  ;;  %v5738_v41 = vrot.slane %v5737_v51, 4 }
 0x717   : > { %v5745_v12 = vrot.slane %v5744_v20, 4  ;;  %v5621_v52 = vrot.slane %v5620_v9, 2  ;;  %v5574_v38 = vrot.slane %v5573_v39, 1  ;;  %v5587_v21 = vadd.f32 %v5586_v23, %v5585_v55 }
 0x718   : > { %v5581_v18 = vrot.slane %v5580_v11, 1  ;;  %v5683_v13 = vadd.f32 %v5682_v62, %v5681_v3  ;;  %v13747_v35 = vsel %vm5496_vm7, %v6012_v16, %v6013_v27  ;;  %v5630_v47 = vrot.slane %v5629_v56, 1 }
 0x719   : > { %v13714_v0 = vpop.xlane.xlu1 %3731  ;;  %17040 = vst [vmem:[#allocation132_spill] sm:$0xff] %v13747_v35  ;;  %v5643_v53 = vadd.f32 %v5642_v54, %v5641_v1  ;;  %v5690_v4 = vadd.f32 %v5689_v48, %v5688_v49  ;;  %v5566_v7 = vadd.f32 %v5565_v24, %v5564_v42  ;;  %v5739_v25 = vadd.f32 %v5738_v41, %v5737_v51 }
 0x71a   : > { %17038 = vst [vmem:[#allocation140_spill] sm:$0xff] %v13714_v0  ;;  %v5635_v0 = vrot.slane %v5634_v29, 2  ;;  %v13739_v5 = vpop.xlane.xlu0 %5344  ;;  %v5746_v50 = vadd.f32 %v5745_v12, %v5744_v20  ;;  %v13755_v23 = vrot.slane %v13747_v35, 2  ;;  %v5622_v55 = vadd.f32 %v5621_v52, %v5620_v9 }
 0x71b   : > { %v5575_v3 = vadd.f32 %v5574_v38, %v5573_v39  ;;  %v5588_v62 = vrot.slane %v5587_v21, 1  ;;  %v5582_v16 = vadd.f32 %v5581_v18, %v5580_v11  ;;  %v5684_v27 = vrot.slane %v5683_v13, 2 }
 0x71c   : > { %v5636_v19 = vadd.f32 %v5635_v0, %v5634_v29  ;;  %v13752_v29 = vrot.slane %v13747_v35, 1  ;;  %17042 = vst [vmem:[#allocation147_spill] sm:$0xff] %v13755_v23  ;;  %v5631_v1 = vadd.f32 %v5630_v47, %v5629_v56  ;;  %v5644_v42 = vrot.slane %v5643_v53, 1  ;;  %v17048_v47 = vld [vmem:[#allocation157_spill] sm:$0xff] }
 0x71d   : > { %v13732_v17 = vpop.xlane.xlu1 %5353  ;;  %v5691_v49 = vrot.slane %v5690_v4, 2  ;;  %v5567_v41 = vrot.slane %v5566_v7, 1  ;;  %v5740_v20 = vrot.slane %v5739_v25, 2  ;;  %v5747_v54 = vrot.slane %v5746_v50, 2 }
 0x71e   : > { %v5637_v22 = vrot.slane %v5636_v19, 1  ;;  %v13749_v0 = vpop.xlane.xlu0 %5392  ;;  %17041 = vst [vmem:[#allocation126_spill] sm:$0xff] %v13752_v29  ;;  %v13760_v48 = vrot.slane %v13747_v35, 3  ;;  %v5623_v24 = vrot.slane %v5622_v55, 1  ;;  %v13763_v12 = vadd.f32 %v13752_v29, %v5575_v3 }
 0x71f   : > { %v5589_v9 = vadd.f32 %v5588_v62, %v5587_v21  ;;  %v13766_v39 = vadd.f32 %v13755_v23, %v5582_v16  ;;  %v5685_v11 = vadd.f32 %v5684_v27, %v5683_v13  ;;  %v5645_v38 = vadd.f32 %v5644_v42, %v5643_v53 }
 0x720   : > { %v5638_v51 = vadd.f32 %v5637_v22, %v5636_v19  ;;  %17044 = vst [vmem:[#allocation134_spill] sm:$0xff] %v13760_v48  ;;  %17045 = vst [vmem:[#allocation154_spill] sm:$0xff] %v13763_v12  ;;  %v13773_v19 = vadd.f32 %v13752_v29, %v5631_v1  ;;  %v5692_v18 = vadd.f32 %v5691_v49, %v5690_v4  ;;  %v6159_v27 = vrot.slane %v13763_v12, 7 }
 0x721   : > { %v13741_v43 = vpop.xlane.xlu1 %5377  ;;  %17046 = vst [vmem:[#allocation181_spill] sm:$0xff] %v13766_v39  ;;  %v5516_v22 = vsel %vm5496_vm7, %v17048_v47, %v13648_v28  ;;  %v5568_v3 = vadd.f32 %v5567_v41, %v5566_v7  ;;  %v5741_v62 = vadd.f32 %v5740_v20, %v5739_v25  ;;  %v5748_v16 = vadd.f32 %v5747_v54, %v5746_v50 }
 0x722   : > { %v13768_v52 = vpop.xlane.xlu0 %4835  ;;  %17047 = vst [vmem:[#allocation182_spill] sm:$0xff] %v13773_v19  ;;  %v13779_v21 = vadd.f32 %v13755_v23, %v5638_v51  ;;  %v5624_v13 = vadd.f32 %v5623_v24, %v5622_v55  ;;  %v13783_v1 = vadd.f32 %v13760_v48, %v5589_v9  ;;  %v5686_v53 = vrot.slane %v5685_v11, 1  ;;  %v17055_v24 = vld [vmem:[#allocation120_spill] sm:$0xff] }
 0x723   : > { %v5695_v4 = vsel %vm5561_vm8, %v5516_v22, 0.0  ;;  %v6162_v28 = vrot.slane %v13766_v39, 6  ;;  %v6180_v7 = vrot.slane %v13773_v19, 7  ;;  %v13791_v25 = vadd.f32 %v13760_v48, %v5645_v38 }
 0x724   : > { %17049 = vst [vmem:[#allocation157_spill] sm:$0xff] %v13779_v21  ;;  %17050 = vst [vmem:[#allocation183_spill] sm:$0xff] %v13783_v1  ;;  %v5693_v50 = vrot.slane %v5692_v18, 1  ;;  %v13794_v55 = vadd.f32 %v13747_v35, %v5568_v3  ;;  %v6182_v49 = vrot.slane %v13779_v21, 6  ;;  %v5742_v41 = vrot.slane %v5741_v62, 1  ;;  %v17056_v3 = vld [vmem:[#allocation121_spill] sm:$0xff] }
 0x725   : > { %v13744_v58 = vpop.xlane.xlu1 %4805  ;;  %17051 = vst [vmem:[#allocation184_spill] sm:$0xff] %v13791_v25  ;;  %v5749_v51 = vrot.slane %v5748_v16, 1  ;;  %v13800_v54 = vadd.f32 %v13747_v35, %v5624_v13  ;;  %v3765_v9 = vsub.f32 %v17055_v24, %v13620_v59  ;;  %v5696_v47 = vrot.slane %v5695_v4, 4 }
 0x726   : > { %17052 = vst [vmem:[#allocation185_spill] sm:$0xff] %v13794_v55  ;;  %v13797_v20 = vpop.xlane.xlu0 %4883  ;;  %v6165_v38 = vrot.slane %v13783_v1, 5  ;;  %v5687_v22 = vadd.f32 %v5686_v53, %v5685_v11  ;;  %v3766_v19 = vsub.f32 %v17056_v3, %v13620_v59  ;;  %v6161_v21 = vsel %vm6160_vm9, %v6159_v27, %v13794_v55  ;;  %v17057_v11 = vld [vmem:[#allocation123_spill] sm:$0xff]  ;;  %v17058_v1 = vld [vmem:[#allocation125_spill] sm:$0xff] }
 0x727   : > { %17053 = vst [vmem:[#allocation186_spill] sm:$0xff] %v13797_v20  ;;  %17054 = vst [vmem:[#allocation187_spill] sm:$0xff] %v13800_v54  ;;  %v6184_v12 = vrot.slane %v13791_v25, 5  ;;  %v5694_v13 = vadd.f32 %v5693_v50, %v5692_v18  ;;  %v6164_v20 = vsel %vm6163_vm10, %v6162_v28, %v6161_v21  ;;  %v6181_v24 = vsel %vm6160_vm9, %v6180_v7, %v13800_v54 }
 0x728   : > { %v5743_v33 = vadd.f32 %v5742_v41, %v5741_v62  ;;  %v5750_v61 = vadd.f32 %v5749_v51, %v5748_v16  ;;  %v3767_v53 = vsub.f32 %v17057_v11, %v13636_v8  ;;  %v6183_v59 = vsel %vm6163_vm10, %v6182_v49, %v6181_v24  ;;  %v17060_v62 = vld [vmem:[#allocation127_spill] sm:$0xff] }
 0x729   : > { %v13757_v57 = vpop.xlane.xlu1 %4853  ;;  %v3861_v3 = vmul.f32 1.442695, %v3765_v9  ;;  %v5697_v27 = vadd.f32 %v5696_v47, %v5695_v4  ;;  %v5524_v18 = vsel %vm5496_vm7, %v13428_v14, %v13652_v46  ;;  %v13824_v21 = vadd.f32 %v13752_v29, %v5687_v22  ;;  %v17065_v22 = vld [vmem:[#allocation130_spill] sm:$0xff] }
 0x72a   : > { %17043 = vst [vmem:[#allocation139_spill] sm:$0xff] %v13757_v57  ;;  %v3768_v57 = vsub.f32 %v17058_v1, %v13636_v8  ;;  %v3863_v28 = vmul.f32 1.442695, %v3766_v19  ;;  %v3769_v16 = vsub.f32 %v17060_v62, %v13640_v30  ;;  %v5509_v7 = vsel %vm5496_vm7, %v13656_v2, %v13666_v6  ;;  %v13831_v50 = vpop.xlane.xlu0 %5347 }
 0x72b   : > { %17059 = vst [vmem:[#allocation120_spill] sm:$0xff] %v13824_v21  ;;  %v13836_v8 = vadd.f32 %v13755_v23, %v5694_v13  ;;  %v13839_v14 = vsel %vm6166_vm11, %v6165_v38, %v6164_v20  ;;  %v13842_v46 = vsel %vm6166_vm11, %v6184_v12, %v6183_v59  ;;  %v13845_v19 = vadd.f32 %v13752_v29, %v5743_v33  ;;  %v17064_v12 = vld [vmem:[#allocation128_spill] sm:$0xff] }
 0x72c   : > { %v13848_v1 = vadd.f32 %v13755_v23, %v5750_v61  ;;  %v3865_v6 = vmul.f32 1.442695, %v3767_v53  ;;  %v5751_v2 = vsel %vm5561_vm8, %v5524_v18, 0.0  ;;  %9728 = vpow2.f32 %v3861_v3  ;;  %v17080_v29 = vld [vmem:[#allocation164_spill] sm:$0xff] }
 0x72d   : > { %v13770_v56 = vpop.xlane.xlu1 %5317  ;;  %17061 = vst [vmem:[#allocation121_spill] sm:$0xff] %v13836_v8  ;;  %17062 = vst [vmem:[#allocation123_spill] sm:$0xff] %v13845_v19  ;;  %v3867_v4 = vmul.f32 1.442695, %v3768_v57  ;;  %v5698_v41 = vrot.slane %v5697_v27, 2  ;;  %v5646_v51 = vsel %vm5561_vm8, %v5509_v7, 0.0  ;;  %9730 = vpow2.f32 %v3863_v28 }
 0x72e   : > { %17063 = vst [vmem:[#allocation125_spill] sm:$0xff] %v13848_v1  ;;  %v3770_v9 = vsub.f32 %v17064_v12, %v13640_v30  ;;  %v3869_v47 = vmul.f32 1.442695, %v3769_v16  ;;  %v3771_v13 = vsub.f32 %v17065_v22, %v13642_v10  ;;  %v5752_v24 = vrot.slane %v5751_v2, 4  ;;  %v17067_v28 = vld [vmem:[#allocation131_spill] sm:$0xff] }
 0x72f   : > { %v5647_v11 = vrot.slane %v5646_v51, 4  ;;  %v5513_v53 = vsel %vm5496_vm7, %v13382_v31, %v13732_v17  ;;  %v5699_v59 = vadd.f32 %v5698_v41, %v5697_v27  ;;  %v13866_v3 = vrot.slane %v13747_v35, 4 }
 0x730   : > { %v3871_v18 = vmul.f32 1.442695, %v3770_v9  ;;  %v3772_v62 = vsub.f32 %v17067_v28, %v13642_v10  ;;  %v5525_v16 = vsel %vm5496_vm7, %v13662_v34, %v13678_v44  ;;  %v5753_v31 = vadd.f32 %v5752_v24, %v5751_v2  ;;  %v17070_v44 = vld [vmem:[#allocation137_spill] sm:$0xff]  ;;  %v17071_v2 = vld [vmem:[#allocation138_spill] sm:$0xff] }
 0x731   : > { %v13786_v42 = vpop.xlane.xlu1 %5365  ;;  %17066 = vst [vmem:[#allocation127_spill] sm:$0xff] %v13866_v3  ;;  %v5510_v17 = vsel %vm5496_vm7, %v13701_v63, %v13739_v5  ;;  %v5674_v27 = vsel %vm5561_vm8, %v5513_v53, 0.0  ;;  %v5648_v41 = vadd.f32 %v5647_v11, %v5646_v51  ;;  %v13880_v12 = vrot.slane %v13747_v35, 5 }
 0x732   : > { %v13883_v10 = vrot.slane %v13747_v35, 6  ;;  %v3775_v34 = vsub.f32 %v17070_v44, %v13646_v36  ;;  %v3776_v9 = vsub.f32 %v17071_v2, %v13646_v36  ;;  %v5758_v5 = vsel %vm5561_vm8, %v5525_v16, 0.0 }
 0x733   : > { %17068 = vst [vmem:[#allocation128_spill] sm:$0xff] %v13880_v12  ;;  %v5653_v63 = vsel %vm5561_vm8, %v5510_v17, 0.0  ;;  %v5675_v51 = vrot.slane %v5674_v27, 4  ;;  %v13894_v22 = vrot.slane %v13747_v35, 7  ;;  %v3875_v24 = vmul.f32 1.442695, %v3772_v62 }
 0x734   : > { %17069 = vst [vmem:[#allocation130_spill] sm:$0xff] %v13883_v10  ;;  %v5754_v11 = vrot.slane %v5753_v31, 2  ;;  %v5521_v36 = vsel %vm5496_vm7, %v13435_v32, %v13741_v43  ;;  %v5759_v16 = vrot.slane %v5758_v5, 4  ;;  %v5526_v17 = vsel %vm5496_vm7, %v13721_v15, %v13749_v0 }
 0x735   : > { %v13807_v39 = vpop.xlane.xlu1 %4808  ;;  %17072 = vst [vmem:[#allocation131_spill] sm:$0xff] %v13894_v22  ;;  %v3881_v44 = vmul.f32 1.442695, %v3775_v34  ;;  %v3883_v2 = vmul.f32 1.442695, %v3776_v9  ;;  %v5654_v62 = vrot.slane %v5653_v63, 4  ;;  %v5676_v57 = vadd.f32 %v5675_v51, %v5674_v27 }
 0x736   : > { %v5730_v32 = vsel %vm5561_vm8, %v5521_v36, 0.0  ;;  %v5755_v15 = vadd.f32 %v5754_v11, %v5753_v31  ;;  %v5765_v0 = vsel %vm5561_vm8, %v5526_v17, 0.0 }
 0x737   : > { %v5655_v31 = vadd.f32 %v5654_v62, %v5653_v63  ;;  %v5731_v51 = vrot.slane %v5730_v32, 4  ;;  %v5766_v11 = vrot.slane %v5765_v0, 4  ;;  %v5677_v36 = vrot.slane %v5676_v57, 2 }
 0x739   : > { %v13833_v49 = vpop.xlane.xlu1 %4856  ;;  %v5732_v62 = vadd.f32 %v5731_v51, %v5730_v32  ;;  %v17079_v51 = vld [vmem:[#allocation165_spill] sm:$0xff] }
 0x73d   : > { %v3927_v33 = vpop.xlane.xlu0 %3926  ;;  %v13855_v38 = vpop.xlane.xlu1 %5320 }
 0x73e   : > { %9732 = vrcp.f32 %v3927_v33 }
 0x73f   : > { %9734 = vpow2.f32 %v3865_v6  ;;  %v3873_v6 = vmul.f32 1.442695, %v3771_v13  ;;  %v13896_v13 = vpop.eup %9728 }
 0x740   : > { %9736 = vpow2.f32 %v3867_v4  ;;  %17073 = vst [vmem:[#allocation137_spill] sm:$0xff] %v13896_v13  ;;  %v13901_v28 = vpop.eup %9730 }
 0x741   : > { %9738 = vpow2.f32 %v3869_v47  ;;  %v13873_v7 = vpop.xlane.xlu1 %5368  ;;  %v3930_v4 = vpop.xlane.xlu0 %3929  ;;  %v5700_v47 = vrot.slane %v5699_v59, 1  ;;  %17074 = vst [vmem:[#allocation138_spill] sm:$0xff] %v13901_v28 }
 0x742   : > { %9740 = vrcp.f32 %v3930_v4 }
 0x743   : > { %9742 = vpow2.f32 %v3871_v18  ;;  %v5649_v18 = vrot.slane %v5648_v41, 2 }
 0x744   : > { %9744 = vpow2.f32 %v3873_v6  ;;  %v5701_v6 = vadd.f32 %v5700_v47, %v5699_v59  ;;  %v13918_v59 = vadd.f32 %v13901_v28, %v13896_v13  ;;  %v5760_v47 = vadd.f32 %v5759_v16, %v5758_v5 }
 0x745   : > { %v13891_v33 = vpop.xlane.xlu1 %4811  ;;  %v3933_v53 = vpop.xlane.xlu0 %3932  ;;  %v5650_v9 = vadd.f32 %v5649_v18, %v5648_v41  ;;  %v17076_v41 = vld [vmem:[#allocation143_spill] sm:$0xff]  ;;  %v5756_v16 = vrot.slane %v5755_v15, 1  ;;  %v5678_v5 = vadd.f32 %v5677_v36, %v5676_v57 }
 0x746   : > { %9746 = vrcp.f32 %v3933_v53 }
 0x747   : > { %9748 = vpow2.f32 %v3875_v24  ;;  %v5651_v17 = vrot.slane %v5650_v9, 1 }
 0x748   : > { %v9733_v4 = vpop.eup %9732 }
 0x749   : > { %v13906_v30 = vpop.eup %9734  ;;  %v13909_v43 = vpop.xlane.xlu1 %4859  ;;  %v4054_v61 = vmul.f32 %v9733_v4, %v13463_v40  ;;  %v4053_v20 = vmul.f32 %v9733_v4, %v13461_v60  ;;  %v5501_v40 = vsel %vm5496_vm7, %v13744_v58, %v13770_v56  ;;  %v13926_v60 = vadd.f32 %v13760_v48, %v5701_v6  ;;  %v17077_v6 = vld [vmem:[#allocation144_spill] sm:$0xff] }
 0x74a   : > { %v13913_v23 = vpop.eup %9736  ;;  %v3936_v34 = vpop.xlane.xlu0 %3935  ;;  %v5511_v58 = vsel %vm5496_vm7, %v13768_v52, %v13831_v50  ;;  %v5590_v56 = vsel %vm5561_vm8, %v5501_v40, 0.0  ;;  %v5761_v4 = vrot.slane %v5760_v47, 2  ;;  %v5656_v50 = vrot.slane %v5655_v31, 2 }
 0x74b   : > { %v13920_v27 = vpop.eup %9738  ;;  %9750 = vrcp.f32 %v3936_v34  ;;  %4277 = vmatprep.mubr.f32.mxu1 %v4054_v61  ;;  %4502 = vmatprep.mubr.f32.mxu0 %v4054_v61  ;;  %17075 = vst [vmem:[#allocation188_spill] sm:$0xff] %v13926_v60  ;;  %v5767_v34 = vadd.f32 %v5766_v11, %v5765_v0  ;;  %v5591_v40 = vrot.slane %v5590_v56, 4  ;;  %v5757_v11 = vadd.f32 %v5756_v16, %v5755_v15 }
 0x74c   : > { %9752 = vpow2.f32 %v3881_v44  ;;  %4278 = vmatmul.mubr.f32.vlgmr.msra.gmra.mrb[160].mxu1 %v4053_v20  ;;  %4503 = vmatmul.mubr.f32.vlgmr.msra.gmra.mrb[160].mxu0 %v4053_v20  ;;  %v9741_v24 = vpop.eup %9740  ;;  %v5762_v13 = vadd.f32 %v5761_v4, %v5760_v47  ;;  %v5679_v47 = vrot.slane %v5678_v5, 1 }
 0x74d   : > { %9754 = vpow2.f32 %v3883_v2  ;;  %v5324_v53 = vpop.xlane.xlu1 %5323  ;;  %v4056_v63 = vmul.f32 %v9741_v24, %v13474_v45  ;;  %v4055_v18 = vmul.f32 %v9741_v24, %v13472_v37  ;;  %v13936_v20 = vpop.eup %9742  ;;  %v5660_v37 = vsel %vm5561_vm8, %v5511_v58, 0.0  ;;  %v17078_v2 = vld [vmem:[#allocation139_spill] sm:$0xff] }
 0x74e   : > { %v3939_v61 = vpop.xlane.xlu0 %3938  ;;  %v13938_v44 = vpop.eup %9744  ;;  %v5502_v24 = vsel %vm5496_vm7, %v13807_v39, %v13855_v38  ;;  %v5517_v52 = vsel %vm5496_vm7, %v17078_v2, %v13786_v42  ;;  %v5652_v58 = vadd.f32 %v5651_v17, %v5650_v9  ;;  %v5657_v39 = vadd.f32 %v5656_v50, %v5655_v31  ;;  %v17081_v17 = vld [vmem:[#allocation167_spill] sm:$0xff] }
 0x74f   : > { %9756 = vrcp.f32 %v3939_v61  ;;  %4282 = vmatprep.mubr.f32.mxu1 %v4056_v63  ;;  %4507 = vmatprep.mubr.f32.mxu0 %v4056_v63  ;;  %v5733_v38 = vrot.slane %v5732_v62, 2  ;;  %v5597_v57 = vsel %vm5561_vm8, %v5502_v24, 0.0  ;;  %v5768_v42 = vrot.slane %v5767_v34, 2 }
 0x750   : > { %v9747_v45 = vpop.eup %9746  ;;  %4283 = vmatmul.mubr.f32.gmra.mrb[162].mxu1 %v4055_v18  ;;  %4508 = vmatmul.mubr.f32.gmra.mrb[162].mxu0 %v4055_v18  ;;  %v5661_v18 = vrot.slane %v5660_v37, 4  ;;  %v5592_v2 = vadd.f32 %v5591_v40, %v5590_v56  ;;  %v5518_v31 = vsel %vm5496_vm7, %v13833_v49, %v13873_v7  ;;  %v17082_v56 = vld [vmem:[#allocation166_spill] sm:$0xff]  ;;  %v5658_v7 = vrot.slane %v5657_v39, 1 }
 0x751   : > { %v5372_v61 = vpop.xlane.xlu1 %5371  ;;  %v4058_v63 = vmul.f32 %v9747_v45, %v17079_v51  ;;  %v4057_v0 = vmul.f32 %v9747_v45, %v17080_v29  ;;  %v13952_v28 = vpop.eup %9748  ;;  %v5702_v51 = vsel %vm5561_vm8, %v5517_v52, 0.0  ;;  %v5503_v29 = vsel %vm5496_vm7, %v13891_v33, %v5324_v53 }
 0x752   : > { %v3942_v32 = vpop.xlane.xlu0 %3941  ;;  %v13970_v33 = vadd.f32 %v13760_v48, %v5757_v11  ;;  %v5763_v53 = vrot.slane %v5762_v13, 1  ;;  %v5598_v45 = vrot.slane %v5597_v57, 4  ;;  %v5734_v40 = vadd.f32 %v5733_v38, %v5732_v62 }
 0x753   : > { %9758 = vrcp.f32 %v3942_v32  ;;  %4287 = vmatprep.mubr.f32.mxu1 %v4058_v63  ;;  %4512 = vmatprep.mubr.f32.mxu0 %v4058_v63  ;;  %v5662_v24 = vadd.f32 %v5661_v18, %v5660_v37  ;;  %v5703_v32 = vrot.slane %v5702_v51, 4  ;;  %v5604_v63 = vsel %vm5561_vm8, %v5503_v29, 0.0  ;;  %v17085_v37 = vld [vmem:[#allocation169_spill] sm:$0xff] }
 0x754   : > { %4288 = vmatmul.mubr.f32.gmra.mrb[164].mxu1 %v4057_v0  ;;  %4513 = vmatmul.mubr.f32.gmra.mrb[164].mxu0 %v4057_v0  ;;  %17083 = vst [vmem:[#allocation143_spill] sm:$0xff] %v13970_v33  ;;  %v5769_v0 = vadd.f32 %v5768_v42, %v5767_v34  ;;  %v5599_v18 = vadd.f32 %v5598_v45, %v5597_v57  ;;  %v5605_v29 = vrot.slane %v5604_v63, 4  ;;  %v17086_v34 = vld [vmem:[#allocation168_spill] sm:$0xff] }
 0x755   : > { %v9751_v36 = vpop.eup %9750  ;;  %v13958_v15 = vpop.xlane.xlu1 %4814  ;;  %v5663_v48 = vrot.slane %v5662_v24, 2 }
 0x756   : > { %v13960_v9 = vpop.eup %9752  ;;  %v3945_v16 = vpop.xlane.xlu0 %3944  ;;  %v4060_v4 = vmul.f32 %v9751_v36, %v17081_v17  ;;  %v4059_v50 = vmul.f32 %v9751_v36, %v17082_v56  ;;  %v5593_v17 = vrot.slane %v5592_v2, 2  ;;  %v5709_v36 = vsel %vm5561_vm8, %v5518_v31, 0.0 }
 0x757   : > { %v13967_v52 = vpop.eup %9754  ;;  %9760 = vrcp.f32 %v3945_v16  ;;  %v13975_v56 = vadd.f32 %v13866_v3, %v5652_v58  ;;  %v5680_v16 = vadd.f32 %v5679_v47, %v5678_v5  ;;  %v5735_v31 = vrot.slane %v5734_v40, 1 }
 0x758   : > { %4292 = vmatprep.mubr.f32.mxu1 %v4060_v4  ;;  %4517 = vmatprep.mubr.f32.mxu0 %v4060_v4  ;;  %v5519_v4 = vsel %vm5496_vm7, %v13909_v43, %v5372_v61  ;;  %v5710_v25 = vrot.slane %v5709_v36, 4  ;;  %v5764_v5 = vadd.f32 %v5763_v53, %v5762_v13  ;;  %v5659_v47 = vadd.f32 %v5658_v7, %v5657_v39  ;;  %v17087_v61 = vld [vmem:[#allocation171_spill] sm:$0xff] }
 0x759   : > { %v9757_v49 = vpop.eup %9756  ;;  %4293 = vmatmul.mubr.f32.gmra.mrb[166].mxu1 %v4059_v50  ;;  %4518 = vmatmul.mubr.f32.gmra.mrb[166].mxu0 %v4059_v50  ;;  %v3948_v11 = vpop.xlane.xlu1 %3947  ;;  %17084 = vst [vmem:[#allocation144_spill] sm:$0xff] %v13975_v56  ;;  %v5704_v50 = vadd.f32 %v5703_v32, %v5702_v51  ;;  %v5594_v54 = vadd.f32 %v5593_v17, %v5592_v2  ;;  %v5716_v45 = vsel %vm5561_vm8, %v5519_v4, 0.0  ;;  %v6186_v39 = vrot.slane %v13975_v56, 4 }
 0x75a   : > { %v5396_v62 = vpop.xlane.xlu0 %5395  ;;  %9762 = vrcp.f32 %v3948_v11  ;;  %v4062_v38 = vmul.f32 %v9757_v49, %v17085_v37  ;;  %v4061_v42 = vmul.f32 %v9757_v49, %v17086_v34  ;;  %v5770_v11 = vrot.slane %v5769_v0, 1  ;;  %v17088_v37 = vld [vmem:[#allocation170_spill] sm:$0xff] }
 0x75b   : > { %v13987_v32 = vadd.f32 %v13747_v35, %v5680_v16  ;;  %v5606_v13 = vadd.f32 %v5605_v29, %v5604_v63  ;;  %v5736_v2 = vadd.f32 %v5735_v31, %v5734_v40  ;;  %v5664_v53 = vadd.f32 %v5663_v48, %v5662_v24  ;;  %v17092_v40 = vld [vmem:[#allocation186_spill] sm:$0xff]  ;;  %v17093_v24 = vld [vmem:[#allocation172_spill] sm:$0xff] }
 0x75c   : > { %4297 = vmatprep.mubr.f32.mxu1 %v4062_v38  ;;  %4522 = vmatprep.mubr.f32.mxu0 %v4062_v38  ;;  %v5600_v38 = vrot.slane %v5599_v18, 2  ;;  %v5705_v7 = vrot.slane %v5704_v50, 2  ;;  %v5711_v17 = vadd.f32 %v5710_v25, %v5709_v36  ;;  %v13991_v34 = vadd.f32 %v13866_v3, %v5764_v5  ;;  %v17094_v31 = vld [vmem:[#allocation26_spill] sm:$0xff] }
 0x75d   : > { %v9759_v58 = vpop.eup %9758  ;;  %4298 = vmatmul.mubr.f32.gmra.mrb[168].mxu1 %v4061_v42  ;;  %4523 = vmatmul.mubr.f32.gmra.mrb[168].mxu0 %v4061_v42  ;;  %v3951_v57 = vpop.xlane.xlu1 %3950  ;;  %17089 = vst [vmem:[#allocation139_spill] sm:$0xff] %v13987_v32  ;;  %v13994_v42 = vadd.f32 %v13880_v12, %v5659_v47  ;;  %v5771_v16 = vadd.f32 %v5770_v11, %v5769_v0  ;;  %v5595_v29 = vrot.slane %v5594_v54, 1  ;;  %v17095_v5 = vrot.slane %v13824_v21, 7 }
 0x75e   : > { %v13982_v43 = vpop.xlane.xlu0 %4838  ;;  %9764 = vrcp.f32 %v3951_v57  ;;  %v4064_v49 = vmul.f32 %v9759_v58, %v17087_v61  ;;  %v4063_v51 = vmul.f32 %v9759_v58, %v17088_v37  ;;  %17090 = vst [vmem:[#allocation165_spill] sm:$0xff] %v13991_v34  ;;  %v5717_v58 = vrot.slane %v5716_v45, 4 }
 0x75f   : > { %17091 = vst [vmem:[#allocation164_spill] sm:$0xff] %v13994_v42  ;;  %v5527_v48 = vsel %vm5496_vm7, %v17092_v40, %v5396_v62  ;;  %v6195_v47 = vsel %vm6160_vm9, %v17095_v5, %v13987_v32  ;;  %v5601_v0 = vadd.f32 %v5600_v38, %v5599_v18  ;;  %v5607_v11 = vrot.slane %v5606_v13, 2  ;;  %v17098_v18 = vld [vmem:[#allocation29_spill] sm:$0xff] }
 0x760   : > { %4302 = vmatprep.mubr.f32.mxu1 %v4064_v49  ;;  %4527 = vmatprep.mubr.f32.mxu0 %v4064_v49  ;;  %v14007_v49 = vadd.f32 %v13747_v35, %v5736_v2  ;;  %v5665_v37 = vrot.slane %v5664_v53, 1  ;;  %v5712_v62 = vrot.slane %v5711_v17, 2  ;;  %v5718_v40 = vadd.f32 %v5717_v58, %v5716_v45 }
 0x761   : > { %v9761_v4 = vpop.eup %9760  ;;  %4303 = vmatmul.mubr.f32.gmra.mrb[170].mxu1 %v4063_v51  ;;  %4528 = vmatmul.mubr.f32.gmra.mrb[170].mxu0 %v4063_v51  ;;  %v13996_v63 = vpop.xlane.xlu1 %4862  ;;  %v5706_v51 = vadd.f32 %v5705_v7, %v5704_v50  ;;  %v6187_v50 = vsel %vm6169_vm12, %v6186_v39, %v13842_v46  ;;  %v6188_v2 = vrot.slane %v13994_v42, 3  ;;  %v14018_v45 = vadd.f32 %v13880_v12, %v5771_v16 }
 0x762   : > { %v3954_v25 = vpop.xlane.xlu0 %3953  ;;  %v4066_v36 = vmul.f32 %v9761_v4, %v17093_v24  ;;  %v4065_v57 = vmul.f32 %v9761_v4, %v17094_v31  ;;  %17096 = vst [vmem:[#allocation167_spill] sm:$0xff] %v14007_v49  ;;  %v5772_v4 = vsel %vm5561_vm8, %v5527_v48, 0.0  ;;  %v17097_v31 = vld [vmem:[#allocation31_spill] sm:$0xff]  ;;  %v5602_v7 = vrot.slane %v5601_v0, 1 }
 0x763   : > { %9766 = vrcp.f32 %v3954_v25  ;;  %v5596_v25 = vadd.f32 %v5595_v29, %v5594_v54  ;;  %17099 = vst [vmem:[#allocation166_spill] sm:$0xff] %v14018_v45  ;;  %v5608_v58 = vadd.f32 %v5607_v11, %v5606_v13  ;;  %v17100_v48 = vrot.slane %v13836_v8, 6  ;;  %v17102_v11 = vld [vmem:[#allocation33_spill] sm:$0xff] }
 0x764   : > { %v9763_v61 = vpop.eup %9762  ;;  %4307 = vmatprep.mubr.f32.mxu1 %v4066_v36  ;;  %4532 = vmatprep.mubr.f32.mxu0 %v4066_v36  ;;  %v17101_v29 = vrot.slane %v13845_v19, 7  ;;  %v5666_v46 = vadd.f32 %v5665_v37, %v5664_v53  ;;  %v5713_v39 = vadd.f32 %v5712_v62, %v5711_v17  ;;  %v5719_v16 = vrot.slane %v5718_v40, 2 }
 0x765   : > { %4308 = vmatmul.mubr.f32.gmra.mrb[172].mxu1 %v4065_v57  ;;  %4533 = vmatmul.mubr.f32.gmra.mrb[172].mxu0 %v4065_v57  ;;  %v3957_v24 = vpop.xlane.xlu1 %3956  ;;  %v4068_v5 = vmul.f32 %v9763_v61, %v17097_v31  ;;  %v4067_v38 = vmul.f32 %v9763_v61, %v17098_v18  ;;  %v6197_v36 = vsel %vm6163_vm10, %v17100_v48, %v6195_v47  ;;  %v5773_v61 = vrot.slane %v5772_v4, 4 }
 0x766   : > { %v14012_v32 = vpop.xlane.xlu0 %4886  ;;  %9768 = vrcp.f32 %v3957_v24  ;;  %v6209_v57 = vsel %vm6160_vm9, %v17101_v29, %v14007_v49  ;;  %v5707_v24 = vrot.slane %v5706_v51, 1  ;;  %v14030_v47 = vadd.f32 %v13866_v3, %v5596_v25 }
 0x767   : > { %4312 = vmatprep.mubr.f32.mxu1 %v4068_v5  ;;  %4537 = vmatprep.mubr.f32.mxu0 %v4068_v5  ;;  %v17103_v5 = vld [vmem:[#allocation28_spill] sm:$0xff]  ;;  %v14035_v53 = vsel %vm6172_vm13, %v6188_v2, %v6187_v50  ;;  %v17105_v17 = vrot.slane %v13926_v60, 5  ;;  %v5603_v62 = vadd.f32 %v5602_v7, %v5601_v0  ;;  %v5714_v25 = vrot.slane %v5713_v39, 1 }
 0x768   : > { %v9765_v54 = vpop.eup %9764  ;;  %17104 = vst [vmem:[#allocation169_spill] sm:$0xff] %v14030_v47  ;;  %v5774_v29 = vadd.f32 %v5773_v61, %v5772_v4  ;;  %v5708_v0 = vadd.f32 %v5707_v24, %v5706_v51  ;;  %v5720_v7 = vadd.f32 %v5719_v16, %v5718_v40  ;;  %v17108_v4 = vld [vmem:[#allocation37_spill] sm:$0xff] }
 0x769   : > { %4313 = vmatmul.mubr.f32.gmra.mrb[174].mxu1 %v4067_v38  ;;  %4538 = vmatmul.mubr.f32.gmra.mrb[174].mxu0 %v4067_v38  ;;  %v5327_v13 = vpop.xlane.xlu1 %5326  ;;  %v4070_v31 = vmul.f32 %v9765_v54, %v17102_v11  ;;  %v4069_v18 = vmul.f32 %v9765_v54, %v17103_v5  ;;  %v14040_v37 = vsel %vm6166_vm11, %v17105_v17, %v6197_v36  ;;  %v5609_v38 = vrot.slane %v5608_v58, 1 }
 0x76a   : > { %v3960_v48 = vpop.xlane.xlu0 %3959  ;;  %v5504_v35 = vsel %vm5496_vm7, %v13958_v15, %v5327_v13  ;;  %v17106_v15 = vrot.slane %v13848_v1, 6  ;;  %v14050_v36 = vadd.f32 %v13883_v10, %v5666_v46  ;;  %v5715_v24 = vadd.f32 %v5714_v25, %v5713_v39 }
 0x76b   : > { %9770 = vrcp.f32 %v3960_v48  ;;  %v5611_v54 = vsel %vm5561_vm8, %v5504_v35, 0.0  ;;  %4317 = vmatprep.mubr.f32.mxu1 %v4070_v31  ;;  %4542 = vmatprep.mubr.f32.mxu0 %v4070_v31  ;;  %v6168_v48 = vrot.slane %v14030_v47, 4  ;;  %v5610_v17 = vadd.f32 %v5609_v38, %v5608_v58  ;;  %v17112_v38 = vld [vmem:[#allocation36_spill] sm:$0xff] }
 0x76c   : > { %v5612_v11 = vrot.slane %v5611_v54, 4  ;;  %v14046_v50 = vsel %vm6163_vm10, %v17106_v15, %v6209_v57  ;;  %17107 = vst [vmem:[#allocation168_spill] sm:$0xff] %v14050_v36  ;;  %v14055_v57 = vadd.f32 %v13880_v12, %v5603_v62  ;;  %v17110_v15 = vld [vmem:[#allocation32_spill] sm:$0xff]  ;;  %v5775_v16 = vrot.slane %v5774_v29, 2 }
 0x76d   : > { %v9767_v2 = vpop.eup %9766  ;;  %4318 = vmatmul.mubr.f32.gmra.mrb[176].mxu1 %v4069_v18  ;;  %4543 = vmatmul.mubr.f32.gmra.mrb[176].mxu0 %v4069_v18  ;;  %v3963_v35 = vpop.xlane.xlu1 %3962 }
 0x76e   : > { %v5613_v31 = vadd.f32 %v5612_v11, %v5611_v54  ;;  %v5351_v5 = vpop.xlane.xlu0 %5350  ;;  %9772 = vrcp.f32 %v3963_v35  ;;  %v4072_v61 = vmul.f32 %v9767_v2, %v17108_v4  ;;  %17109 = vst [vmem:[#allocation171_spill] sm:$0xff] %v14055_v57  ;;  %v4071_v51 = vmul.f32 %v9767_v2, %v17110_v15  ;;  %v17111_v4 = vld [vmem:[#allocation38_spill] sm:$0xff] }
 0x76f   : > { %v5512_v46 = vsel %vm5496_vm7, %v13982_v43, %v5351_v5  ;;  %v5721_v11 = vrot.slane %v5720_v7, 1  ;;  %v14064_v43 = vadd.f32 %v13866_v3, %v5708_v0 }
 0x770   : > { %v9769_v40 = vpop.eup %9768  ;;  %v5614_v18 = vrot.slane %v5613_v31, 2  ;;  %v5667_v54 = vsel %vm5561_vm8, %v5512_v46, 0.0  ;;  %4322 = vmatprep.mubr.f32.mxu1 %v4072_v61  ;;  %4547 = vmatprep.mubr.f32.mxu0 %v4072_v61  ;;  %v14070_v61 = vadd.f32 %v13883_v10, %v5610_v17 }
 0x771   : > { %v5668_v35 = vrot.slane %v5667_v54, 4  ;;  %4323 = vmatmul.mubr.f32.gmra.mrb[178].mxu1 %v4071_v51  ;;  %4548 = vmatmul.mubr.f32.gmra.mrb[178].mxu0 %v4071_v51  ;;  %v5375_v62 = vpop.xlane.xlu1 %5374  ;;  %v4074_v58 = vmul.f32 %v9769_v40, %v17111_v4  ;;  %v4073_v13 = vmul.f32 %v9769_v40, %v17112_v38  ;;  %17113 = vst [vmem:[#allocation170_spill] sm:$0xff] %v14064_v43 }
 0x772   : > { %v5615_v39 = vadd.f32 %v5614_v18, %v5613_v31  ;;  %v3966_v25 = vpop.xlane.xlu0 %3965  ;;  %v5520_v2 = vsel %vm5496_vm7, %v13996_v63, %v5375_v62  ;;  %17114 = vst [vmem:[#allocation186_spill] sm:$0xff] %v14070_v61  ;;  %v5776_v51 = vadd.f32 %v5775_v16, %v5774_v29  ;;  %v6170_v31 = vsel %vm6169_vm12, %v6168_v48, %v13839_v14  ;;  %v17116_v29 = vld [vmem:[#allocation113_spill] sm:$0xff]  ;;  %v17117_v48 = vld [vmem:[#allocation111_spill] sm:$0xff] }
 0x773   : > { %v5669_v46 = vadd.f32 %v5668_v35, %v5667_v54  ;;  %9774 = vrcp.f32 %v3966_v25  ;;  %v5723_v15 = vsel %vm5561_vm8, %v5520_v2, 0.0  ;;  %4327 = vmatprep.mubr.f32.mxu1 %v4074_v58  ;;  %4552 = vmatprep.mubr.f32.mxu0 %v4074_v58  ;;  %v14076_v63 = vadd.f32 %v13880_v12, %v5715_v24 }
 0x774   : > { %v5616_v0 = vrot.slane %v5615_v39, 1  ;;  %v5724_v40 = vrot.slane %v5723_v15, 4  ;;  %v5722_v62 = vadd.f32 %v5721_v11, %v5720_v7  ;;  %v6171_v54 = vrot.slane %v14055_v57, 3 }
 0x775   : > { %v9771_v18 = vpop.eup %9770  ;;  %17115 = vst [vmem:[#allocation172_spill] sm:$0xff] %v14076_v63  ;;  %v5670_v4 = vrot.slane %v5669_v46, 2  ;;  %4328 = vmatmul.mubr.f32.gmra.mrb[180].mxu1 %v4073_v13  ;;  %4553 = vmatmul.mubr.f32.gmra.mrb[180].mxu0 %v4073_v13  ;;  %v3969_v17 = vpop.xlane.xlu1 %3968  ;;  %v6174_v7 = vrot.slane %v14070_v61, 2  ;;  %v5777_v2 = vrot.slane %v5776_v51, 1 }
 0x776   : > { %v5617_v35 = vadd.f32 %v5616_v0, %v5615_v39  ;;  %v5725_v38 = vadd.f32 %v5724_v40, %v5723_v15  ;;  %v5399_v58 = vpop.xlane.xlu0 %5398  ;;  %9776 = vrcp.f32 %v3969_v17  ;;  %v4076_v16 = vmul.f32 %v9771_v18, %v17116_v29  ;;  %v17120_v40 = vld [vmem:[#allocation114_spill] sm:$0xff] }
 0x777   : > { %v5671_v25 = vadd.f32 %v5670_v4, %v5669_v46  ;;  %v5528_v14 = vsel %vm5496_vm7, %v14012_v32, %v5399_v58  ;;  %v4075_v24 = vmul.f32 %v9771_v18, %v17117_v48  ;;  %v17119_v46 = vld [vmem:[#allocation34_spill] sm:$0xff]  ;;  %v14091_v4 = vadd.f32 %v13883_v10, %v5722_v62 }
 0x778   : > { %v9773_v11 = vpop.eup %9772  ;;  %v14085_v13 = vadd.f32 %v13894_v22, %v5617_v35  ;;  %v5726_v5 = vrot.slane %v5725_v38, 2  ;;  %v5779_v39 = vsel %vm5561_vm8, %v5528_v14, 0.0  ;;  %4332 = vmatprep.mubr.f32.mxu1 %v4076_v16  ;;  %4557 = vmatprep.mubr.f32.mxu0 %v4076_v16  ;;  %v6173_v35 = vsel %vm6172_vm13, %v6171_v54, %v6170_v31 }
 0x779   : > { %v5672_v15 = vrot.slane %v5671_v25, 1  ;;  %v5780_v0 = vrot.slane %v5779_v39, 4  ;;  %4333 = vmatmul.mubr.f32.gmra.mrb[182].mxu1 %v4075_v24  ;;  %4558 = vmatmul.mubr.f32.gmra.mrb[182].mxu0 %v4075_v24  ;;  %v4078_v32 = vmul.f32 %v9773_v11, %v17119_v46  ;;  %v4077_v18 = vmul.f32 %v9773_v11, %v17120_v40  ;;  %17121 = vst [vmem:[#allocation31_spill] sm:$0xff] %v14091_v4 }
 0x77a   : > { %17118 = vst [vmem:[#allocation26_spill] sm:$0xff] %v14085_v13  ;;  %v5727_v17 = vadd.f32 %v5726_v5, %v5725_v38  ;;  %v3972_v58 = vpop.xlane.xlu0 %3971  ;;  %v6177_v29 = vrot.slane %v14085_v13, 1  ;;  %v6176_v16 = vsel %vm6175_vm15, %v6174_v7, %v6173_v35  ;;  %v5778_v24 = vadd.f32 %v5777_v2, %v5776_v51  ;;  %v17124_v7 = vld [vmem:[#allocation117_spill] sm:$0xff] }
 0x77b   : > { %v5673_v14 = vadd.f32 %v5672_v15, %v5671_v25  ;;  %v5781_v48 = vadd.f32 %v5780_v0, %v5779_v39  ;;  %9778 = vrcp.f32 %v3972_v58  ;;  %4337 = vmatprep.mubr.f32.mxu1 %v4078_v32  ;;  %4562 = vmatprep.mubr.f32.mxu0 %v4078_v32  ;;  %v6200_v62 = vrot.slane %v14064_v43, 4 }
 0x77c   : > { %v5728_v46 = vrot.slane %v5727_v17, 1  ;;  %v6179_v11 = vsel %vm6178_vm14, %v6177_v29, %v6176_v16  ;;  %v17123_v38 = vrot.slane %v13970_v33, 5  ;;  %v17125_v39 = vrot.slane %v14050_v36, 2 }
 0x77d   : > { %v9775_v40 = vpop.eup %9774  ;;  %v14099_v5 = vadd.f32 %v13894_v22, %v5673_v14  ;;  %v5782_v31 = vrot.slane %v5781_v48, 2  ;;  %4338 = vmatmul.mubr.f32.gmra.mrb[184].mxu1 %v4077_v18  ;;  %4563 = vmatmul.mubr.f32.gmra.mrb[184].mxu0 %v4077_v18  ;;  %v6286_v54 = vsel %vm5561_vm8, %v6179_v11, -inf  ;;  %v6202_v0 = vrot.slane %v14076_v63, 3  ;;  %v17126_v18 = vld [vmem:[#allocation116_spill] sm:$0xff] }
 0x77e   : > { %v6213_v25 = vsel %vm6166_vm11, %v17123_v38, %v14046_v50  ;;  %v5729_v51 = vadd.f32 %v5728_v46, %v5727_v17  ;;  %6287 = vmax.xlane.f32.xlu1 %v6286_v54  ;;  %v4080_v2 = vmul.f32 %v9775_v40, %v17124_v7  ;;  %v6191_v15 = vsel %vm6175_vm15, %v17125_v39, %v14035_v53  ;;  %v17134_v39 = vld [vmem:[#allocation148_spill] sm:$0xff] }
 0x77f   : > { %17122 = vst [vmem:[#allocation29_spill] sm:$0xff] %v14099_v5  ;;  %v5783_v32 = vadd.f32 %v5782_v31, %v5781_v48  ;;  %v4079_v58 = vmul.f32 %v9775_v40, %v17126_v18  ;;  %v6192_v35 = vrot.slane %v14099_v5, 1  ;;  %v6204_v29 = vrot.slane %v14091_v4, 2  ;;  %v17130_v40 = vld [vmem:[#allocation39_spill] sm:$0xff] }
 0x780   : > { %v9777_v14 = vpop.eup %9776  ;;  %v17127_v50 = vsub.f32 %v17076_v41, %v13654_v26  ;;  %v14119_v16 = vadd.f32 %v13883_v10, %v5778_v24  ;;  %v14122_v46 = vadd.f32 %v13894_v22, %v5729_v51  ;;  %4342 = vmatprep.mubr.f32.mxu1 %v4080_v2  ;;  %4567 = vmatprep.mubr.f32.mxu0 %v4080_v2  ;;  %v17131_v41 = vld [vmem:[#allocation115_spill] sm:$0xff]  ;;  %v6214_v7 = vrot.slane %v13991_v34, 4  ;;  %v17133_v2 = vld [vmem:[#allocation177_spill] sm:$0xff] }
 0x781   : > { %v6201_v53 = vsel %vm6169_vm12, %v6200_v62, %v14040_v37  ;;  %v5784_v48 = vrot.slane %v5783_v32, 1  ;;  %4343 = vmatmul.mubr.f32.gmra.mrb[186].mxu1 %v4079_v58  ;;  %4568 = vmatmul.mubr.f32.gmra.mrb[186].mxu0 %v4079_v58  ;;  %v6193_v11 = vsel %vm6178_vm14, %v6192_v35, %v6191_v15  ;;  %v4082_v31 = vmul.f32 %v9777_v14, %v17130_v40  ;;  %v17138_v40 = vld [vmem:[#allocation119_spill] sm:$0xff] }
 0x782   : > { %v3889_v17 = vmul.f32 1.442695, %v17127_v50  ;;  %17128 = vst [vmem:[#allocation33_spill] sm:$0xff] %v14119_v16  ;;  %17129 = vst [vmem:[#allocation28_spill] sm:$0xff] %v14122_v46  ;;  %v4081_v54 = vmul.f32 %v9777_v14, %v17131_v41  ;;  %v6289_v24 = vsel %vm5561_vm8, %v6193_v11, -inf  ;;  %3974 = vadd.xlane.f32.xlu1 %v13918_v59  ;;  %v6203_v38 = vsel %vm6172_vm13, %v6202_v0, %v6201_v53  ;;  %v17135_v59 = vld [vmem:[#allocation149_spill] sm:$0xff] }
 0x783   : > { %v6206_v51 = vrot.slane %v14122_v46, 1  ;;  %v17132_v37 = vsub.f32 %v17077_v6, %v13654_v26  ;;  %v3783_v15 = vsub.f32 %v17134_v39, %v17133_v2  ;;  %v5785_v18 = vadd.f32 %v5784_v48, %v5783_v32  ;;  %6290 = vmax.xlane.f32.xlu0 %v6289_v24  ;;  %4347 = vmatprep.mubr.f32.mxu1 %v4082_v31  ;;  %v17137_v48 = vld [vmem:[#allocation173_spill] sm:$0xff] }
 0x784   : > { %v6205_v58 = vsel %vm6175_vm15, %v6204_v29, %v6203_v38  ;;  %v3784_v35 = vsub.f32 %v17135_v59, %v17133_v2  ;;  %4572 = vmatprep.mubr.f32.mxu0 %v4082_v31  ;;  %v6215_v14 = vsel %vm6169_vm12, %v6214_v7, %v6213_v25  ;;  %v6218_v50 = vrot.slane %v14119_v16, 2 }
 0x785   : > { %v3891_v62 = vmul.f32 1.442695, %v17132_v37  ;;  %v6207_v0 = vsel %vm6178_vm14, %v6206_v51, %v6205_v58  ;;  %v9779_v26 = vpop.eup %9778  ;;  %v14146_v6 = vadd.f32 %v13894_v22, %v5785_v18  ;;  %4348 = vmatmul.mubr.f32.gmra.mrb[188].mxu1 %v4081_v54  ;;  %4573 = vmatmul.mubr.f32.gmra.mrb[188].mxu0 %v4081_v54  ;;  %v3976_v32 = vadd.f32 %v13913_v23, %v13906_v30 }
 0x786   : > { %v6292_v29 = vsel %vm5561_vm8, %v6207_v0, -inf  ;;  %v6216_v53 = vrot.slane %v14018_v45, 3  ;;  %9780 = vpow2.f32 %v3889_v17  ;;  %v4084_v11 = vmul.f32 %v9779_v26, %v17137_v48  ;;  %v17141_v0 = vld [vmem:[#allocation133_spill] sm:$0xff] }
 0x787   : > { %17136 = vst [vmem:[#allocation37_spill] sm:$0xff] %v14146_v6  ;;  %6293 = vmax.xlane.f32.xlu1 %v6292_v29  ;;  %v3897_v25 = vmul.f32 1.442695, %v3783_v15  ;;  %3977 = vadd.xlane.f32.xlu0 %v3976_v32  ;;  %v4083_v31 = vmul.f32 %v9779_v26, %v17138_v40  ;;  %v6220_v24 = vrot.slane %v14146_v6, 1  ;;  %9782 = vpow2.f32 %v3891_v62  ;;  %v17144_v48 = vld [vmem:[#allocation141_spill] sm:$0xff] }
 0x788   : > { %v6217_v41 = vsel %vm6172_vm13, %v6216_v53, %v6215_v14  ;;  %v3899_v54 = vmul.f32 1.442695, %v3784_v35  ;;  %4352 = vmatprep.mubr.f32.mxu1 %v4084_v11  ;;  %4577 = vmatprep.mubr.f32.mxu0 %v4084_v11  ;;  %v3979_v17 = vadd.f32 %v13936_v20, %v13920_v27  ;;  %v3982_v37 = vadd.f32 %v13952_v28, %v13938_v44  ;;  %v17140_v35 = vld [vmem:[#allocation174_spill] sm:$0xff]  ;;  %v17143_v53 = vld [vmem:[#allocation175_spill] sm:$0xff] }
 0x789   : > { %v6219_v38 = vsel %vm6175_vm15, %v6218_v50, %v6217_v41  ;;  %4353 = vmatmul.mubr.f32.gmra.mrb[190].mxu1 %v4083_v31  ;;  %4578 = vmatmul.mubr.f32.gmra.mrb[190].mxu0 %v4083_v31  ;;  %9784 = vpow2.f32 %v3897_v25  ;;  %v3988_v2 = vadd.f32 %v13967_v52, %v13960_v9  ;;  %v3773_v14 = vsub.f32 %v17141_v0, %v17140_v35  ;;  %v17142_v50 = vld [vmem:[#allocation135_spill] sm:$0xff] }
 0x78a   : > { %v6221_v51 = vsel %vm6178_vm14, %v6220_v24, %v6219_v38  ;;  %9786 = vpow2.f32 %v3899_v54  ;;  %v3774_v26 = vsub.f32 %v17142_v50, %v17140_v35  ;;  %v3777_v11 = vsub.f32 %v17144_v48, %v17143_v53  ;;  %v17146_v38 = vld [vmem:[#allocation142_spill] sm:$0xff]  ;;  %v17148_v35 = vld [vmem:[#allocation181_spill] sm:$0xff] }
 0x78b   : > { %v6295_v7 = vsel %vm5561_vm8, %v6221_v51, -inf  ;;  %3980 = vadd.xlane.f32.xlu1 %v3979_v17  ;;  %v3877_v32 = vmul.f32 1.442695, %v3773_v14  ;;  %v3778_v17 = vsub.f32 %v17146_v38, %v17143_v53  ;;  %v17149_v14 = vld [vmem:[#allocation183_spill] sm:$0xff] }
 0x78c   : > { %6296 = vmax.xlane.f32.xlu0 %v6295_v7  ;;  %v3879_v29 = vmul.f32 1.442695, %v3774_v26  ;;  %v3885_v25 = vmul.f32 1.442695, %v3777_v11  ;;  %v17150_v26 = vld [vmem:[#allocation176_spill] sm:$0xff] }
 0x78d   : > { %9788 = vpow2.f32 %v3877_v32  ;;  %v17151_v32 = vld [vmem:[#allocation145_spill] sm:$0xff] }
 0x78e   : > { %9790 = vpow2.f32 %v3879_v29  ;;  %v3781_v29 = vsub.f32 %v17151_v32, %v17150_v26 }
 0x78f   : > { %9792 = vpow2.f32 %v3885_v25 }
 0x790   : > { %3983 = vadd.xlane.f32.xlu0 %v3982_v37  ;;  %v14163_v62 = vpop.eup %9780 }
 0x791   : > { %v14167_v39 = vpop.eup %9782 }
 0x792   : > { %v3994_v18 = vadd.f32 %v14167_v39, %v14163_v62 }
 0x793   : > { %v14169_v15 = vpop.eup %9784 }
 0x794   : > { %3989 = vadd.xlane.f32.xlu0 %v3988_v2  ;;  %17139 = vst [vmem:[#allocation32_spill] sm:$0xff] %v14169_v15  ;;  %v14173_v58 = vpop.eup %9786 }
 0x795   : > { %v4000_v59 = vadd.f32 %v14173_v58, %v14169_v15 }
 0x798   : > { %3995 = vadd.xlane.f32.xlu0 %v3994_v18  ;;  %v17147_v18 = vld [vmem:[#allocation154_spill] sm:$0xff] }
 0x79c   : > { %4001 = vadd.xlane.f32.xlu0 %v4000_v59 }
 0x80b   : > { %v14183_v40 = vpop.xlane.xlu1 %6287 }
 0x80c   : > { %17145 = vst [vmem:[#allocation38_spill] sm:$0xff] %v14183_v40  ;;  %v6438_v31 = vsub.f32 %v13794_v55, %v14183_v40  ;;  %v6318_v41 = vrot.slane %v14183_v40, 1  ;;  %v6319_v24 = vrot.slane %v14183_v40, 2  ;;  %v6320_v54 = vrot.slane %v14183_v40, 3 }
 0x80d   : > { %v6321_v51 = vrot.slane %v14183_v40, 4  ;;  %v6322_v7 = vrot.slane %v14183_v40, 5  ;;  %v6323_v37 = vrot.slane %v14183_v40, 6  ;;  %v6324_v53 = vrot.slane %v14183_v40, 7  ;;  %v17162_v40 = vld [vmem:[#allocation178_spill] sm:$0xff] }
 0x80e   : > { %v6502_v2 = vmul.f32 1.442695, %v6438_v31  ;;  %v6439_v59 = vsub.f32 %v17147_v18, %v6318_v41  ;;  %v6440_v0 = vsub.f32 %v17148_v35, %v6319_v24  ;;  %v6441_v50 = vsub.f32 %v17149_v14, %v6320_v54  ;;  %v17161_v35 = vld [vmem:[#allocation137_spill] sm:$0xff] }
 0x80f   : > { %v3975_v48 = vpop.xlane.xlu1 %3974  ;;  %v6442_v11 = vsub.f32 %v14030_v47, %v6321_v51  ;;  %v3887_v41 = vmul.f32 1.442695, %v3778_v17  ;;  %v6443_v24 = vsub.f32 %v14055_v57, %v6322_v7  ;;  %v6444_v25 = vsub.f32 %v14070_v61, %v6323_v37  ;;  %v14209_v51 = vpop.eup %9788  ;;  %v17157_v57 = vld [vmem:[#allocation157_spill] sm:$0xff] }
 0x810   : > { %9794 = vpow2.f32 %v6502_v2  ;;  %v14202_v38 = vpop.xlane.xlu0 %6290  ;;  %v6504_v22 = vmul.f32 1.442695, %v6439_v59  ;;  %v6506_v31 = vmul.f32 1.442695, %v6440_v0  ;;  %v6508_v10 = vmul.f32 1.442695, %v6441_v50  ;;  %v14213_v0 = vpop.eup %9790 }
 0x811   : > { %17152 = vst [vmem:[#allocation36_spill] sm:$0xff] %v14202_v38  ;;  %9796 = vrcp.f32 %v3975_v48  ;;  %v6510_v32 = vmul.f32 1.442695, %v6442_v11  ;;  %v6325_v14 = vrot.slane %v14202_v38, 1  ;;  %v3893_v2 = vmul.f32 1.442695, %v3781_v29 }
 0x812   : > { %9798 = vpow2.f32 %v6504_v22  ;;  %v6445_v59 = vsub.f32 %v14085_v13, %v6324_v53  ;;  %v6326_v17 = vrot.slane %v14202_v38, 2  ;;  %v17154_v22 = vld [vmem:[#allocation146_spill] sm:$0xff]  ;;  %v6512_v37 = vmul.f32 1.442695, %v6443_v24 }
 0x813   : > { %9800 = vpow2.f32 %v6506_v31  ;;  %v3782_v7 = vsub.f32 %v17154_v22, %v17150_v26  ;;  %v6514_v50 = vmul.f32 1.442695, %v6444_v25  ;;  %v6327_v48 = vrot.slane %v14202_v38, 3  ;;  %v14224_v26 = vpop.eup %9792 }
 0x814   : > { %v14206_v54 = vpop.xlane.xlu1 %6293  ;;  %v3978_v18 = vpop.xlane.xlu0 %3977  ;;  %9802 = vpow2.f32 %v6508_v10  ;;  %v6328_v29 = vrot.slane %v14202_v38, 4  ;;  %v6329_v53 = vrot.slane %v14202_v38, 5  ;;  %v17155_v10 = vld [vmem:[#allocation182_spill] sm:$0xff]  ;;  %v6448_v12 = vsub.f32 %v17157_v57, %v6326_v17 }
 0x815   : > { %17153 = vst [vmem:[#allocation113_spill] sm:$0xff] %v14206_v54  ;;  %9804 = vpow2.f32 %v3887_v41  ;;  %v6447_v31 = vsub.f32 %v17155_v10, %v6325_v14  ;;  %v6516_v41 = vmul.f32 1.442695, %v6445_v59  ;;  %v6330_v25 = vrot.slane %v14202_v38, 6 }
 0x816   : > { %9806 = vrcp.f32 %v3978_v18  ;;  %v17158_v18 = vld [vmem:[#allocation187_spill] sm:$0xff]  ;;  %v14229_v22 = vmul.f32 1.442695, %v3782_v7  ;;  %v6331_v14 = vrot.slane %v14202_v38, 7  ;;  %v6450_v59 = vsub.f32 %v13975_v56, %v6328_v29 }
 0x817   : > { %9808 = vpow2.f32 %v6510_v32  ;;  %v6446_v24 = vsub.f32 %v17158_v18, %v14202_v38  ;;  %v6451_v17 = vsub.f32 %v13994_v42, %v6329_v53  ;;  %v6520_v57 = vmul.f32 1.442695, %v6447_v31  ;;  %v17163_v38 = vld [vmem:[#allocation150_spill] sm:$0xff] }
 0x818   : > { %v3981_v11 = vpop.xlane.xlu1 %3980  ;;  %9810 = vpow2.f32 %v3893_v2  ;;  %v17159_v2 = vld [vmem:[#allocation184_spill] sm:$0xff]  ;;  %v6522_v7 = vmul.f32 1.442695, %v6448_v12  ;;  %v3785_v15 = vsub.f32 %v17163_v38, %v17162_v40  ;;  %v6453_v31 = vsub.f32 %v14099_v5, %v6331_v14 }
 0x819   : > { %v14221_v13 = vpop.xlane.xlu0 %6296  ;;  %9812 = vrcp.f32 %v3981_v11  ;;  %v6449_v10 = vsub.f32 %v17159_v2, %v6327_v48  ;;  %v17160_v11 = vld [vmem:[#allocation138_spill] sm:$0xff]  ;;  %v6518_v48 = vmul.f32 1.442695, %v6446_v24  ;;  %v6526_v38 = vmul.f32 1.442695, %v6450_v59 }
 0x81a   : > { %17156 = vst [vmem:[#allocation111_spill] sm:$0xff] %v14221_v13  ;;  %v9795_v32 = vpop.eup %9794  ;;  %9814 = vpow2.f32 %v6512_v37  ;;  %v6528_v14 = vmul.f32 1.442695, %v6451_v17  ;;  %v17168_v17 = vld [vmem:[#allocation151_spill] sm:$0xff] }
 0x81b   : > { %v9797_v3 = vpop.eup %9796  ;;  %9816 = vpow2.f32 %v6514_v50  ;;  %v6452_v50 = vsub.f32 %v14050_v36, %v6330_v25 }
 0x81c   : > { %v9799_v61 = vpop.eup %9798  ;;  %v4086_v47 = vmul.f32 %v9797_v3, %v17160_v11  ;;  %v4085_v55 = vmul.f32 %v9797_v3, %v17161_v35  ;;  %9818 = vpow2.f32 %v6516_v41  ;;  %v6524_v11 = vmul.f32 1.442695, %v6449_v10 }
 0x81d   : > { %v3984_v18 = vpop.xlane.xlu0 %3983  ;;  %v9801_v37 = vpop.eup %9800  ;;  %v6694_v2 = vrot.slane %v9799_v61, 7 }
 0x81e   : > { %v9803_v29 = vpop.eup %9802  ;;  %9820 = vrcp.f32 %v3984_v18  ;;  %4357 = vmatprep.mubr.f32.mxu1 %v4086_v47  ;;  %4582 = vmatprep.mubr.f32.mxu0 %v4086_v47  ;;  %v6696_v53 = vrot.slane %v9801_v37, 6  ;;  %v17165_v18 = vld [vmem:[#allocation179_spill] sm:$0xff]  ;;  %v17166_v47 = vld [vmem:[#allocation152_spill] sm:$0xff] }
 0x81f   : > { %v14241_v56 = vpop.eup %9804  ;;  %v14243_v3 = vpop.f32.mrb[160].mxu1  ;;  %4358 = vmatmul.mubr.f32.gmra.mrb[192].mxu1 %v4085_v55  ;;  %4583 = vmatmul.mubr.f32.gmra.mrb[192].mxu0 %v4085_v55  ;;  %v6695_v61 = vsel %vm6160_vm9, %v6694_v2, %v9795_v32  ;;  %v6698_v35 = vrot.slane %v9803_v29, 5  ;;  %9822 = vpow2.f32 %v6520_v57  ;;  %v3787_v24 = vsub.f32 %v17166_v47, %v17165_v18  ;;  %v17167_v57 = vld [vmem:[#allocation153_spill] sm:$0xff] }
 0x820   : > { %17164 = vst [vmem:[#allocation34_spill] sm:$0xff] %v14243_v3  ;;  %v14245_v12 = vpop.f32.mrb[160].mxu0  ;;  %v9807_v41 = vpop.eup %9806  ;;  %v6697_v10 = vsel %vm6163_vm10, %v6696_v53, %v6695_v61  ;;  %9824 = vpow2.f32 %v6522_v7  ;;  %v6530_v32 = vmul.f32 1.442695, %v6452_v50  ;;  %v3788_v59 = vsub.f32 %v17167_v57, %v17165_v18  ;;  %v17170_v18 = vld [vmem:[#allocation122_spill] sm:$0xff] }
 0x821   : > { %v4281_v25 = vpop.f32.mrb[161].mxu1  ;;  %v9809_v37 = vpop.eup %9808  ;;  %9826 = vpow2.f32 %v6518_v48  ;;  %v4088_v5 = vmul.f32 %v9807_v41, %v13913_v23  ;;  %v6699_v55 = vsel %vm6166_vm11, %v6698_v35, %v6697_v10  ;;  %v4087_v29 = vmul.f32 %v9807_v41, %v13906_v30 }
 0x822   : > { %v4506_v36 = vpop.f32.mrb[161].mxu0  ;;  %v14253_v2 = vpop.eup %9810  ;;  %v6700_v47 = vrot.slane %v9809_v37, 4  ;;  %9828 = vpow2.f32 %v6524_v11  ;;  %v3786_v7 = vsub.f32 %v17168_v17, %v17162_v40  ;;  %v3901_v48 = vmul.f32 1.442695, %v3785_v15  ;;  %v17171_v25 = vld [vmem:[#allocation158_spill] sm:$0xff] }
 0x823   : > { %v9813_v53 = vpop.eup %9812  ;;  %4362 = vmatprep.mubr.f32.mxu1 %v4088_v5  ;;  %4587 = vmatprep.mubr.f32.mxu0 %v4088_v5  ;;  %9830 = vpow2.f32 %v6526_v38  ;;  %v6532_v23 = vmul.f32 1.442695, %v6453_v31  ;;  %v14260_v50 = vpop.f32.mrb[162].mxu1  ;;  %v3905_v15 = vmul.f32 1.442695, %v3787_v24  ;;  %v3791_v10 = vsub.f32 %v17171_v25, %v17170_v18 }
 0x824   : > { %v9815_v36 = vpop.eup %9814  ;;  %17169 = vst [vmem:[#allocation114_spill] sm:$0xff] %v14260_v50  ;;  %v14262_v61 = vpop.f32.mrb[162].mxu0  ;;  %4363 = vmatmul.mubr.f32.gmra.mrb[194].mxu1 %v4087_v29  ;;  %4588 = vmatmul.mubr.f32.gmra.mrb[194].mxu0 %v4087_v29  ;;  %v4090_v30 = vmul.f32 %v9813_v53, %v13936_v20  ;;  %v4089_v11 = vmul.f32 %v9813_v53, %v13920_v27  ;;  %9832 = vpow2.f32 %v6528_v14  ;;  %v3907_v38 = vmul.f32 1.442695, %v3788_v59  ;;  %v17172_v27 = vld [vmem:[#allocation159_spill] sm:$0xff] }
 0x825   : > { %v6701_v35 = vsel %vm6169_vm12, %v6700_v47, %v6699_v55  ;;  %v9817_v40 = vpop.eup %9816  ;;  %v4286_v41 = vpop.f32.mrb[163].mxu1  ;;  %v6702_v5 = vrot.slane %v9815_v36, 3  ;;  %9834 = vpow2.f32 %v6530_v32  ;;  %v3792_v55 = vsub.f32 %v17172_v27, %v17170_v18 }
 0x826   : > { %v9819_v31 = vpop.eup %9818  ;;  %9836 = vpow2.f32 %v14229_v22  ;;  %v4511_v37 = vpop.f32.mrb[163].mxu0  ;;  %4367 = vmatprep.mubr.f32.mxu1 %v4090_v30  ;;  %4592 = vmatprep.mubr.f32.mxu0 %v4090_v30  ;;  %v6704_v20 = vrot.slane %v9817_v40, 2  ;;  %v3903_v32 = vmul.f32 1.442695, %v3786_v7 }
 0x827   : > { %v6703_v14 = vsel %vm6172_vm13, %v6702_v5, %v6701_v35  ;;  %v6706_v24 = vrot.slane %v9819_v31, 1  ;;  %9838 = vpow2.f32 %v6532_v23  ;;  %v14273_v29 = vpop.f32.mrb[164].mxu1  ;;  %v14275_v22 = vpop.f32.mrb[164].mxu0  ;;  %v3913_v23 = vmul.f32 1.442695, %v3791_v10 }
 0x828   : > { %v9821_v57 = vpop.eup %9820  ;;  %9840 = vpow2.f32 %v3901_v48  ;;  %17173 = vst [vmem:[#allocation117_spill] sm:$0xff] %v14273_v29  ;;  %4368 = vmatmul.mubr.f32.gmra.mrb[196].mxu1 %v4089_v11  ;;  %4593 = vmatmul.mubr.f32.gmra.mrb[196].mxu0 %v4089_v11  ;;  %v6705_v59 = vsel %vm6175_vm15, %v6704_v20, %v6703_v14  ;;  %v4291_v53 = vpop.f32.mrb[165].mxu1  ;;  %v3915_v11 = vmul.f32 1.442695, %v3792_v55  ;;  %v3985_v20 = vadd.f32 %v14213_v0, %v14209_v51 }
 0x829   : > { %v9823_v47 = vpop.eup %9822  ;;  %9842 = vpow2.f32 %v3905_v15  ;;  %v6707_v17 = vsel %vm6178_vm14, %v6706_v24, %v6705_v59  ;;  %v4092_v36 = vmul.f32 %v9821_v57, %v13952_v28  ;;  %v4516_v35 = vpop.f32.mrb[165].mxu0  ;;  %v4091_v40 = vmul.f32 %v9821_v57, %v13938_v44 }
 0x82a   : > { %v9825_v30 = vpop.eup %9824  ;;  %v6814_v7 = vsel %vm5561_vm8, %v6707_v17, 0.0  ;;  %v6708_v48 = vrot.slane %v9823_v47, 7  ;;  %9844 = vpow2.f32 %v3907_v38 }
 0x82b   : > { %v9827_v41 = vpop.eup %9826  ;;  %6815 = vadd.xlane.f32.xlu1 %v6814_v7  ;;  %4372 = vmatprep.mubr.f32.mxu1 %v4092_v36  ;;  %v6710_v5 = vrot.slane %v9825_v30, 6  ;;  %9846 = vpow2.f32 %v3903_v32  ;;  %v3991_v7 = vadd.f32 %v14241_v56, %v14224_v26 }
 0x82c   : > { %v9829_v15 = vpop.eup %9828  ;;  %4597 = vmatprep.mubr.f32.mxu0 %v4092_v36  ;;  %v14282_v31 = vpop.f32.mrb[166].mxu1  ;;  %v6709_v18 = vsel %vm6160_vm9, %v6708_v48, %v9827_v41  ;;  %4373 = vmatmul.mubr.f32.gmra.mrb[198].mxu1 %v4091_v40  ;;  %9848 = vpow2.f32 %v3913_v23 }
 0x82d   : > { %17174 = vst [vmem:[#allocation116_spill] sm:$0xff] %v14282_v31  ;;  %v14284_v28 = vpop.f32.mrb[166].mxu0  ;;  %v9831_v25 = vpop.eup %9830  ;;  %v6711_v10 = vsel %vm6163_vm10, %v6710_v5, %v6709_v18  ;;  %v6712_v44 = vrot.slane %v9829_v15, 5  ;;  %4598 = vmatmul.mubr.f32.gmra.mrb[198].mxu0 %v4091_v40  ;;  %9850 = vpow2.f32 %v3915_v11 }
 0x82e   : > { %17175 = vst [vmem:[#allocation39_spill] sm:$0xff] %v14284_v28  ;;  %v4296_v38 = vpop.f32.mrb[167].mxu1  ;;  %v4521_v37 = vpop.f32.mrb[167].mxu0  ;;  %v6714_v55 = vrot.slane %v9831_v25, 4 }
 0x82f   : > { %v9833_v27 = vpop.eup %9832  ;;  %v6713_v24 = vsel %vm6166_vm11, %v6712_v44, %v6711_v10  ;;  %3986 = vadd.xlane.f32.xlu1 %v3985_v20 }
 0x830   : > { %v9835_v14 = vpop.eup %9834  ;;  %v6716_v57 = vrot.slane %v9833_v27, 3  ;;  %v6715_v59 = vsel %vm6169_vm12, %v6714_v55, %v6713_v24  ;;  %v14294_v53 = vpop.f32.mrb[168].mxu1 }
 0x831   : > { %v14291_v32 = vpop.eup %9836  ;;  %v6718_v47 = vrot.slane %v9835_v14, 2  ;;  %17176 = vst [vmem:[#allocation115_spill] sm:$0xff] %v14294_v53  ;;  %v14296_v17 = vpop.f32.mrb[168].mxu0 }
 0x832   : > { %v9839_v36 = vpop.eup %9838  ;;  %v6717_v30 = vsel %vm6172_vm13, %v6716_v57, %v6715_v59  ;;  %v4301_v23 = vpop.f32.mrb[169].mxu1  ;;  %v3997_v37 = vadd.f32 %v14291_v32, %v14253_v2 }
 0x833   : > { %v4526_v35 = vpop.f32.mrb[169].mxu0  ;;  %v14301_v48 = vpop.eup %9840  ;;  %v6719_v40 = vsel %vm6175_vm15, %v6718_v47, %v6717_v30  ;;  %v6720_v41 = vrot.slane %v9839_v36, 1  ;;  %3992 = vadd.xlane.f32.xlu1 %v3991_v7 }
 0x834   : > { %v14304_v11 = vpop.eup %9842  ;;  %v14307_v15 = vpop.f32.mrb[170].mxu1 }
 0x835   : > { %v6721_v5 = vsel %vm6178_vm14, %v6720_v41, %v6719_v40  ;;  %17177 = vst [vmem:[#allocation177_spill] sm:$0xff] %v14307_v15  ;;  %v14309_v18 = vpop.f32.mrb[170].mxu0  ;;  %v14311_v25 = vpop.eup %9844  ;;  %v17194_v15 = vld [vmem:[#allocation180_spill] sm:$0xff] }
 0x836   : > { %17178 = vst [vmem:[#allocation148_spill] sm:$0xff] %v14309_v18  ;;  %v6817_v10 = vsel %vm5561_vm8, %v6721_v5, 0.0  ;;  %v4306_v44 = vpop.f32.mrb[171].mxu1  ;;  %v4531_v38 = vpop.f32.mrb[171].mxu0  ;;  %v4006_v55 = vadd.f32 %v14311_v25, %v14304_v11  ;;  %v17195_v18 = vld [vmem:[#allocation155_spill] sm:$0xff] }
 0x837   : > { %v14316_v20 = vpop.eup %9846  ;;  %6818 = vadd.xlane.f32.xlu0 %v6817_v10  ;;  %3998 = vadd.xlane.f32.xlu1 %v3997_v37 }
 0x838   : > { %v14318_v27 = vpop.eup %9848  ;;  %v14322_v14 = vpop.f32.mrb[172].mxu1  ;;  %v4003_v36 = vadd.f32 %v14316_v20, %v14301_v48 }
 0x839   : > { %17179 = vst [vmem:[#allocation149_spill] sm:$0xff] %v14322_v14  ;;  %v14324_v24 = vpop.f32.mrb[172].mxu0  ;;  %v14326_v57 = vpop.eup %9850 }
 0x83a   : > { %v4311_v59 = vpop.f32.mrb[173].mxu1  ;;  %v4536_v47 = vpop.f32.mrb[173].mxu0  ;;  %v4012_v30 = vadd.f32 %v14326_v57, %v14318_v27 }
 0x83b   : > { %4007 = vadd.xlane.f32.xlu0 %v4006_v55  ;;  %4004 = vadd.xlane.f32.xlu1 %v4003_v36 }
 0x83c   : > { %v14332_v23 = vpop.f32.mrb[174].mxu1  ;;  %v14334_v35 = vpop.f32.mrb[174].mxu0 }
 0x83d   : > { %17180 = vst [vmem:[#allocation173_spill] sm:$0xff] %v14332_v23  ;;  %17181 = vst [vmem:[#allocation119_spill] sm:$0xff] %v14334_v35  ;;  %v4316_v7 = vpop.f32.mrb[175].mxu1  ;;  %v4541_v40 = vpop.f32.mrb[175].mxu0  ;;  %v17191_v35 = vld [vmem:[#allocation65_spill] sm:$0xff] }
 0x83f   : > { %4013 = vadd.xlane.f32.xlu0 %v4012_v30  ;;  %v17186_v30 = vld [vmem:[#allocation72_spill] sm:$0xff] }
 0x840   : > { %v14336_v41 = vpop.f32.mrb[176].mxu1  ;;  %v14338_v5 = vpop.f32.mrb[176].mxu0 }
 0x841   : > { %17182 = vst [vmem:[#allocation174_spill] sm:$0xff] %v14336_v41  ;;  %v4321_v10 = vpop.f32.mrb[177].mxu1  ;;  %v4546_v44 = vpop.f32.mrb[177].mxu0 }
 0x844   : > { %v14340_v38 = vpop.f32.mrb[178].mxu1  ;;  %v14342_v37 = vpop.f32.mrb[178].mxu0 }
 0x845   : > { %17183 = vst [vmem:[#allocation133_spill] sm:$0xff] %v14340_v38  ;;  %17184 = vst [vmem:[#allocation135_spill] sm:$0xff] %v14342_v37  ;;  %v4326_v55 = vpop.f32.mrb[179].mxu1  ;;  %v4551_v59 = vpop.f32.mrb[179].mxu0 }
 0x848   : > { %v14344_v47 = vpop.f32.mrb[180].mxu1  ;;  %v14346_v36 = vpop.f32.mrb[180].mxu0 }
 0x849   : > { %17185 = vst [vmem:[#allocation175_spill] sm:$0xff] %v14344_v47  ;;  %v4331_v42 = vpop.f32.mrb[181].mxu1  ;;  %v4556_v7 = vpop.f32.mrb[181].mxu0 }
 0x84c   : > { %7374 = vrot.lane.b32.xlu1 %v17186_v30, %s10212_s10  ;;  %v14350_v40 = vpop.f32.mrb[182].mxu1  ;;  %v14352_v10 = vpop.f32.mrb[182].mxu0 }
 0x84d   : > { %17187 = vst [vmem:[#allocation141_spill] sm:$0xff] %v14350_v40  ;;  %17188 = vst [vmem:[#allocation142_spill] sm:$0xff] %v14352_v10  ;;  %v4336_v44 = vpop.f32.mrb[183].mxu1  ;;  %v4561_v41 = vpop.f32.mrb[183].mxu0  ;;  %v3789_v10 = vsub.f32 %v17195_v18, %v17194_v15 }
 0x850   : > { %v14354_v23 = vpop.f32.mrb[184].mxu1  ;;  %v14356_v55 = vpop.f32.mrb[184].mxu0 }
 0x851   : > { %17189 = vst [vmem:[#allocation176_spill] sm:$0xff] %v14354_v23  ;;  %17190 = vst [vmem:[#allocation145_spill] sm:$0xff] %v14356_v55  ;;  %v4341_v59 = vpop.f32.mrb[185].mxu1  ;;  %v4566_v37 = vpop.f32.mrb[185].mxu0  ;;  %v17198_v23 = vld [vmem:[#allocation156_spill] sm:$0xff] }
 0x852   : > { %v3790_v59 = vsub.f32 %v17198_v23, %v17194_v15  ;;  %v17199_v55 = vld [vmem:[#allocation140_spill] sm:$0xff] }
 0x854   : > { %v14360_v42 = vpop.f32.mrb[186].mxu1  ;;  %v14362_v7 = vpop.f32.mrb[186].mxu0  ;;  %v3911_v18 = vmul.f32 1.442695, %v3790_v59  ;;  %v17208_v59 = vld [vmem:[#allocation161_spill] sm:$0xff] }
 0x855   : > { %7376 = vrot.lane.b32.xlu0 %v17191_v35, %s10212_s10  ;;  %17192 = vst [vmem:[#allocation146_spill] sm:$0xff] %v14360_v42  ;;  %17193 = vst [vmem:[#allocation138_spill] sm:$0xff] %v14362_v7  ;;  %v4346_v30 = vpop.f32.mrb[187].mxu1  ;;  %v4571_v14 = vpop.f32.mrb[187].mxu0  ;;  %v17200_v35 = vld [vmem:[#allocation162_spill] sm:$0xff]  ;;  %v17201_v7 = vld [vmem:[#allocation163_spill] sm:$0xff] }
 0x856   : > { %v3795_v28 = vsub.f32 %v17200_v35, %v17199_v55  ;;  %v3909_v42 = vmul.f32 1.442695, %v3789_v10  ;;  %v3796_v30 = vsub.f32 %v17201_v7, %v17199_v55  ;;  %v17206_v7 = vld [vmem:[#allocation160_spill] sm:$0xff] }
 0x858   : > { %v14366_v44 = vpop.f32.mrb[188].mxu1  ;;  %v14368_v41 = vpop.f32.mrb[188].mxu0  ;;  %9852 = vpow2.f32 %v3909_v42  ;;  %v3923_v29 = vmul.f32 1.442695, %v3796_v30  ;;  %v17205_v42 = vld [vmem:[#allocation136_spill] sm:$0xff] }
 0x859   : > { %17196 = vst [vmem:[#allocation137_spill] sm:$0xff] %v14366_v44  ;;  %17197 = vst [vmem:[#allocation178_spill] sm:$0xff] %v14368_v41  ;;  %v4351_v37 = vpop.f32.mrb[189].mxu1  ;;  %v4576_v53 = vpop.f32.mrb[189].mxu0  ;;  %v3921_v41 = vmul.f32 1.442695, %v3795_v28  ;;  %9854 = vpow2.f32 %v3911_v18 }
 0x85a   : > { %v3794_v37 = vsub.f32 %v17208_v59, %v17205_v42  ;;  %v17209_v30 = vld [vmem:[#allocation84_spill] sm:$0xff] }
 0x85b   : > { %9856 = vpow2.f32 %v3921_v41  ;;  %v17207_v41 = vld [vmem:[#allocation81_spill] sm:$0xff] }
 0x85c   : > { %v14376_v14 = vpop.f32.mrb[190].mxu1  ;;  %v14378_v40 = vpop.f32.mrb[190].mxu0  ;;  %9858 = vpow2.f32 %v3923_v29  ;;  %v17204_v29 = vld [vmem:[#allocation62_spill] sm:$0xff]  ;;  %v3919_v18 = vmul.f32 1.442695, %v3794_v37 }
 0x85d   : > { %17202 = vst [vmem:[#allocation150_spill] sm:$0xff] %v14376_v14  ;;  %v4356_v44 = vpop.f32.mrb[191].mxu1  ;;  %v4581_v47 = vpop.f32.mrb[191].mxu0 }
 0x85e   : > { %v17203_v47 = vld [vmem:[#allocation56_spill] sm:$0xff]  ;;  %v3793_v44 = vsub.f32 %v17206_v7, %v17205_v42 }
 0x860   : > { %v3917_v35 = vmul.f32 1.442695, %v3793_v44  ;;  %v17212_v44 = vld [vmem:[#allocation60_spill] sm:$0xff] }
 0x862   : > { %v14380_v53 = vpop.eup %9852  ;;  %9860 = vpow2.f32 %v3917_v35  ;;  %v6462_v35 = vsub.f32 %v14007_v49, %v14221_v13  ;;  %v17214_v49 = vld [vmem:[#allocation103_spill] sm:$0xff] }
 0x863   : > { %v14382_v15 = vpop.eup %9854  ;;  %9862 = vpow2.f32 %v3919_v18  ;;  %v6342_v18 = vrot.slane %v14221_v13, 4 }
 0x864   : > { %v4009_v55 = vadd.f32 %v14382_v15, %v14380_v53 }
 0x865   : > { %v14384_v23 = vpop.eup %9856 }
 0x866   : > { %v14386_v10 = vpop.eup %9858 }
 0x867   : > { %v4018_v28 = vadd.f32 %v14386_v10, %v14384_v23 }
 0x86c   : > { %v14415_v37 = vpop.eup %9860 }
 0x870   : > { %4010 = vadd.xlane.f32.xlu1 %v4009_v55  ;;  %v17210_v55 = vld [vmem:[#allocation86_spill] sm:$0xff] }
 0x874   : > { %4019 = vadd.xlane.f32.xlu0 %v4018_v28  ;;  %v6339_v28 = vrot.slane %v14221_v13, 1 }
 0x876   : > { %v6463_v7 = vsub.f32 %v13845_v19, %v6339_v28  ;;  %v17213_v28 = vld [vmem:[#allocation70_spill] sm:$0xff]  ;;  %v6344_v19 = vrot.slane %v14221_v13, 6 }
 0x878   : > { %v6552_v59 = vmul.f32 1.442695, %v6463_v7 }
 0x87a   : > { %9864 = vpow2.f32 %v6552_v59 }
 0x881   : > { %7378 = vrot.lane.b32.xlu1 %v17203_v47, %s10212_s10  ;;  %v6340_v47 = vrot.slane %v14221_v13, 2 }
 0x883   : > { %v6464_v42 = vsub.f32 %v13848_v1, %v6340_v47  ;;  %v6466_v1 = vsub.f32 %v13991_v34, %v6342_v18  ;;  %v6468_v18 = vsub.f32 %v14119_v16, %v6344_v19 }
 0x885   : > { %v6558_v59 = vmul.f32 1.442695, %v6466_v1  ;;  %v6333_v1 = vrot.slane %v14206_v54, 2 }
 0x88a   : > { %7382 = vrot.lane.b32.xlu0 %v17204_v29, %s10212_s10  ;;  %v17211_v29 = vld [vmem:[#allocation54_spill] sm:$0xff] }
 0x88e   : > { %7386 = vrot.lane.b32.xlu0 %v17207_v41, %s10212_s10  ;;  %v6341_v41 = vrot.slane %v14221_v13, 3 }
 0x890   : > { %v6465_v47 = vsub.f32 %v13970_v33, %v6341_v41 }
 0x892   : > { %7390 = vrot.lane.b32.xlu0 %v17209_v30, %s10212_s10  ;;  %v14419_v30 = vpop.eup %9862 }
 0x893   : > { %v4015_v7 = vadd.f32 %v14419_v30, %v14415_v37 }
 0x896   : > { %7394 = vrot.lane.b32.xlu0 %v17210_v55, %s10212_s10  ;;  %v6554_v55 = vmul.f32 1.442695, %v6464_v42  ;;  %v6556_v42 = vmul.f32 1.442695, %v6465_v47 }
 0x898   : > { %9866 = vpow2.f32 %v6554_v55  ;;  %v9865_v55 = vpop.eup %9864 }
 0x899   : > { %v6736_v33 = vrot.slane %v9865_v55, 7 }
 0x89a   : > { %7398 = vrot.lane.b32.xlu0 %v17211_v29, %s10212_s10  ;;  %v6550_v29 = vmul.f32 1.442695, %v6462_v35  ;;  %v17215_v35 = vld [vmem:[#allocation107_spill] sm:$0xff] }
 0x89c   : > { %9868 = vpow2.f32 %v6550_v29  ;;  %v6562_v29 = vmul.f32 1.442695, %v6468_v18  ;;  %v6334_v18 = vrot.slane %v14206_v54, 3 }
 0x89d   : > { %9870 = vpow2.f32 %v6556_v42 }
 0x89e   : > { %7402 = vrot.lane.b32.xlu0 %v17212_v44, %s10212_s10  ;;  %v6343_v44 = vrot.slane %v14221_v13, 5  ;;  %9872 = vpow2.f32 %v6558_v59  ;;  %v17216_v59 = vld [vmem:[#allocation139_spill] sm:$0xff] }
 0x8a0   : > { %v6467_v41 = vsub.f32 %v14018_v45, %v6343_v44 }
 0x8a2   : > { %7406 = vrot.lane.b32.xlu0 %v17213_v28, %s10212_s10  ;;  %v6345_v28 = vrot.slane %v14221_v13, 7  ;;  %v6560_v34 = vmul.f32 1.442695, %v6467_v41  ;;  %v6456_v41 = vsub.f32 %v13836_v8, %v6333_v1  ;;  %v6457_v1 = vsub.f32 %v13926_v60, %v6334_v18 }
 0x8a4   : > { %v6469_v47 = vsub.f32 %v14146_v6, %v6345_v28  ;;  %9874 = vpow2.f32 %v6560_v34  ;;  %v6454_v28 = vsub.f32 %v17216_v59, %v14206_v54 }
 0x8a5   : > { %4016 = vadd.xlane.f32.xlu1 %v4015_v7  ;;  %v9867_v7 = vpop.eup %9866  ;;  %9876 = vpow2.f32 %v6562_v29 }
 0x8a6   : > { %7410 = vrot.lane.b32.xlu0 %v17214_v49, %s10212_s10  ;;  %v6332_v49 = vrot.slane %v14206_v54, 1  ;;  %v6564_v45 = vmul.f32 1.442695, %v6469_v47  ;;  %v6738_v42 = vrot.slane %v9867_v7, 6  ;;  %v6335_v7 = vrot.slane %v14206_v54, 4 }
 0x8a7   : > { %v6534_v29 = vmul.f32 1.442695, %v6454_v28  ;;  %v6540_v28 = vmul.f32 1.442695, %v6457_v1 }
 0x8a8   : > { %v6455_v44 = vsub.f32 %v13824_v21, %v6332_v49  ;;  %9878 = vpow2.f32 %v6564_v45  ;;  %v17217_v49 = vld [vmem:[#allocation44_spill] sm:$0xff]  ;;  %v3990_v45 = vpop.xlane.xlu0 %3989 }
 0x8aa   : > { %7414 = vrot.lane.b32.xlu0 %v17215_v35, %s10212_s10  ;;  %v9869_v35 = vpop.eup %9868  ;;  %v6536_v55 = vmul.f32 1.442695, %v6455_v44 }
 0x8ab   : > { %v6737_v19 = vsel %vm6160_vm9, %v6736_v33, %v9869_v35  ;;  %v9871_v16 = vpop.eup %9870  ;;  %v6538_v33 = vmul.f32 1.442695, %v6456_v41 }
 0x8ac   : > { %v6739_v34 = vsel %vm6163_vm10, %v6738_v42, %v6737_v19  ;;  %v9873_v6 = vpop.eup %9872  ;;  %v6740_v47 = vrot.slane %v9871_v16, 5  ;;  %9880 = vpow2.f32 %v6536_v55  ;;  %v6336_v42 = vrot.slane %v14206_v54, 5  ;;  %v17218_v19 = vld [vmem:[#allocation45_spill] sm:$0xff] }
 0x8ad   : > { %v6742_v59 = vrot.slane %v9873_v6, 4  ;;  %v6458_v16 = vsub.f32 %v14064_v43, %v6335_v7  ;;  %9882 = vpow2.f32 %v6538_v33  ;;  %v6338_v7 = vrot.slane %v14206_v54, 7 }
 0x8ae   : > { %v6741_v8 = vsel %vm6166_vm11, %v6740_v47, %v6739_v34  ;;  %v9875_v44 = vpop.eup %9874  ;;  %9884 = vpow2.f32 %v6534_v29  ;;  %v6337_v34 = vrot.slane %v14206_v54, 6  ;;  %v6459_v6 = vsub.f32 %v14076_v63, %v6336_v42  ;;  %v3996_v29 = vpop.xlane.xlu0 %3995 }
 0x8af   : > { %v6743_v41 = vsel %vm6169_vm12, %v6742_v59, %v6741_v8  ;;  %v9877_v18 = vpop.eup %9876  ;;  %9886 = vrcp.f32 %v3990_v45  ;;  %v6542_v13 = vmul.f32 1.442695, %v6458_v16  ;;  %v6461_v42 = vsub.f32 %v14122_v46, %v6338_v7 }
 0x8b0   : > { %v6746_v60 = vrot.slane %v9877_v18, 2  ;;  %v6460_v8 = vsub.f32 %v14091_v4, %v6337_v34 }
 0x8b2   : > { %v6546_v18 = vmul.f32 1.442695, %v6460_v8 }
 0x8b6   : > { %7380 = vrot.lane.b32.xlu1 %v17217_v49, %s10212_s10  ;;  %v6744_v49 = vrot.slane %v9875_v44, 3  ;;  %v6544_v44 = vmul.f32 1.442695, %v6459_v6  ;;  %v4002_v6 = vpop.xlane.xlu0 %4001 }
 0x8b8   : > { %v14451_v35 = vpop.xlane.xlu1 %6815  ;;  %v6745_v47 = vsel %vm6172_vm13, %v6744_v49, %v6743_v41 }
 0x8b9   : > { %v6747_v1 = vsel %vm6175_vm15, %v6746_v60, %v6745_v47  ;;  %v6548_v60 = vmul.f32 1.442695, %v6461_v42 }
 0x8ba   : > { %7384 = vrot.lane.b32.xlu1 %v17218_v19, %s10212_s10  ;;  %v9879_v19 = vpop.eup %9878 }
 0x8bb   : > { %v9881_v59 = vpop.eup %9880  ;;  %v6748_v45 = vrot.slane %v9879_v19, 1 }
 0x8bc   : > { %v3987_v55 = vpop.xlane.xlu1 %3986  ;;  %v9883_v41 = vpop.eup %9882 }
 0x8bd   : > { %9888 = vrcp.f32 %v3987_v55  ;;  %v6749_v16 = vsel %vm6178_vm14, %v6748_v45, %v6747_v1  ;;  %v6722_v55 = vrot.slane %v9881_v59, 7  ;;  %v6724_v47 = vrot.slane %v9883_v41, 6 }
 0x8be   : > { %9890 = vpow2.f32 %v6540_v28  ;;  %v9885_v28 = vpop.eup %9884  ;;  %v6823_v43 = vsel %vm5561_vm8, %v6749_v16, 0.0 }
 0x8bf   : > { %v9887_v49 = vpop.eup %9886  ;;  %v6723_v7 = vsel %vm6160_vm9, %v6722_v55, %v9885_v28 }
 0x8c0   : > { %v3993_v33 = vpop.xlane.xlu1 %3992  ;;  %v4096_v8 = vmul.f32 %v9887_v49, %v13967_v52 }
 0x8c1   : > { %9892 = vrcp.f32 %v3993_v33 }
 0x8c2   : > { %9894 = vpow2.f32 %v6542_v13 }
 0x8c3   : > { %9896 = vrcp.f32 %v3996_v29  ;;  %v6725_v29 = vsel %vm6163_vm10, %v6724_v47, %v6723_v7 }
 0x8c4   : > { %9898 = vpow2.f32 %v6544_v44  ;;  %v3999_v34 = vpop.xlane.xlu1 %3998  ;;  %v14473_v1 = vpop.xlane.xlu0 %6818 }
 0x8c5   : > { %9900 = vpow2.f32 %v6546_v18  ;;  %17219 = vst [vmem:[#allocation179_spill] sm:$0xff] %v14473_v1 }
 0x8c6   : > { %9902 = vrcp.f32 %v3999_v34 }
 0x8c7   : > { %v9889_v4 = vpop.eup %9888  ;;  %9904 = vpow2.f32 %v6548_v60 }
 0x8c8   : > { %v4094_v13 = vmul.f32 %v9889_v4, %v14213_v0  ;;  %v4093_v19 = vmul.f32 %v9889_v4, %v14209_v51  ;;  %v9891_v33 = vpop.eup %9890  ;;  %9906 = vrcp.f32 %v4002_v6  ;;  %v4095_v51 = vmul.f32 %v9887_v49, %v13960_v9  ;;  %v4005_v44 = vpop.xlane.xlu1 %4004 }
 0x8c9   : > { %6824 = vadd.xlane.f32.xlu0 %v6823_v43  ;;  %v6726_v4 = vrot.slane %v9891_v33, 5  ;;  %9908 = vrcp.f32 %v4005_v44  ;;  %v4008_v28 = vpop.xlane.xlu0 %4007 }
 0x8ca   : > { %4377 = vmatprep.mubr.f32.mxu1 %v4094_v13  ;;  %4602 = vmatprep.mubr.f32.mxu0 %v4094_v13  ;;  %9910 = vrcp.f32 %v4008_v28 }
 0x8cb   : > { %v9893_v59 = vpop.eup %9892  ;;  %4378 = vmatmul.mubr.f32.gmra.mrb[200].mxu1 %v4093_v19  ;;  %4603 = vmatmul.mubr.f32.gmra.mrb[200].mxu0 %v4093_v19  ;;  %v6727_v52 = vsel %vm6166_vm11, %v6726_v4, %v6725_v29 }
 0x8cc   : > { %v9895_v43 = vpop.eup %9894  ;;  %4382 = vmatprep.mubr.f32.mxu1 %v4096_v8  ;;  %4607 = vmatprep.mubr.f32.mxu0 %v4096_v8  ;;  %v4098_v45 = vmul.f32 %v9893_v59, %v14241_v56  ;;  %v4097_v16 = vmul.f32 %v9893_v59, %v14224_v26 }
 0x8cd   : > { %v9897_v0 = vpop.eup %9896  ;;  %v6728_v41 = vrot.slane %v9895_v43, 4  ;;  %v17221_v43 = vld [vmem:[#allocation9_spill] sm:$0xff] }
 0x8ce   : > { %v9899_v42 = vpop.eup %9898  ;;  %v4100_v9 = vmul.f32 %v9897_v0, %v14167_v39  ;;  %v4099_v47 = vmul.f32 %v9897_v0, %v14163_v62 }
 0x8cf   : > { %4383 = vmatmul.mubr.f32.gmra.mrb[202].mxu1 %v4095_v51  ;;  %4608 = vmatmul.mubr.f32.gmra.mrb[202].mxu0 %v4095_v51  ;;  %v6729_v18 = vsel %vm6169_vm12, %v6728_v41, %v6727_v52  ;;  %v9901_v55 = vpop.eup %9900  ;;  %v6730_v49 = vrot.slane %v9899_v42, 3  ;;  %v17222_v51 = vld [vmem:[#allocation80_spill] sm:$0xff]  ;;  %v17226_v52 = vld [vmem:[#allocation47_spill] sm:$0xff]  ;;  %v17228_v42 = vld [vmem:[#allocation50_spill] sm:$0xff] }
 0x8d0   : > { %4387 = vmatprep.mubr.f32.mxu1 %v4098_v45  ;;  %4612 = vmatprep.mubr.f32.mxu0 %v4098_v45  ;;  %v9903_v34 = vpop.eup %9902  ;;  %v6732_v6 = vrot.slane %v9901_v55, 2  ;;  %v17224_v45 = vld [vmem:[#allocation90_spill] sm:$0xff] }
 0x8d1   : > { %v6731_v56 = vsel %vm6172_vm13, %v6730_v49, %v6729_v18  ;;  %v9905_v60 = vpop.eup %9904  ;;  %v4102_v26 = vmul.f32 %v9903_v34, %v14291_v32  ;;  %v4101_v7 = vmul.f32 %v9903_v34, %v14253_v2  ;;  %v17220_v32 = vld [vmem:[#allocation32_spill] sm:$0xff]  ;;  %v17229_v18 = vld [vmem:[#allocation87_spill] sm:$0xff]  ;;  %v14522_v49 = vpop.permute.xlu1 %7374 }
 0x8d2   : > { %v9907_v13 = vpop.eup %9906  ;;  %v6733_v39 = vsel %vm6175_vm15, %v6732_v6, %v6731_v56  ;;  %v6734_v19 = vrot.slane %v9905_v60, 1  ;;  %v4014_v34 = vpop.xlane.xlu0 %4013  ;;  %v17231_v56 = vld [vmem:[#allocation57_spill] sm:$0xff] }
 0x8d3   : > { %4388 = vmatmul.mubr.f32.gmra.mrb[204].mxu1 %v4097_v16  ;;  %4613 = vmatmul.mubr.f32.gmra.mrb[204].mxu0 %v4097_v16  ;;  %v4104_v33 = vmul.f32 %v9907_v13, %v14173_v58  ;;  %v9909_v59 = vpop.eup %9908  ;;  %v4103_v29 = vmul.f32 %v9907_v13, %v17220_v32  ;;  %9912 = vrcp.f32 %v4014_v34  ;;  %v17233_v13 = vld [vmem:[#allocation67_spill] sm:$0xff]  ;;  %v10091_v34 = vld [vmem:[%s16193_s4 + $0x100] sm:$0xff] }
 0x8d4   : > { %4392 = vmatprep.mubr.f32.mxu1 %v4100_v9  ;;  %4617 = vmatprep.mubr.f32.mxu0 %v4100_v9  ;;  %v6735_v8 = vsel %vm6178_vm14, %v6734_v19, %v6733_v39  ;;  %v4106_v4 = vmul.f32 %v9909_v59, %v14316_v20  ;;  %v9911_v2 = vpop.eup %9910  ;;  %v4105_v58 = vmul.f32 %v9909_v59, %v14301_v48  ;;  %v17223_v20 = vld [vmem:[#allocation85_spill] sm:$0xff] }
 0x8d5   : > { %v6820_v62 = vsel %vm5561_vm8, %v6735_v8, 0.0  ;;  %v4108_v0 = vmul.f32 %v9911_v2, %v14311_v25  ;;  %v4107_v44 = vmul.f32 %v9911_v2, %v14304_v11  ;;  %v17225_v48 = vld [vmem:[#allocation17_spill] sm:$0xff]  ;;  %v17235_v8 = vld [vmem:[#allocation68_spill] sm:$0xff] }
 0x8d7   : > { %4393 = vmatmul.mubr.f32.gmra.mrb[206].mxu1 %v4099_v47  ;;  %4618 = vmatmul.mubr.f32.gmra.mrb[206].mxu0 %v4099_v47 }
 0x8d8   : > { %4397 = vmatprep.mubr.f32.mxu1 %v4102_v26  ;;  %4622 = vmatprep.mubr.f32.mxu0 %v4102_v26 }
 0x8db   : > { %4398 = vmatmul.mubr.f32.gmra.mrb[208].mxu1 %v4101_v7  ;;  %4623 = vmatmul.mubr.f32.gmra.mrb[208].mxu0 %v4101_v7 }
 0x8dc   : > { %4402 = vmatprep.mubr.f32.mxu1 %v4104_v33  ;;  %4627 = vmatprep.mubr.f32.mxu0 %v4104_v33 }
 0x8dd   : > { %v9913_v59 = vpop.eup %9912 }
 0x8de   : > { %6821 = vadd.xlane.f32.xlu1 %v6820_v62  ;;  %v17236_v62 = vld [vmem:[#allocation105_spill] sm:$0xff]  ;;  %v4112_v2 = vmul.f32 %v9913_v59, %v14326_v57  ;;  %v17239_v57 = vld [vmem:[#allocation82_spill] sm:$0xff] }
 0x8df   : > { %7418 = vrot.lane.b32.xlu0 %v17221_v43, %s10212_s10  ;;  %4403 = vmatmul.mubr.f32.gmra.mrb[210].mxu1 %v4103_v29 }
 0x8e0   : > { %4628 = vmatmul.mubr.f32.gmra.mrb[210].mxu0 %v4103_v29  ;;  %4407 = vmatprep.mubr.f32.mxu1 %v4106_v4 }
 0x8e1   : > { %4632 = vmatprep.mubr.f32.mxu0 %v4106_v4  ;;  %v17237_v4 = vld [vmem:[#allocation109_spill] sm:$0xff] }
 0x8e3   : > { %7422 = vrot.lane.b32.xlu0 %v17222_v51, %s10212_s10  ;;  %4408 = vmatmul.mubr.f32.gmra.mrb[212].mxu1 %v4105_v58  ;;  %v17238_v51 = vld [vmem:[#allocation78_spill] sm:$0xff] }
 0x8e4   : > { %4633 = vmatmul.mubr.f32.gmra.mrb[212].mxu0 %v4105_v58  ;;  %4412 = vmatprep.mubr.f32.mxu1 %v4108_v0  ;;  %v4111_v58 = vmul.f32 %v9913_v59, %v14318_v27  ;;  %v17241_v27 = vld [vmem:[#allocation88_spill] sm:$0xff]  ;;  %v10093_v59 = vld [vmem:[%s16193_s4 + $0x108] sm:$0xff] }
 0x8e5   : > { %4637 = vmatprep.mubr.f32.mxu0 %v4108_v0  ;;  %v17240_v0 = vld [vmem:[#allocation93_spill] sm:$0xff] }
 0x8e7   : > { %7426 = vrot.lane.b32.xlu0 %v17223_v20, %s10212_s10  ;;  %4413 = vmatmul.mubr.f32.gmra.mrb[214].mxu1 %v4107_v44 }
 0x8e8   : > { %4638 = vmatmul.mubr.f32.gmra.mrb[214].mxu0 %v4107_v44  ;;  %v5275_v44 = vmul.f32 %v17240_v0, %v14282_v31  ;;  %v17250_v0 = vld [vmem:[#allocation175_spill] sm:$0xff] }
 0x8eb   : > { %7430 = vrot.lane.b32.xlu0 %v17224_v45, %s10212_s10  ;;  %v5409_v45 = vsel %vm4791_vm6, %v5275_v44, 0.0 }
 0x8ef   : > { %7434 = vrot.lane.b32.xlu0 %v17225_v48, %s10212_s10  ;;  %7388 = vrot.lane.b32.xlu1 %v17226_v52, %s10212_s10  ;;  %v17242_v48 = vld [vmem:[#allocation91_spill] sm:$0xff]  ;;  %v17243_v52 = vld [vmem:[#allocation97_spill] sm:$0xff] }
 0x8f2   : > { %v14508_v25 = vpop.f32.mrb[192].mxu1  ;;  %v14510_v11 = vpop.f32.mrb[192].mxu0 }
 0x8f3   : > { %7438 = vrot.lane.b32.xlu0 %v14245_v12, %s10212_s10  ;;  %17227 = vst [vmem:[#allocation152_spill] sm:$0xff] %v14508_v25  ;;  %7392 = vrot.lane.b32.xlu1 %v17228_v42, %s10212_s10  ;;  %v4361_v41 = vpop.f32.mrb[193].mxu1  ;;  %v4586_v16 = vpop.f32.mrb[193].mxu0 }
 0x8f4   : > { %v14564_v42 = vpop.permute.xlu0 %7376 }
 0x8f5   : > { %17244 = vst [vmem:[#allocation158_spill] sm:$0xff] %v14564_v42 }
 0x8f7   : > { %7442 = vrot.lane.b32.xlu0 %v14275_v22, %s10212_s10  ;;  %7396 = vrot.lane.b32.xlu1 %v17229_v18, %s10212_s10  ;;  %v14518_v55 = vpop.f32.mrb[194].mxu1  ;;  %v14520_v28 = vpop.f32.mrb[194].mxu0 }
 0x8f8   : > { %17230 = vst [vmem:[#allocation153_spill] sm:$0xff] %v14518_v55  ;;  %v4366_v12 = vpop.f32.mrb[195].mxu1  ;;  %v4591_v9 = vpop.f32.mrb[195].mxu0 }
 0x8fb   : > { %7400 = vrot.lane.b32.xlu1 %v17231_v56, %s10212_s10  ;;  %v14526_v60 = vpop.f32.mrb[196].mxu1  ;;  %v14528_v47 = vpop.f32.mrb[196].mxu0  ;;  %v4759_v56 = vmul.f32 %v10091_v34, %v14243_v3 }
 0x8fc   : > { %17232 = vst [vmem:[#allocation151_spill] sm:$0xff] %v14526_v60  ;;  %v4371_v22 = vpop.f32.mrb[197].mxu1  ;;  %v4596_v6 = vpop.f32.mrb[197].mxu0 }
 0x8fd   : > { %v4011_v26 = vpop.xlane.xlu1 %4010 }
 0x8fe   : > { %9914 = vrcp.f32 %v4011_v26  ;;  %v4888_v26 = vsel %vm4791_vm6, %v4759_v56, 0.0  ;;  %v17254_v56 = vld [vmem:[#allocation39_spill] sm:$0xff] }
 0x8ff   : > { %7404 = vrot.lane.b32.xlu1 %v17233_v13, %s10212_s10  ;;  %v14532_v39 = vpop.f32.mrb[198].mxu1 }
 0x900   : > { %17234 = vst [vmem:[#allocation122_spill] sm:$0xff] %v14532_v39  ;;  %v14534_v19 = vpop.f32.mrb[198].mxu0  ;;  %v4376_v7 = vpop.f32.mrb[199].mxu1 }
 0x901   : > { %v4601_v33 = vpop.f32.mrb[199].mxu0  ;;  %v14566_v41 = vpop.permute.xlu1 %7378  ;;  %v17246_v7 = vld [vmem:[#allocation49_spill] sm:$0xff] }
 0x902   : > { %v4020_v16 = vpop.xlane.xlu0 %4019  ;;  %v5281_v33 = vmul.f32 %v17246_v7, %v14340_v38 }
 0x903   : > { %7408 = vrot.lane.b32.xlu1 %v17235_v8, %s10212_s10  ;;  %9916 = vrcp.f32 %v4020_v16 }
 0x907   : > { %7412 = vrot.lane.b32.xlu1 %v17236_v62, %s10212_s10  ;;  %v4760_v62 = vmul.f32 %v10093_v59, %v14260_v50 }
 0x908   : > { %v9915_v32 = vpop.eup %9914 }
 0x909   : > { %v4110_v29 = vmul.f32 %v9915_v32, %v14382_v15  ;;  %v4109_v43 = vmul.f32 %v9915_v32, %v14380_v53  ;;  %v10090_v53 = vld [vmem:[%s16193_s4 + $0x118] sm:$0xff]  ;;  %v17247_v32 = vld [vmem:[#allocation41_spill] sm:$0xff] }
 0x90a   : > { %v4762_v15 = vmul.f32 %v10090_v53, %v14282_v31 }
 0x90b   : > { %7416 = vrot.lane.b32.xlu1 %v17237_v4, %s10212_s10  ;;  %4417 = vmatprep.mubr.f32.mxu1 %v4110_v29  ;;  %v17248_v4 = vld [vmem:[#allocation117_spill] sm:$0xff] }
 0x90c   : > { %4642 = vmatprep.mubr.f32.mxu0 %v4110_v29  ;;  %4418 = vmatmul.mubr.f32.gmra.mrb[216].mxu1 %v4109_v43  ;;  %v4897_v20 = vsel %vm4791_vm6, %v4762_v15, 0.0  ;;  %v5273_v29 = vmul.f32 %v17247_v32, %v14260_v50 }
 0x90d   : > { %4643 = vmatmul.mubr.f32.gmra.mrb[216].mxu0 %v4109_v43  ;;  %4422 = vmatprep.mubr.f32.mxu1 %v4112_v2  ;;  %v9917_v12 = vpop.eup %9916  ;;  %v4891_v43 = vsel %vm4791_vm6, %v4760_v62, 0.0 }
 0x90e   : > { %4647 = vmatprep.mubr.f32.mxu0 %v4112_v2  ;;  %v4115_v13 = vmul.f32 %v9917_v12, %v14384_v23  ;;  %v5427_v23 = vsel %vm4791_vm6, %v5281_v33, 0.0 }
 0x90f   : > { %7420 = vrot.lane.b32.xlu1 %v17238_v51, %s10212_s10 }
 0x910   : > { %4423 = vmatmul.mubr.f32.gmra.mrb[218].mxu1 %v4111_v58 }
 0x911   : > { %4648 = vmatmul.mubr.f32.gmra.mrb[218].mxu0 %v4111_v58  ;;  %v17249_v58 = vld [vmem:[#allocation40_spill] sm:$0xff] }
 0x912   : > { %v5274_v51 = vmul.f32 %v17249_v58, %v17248_v4 }
 0x913   : > { %7424 = vrot.lane.b32.xlu1 %v17239_v57, %s10212_s10  ;;  %v10095_v57 = vld [vmem:[%s16193_s4 + $0x150] sm:$0xff] }
 0x914   : > { %v5406_v15 = vsel %vm4791_vm6, %v5274_v51, 0.0  ;;  %v4769_v44 = vmul.f32 %v10095_v57, %v17250_v0 }
 0x916   : > { %4898 = vadd.xlane.f32.xlu0 %v4897_v20  ;;  %v17251_v20 = vld [vmem:[#allocation59_spill] sm:$0xff] }
 0x917   : > { %7428 = vrot.lane.b32.xlu1 %v17241_v27, %s10212_s10  ;;  %v5282_v27 = vmul.f32 %v17251_v20, %v17250_v0 }
 0x91a   : > { %5410 = vadd.xlane.f32.xlu0 %v5409_v45  ;;  %v4918_v45 = vsel %vm4791_vm6, %v4769_v44, 0.0 }
 0x91b   : > { %7432 = vrot.lane.b32.xlu1 %v17242_v48, %s10212_s10  ;;  %v10096_v48 = vld [vmem:[%s16193_s4 + $0x158] sm:$0xff] }
 0x91f   : > { %7436 = vrot.lane.b32.xlu1 %v17243_v52, %s10212_s10  ;;  %v17252_v52 = vld [vmem:[#allocation141_spill] sm:$0xff] }
 0x920   : > { %v4770_v16 = vmul.f32 %v10096_v48, %v17252_v52  ;;  %v17257_v48 = vld [vmem:[#allocation115_spill] sm:$0xff] }
 0x922   : > { %v4921_v34 = vsel %vm4791_vm6, %v4770_v16, 0.0 }
 0x930   : > { %7446 = vrot.lane.b32.xlu0 %v14296_v17, %s10212_s10 }
 0x932   : > { %v4017_v18 = vpop.xlane.xlu1 %4016 }
 0x933   : > { %9918 = vrcp.f32 %v4017_v18  ;;  %v5430_v18 = vsel %vm4791_vm6, %v5282_v27, 0.0 }
 0x934   : > { %7450 = vrot.lane.b32.xlu0 %v14324_v24, %s10212_s10  ;;  %v4116_v24 = vmul.f32 %v9917_v12, %v14386_v10  ;;  %v10092_v10 = vld [vmem:[%s16193_s4 + $0x148] sm:$0xff]  ;;  %v17253_v12 = vld [vmem:[#allocation94_spill] sm:$0xff]  ;;  %9920 = vlog2.f32 %v14451_v35 }
 0x938   : > { %7454 = vrot.lane.b32.xlu0 %v14338_v5, %s10212_s10  ;;  %v17245_v5 = vld [vmem:[#allocation92_spill] sm:$0xff] }
 0x939   : > { %v5272_v6 = vmul.f32 %v17245_v5, %v14243_v3 }
 0x93d   : > { %v9919_v9 = vpop.eup %9918 }
 0x93e   : > { %v4114_v22 = vmul.f32 %v9919_v9, %v14419_v30  ;;  %v4113_v17 = vmul.f32 %v9919_v9, %v14415_v37  ;;  %v5400_v37 = vsel %vm4791_vm6, %v5272_v6, 0.0  ;;  %v4768_v30 = vmul.f32 %v10092_v10, %v14340_v38 }
 0x93f   : > { %v5283_v9 = vmul.f32 %v17253_v12, %v17252_v52 }
 0x940   : > { %4427 = vmatprep.mubr.f32.mxu1 %v4114_v22  ;;  %4652 = vmatprep.mubr.f32.mxu0 %v4114_v22  ;;  %v4915_v8 = vsel %vm4791_vm6, %v4768_v30, 0.0 }
 0x941   : > { %4428 = vmatmul.mubr.f32.gmra.mrb[220].mxu1 %v4113_v17  ;;  %4653 = vmatmul.mubr.f32.gmra.mrb[220].mxu0 %v4113_v17  ;;  %v5433_v22 = vsel %vm4791_vm6, %v5283_v9, 0.0 }
 0x942   : > { %4432 = vmatprep.mubr.f32.mxu1 %v4116_v24  ;;  %4657 = vmatprep.mubr.f32.mxu0 %v4116_v24 }
 0x943   : > { %4889 = vadd.xlane.f32.xlu1 %v4888_v26 }
 0x945   : > { %4433 = vmatmul.mubr.f32.gmra.mrb[222].mxu1 %v4115_v13  ;;  %4658 = vmatmul.mubr.f32.gmra.mrb[222].mxu0 %v4115_v13 }
 0x947   : > { %5401 = vadd.xlane.f32.xlu1 %v5400_v37 }
 0x957   : > { %4916 = vadd.xlane.f32.xlu0 %v4915_v8 }
 0x958   : > { %7440 = vrot.lane.b32.xlu1 %v14262_v61, %s10212_s10  ;;  %v10094_v61 = vld [vmem:[%s16193_s4 + $0x110] sm:$0xff] }
 0x959   : > { %v4761_v2 = vmul.f32 %v10094_v61, %v17248_v4 }
 0x95b   : > { %5428 = vadd.xlane.f32.xlu0 %v5427_v23  ;;  %v4894_v53 = vsel %vm4791_vm6, %v4761_v2, 0.0 }
 0x971   : > { %7458 = vrot.lane.b32.xlu0 %v14346_v36, %s10212_s10  ;;  %v5403_v36 = vsel %vm4791_vm6, %v5273_v29, 0.0 }
 0x97c   : > { %4892 = vadd.xlane.f32.xlu1 %v4891_v43 }
 0x980   : > { %5404 = vadd.xlane.f32.xlu1 %v5403_v36  ;;  %v17255_v36 = vld [vmem:[#allocation145_spill] sm:$0xff] }
 0x984   : > { %4895 = vadd.xlane.f32.xlu1 %v4894_v53 }
 0x988   : > { %5407 = vadd.xlane.f32.xlu1 %v5406_v15 }
 0x990   : > { %4919 = vadd.xlane.f32.xlu0 %v4918_v45  ;;  %v10097_v45 = vld [vmem:[%s16193_s4 + $0x120] sm:$0xff] }
 0x991   : > { %v4763_v16 = vmul.f32 %v10097_v45, %v17257_v48 }
 0x994   : > { %5431 = vadd.xlane.f32.xlu0 %v5430_v18 }
 0x998   : > { %4922 = vadd.xlane.f32.xlu0 %v4921_v34 }
 0x999   : > { %7444 = vrot.lane.b32.xlu1 %v17254_v56, %s10212_s10  ;;  %v17259_v56 = vld [vmem:[#allocation96_spill] sm:$0xff] }
 0x99c   : > { %5434 = vadd.xlane.f32.xlu0 %v5433_v22  ;;  %v5276_v22 = vmul.f32 %v17259_v56, %v17257_v48 }
 0x99e   : > { %v14632_v17 = vpop.f32.mrb[200].mxu1  ;;  %v14634_v24 = vpop.f32.mrb[200].mxu0 }
 0x99f   : > { %v4381_v5 = vpop.f32.mrb[201].mxu1  ;;  %v4606_v6 = vpop.f32.mrb[201].mxu0 }
 0x9a0   : > { %v4900_v5 = vsel %vm4791_vm6, %v4763_v16, 0.0  ;;  %v5412_v6 = vsel %vm4791_vm6, %v5276_v22, 0.0 }
 0x9a2   : > { %v14636_v26 = vpop.f32.mrb[202].mxu1  ;;  %v14638_v13 = vpop.f32.mrb[202].mxu0 }
 0x9a3   : > { %v4386_v37 = vpop.f32.mrb[203].mxu1  ;;  %v4611_v10 = vpop.f32.mrb[203].mxu0 }
 0x9a4   : > { %v10098_v37 = vld [vmem:[%s16193_s4 + $0x160] sm:$0xff] }
 0x9a5   : > { %v17260_v10 = vld [vmem:[#allocation176_spill] sm:$0xff] }
 0x9a6   : > { %v14640_v30 = vpop.f32.mrb[204].mxu1  ;;  %v14642_v7 = vpop.f32.mrb[204].mxu0 }
 0x9a7   : > { %v4391_v33 = vpop.f32.mrb[205].mxu1  ;;  %v4616_v8 = vpop.f32.mrb[205].mxu0 }
 0x9a8   : > { %v4771_v33 = vmul.f32 %v10098_v37, %v17260_v10  ;;  %v17261_v8 = vld [vmem:[#allocation98_spill] sm:$0xff] }
 0x9aa   : > { %v14644_v23 = vpop.f32.mrb[206].mxu1  ;;  %v14646_v59 = vpop.f32.mrb[206].mxu0 }
 0x9ab   : > { %v4396_v62 = vpop.f32.mrb[207].mxu1  ;;  %v4621_v32 = vpop.f32.mrb[207].mxu0 }
 0x9ac   : > { %v5284_v62 = vmul.f32 %v17261_v8, %v17260_v10  ;;  %v4924_v32 = vsel %vm4791_vm6, %v4771_v33, 0.0  ;;  %v14700_v8 = vpop.permute.xlu0 %7382 }
 0x9ae   : > { %v14648_v29 = vpop.f32.mrb[208].mxu1  ;;  %v14650_v43 = vpop.f32.mrb[208].mxu0 }
 0x9af   : > { %v4401_v61 = vpop.f32.mrb[209].mxu1  ;;  %v4626_v2 = vpop.f32.mrb[209].mxu0 }
 0x9b0   : > { %v17262_v61 = vld [vmem:[#allocation148_spill] sm:$0xff]  ;;  %v10099_v2 = vld [vmem:[%s16193_s4 + $0x168] sm:$0xff] }
 0x9b2   : > { %7462 = vrot.lane.b32.xlu0 %v17255_v36, %s10212_s10  ;;  %v14654_v58 = vpop.f32.mrb[210].mxu1  ;;  %v17263_v36 = vld [vmem:[#allocation146_spill] sm:$0xff] }
 0x9b3   : > { %17256 = vst [vmem:[#allocation159_spill] sm:$0xff] %v14654_v58  ;;  %v14656_v51 = vpop.f32.mrb[210].mxu0  ;;  %v4406_v53 = vpop.f32.mrb[211].mxu1 }
 0x9b4   : > { %v4631_v15 = vpop.f32.mrb[211].mxu0  ;;  %v4772_v53 = vmul.f32 %v10099_v2, %v17263_v36 }
 0x9b5   : > { %v5436_v15 = vsel %vm4791_vm6, %v5284_v62, 0.0  ;;  %v14702_v62 = vpop.permute.xlu0 %7386 }
 0x9b6   : > { %v14658_v57 = vpop.f32.mrb[212].mxu1  ;;  %v4927_v45 = vsel %vm4791_vm6, %v4772_v53, 0.0  ;;  %v17267_v53 = vld [vmem:[#allocation178_spill] sm:$0xff] }
 0x9b7   : > { %v14660_v44 = vpop.f32.mrb[212].mxu0  ;;  %v4411_v20 = vpop.f32.mrb[213].mxu1 }
 0x9b8   : > { %v4636_v27 = vpop.f32.mrb[213].mxu0  ;;  %v17264_v20 = vld [vmem:[#allocation100_spill] sm:$0xff] }
 0x9b9   : > { %v5285_v27 = vmul.f32 %v17264_v20, %v17263_v36  ;;  %v17269_v20 = vld [vmem:[#allocation99_spill] sm:$0xff] }
 0x9ba   : > { %v14666_v18 = vpop.f32.mrb[214].mxu1 }
 0x9bb   : > { %17258 = vst [vmem:[#allocation72_spill] sm:$0xff] %v14666_v18  ;;  %v14668_v12 = vpop.f32.mrb[214].mxu0  ;;  %v4416_v9 = vpop.f32.mrb[215].mxu1  ;;  %v5439_v16 = vsel %vm4791_vm6, %v5285_v27, 0.0 }
 0x9bc   : > { %v4641_v34 = vpop.f32.mrb[215].mxu0 }
 0x9bd   : > { %4901 = vadd.xlane.f32.xlu1 %v4900_v5 }
 0x9c1   : > { %5413 = vadd.xlane.f32.xlu1 %v5412_v6 }
 0x9d1   : > { %4925 = vadd.xlane.f32.xlu0 %v4924_v32  ;;  %v10100_v32 = vld [vmem:[%s16193_s4 + $0x128] sm:$0xff] }
 0x9d2   : > { %7448 = vrot.lane.b32.xlu1 %v17262_v61, %s10212_s10  ;;  %v17266_v61 = vld [vmem:[#allocation177_spill] sm:$0xff] }
 0x9d3   : > { %v4764_v2 = vmul.f32 %v10100_v32, %v17266_v61  ;;  %v5277_v27 = vmul.f32 %v17269_v20, %v17266_v61  ;;  %v17272_v32 = vld [vmem:[#allocation27_spill] sm:$0xff] }
 0x9d5   : > { %5437 = vadd.xlane.f32.xlu0 %v5436_v15  ;;  %v14710_v15 = vpop.permute.xlu0 %7390 }
 0x9d6   : > { %17268 = vst [vmem:[#allocation180_spill] sm:$0xff] %v14710_v15 }
 0x9d9   : > { %4928 = vadd.xlane.f32.xlu0 %v4927_v45  ;;  %v4903_v45 = vsel %vm4791_vm6, %v4764_v2, 0.0 }
 0x9dd   : > { %5440 = vadd.xlane.f32.xlu0 %v5439_v16  ;;  %v10101_v16 = vld [vmem:[%s16193_s4 + $0x130] sm:$0xff] }
 0x9df   : > { %v14692_v9 = vpop.f32.mrb[216].mxu1 }
 0x9e0   : > { %v14694_v34 = vpop.f32.mrb[216].mxu0  ;;  %v4421_v56 = vpop.f32.mrb[217].mxu1 }
 0x9e1   : > { %v4646_v22 = vpop.f32.mrb[217].mxu0  ;;  %v17270_v56 = vld [vmem:[#allocation149_spill] sm:$0xff] }
 0x9e2   : > { %v4765_v22 = vmul.f32 %v10101_v16, %v17270_v56  ;;  %v17276_v16 = vld [vmem:[#allocation137_spill] sm:$0xff] }
 0x9e3   : > { %v14696_v5 = vpop.f32.mrb[218].mxu1 }
 0x9e4   : > { %17265 = vst [vmem:[#allocation65_spill] sm:$0xff] %v14696_v5  ;;  %v14698_v6 = vpop.f32.mrb[218].mxu0  ;;  %v4426_v37 = vpop.f32.mrb[219].mxu1  ;;  %v4906_v36 = vsel %vm4791_vm6, %v4765_v22, 0.0 }
 0x9e5   : > { %v4651_v33 = vpop.f32.mrb[219].mxu0  ;;  %v14719_v37 = vpop.permute.xlu0 %7394 }
 0x9e6   : > { %17271 = vst [vmem:[#allocation155_spill] sm:$0xff] %v14719_v37  ;;  %v5415_v33 = vsel %vm4791_vm6, %v5277_v27, 0.0  ;;  %v10102_v27 = vld [vmem:[%s16193_s4 + $0x170] sm:$0xff]  ;;  %v14738_v22 = vpop.permute.xlu1 %7380 }
 0x9e7   : > { %17278 = vst [vmem:[#allocation163_spill] sm:$0xff] %v14738_v22 }
 0x9e9   : > { %v14725_v20 = vpop.permute.xlu0 %7398 }
 0x9ea   : > { %17273 = vst [vmem:[#allocation156_spill] sm:$0xff] %v14725_v20  ;;  %v14754_v61 = vpop.permute.xlu1 %7384 }
 0x9eb   : > { %17281 = vst [vmem:[#allocation62_spill] sm:$0xff] %v14754_v61 }
 0x9ee   : > { %v14765_v3 = vpop.xlane.xlu1 %6821 }
 0x9ef   : > { %17285 = vst [vmem:[#allocation81_spill] sm:$0xff] %v14765_v3 }
 0x9f3   : > { %7466 = vrot.lane.b32.xlu0 %v17267_v53, %s10212_s10  ;;  %v5278_v53 = vmul.f32 %v17272_v32, %v17270_v56  ;;  %v17277_v32 = vld [vmem:[#allocation35_spill] sm:$0xff] }
 0x9f4   : > { %v5286_v52 = vmul.f32 %v17277_v32, %v17276_v16 }
 0x9f5   : > { %v5418_v2 = vsel %vm4791_vm6, %v5278_v53, 0.0  ;;  %v17280_v53 = vld [vmem:[#allocation119_spill] sm:$0xff] }
 0x9f6   : > { %4904 = vadd.xlane.f32.xlu1 %v4903_v45  ;;  %v14728_v45 = vpop.permute.xlu0 %7402 }
 0x9f7   : > { %17274 = vst [vmem:[#allocation140_spill] sm:$0xff] %v14728_v45  ;;  %v17298_v45 = vld [vmem:[#allocation174_spill] sm:$0xff] }
 0x9fa   : > { %5416 = vadd.xlane.f32.xlu1 %v5415_v33  ;;  %v14730_v10 = vpop.permute.xlu0 %7406  ;;  %v4773_v33 = vmul.f32 %v10102_v27, %v17276_v16  ;;  %v5442_v27 = vsel %vm4791_vm6, %v5286_v52, 0.0 }
 0x9fb   : > { %17275 = vst [vmem:[#allocation162_spill] sm:$0xff] %v14730_v10 }
 0x9fe   : > { %4907 = vadd.xlane.f32.xlu1 %v4906_v36  ;;  %v4930_v36 = vsel %vm4791_vm6, %v4773_v33, 0.0  ;;  %v14741_v0 = vpop.permute.xlu0 %7410 }
 0x9ff   : > { %17279 = vst [vmem:[#allocation56_spill] sm:$0xff] %v14741_v0 }
 0xa02   : > { %5419 = vadd.xlane.f32.xlu1 %v5418_v2  ;;  %v10103_v2 = vld [vmem:[%s16193_s4 + $0x178] sm:$0xff] }
 0xa03   : > { %v4774_v38 = vmul.f32 %v10103_v2, %v14376_v14 }
 0xa05   : > { %v4933_v31 = vsel %vm4791_vm6, %v4774_v38, 0.0 }
 0xa12   : > { %4931 = vadd.xlane.f32.xlu0 %v4930_v36  ;;  %v14756_v36 = vpop.permute.xlu0 %7414 }
 0xa13   : > { %7452 = vrot.lane.b32.xlu1 %v17280_v53, %s10212_s10  ;;  %17282 = vst [vmem:[#allocation136_spill] sm:$0xff] %v14756_v36  ;;  %v17283_v53 = vld [vmem:[#allocation124_spill] sm:$0xff] }
 0xa14   : > { %v14750_v56 = vpop.f32.mrb[220].mxu1  ;;  %v14752_v32 = vpop.f32.mrb[220].mxu0  ;;  %v5287_v48 = vmul.f32 %v17283_v53, %v14376_v14 }
 0xa15   : > { %v4431_v33 = vpop.f32.mrb[221].mxu1  ;;  %v4656_v16 = vpop.f32.mrb[221].mxu0 }
 0xa16   : > { %5443 = vadd.xlane.f32.xlu0 %v5442_v27  ;;  %v14767_v27 = vpop.xlane.xlu0 %6824  ;;  %v5445_v16 = vsel %vm4791_vm6, %v5287_v48, 0.0  ;;  %v14770_v33 = vpop.permute.xlu1 %7388 }
 0xa17   : > { %17286 = vst [vmem:[#allocation161_spill] sm:$0xff] %v14767_v27  ;;  %17287 = vst [vmem:[#allocation84_spill] sm:$0xff] %v14770_v33 }
 0xa18   : > { %v14761_v4 = vpop.f32.mrb[222].mxu1  ;;  %v14763_v2 = vpop.f32.mrb[222].mxu0 }
 0xa19   : > { %17284 = vst [vmem:[#allocation160_spill] sm:$0xff] %v14761_v4  ;;  %v4436_v52 = vpop.f32.mrb[223].mxu1  ;;  %v4661_v50 = vpop.f32.mrb[223].mxu0 }
 0xa1a   : > { %4934 = vadd.xlane.f32.xlu0 %v4933_v31  ;;  %v14772_v36 = vpop.permute.xlu0 %7418  ;;  %v14774_v53 = vpop.permute.xlu1 %7392  ;;  %v10104_v50 = vld [vmem:[%s16193_s4 + $0x138] sm:$0xff]  ;;  %v17293_v52 = vld [vmem:[#allocation173_spill] sm:$0xff] }
 0xa1b   : > { %17288 = vst [vmem:[#allocation86_spill] sm:$0xff] %v14772_v36  ;;  %17289 = vst [vmem:[#allocation54_spill] sm:$0xff] %v14774_v53  ;;  %v4766_v0 = vmul.f32 %v10104_v50, %v17293_v52  ;;  %v17296_v36 = vld [vmem:[#allocation112_spill] sm:$0xff] }
 0xa1c   : > { %v10105_v50 = vld [vmem:[%s16193_s4 + $0x140] sm:$0xff] }
 0xa1d   : > { %v4909_v10 = vsel %vm4791_vm6, %v4766_v0, 0.0 }
 0xa1e   : > { %5446 = vadd.xlane.f32.xlu0 %v5445_v16  ;;  %v14776_v38 = vpop.permute.xlu0 %7422  ;;  %v14778_v14 = vpop.permute.xlu1 %7396 }
 0xa1f   : > { %17290 = vst [vmem:[#allocation60_spill] sm:$0xff] %v14776_v38  ;;  %17291 = vst [vmem:[#allocation70_spill] sm:$0xff] %v14778_v14  ;;  %v5279_v38 = vmul.f32 %v17296_v36, %v17293_v52  ;;  %v17300_v36 = vld [vmem:[#allocation16_spill] sm:$0xff] }
 0xa20   : > { %v5280_v0 = vmul.f32 %v17300_v36, %v17298_v45 }
 0xa22   : > { %v14780_v31 = vpop.permute.xlu0 %7426  ;;  %v14786_v48 = vpop.permute.xlu1 %7400 }
 0xa23   : > { %17292 = vst [vmem:[#allocation103_spill] sm:$0xff] %v14780_v31  ;;  %17294 = vst [vmem:[#allocation107_spill] sm:$0xff] %v14786_v48  ;;  %v4767_v48 = vmul.f32 %v10105_v50, %v17298_v45 }
 0xa26   : > { %v14790_v16 = vpop.permute.xlu0 %7430  ;;  %v14797_v31 = vpop.permute.xlu1 %7404 }
 0xa27   : > { %17295 = vst [vmem:[#allocation44_spill] sm:$0xff] %v14790_v16  ;;  %17297 = vst [vmem:[#allocation45_spill] sm:$0xff] %v14797_v31  ;;  %v5421_v16 = vsel %vm4791_vm6, %v5279_v38, 0.0  ;;  %v5424_v31 = vsel %vm4791_vm6, %v5280_v0, 0.0  ;;  %v17308_v0 = vld [vmem:[#allocation95_spill] sm:$0xff] }
 0xa28   : > { %v5291_v45 = vmul.f32 %v17308_v0, %v14532_v39 }
 0xa2a   : > { %v14808_v52 = vpop.permute.xlu1 %7408 }
 0xa2b   : > { %17301 = vst [vmem:[#allocation9_spill] sm:$0xff] %v14808_v52  ;;  %v17322_v52 = vld [vmem:[#allocation22_spill] sm:$0xff] }
 0xa2c   : > { %v5300_v37 = vmul.f32 %v17322_v52, %v14692_v9  ;;  %v17324_v52 = vld [vmem:[#allocation24_spill] sm:$0xff] }
 0xa2e   : > { %v14814_v20 = vpop.permute.xlu1 %7412  ;;  %v5484_v15 = vsel %vm4791_vm6, %v5300_v37, 0.0 }
 0xa2f   : > { %17303 = vst [vmem:[#allocation85_spill] sm:$0xff] %v14814_v20 }
 0xa34   : > { %7470 = vrot.lane.b32.xlu0 %v14510_v11, %s10212_s10  ;;  %v14803_v11 = vpop.permute.xlu0 %7434 }
 0xa35   : > { %17299 = vst [vmem:[#allocation32_spill] sm:$0xff] %v14803_v11  ;;  %v14818_v11 = vpop.permute.xlu1 %7416 }
 0xa36   : > { %17305 = vst [vmem:[#allocation17_spill] sm:$0xff] %v14818_v11 }
 0xa37   : > { %4910 = vadd.xlane.f32.xlu1 %v4909_v10 }
 0xa38   : > { %7474 = vrot.lane.b32.xlu0 %v14528_v47, %s10212_s10  ;;  %v4912_v47 = vsel %vm4791_vm6, %v4767_v48, 0.0  ;;  %v14811_v10 = vpop.permute.xlu0 %7438  ;;  %v10106_v48 = vld [vmem:[%s16193_s4 + $0x198] sm:$0xff] }
 0xa39   : > { %17302 = vst [vmem:[#allocation80_spill] sm:$0xff] %v14811_v10 }
 0xa3b   : > { %5422 = vadd.xlane.f32.xlu1 %v5421_v16  ;;  %v14822_v16 = vpop.permute.xlu1 %7420 }
 0xa3c   : > { %v14816_v50 = vpop.permute.xlu0 %7442  ;;  %17306 = vst [vmem:[#allocation47_spill] sm:$0xff] %v14822_v16  ;;  %v17311_v16 = vld [vmem:[#allocation142_spill] sm:$0xff] }
 0xa3d   : > { %17304 = vst [vmem:[#allocation90_spill] sm:$0xff] %v14816_v50 }
 0xa3f   : > { %4913 = vadd.xlane.f32.xlu1 %v4912_v47  ;;  %v4778_v47 = vmul.f32 %v10106_v48, %v14532_v39  ;;  %v14835_v10 = vpop.permute.xlu1 %7424  ;;  %v10107_v48 = vld [vmem:[%s16193_s4 + $0x1c8] sm:$0xff]  ;;  %v17314_v39 = vld [vmem:[#allocation138_spill] sm:$0xff] }
 0xa40   : > { %v14820_v38 = vpop.xlane.xlu0 %4898  ;;  %17309 = vst [vmem:[#allocation50_spill] sm:$0xff] %v14835_v10  ;;  %v4784_v20 = vmul.f32 %v10107_v48, %v14654_v58 }
 0xa41   : > { %v4945_v50 = vsel %vm4791_vm6, %v4778_v47, 0.0 }
 0xa43   : > { %5425 = vadd.xlane.f32.xlu1 %v5424_v31  ;;  %v17307_v31 = vld [vmem:[#allocation135_spill] sm:$0xff]  ;;  %v14846_v0 = vpop.permute.xlu1 %7428 }
 0xa44   : > { %v14824_v36 = vpop.xlane.xlu0 %5410  ;;  %17312 = vst [vmem:[#allocation57_spill] sm:$0xff] %v14846_v0 }
 0xa48   : > { %v14837_v11 = vpop.permute.xlu0 %7446 }
 0xa49   : > { %17310 = vst [vmem:[#allocation87_spill] sm:$0xff] %v14837_v11 }
 0xa4c   : > { %v14848_v47 = vpop.permute.xlu0 %7450 }
 0xa4d   : > { %17313 = vst [vmem:[#allocation67_spill] sm:$0xff] %v14848_v47  ;;  %v14862_v47 = vpop.permute.xlu1 %7432 }
 0xa4e   : > { %17316 = vst [vmem:[#allocation68_spill] sm:$0xff] %v14862_v47 }
 0xa54   : > { %7456 = vrot.lane.b32.xlu1 %v17307_v31, %s10212_s10  ;;  %v5457_v31 = vsel %vm4791_vm6, %v5291_v45, 0.0  ;;  %v10108_v45 = vld [vmem:[%s16193_s4 + $0x1d0] sm:$0xff] }
 0xa55   : > { %v4785_v48 = vmul.f32 %v10108_v45, %v14658_v57  ;;  %v10109_v45 = vld [vmem:[%s16193_s4 + $0x1d8] sm:$0xff] }
 0xa57   : > { %4946 = vadd.xlane.f32.xlu0 %v4945_v50  ;;  %v17315_v50 = vld [vmem:[#allocation66_spill] sm:$0xff] }
 0xa58   : > { %7460 = vrot.lane.b32.xlu1 %v17311_v16, %s10212_s10  ;;  %v5297_v11 = vmul.f32 %v17315_v50, %v14654_v58  ;;  %v4963_v16 = vsel %vm4791_vm6, %v4784_v20, 0.0  ;;  %v17318_v50 = vld [vmem:[#allocation43_spill] sm:$0xff] }
 0xa59   : > { %v5298_v20 = vmul.f32 %v17318_v50, %v14658_v57 }
 0xa5b   : > { %5458 = vadd.xlane.f32.xlu0 %v5457_v31  ;;  %v5475_v31 = vsel %vm4791_vm6, %v5297_v11, 0.0  ;;  %v4786_v11 = vmul.f32 %v10109_v45, %v14666_v18  ;;  %v5478_v47 = vsel %vm4791_vm6, %v5298_v20, 0.0 }
 0xa5c   : > { %7464 = vrot.lane.b32.xlu1 %v17314_v39, %s10212_s10  ;;  %v14864_v39 = vpop.permute.xlu0 %7454 }
 0xa5d   : > { %17317 = vst [vmem:[#allocation105_spill] sm:$0xff] %v14864_v39 }
 0xa5f   : > { %4964 = vadd.xlane.f32.xlu0 %v4963_v16  ;;  %v4966_v16 = vsel %vm4791_vm6, %v4785_v48, 0.0  ;;  %v17320_v48 = vld [vmem:[#allocation21_spill] sm:$0xff] }
 0xa60   : > { %7468 = vrot.lane.b32.xlu1 %v14378_v40, %s10212_s10  ;;  %v14869_v0 = vpop.xlane.xlu0 %4916  ;;  %v14871_v40 = vpop.permute.xlu1 %7436  ;;  %v5299_v50 = vmul.f32 %v17320_v48, %v14666_v18  ;;  %v17339_v18 = vld [vmem:[#allocation181_spill] sm:$0xff] }
 0xa61   : > { %17319 = vst [vmem:[#allocation109_spill] sm:$0xff] %v14871_v40  ;;  %v10110_v40 = vld [vmem:[%s16193_s4 + $0x1e0] sm:$0xff] }
 0xa62   : > { %v4787_v10 = vmul.f32 %v10110_v40, %v14692_v9  ;;  %v5481_v45 = vsel %vm4791_vm6, %v5299_v50, 0.0  ;;  %v10111_v40 = vld [vmem:[%s16193_s4 + $0x1e8] sm:$0xff] }
 0xa63   : > { %5476 = vadd.xlane.f32.xlu0 %v5475_v31  ;;  %v4788_v50 = vmul.f32 %v10111_v40, %v14696_v5 }
 0xa64   : > { %v14878_v31 = vpop.xlane.xlu1 %4889  ;;  %v14880_v39 = vpop.xlane.xlu0 %5428  ;;  %v4972_v48 = vsel %vm4791_vm6, %v4787_v10, 0.0  ;;  %v5301_v10 = vmul.f32 %v17324_v52, %v14696_v5 }
 0xa66   : > { %v5487_v40 = vsel %vm4791_vm6, %v5301_v10, 0.0 }
 0xa67   : > { %4967 = vadd.xlane.f32.xlu0 %v4966_v16  ;;  %v4969_v16 = vsel %vm4791_vm6, %v4786_v11, 0.0 }
 0xa68   : > { %v14890_v20 = vpop.xlane.xlu1 %5401 }
 0xa6b   : > { %5479 = vadd.xlane.f32.xlu0 %v5478_v47  ;;  %v14892_v47 = vpop.permute.xlu0 %7458 }
 0xa6c   : > { %17321 = vst [vmem:[#allocation78_spill] sm:$0xff] %v14892_v47 }
 0xa6f   : > { %4970 = vadd.xlane.f32.xlu0 %v4969_v16  ;;  %v14897_v11 = vpop.xlane.xlu0 %4919  ;;  %v14899_v16 = vpop.permute.xlu1 %7440 }
 0xa70   : > { %17323 = vst [vmem:[#allocation82_spill] sm:$0xff] %v14899_v16  ;;  %v10112_v16 = vld [vmem:[%s16193_s4 + $0x180] sm:$0xff] }
 0xa71   : > { %v4775_v14 = vmul.f32 %v10112_v16, %v14508_v25  ;;  %v17326_v16 = vld [vmem:[#allocation110_spill] sm:$0xff] }
 0xa72   : > { %v5302_v63 = vmul.f32 %v17326_v16, %v14750_v56 }
 0xa73   : > { %5482 = vadd.xlane.f32.xlu0 %v5481_v45  ;;  %v14906_v45 = vpop.xlane.xlu1 %4892  ;;  %v14908_v47 = vpop.xlane.xlu0 %5431  ;;  %v4936_v46 = vsel %vm4791_vm6, %v4775_v14, 0.0  ;;  %v17327_v14 = vld [vmem:[#allocation129_spill] sm:$0xff] }
 0xa74   : > { %v5303_v16 = vmul.f32 %v17327_v14, %v14761_v4 }
 0xa77   : > { %4973 = vadd.xlane.f32.xlu0 %v4972_v48  ;;  %v4975_v48 = vsel %vm4791_vm6, %v4788_v50, 0.0  ;;  %v14922_v53 = vpop.xlane.xlu1 %5404  ;;  %v14924_v52 = vpop.xlane.xlu0 %4922  ;;  %v17325_v50 = vld [vmem:[#allocation19_spill] sm:$0xff] }
 0xa7b   : > { %5485 = vadd.xlane.f32.xlu0 %v5484_v15  ;;  %v10113_v15 = vld [vmem:[%s16193_s4 + $0x1f0] sm:$0xff]  ;;  %v14933_v10 = vpop.xlane.xlu1 %4895  ;;  %v5435_v33 = vpop.xlane.xlu0 %5434 }
 0xa7c   : > { %v4789_v37 = vmul.f32 %v10113_v15, %v14750_v56 }
 0xa7e   : > { %v4978_v21 = vsel %vm4791_vm6, %v4789_v37, 0.0 }
 0xa7f   : > { %4976 = vadd.xlane.f32.xlu0 %v4975_v48  ;;  %v5288_v48 = vmul.f32 %v17325_v50, %v14508_v25  ;;  %v14943_v37 = vpop.xlane.xlu1 %5407 }
 0xa81   : > { %v5448_v15 = vsel %vm4791_vm6, %v5288_v48, 0.0  ;;  %v14945_v48 = vpop.permute.xlu0 %7462 }
 0xa82   : > { %17328 = vst [vmem:[#allocation93_spill] sm:$0xff] %v14945_v48  ;;  %v9921_v48 = vpop.eup %9920 }
 0xa83   : > { %5488 = vadd.xlane.f32.xlu0 %v5487_v40  ;;  %v10114_v40 = vld [vmem:[%s16193_s4 + $0x1f8] sm:$0xff]  ;;  %v14948_v61 = vpop.permute.xlu1 %7444 }
 0xa84   : > { %4937 = vadd.xlane.f32.xlu1 %v4936_v46  ;;  %v4790_v50 = vmul.f32 %v10114_v40, %v14761_v4  ;;  %v5490_v46 = vsel %vm4791_vm6, %v5302_v63, 0.0  ;;  %17329 = vst [vmem:[#allocation88_spill] sm:$0xff] %v14948_v61 }
 0xa85   : > { %v4926_v25 = vpop.xlane.xlu0 %4925 }
 0xa87   : > { %4979 = vadd.xlane.f32.xlu0 %v4978_v21  ;;  %v4981_v21 = vsel %vm4791_vm6, %v4790_v50, 0.0  ;;  %v14950_v40 = vpop.xlane.xlu1 %4901 }
 0xa88   : > { %5449 = vadd.xlane.f32.xlu1 %v5448_v15  ;;  %v5493_v15 = vsel %vm4791_vm6, %v5303_v16, 0.0 }
 0xa89   : > { %v5438_v63 = vpop.xlane.xlu0 %5437 }
 0xa8b   : > { %5491 = vadd.xlane.f32.xlu0 %v5490_v46  ;;  %v14954_v46 = vpop.xlane.xlu1 %5413 }
 0xa8d   : > { %v4929_v50 = vpop.xlane.xlu0 %4928 }
 0xa8f   : > { %4982 = vadd.xlane.f32.xlu0 %v4981_v21  ;;  %v14956_v14 = vpop.permute.xlu1 %7448 }
 0xa90   : > { %17330 = vst [vmem:[#allocation91_spill] sm:$0xff] %v14956_v14  ;;  %v6839_v14 = vmul.f32 0.6931472, %v9921_v48 }
 0xa91   : > { %v5441_v54 = vpop.xlane.xlu0 %5440 }
 0xa93   : > { %5494 = vadd.xlane.f32.xlu0 %v5493_v15  ;;  %v14959_v21 = vpop.xlane.xlu1 %4904 }
 0xa94   : > { %17331 = vst [vmem:[#allocation97_spill] sm:$0xff] %v14959_v21 }
 0xa95   : > { %v14963_v16 = vpop.permute.xlu0 %7466 }
 0xa96   : > { %17332 = vst [vmem:[#allocation92_spill] sm:$0xff] %v14963_v16  ;;  %v17335_v16 = vld [vmem:[#allocation38_spill] sm:$0xff] }
 0xa97   : > { %v14967_v15 = vpop.xlane.xlu1 %5416  ;;  %v14977_v27 = vadd.f32 %v6839_v14, %v17335_v16  ;;  %v17338_v16 = vld [vmem:[#allocation55_spill] sm:$0xff] }
 0xa98   : > { %v5289_v5 = vmul.f32 %v17338_v16, %v14518_v55 }
 0xa99   : > { %7472 = vrot.lane.b32.xlu1 %v14520_v28, %s10212_s10  ;;  %v6871_v14 = vrot.slane %v14977_v27, 2  ;;  %v6873_v16 = vrot.slane %v14977_v27, 4 }
 0xa9b   : > { %v14971_v61 = vpop.xlane.xlu1 %4907  ;;  %v6992_v3 = vsub.f32 %v17339_v18, %v6871_v14  ;;  %v5451_v18 = vsel %vm4791_vm6, %v5289_v5, 0.0 }
 0xa9c   : > { %17333 = vst [vmem:[#allocation49_spill] sm:$0xff] %v14971_v61 }
 0xa9f   : > { %v4932_v28 = vpop.xlane.xlu0 %4931  ;;  %v14987_v48 = vpop.xlane.xlu1 %5419 }
 0xaa0   : > { %17336 = vst [vmem:[#allocation41_spill] sm:$0xff] %v14987_v48 }
 0xaa3   : > { %v5444_v35 = vpop.xlane.xlu0 %5443 }
 0xaa7   : > { %v4935_v4 = vpop.xlane.xlu0 %4934 }
 0xaa9   : > { %7478 = vrot.lane.b32.xlu0 %v14634_v24, %s10212_s10  ;;  %v17334_v24 = vlaneseq }
 0xaab   : > { %v7055_v22 = vshrl.u32 %v17334_v24, 7 }
 0xaad   : > { %7482 = vrot.lane.b32.xlu0 %v14642_v7, %s10212_s10  ;;  %v10115_v7 = vld [vmem:[%s16193_s4 + $0x188] sm:$0xff] }
 0xaae   : > { %v4776_v42 = vmul.f32 %v10115_v7, %v14518_v55 }
 0xab0   : > { %v4939_v7 = vsel %vm4791_vm6, %v4776_v42, 0.0  ;;  %v10116_v42 = vld [vmem:[%s16193_s4 + $0x190] sm:$0xff] }
 0xab1   : > { %7486 = vrot.lane.b32.xlu0 %v14650_v43, %s10212_s10  ;;  %v14985_v43 = vsub.s32 0, %v7055_v22  ;;  %v5539_v22 = vsel %vm5496_vm7, %v14897_v11, %v14908_v47  ;;  %v15014_v47 = vpop.permute.xlu1 %7452  ;;  %v5447_v11 = vpop.xlane.xlu0 %5446 }
 0xab2   : > { %17340 = vst [vmem:[#allocation40_spill] sm:$0xff] %v15014_v47  ;;  %v5544_v5 = vsel %vm5496_vm7, %v4935_v4, %v5447_v11  ;;  %v17344_v11 = vld [vmem:[#allocation186_spill] sm:$0xff] }
 0xab5   : > { %7490 = vrot.lane.b32.xlu0 %v14660_v44, %s10212_s10  ;;  %v17337_v44 = vld [vmem:[#allocation185_spill] sm:$0xff] }
 0xab6   : > { %v6990_v24 = vsub.f32 %v17337_v44, %v14977_v27 }
 0xab8   : > { %v7057_v44 = vrot.slane %v6990_v24, %v14985_v43  ;;  %v6875_v24 = vrot.slane %v14977_v27, 6 }
 0xab9   : > { %7494 = vrot.lane.b32.xlu0 %v14694_v34, %s10212_s10  ;;  %v5538_v34 = vsel %vm5496_vm7, %v14869_v0, %v14880_v39  ;;  %v4777_v0 = vmul.f32 %v10116_v42, %v14526_v60 }
 0xaba   : > { %v5849_v39 = vsel %vm5561_vm8, %v5538_v34, 0.0  ;;  %v5543_v34 = vsel %vm5496_vm7, %v4932_v28, %v5444_v35 }
 0xabb   : > { %v5850_v55 = vrot.slane %v5849_v39, 4  ;;  %v4942_v28 = vsel %vm4791_vm6, %v4777_v0, 0.0  ;;  %v5884_v35 = vsel %vm5561_vm8, %v5543_v34, 0.0 }
 0xabd   : > { %7498 = vrot.lane.b32.xlu0 %v14752_v32, %s10212_s10  ;;  %4940 = vadd.xlane.f32.xlu1 %v4939_v7  ;;  %v5540_v32 = vsel %vm5496_vm7, %v14924_v52, %v5435_v33  ;;  %v5541_v7 = vsel %vm5496_vm7, %v4926_v25, %v5438_v63  ;;  %v5856_v33 = vsel %vm5561_vm8, %v5539_v22, 0.0  ;;  %v5542_v52 = vsel %vm5496_vm7, %v4929_v50, %v5441_v54  ;;  %v17341_v63 = vld [vmem:[#allocation169_spill] sm:$0xff]  ;;  %v17342_v22 = vld [vmem:[#allocation51_spill] sm:$0xff] }
 0xabe   : > { %v5863_v14 = vsel %vm5561_vm8, %v5540_v32, 0.0  ;;  %v7065_v25 = vrot.slane %v6992_v3, %v14985_v43  ;;  %v6994_v42 = vsub.f32 %v17341_v63, %v6873_v16  ;;  %v5290_v47 = vmul.f32 %v17342_v22, %v14526_v60 }
 0xabf   : > { %v5857_v54 = vrot.slane %v5856_v33, 4  ;;  %v5877_v50 = vsel %vm5561_vm8, %v5542_v52, 0.0  ;;  %v5864_v3 = vrot.slane %v5863_v14, 4  ;;  %v5851_v63 = vadd.f32 %v5850_v55, %v5849_v39 }
 0xac0   : > { %v7073_v4 = vrot.slane %v6994_v42, %v14985_v43  ;;  %v5878_v22 = vrot.slane %v5877_v50, 4  ;;  %v5885_v60 = vrot.slane %v5884_v35, 4  ;;  %v5454_v0 = vsel %vm4791_vm6, %v5290_v47, 0.0 }
 0xac1   : > { %7630 = vrot.lane.b32.xlu0 %v7057_v44, %s10213_s13  ;;  %5452 = vadd.xlane.f32.xlu1 %v5451_v18  ;;  %v5870_v44 = vsel %vm5561_vm8, %v5541_v7, 0.0  ;;  %v5891_v7 = vsel %vm5561_vm8, %v5544_v5, 0.0  ;;  %v6996_v18 = vsub.f32 %v17344_v11, %v6875_v24  ;;  %v5858_v52 = vadd.f32 %v5857_v54, %v5856_v33 }
 0xac2   : > { %v5871_v16 = vrot.slane %v5870_v44, 4  ;;  %v5865_v58 = vadd.f32 %v5864_v3, %v5863_v14  ;;  %v5892_v34 = vrot.slane %v5891_v7, 4  ;;  %v5852_v1 = vrot.slane %v5851_v63, 2 }
 0xac3   : > { %v7081_v5 = vrot.slane %v6996_v18, %v14985_v43  ;;  %v5879_v42 = vadd.f32 %v5878_v22, %v5877_v50  ;;  %v5886_v24 = vadd.f32 %v5885_v60, %v5884_v35 }
 0xac4   : > { %v15031_v32 = vpop.xlane.xlu1 %4910  ;;  %v5866_v39 = vrot.slane %v5865_v58, 2  ;;  %v5893_v33 = vadd.f32 %v5892_v34, %v5891_v7 }
 0xac5   : > { %7634 = vrot.lane.b32.xlu0 %v7065_v25, %s10213_s13  ;;  %17343 = vst [vmem:[#allocation59_spill] sm:$0xff] %v15031_v32  ;;  %4943 = vadd.xlane.f32.xlu1 %v4942_v28  ;;  %v5872_v28 = vadd.f32 %v5871_v16, %v5870_v44  ;;  %v5859_v32 = vrot.slane %v5858_v52, 2  ;;  %v5880_v11 = vrot.slane %v5879_v42, 2  ;;  %v5887_v47 = vrot.slane %v5886_v24, 2 }
 0xac6   : > { %v5867_v3 = vadd.f32 %v5866_v39, %v5865_v58 }
 0xac7   : > { %v5873_v54 = vrot.slane %v5872_v28, 2  ;;  %v5881_v60 = vadd.f32 %v5880_v11, %v5879_v42  ;;  %v17347_v42 = vld [vmem:[#allocation126_spill] sm:$0xff] }
 0xac8   : > { %v15039_v25 = vpop.xlane.xlu1 %5422  ;;  %v5868_v61 = vrot.slane %v5867_v3, 1 }
 0xac9   : > { %7638 = vrot.lane.b32.xlu0 %v7073_v4, %s10213_s13  ;;  %17345 = vst [vmem:[#allocation94_spill] sm:$0xff] %v15039_v25  ;;  %5455 = vadd.xlane.f32.xlu1 %v5454_v0  ;;  %v5853_v4 = vadd.f32 %v5852_v1, %v5851_v63  ;;  %v5860_v25 = vadd.f32 %v5859_v32, %v5858_v52  ;;  %v5894_v0 = vrot.slane %v5893_v33, 2  ;;  %v5882_v32 = vrot.slane %v5881_v60, 1 }
 0xaca   : > { %v5874_v16 = vadd.f32 %v5873_v54, %v5872_v28  ;;  %v5869_v39 = vadd.f32 %v5868_v61, %v5867_v3 }
 0xacb   : > { %v5854_v18 = vrot.slane %v5853_v4, 1  ;;  %v5861_v22 = vrot.slane %v5860_v25, 1  ;;  %v5895_v7 = vadd.f32 %v5894_v0, %v5893_v33  ;;  %v5883_v33 = vadd.f32 %v5882_v32, %v5881_v60  ;;  %v17356_v60 = vld [vmem:[#allocation132_spill] sm:$0xff] }
 0xacc   : > { %v4914_v55 = vpop.xlane.xlu1 %4913  ;;  %v5875_v1 = vrot.slane %v5874_v16, 1 }
 0xacd   : > { %7642 = vrot.lane.b32.xlu0 %v7081_v5, %s10213_s13  ;;  %v5888_v5 = vadd.f32 %v5887_v47, %v5886_v24  ;;  %v5855_v63 = vadd.f32 %v5854_v18, %v5853_v4  ;;  %v5862_v48 = vadd.f32 %v5861_v22, %v5860_v25  ;;  %v5896_v21 = vrot.slane %v5895_v7, 1  ;;  %v17348_v47 = vld [vmem:[#allocation147_spill] sm:$0xff]  ;;  %v17349_v25 = vld [vmem:[#allocation134_spill] sm:$0xff] }
 0xace   : > { %v5876_v54 = vadd.f32 %v5875_v1, %v5874_v16  ;;  %v15057_v0 = vadd.f32 %v17349_v25, %v5869_v39 }
 0xacf   : > { %v5889_v58 = vrot.slane %v5888_v5, 1  ;;  %v15051_v24 = vadd.f32 %v17347_v42, %v5855_v63  ;;  %v15054_v4 = vadd.f32 %v17348_v47, %v5862_v48  ;;  %v5897_v61 = vadd.f32 %v5896_v21, %v5895_v7  ;;  %v17360_v7 = vld [vmem:[#allocation131_spill] sm:$0xff] }
 0xad0   : > { %v5426_v14 = vpop.xlane.xlu1 %5425  ;;  %17350 = vst [vmem:[#allocation145_spill] sm:$0xff] %v15057_v0  ;;  %v6240_v21 = vrot.slane %v15057_v0, 5  ;;  %v17365_v0 = vld [vmem:[#allocation118_spill] sm:$0xff] }
 0xad1   : > { %v5537_v44 = vsel %vm5496_vm7, %v4914_v55, %v5426_v14  ;;  %v15046_v55 = vpop.permute.xlu0 %7470  ;;  %v5890_v14 = vadd.f32 %v5889_v58, %v5888_v5  ;;  %v6236_v16 = vrot.slane %v15051_v24, 7  ;;  %v6238_v48 = vrot.slane %v15054_v4, 6  ;;  %v17358_v5 = vld [vmem:[#allocation130_spill] sm:$0xff] }
 0xad2   : > { %v5842_v50 = vsel %vm5561_vm8, %v5537_v44, 0.0  ;;  %17346 = vst [vmem:[#allocation39_spill] sm:$0xff] %v15046_v55  ;;  %v17351_v44 = vld [vmem:[#allocation127_spill] sm:$0xff]  ;;  %v15077_v1 = vadd.f32 %v17360_v7, %v5897_v61  ;;  %v17363_v55 = vld [vmem:[#allocation25_spill] sm:$0xff] }
 0xad3   : > { %v5843_v35 = vrot.slane %v5842_v50, 4 }
 0xad4   : > { %17361 = vst [vmem:[#allocation99_spill] sm:$0xff] %v15077_v1 }
 0xad5   : > { %v5844_v34 = vadd.f32 %v5843_v35, %v5842_v50  ;;  %v15060_v50 = vadd.f32 %v17351_v44, %v5876_v54  ;;  %v15066_v35 = vpop.permute.xlu0 %7474 }
 0xad6   : > { %17355 = vst [vmem:[#allocation148_spill] sm:$0xff] %v15066_v35 }
 0xad7   : > { %v5845_v52 = vrot.slane %v5844_v34, 2  ;;  %17352 = vst [vmem:[#allocation96_spill] sm:$0xff] %v15060_v50 }
 0xad9   : > { %v5846_v28 = vadd.f32 %v5845_v52, %v5844_v34  ;;  %v15073_v34 = vadd.f32 %v17358_v5, %v5890_v14  ;;  %v6242_v52 = vrot.slane %v15060_v50, 4  ;;  %v6248_v14 = vrot.slane %v15077_v1, 1  ;;  %v10120_v50 = vld [vmem:[%s16193_s4 + $0x1b8] sm:$0xff] }
 0xada   : > { %7476 = vrot.lane.b32.xlu1 %v14534_v19, %s10212_s10  ;;  %v17353_v19 = vld [vmem:[#allocation128_spill] sm:$0xff]  ;;  %v5293_v1 = vmul.f32 %v17363_v55, %v14636_v26 }
 0xadb   : > { %v5847_v11 = vrot.slane %v5846_v28, 1  ;;  %v15064_v18 = vadd.f32 %v17353_v19, %v5883_v33  ;;  %17359 = vst [vmem:[#allocation178_spill] sm:$0xff] %v15073_v34  ;;  %v6246_v33 = vrot.slane %v15073_v34, 2 }
 0xadd   : > { %v5848_v3 = vadd.f32 %v5847_v11, %v5846_v28  ;;  %17354 = vst [vmem:[#allocation98_spill] sm:$0xff] %v15064_v18  ;;  %v6244_v28 = vrot.slane %v15064_v18, 3 }
 0xadf   : > { %v15069_v22 = vadd.f32 %v17356_v60, %v5848_v3 }
 0xae1   : > { %17357 = vst [vmem:[#allocation100_spill] sm:$0xff] %v15069_v22  ;;  %v6237_v63 = vsel %vm6160_vm9, %v6236_v16, %v15069_v22  ;;  %v17366_v22 = vld [vmem:[#allocation18_spill] sm:$0xff] }
 0xae2   : > { %v6239_v32 = vsel %vm6163_vm10, %v6238_v48, %v6237_v63 }
 0xae3   : > { %v6241_v39 = vsel %vm6166_vm11, %v6240_v21, %v6239_v32 }
 0xae4   : > { %v15083_v58 = vpop.xlane.xlu0 %4946  ;;  %v6243_v54 = vsel %vm6169_vm12, %v6242_v52, %v6241_v39  ;;  %v10117_v39 = vld [vmem:[%s16193_s4 + $0x1a0] sm:$0xff] }
 0xae5   : > { %v6245_v11 = vsel %vm6172_vm13, %v6244_v28, %v6243_v54  ;;  %v4779_v28 = vmul.f32 %v10117_v39, %v14632_v17 }
 0xae6   : > { %v6247_v61 = vsel %vm6175_vm15, %v6246_v33, %v6245_v11  ;;  %v17362_v33 = vld [vmem:[#allocation23_spill] sm:$0xff] }
 0xae7   : > { %v6249_v16 = vsel %vm6178_vm14, %v6248_v14, %v6247_v61  ;;  %v5292_v11 = vmul.f32 %v17362_v33, %v14632_v17  ;;  %v4948_v14 = vsel %vm4791_vm6, %v4779_v28, 0.0 }
 0xae8   : > { %v15092_v3 = vpop.xlane.xlu0 %5458  ;;  %v6301_v48 = vsel %vm5561_vm8, %v6249_v16, -inf  ;;  %v10118_v16 = vld [vmem:[%s16193_s4 + $0x1a8] sm:$0xff] }
 0xae9   : > { %v5460_v35 = vsel %vm4791_vm6, %v5292_v11, 0.0  ;;  %v17364_v11 = vld [vmem:[#allocation30_spill] sm:$0xff] }
 0xaea   : > { %v5294_v18 = vmul.f32 %v17364_v11, %v14640_v30  ;;  %v5295_v11 = vmul.f32 %v17365_v0, %v14644_v23  ;;  %v5296_v0 = vmul.f32 %v17366_v22, %v14648_v29 }
 0xaec   : > { %v15096_v63 = vpop.xlane.xlu0 %4964  ;;  %6302 = vmax.xlane.f32.xlu0 %v6301_v48  ;;  %v4780_v48 = vmul.f32 %v10118_v16, %v14636_v26  ;;  %v5463_v16 = vsel %vm4791_vm6, %v5293_v1, 0.0  ;;  %v5466_v1 = vsel %vm4791_vm6, %v5294_v18, 0.0  ;;  %v5469_v18 = vsel %vm4791_vm6, %v5295_v11, 0.0 }
 0xaee   : > { %v4951_v33 = vsel %vm4791_vm6, %v4780_v48, 0.0 }
 0xaf0   : > { %v15098_v21 = vpop.xlane.xlu0 %5476 }
 0xaf4   : > { %v15100_v32 = vpop.xlane.xlu0 %4967 }
 0xaf8   : > { %v15102_v52 = vpop.xlane.xlu0 %5479 }
 0xafc   : > { %v15108_v54 = vpop.xlane.xlu0 %4970 }
 0xafe   : > { %4949 = vadd.xlane.f32.xlu1 %v4948_v14  ;;  %v10119_v14 = vld [vmem:[%s16193_s4 + $0x1b0] sm:$0xff] }
 0xaff   : > { %v4781_v34 = vmul.f32 %v10119_v14, %v14640_v30  ;;  %v4782_v14 = vmul.f32 %v10120_v50, %v14644_v23 }
 0xb00   : > { %v15113_v61 = vpop.xlane.xlu0 %5482 }
 0xb01   : > { %v4954_v55 = vsel %vm4791_vm6, %v4781_v34, 0.0  ;;  %v4957_v34 = vsel %vm4791_vm6, %v4782_v14, 0.0 }
 0xb02   : > { %5461 = vadd.xlane.f32.xlu1 %v5460_v35 }
 0xb04   : > { %v15120_v39 = vpop.xlane.xlu0 %4973 }
 0xb06   : > { %4952 = vadd.xlane.f32.xlu1 %v4951_v33 }
 0xb08   : > { %v15125_v28 = vpop.xlane.xlu0 %5485 }
 0xb0a   : > { %5464 = vadd.xlane.f32.xlu1 %v5463_v16 }
 0xb0c   : > { %v4977_v35 = vpop.xlane.xlu0 %4976 }
 0xb0e   : > { %4955 = vadd.xlane.f32.xlu1 %v4954_v55 }
 0xb10   : > { %v5489_v48 = vpop.xlane.xlu0 %5488 }
 0xb11   : > { %v15136_v33 = vsel %vm5496_vm7, %v4977_v35, %v5489_v48  ;;  %v10121_v48 = vld [vmem:[%s16193_s4 + $0x1c0] sm:$0xff] }
 0xb12   : > { %5467 = vadd.xlane.f32.xlu1 %v5466_v1  ;;  %v4783_v50 = vmul.f32 %v10121_v48, %v14648_v29 }
 0xb14   : > { %v4980_v16 = vpop.xlane.xlu0 %4979  ;;  %v4960_v14 = vsel %vm4791_vm6, %v4783_v50, 0.0 }
 0xb16   : > { %4958 = vadd.xlane.f32.xlu1 %v4957_v34 }
 0xb18   : > { %v5492_v55 = vpop.xlane.xlu0 %5491 }
 0xb19   : > { %v15147_v35 = vsel %vm5496_vm7, %v4980_v16, %v5492_v55  ;;  %v5472_v55 = vsel %vm4791_vm6, %v5296_v0, 0.0 }
 0xb1a   : > { %5470 = vadd.xlane.f32.xlu1 %v5469_v18 }
 0xb1c   : > { %v4983_v1 = vpop.xlane.xlu0 %4982 }
 0xb1e   : > { %4961 = vadd.xlane.f32.xlu1 %v4960_v14 }
 0xb20   : > { %v5495_v34 = vpop.xlane.xlu0 %5494 }
 0xb21   : > { %v15158_v16 = vsel %vm5496_vm7, %v4983_v1, %v5495_v34 }
 0xb22   : > { %5473 = vadd.xlane.f32.xlu1 %v5472_v55 }
 0xb24   : > { %v7479_v48 = vpop.permute.xlu0 %7478 }
 0xb25   : > { %v15163_v11 = vsel %vm4791_vm6, %v14632_v17, %v7479_v48 }
 0xb26   : > { %17367 = vst [vmem:[#allocation27_spill] sm:$0xff] %v15163_v11 }
 0xb28   : > { %v7483_v18 = vpop.permute.xlu0 %7482 }
 0xb29   : > { %v15167_v22 = vsel %vm4791_vm6, %v14640_v30, %v7483_v18 }
 0xb2a   : > { %17368 = vst [vmem:[#allocation35_spill] sm:$0xff] %v15167_v22 }
 0xb2c   : > { %v7487_v50 = vpop.permute.xlu0 %7486 }
 0xb2d   : > { %v15171_v14 = vsel %vm4791_vm6, %v14648_v29, %v7487_v50  ;;  %v6870_v50 = vrot.slane %v14977_v27, 1 }
 0xb2e   : > { %17369 = vst [vmem:[#allocation119_spill] sm:$0xff] %v15171_v14 }
 0xb30   : > { %v7491_v1 = vpop.permute.xlu0 %7490 }
 0xb31   : > { %v15175_v0 = vsel %vm4791_vm6, %v14658_v57, %v7491_v1  ;;  %v17373_v57 = vld [vmem:[#allocation42_spill] sm:$0xff]  ;;  %v17375_v1 = vld [vmem:[#allocation73_spill] sm:$0xff] }
 0xb32   : > { %17370 = vst [vmem:[#allocation124_spill] sm:$0xff] %v15175_v0 }
 0xb33   : > { %7480 = vrot.lane.b32.xlu1 %v14638_v13, %s10212_s10  ;;  %v7822_v13 = vsel %vm4791_vm6, %v17373_v57, %v14522_v49  ;;  %v17376_v57 = vld [vmem:[#allocation154_spill] sm:$0xff] }
 0xb34   : > { %v7495_v34 = vpop.permute.xlu0 %7494 }
 0xb35   : > { %v15181_v17 = vsel %vm4791_vm6, %v14692_v9, %v7495_v34  ;;  %v7826_v34 = vsel %vm4791_vm6, %v17375_v1, %v14700_v8  ;;  %v6874_v8 = vrot.slane %v14977_v27, 5 }
 0xb36   : > { %17371 = vst [vmem:[#allocation112_spill] sm:$0xff] %v15181_v17 }
 0xb37   : > { %7484 = vrot.lane.b32.xlu1 %v14646_v59, %s10212_s10  ;;  %v17374_v59 = vld [vmem:[#allocation69_spill] sm:$0xff] }
 0xb38   : > { %v7499_v30 = vpop.permute.xlu0 %7498 }
 0xb39   : > { %v15188_v29 = vsel %vm4791_vm6, %v14750_v56, %v7499_v30  ;;  %v7824_v56 = vsel %vm4791_vm6, %v17374_v59, %v14566_v41 }
 0xb3a   : > { %17372 = vst [vmem:[#allocation16_spill] sm:$0xff] %v15188_v29 }
 0xb3b   : > { %7488 = vrot.lane.b32.xlu1 %v14656_v51, %s10212_s10 }
 0xb3c   : > { %v7631_v55 = vpop.permute.xlu0 %7630 }
 0xb3d   : > { %v7886_v9 = vsel %vm719_vm0, %v7822_v13, %v7631_v55  ;;  %v6991_v13 = vsub.f32 %v17376_v57, %v6870_v50  ;;  %v6872_v55 = vrot.slane %v14977_v27, 3  ;;  %v17379_v50 = vld [vmem:[#allocation183_spill] sm:$0xff] }
 0xb3e   : > { %v7951_v48 = vsel %vm7950_vm1, %v7886_v9, 0.0  ;;  %v17377_v9 = vld [vmem:[#allocation76_spill] sm:$0xff] }
 0xb3f   : > { %8015 = vst [vmem:[%s15199_s29] sm:$0xff] %v7951_v48  ;;  %7492 = vrot.lane.b32.xlu1 %v14668_v12, %s10212_s10  ;;  %v7828_v48 = vsel %vm4791_vm6, %v17377_v9, %v14702_v62  ;;  %v6993_v62 = vsub.f32 %v17379_v50, %v6872_v55 }
 0xb40   : > { %v7635_v18 = vpop.permute.xlu0 %7634 }
 0xb41   : > { %v7888_v49 = vsel %vm719_vm0, %v7824_v56, %v7635_v18  ;;  %v5530_v56 = vsel %vm5496_vm7, %v14906_v45, %v14922_v53  ;;  %v15231_v18 = vpop.permute.xlu1 %7456  ;;  %v7069_v53 = vrot.slane %v6993_v62, %v14985_v43  ;;  %v17380_v45 = vld [vmem:[#allocation171_spill] sm:$0xff] }
 0xb42   : > { %v7953_v51 = vsel %vm7950_vm1, %v7888_v49, 0.0  ;;  %17378 = vst [vmem:[#allocation135_spill] sm:$0xff] %v15231_v18  ;;  %v5793_v1 = vsel %vm5561_vm8, %v5530_v56, 0.0 }
 0xb43   : > { %8017 = vst [vmem:[%s15199_s29 + $0x10] sm:$0xff] %v7953_v51  ;;  %7496 = vrot.lane.b32.xlu1 %v14698_v6, %s10212_s10  ;;  %v7061_v51 = vrot.slane %v6991_v13, %v14985_v43  ;;  %v5794_v57 = vrot.slane %v5793_v1, 4  ;;  %v17381_v13 = vld [vmem:[#allocation97_spill] sm:$0xff] }
 0xb44   : > { %v7639_v30 = vpop.permute.xlu0 %7638  ;;  %v5534_v55 = vsel %vm5496_vm7, %v17381_v13, %v14967_v15 }
 0xb45   : > { %v7890_v41 = vsel %vm719_vm0, %v7826_v34, %v7639_v30  ;;  %v6995_v30 = vsub.f32 %v17380_v45, %v6874_v8  ;;  %v15258_v9 = vpop.permute.xlu1 %7460 }
 0xb46   : > { %v7955_v12 = vsel %vm7950_vm1, %v7890_v41, 0.0  ;;  %v6876_v41 = vrot.slane %v14977_v27, 7  ;;  %17382 = vst [vmem:[#allocation95_spill] sm:$0xff] %v15258_v9 }
 0xb47   : > { %8019 = vst [vmem:[%s15199_s29 + $0x20] sm:$0xff] %v7955_v12  ;;  %7500 = vrot.lane.b32.xlu1 %v14763_v2, %s10212_s10  ;;  %v5531_v2 = vsel %vm5496_vm7, %v14933_v10, %v14943_v37  ;;  %v5533_v12 = vsel %vm5496_vm7, %v14950_v40, %v14954_v46  ;;  %v5532_v10 = vsel %vm5496_vm7, %v14820_v38, %v14824_v36  ;;  %v17384_v40 = vld [vmem:[#allocation49_spill] sm:$0xff]  ;;  %v17385_v36 = vld [vmem:[#allocation94_spill] sm:$0xff] }
 0xb48   : > { %v7643_v59 = vpop.permute.xlu0 %7642  ;;  %v5800_v34 = vsel %vm5561_vm8, %v5531_v2, 0.0  ;;  %v5529_v37 = vsel %vm5496_vm7, %v14878_v31, %v14890_v20  ;;  %v5814_v38 = vsel %vm5561_vm8, %v5533_v12, 0.0  ;;  %v7077_v20 = vrot.slane %v6995_v30, %v14985_v43 }
 0xb49   : > { %v7892_v6 = vsel %vm719_vm0, %v7828_v48, %v7643_v59  ;;  %v5801_v27 = vrot.slane %v5800_v34, 4  ;;  %v17383_v48 = vld [vmem:[#allocation41_spill] sm:$0xff]  ;;  %v17386_v59 = vld [vmem:[#allocation59_spill] sm:$0xff]  ;;  %v5807_v15 = vsel %vm5561_vm8, %v5532_v10, 0.0  ;;  %v5786_v56 = vsel %vm5561_vm8, %v5529_v37, 0.0  ;;  %v15276_v13 = vpop.permute.xlu1 %7464 }
 0xb4a   : > { %v7957_v49 = vsel %vm7950_vm1, %v7892_v6, 0.0  ;;  %v5535_v46 = vsel %vm5496_vm7, %v17384_v40, %v17383_v48  ;;  %v5536_v31 = vsel %vm5496_vm7, %v17386_v59, %v17385_v36  ;;  %v17387_v6 = vld [vmem:[#allocation26_spill] sm:$0xff]  ;;  %v5815_v2 = vrot.slane %v5814_v38, 4  ;;  %17388 = vst [vmem:[#allocation142_spill] sm:$0xff] %v15276_v13 }
 0xb4b   : > { %8021 = vst [vmem:[%s15199_s29 + $0x30] sm:$0xff] %v7957_v49  ;;  %7632 = vrot.lane.b32.xlu1 %v7061_v51, %s10213_s13  ;;  %v6997_v8 = vsub.f32 %v17387_v6, %v6876_v41  ;;  %v5821_v49 = vsel %vm5561_vm8, %v5534_v55, 0.0  ;;  %v5795_v51 = vadd.f32 %v5794_v57, %v5793_v1  ;;  %v5828_v50 = vsel %vm5561_vm8, %v5535_v46, 0.0 }
 0xb4c   : > { %v5802_v62 = vadd.f32 %v5801_v27, %v5800_v34  ;;  %v5808_v45 = vrot.slane %v5807_v15, 4  ;;  %v5787_v12 = vrot.slane %v5786_v56, 4  ;;  %v5822_v30 = vrot.slane %v5821_v49, 4 }
 0xb4d   : > { %v7085_v41 = vrot.slane %v6997_v8, %v14985_v43  ;;  %v5829_v10 = vrot.slane %v5828_v50, 4  ;;  %v5796_v37 = vrot.slane %v5795_v51, 2  ;;  %v5816_v57 = vadd.f32 %v5815_v2, %v5814_v38  ;;  %v15280_v59 = vpop.permute.xlu1 %7468 }
 0xb4e   : > { %v5803_v1 = vrot.slane %v5802_v62, 2  ;;  %v5809_v55 = vadd.f32 %v5808_v45, %v5807_v15  ;;  %v5788_v40 = vadd.f32 %v5787_v12, %v5786_v56  ;;  %v5823_v34 = vadd.f32 %v5822_v30, %v5821_v49  ;;  %17389 = vst [vmem:[#allocation138_spill] sm:$0xff] %v15280_v59 }
 0xb4f   : > { %7636 = vrot.lane.b32.xlu1 %v7069_v53, %s10213_s13  ;;  %v5835_v53 = vsel %vm5561_vm8, %v5536_v31, 0.0  ;;  %v5830_v27 = vadd.f32 %v5829_v10, %v5828_v50  ;;  %v5797_v46 = vadd.f32 %v5796_v37, %v5795_v51 }
 0xb50   : > { %v5836_v48 = vrot.slane %v5835_v53, 4  ;;  %v5804_v31 = vadd.f32 %v5803_v1, %v5802_v62  ;;  %v5810_v6 = vrot.slane %v5809_v55, 2  ;;  %v5789_v29 = vrot.slane %v5788_v40, 2 }
 0xb51   : > { %v5824_v8 = vrot.slane %v5823_v34, 2  ;;  %v5831_v17 = vrot.slane %v5830_v27, 2  ;;  %v5798_v0 = vrot.slane %v5797_v46, 1  ;;  %v15282_v22 = vpop.xlane.xlu1 %4937 }
 0xb52   : > { %v5837_v36 = vadd.f32 %v5836_v48, %v5835_v53  ;;  %v5811_v15 = vadd.f32 %v5810_v6, %v5809_v55  ;;  %v5790_v56 = vadd.f32 %v5789_v29, %v5788_v40 }
 0xb53   : > { %7640 = vrot.lane.b32.xlu1 %v7077_v20, %s10213_s13  ;;  %v5817_v20 = vrot.slane %v5816_v57, 2  ;;  %v5825_v49 = vadd.f32 %v5824_v8, %v5823_v34  ;;  %v5832_v50 = vadd.f32 %v5831_v17, %v5830_v27  ;;  %v5799_v51 = vadd.f32 %v5798_v0, %v5797_v46 }
 0xb54   : > { %v5838_v14 = vrot.slane %v5837_v36, 2  ;;  %v5812_v62 = vrot.slane %v5811_v15, 1  ;;  %v5791_v12 = vrot.slane %v5790_v56, 1 }
 0xb55   : > { %v5818_v38 = vadd.f32 %v5817_v20, %v5816_v57  ;;  %v5826_v30 = vrot.slane %v5825_v49, 1  ;;  %v5450_v10 = vpop.xlane.xlu1 %5449  ;;  %v5833_v37 = vrot.slane %v5832_v50, 1  ;;  %v15285_v48 = vadd.f32 %v17347_v42, %v5799_v51 }
 0xb56   : > { %v5839_v2 = vadd.f32 %v5838_v14, %v5837_v36  ;;  %v5813_v29 = vadd.f32 %v5812_v62, %v5811_v15  ;;  %v5792_v55 = vadd.f32 %v5791_v12, %v5790_v56 }
 0xb57   : > { %7644 = vrot.lane.b32.xlu1 %v7085_v41, %s10213_s13  ;;  %v5805_v41 = vrot.slane %v5804_v31, 1  ;;  %v5819_v45 = vrot.slane %v5818_v38, 1  ;;  %v5827_v17 = vadd.f32 %v5826_v30, %v5825_v49  ;;  %v5834_v0 = vadd.f32 %v5833_v37, %v5832_v50 }
 0xb58   : > { %v5840_v1 = vrot.slane %v5839_v2, 1  ;;  %v6222_v14 = vrot.slane %v15285_v48, 7  ;;  %v15298_v36 = vadd.f32 %v17349_v25, %v5813_v29 }
 0xb59   : > { %v5806_v53 = vadd.f32 %v5805_v41, %v5804_v31  ;;  %v5820_v57 = vadd.f32 %v5819_v45, %v5818_v38  ;;  %v15291_v34 = vpop.permute.xlu1 %7472  ;;  %v15301_v31 = vadd.f32 %v17356_v60, %v5792_v55  ;;  %v15304_v20 = vadd.f32 %v17353_v19, %v5827_v17 }
 0xb5a   : > { %v5841_v40 = vadd.f32 %v5840_v1, %v5839_v2  ;;  %17390 = vst [vmem:[#allocation66_spill] sm:$0xff] %v15291_v34  ;;  %v15307_v6 = vadd.f32 %v17358_v5, %v5834_v0  ;;  %v6226_v49 = vrot.slane %v15298_v36, 5  ;;  %v5548_v55 = vsel %vm5496_vm7, %v15083_v58, %v15092_v3 }
 0xb5b   : > { %v15288_v11 = vadd.f32 %v17348_v47, %v5806_v53  ;;  %v15295_v46 = vadd.f32 %v17351_v44, %v5820_v57  ;;  %v6223_v38 = vsel %vm6160_vm9, %v6222_v14, %v15301_v31  ;;  %v6230_v50 = vrot.slane %v15304_v20, 3 }
 0xb5c   : > { %v15310_v8 = vadd.f32 %v17360_v7, %v5841_v40  ;;  %v6232_v51 = vrot.slane %v15307_v6, 2  ;;  %v5919_v0 = vsel %vm5561_vm8, %v5548_v55, 0.0  ;;  %v5545_v58 = vsel %vm5496_vm7, %v15282_v22, %v5450_v10 }
 0xb5d   : > { %v6224_v27 = vrot.slane %v15288_v11, 6  ;;  %v4941_v41 = vpop.xlane.xlu1 %4940  ;;  %v6228_v56 = vrot.slane %v15295_v46, 4 }
 0xb5e   : > { %v6234_v53 = vrot.slane %v15310_v8, 1 }
 0xb5f   : > { %v6225_v15 = vsel %vm6163_vm10, %v6224_v27, %v6223_v38  ;;  %v5920_v27 = vrot.slane %v5919_v0, 4 }
 0xb60   : > { %v6227_v2 = vsel %vm6166_vm11, %v6226_v49, %v6225_v15 }
 0xb61   : > { %v6229_v45 = vsel %vm6169_vm12, %v6228_v56, %v6227_v2  ;;  %v5453_v62 = vpop.xlane.xlu1 %5452 }
 0xb62   : > { %v6231_v12 = vsel %vm6172_vm13, %v6230_v50, %v6229_v45  ;;  %v5546_v40 = vsel %vm5496_vm7, %v4941_v41, %v5453_v62  ;;  %v5921_v50 = vadd.f32 %v5920_v27, %v5919_v0  ;;  %v5554_v41 = vsel %vm5496_vm7, %v15096_v63, %v15098_v21 }
 0xb63   : > { %v6233_v30 = vsel %vm6175_vm15, %v6232_v51, %v6231_v12  ;;  %v5905_v15 = vsel %vm5561_vm8, %v5546_v40, 0.0  ;;  %v5898_v12 = vsel %vm5561_vm8, %v5545_v58, 0.0 }
 0xb64   : > { %v6235_v37 = vsel %vm6178_vm14, %v6234_v53, %v6233_v30  ;;  %v5906_v3 = vrot.slane %v5905_v15, 4  ;;  %v5922_v62 = vrot.slane %v5921_v50, 2 }
 0xb65   : > { %v6298_v1 = vsel %vm5561_vm8, %v6235_v37, -inf  ;;  %v4944_v57 = vpop.xlane.xlu1 %4943  ;;  %v5961_v37 = vsel %vm5561_vm8, %v5554_v41, 0.0 }
 0xb66   : > { %v5907_v30 = vadd.f32 %v5906_v3, %v5905_v15  ;;  %v5923_v0 = vadd.f32 %v5922_v62, %v5921_v50  ;;  %v5962_v21 = vrot.slane %v5961_v37, 4 }
 0xb68   : > { %v5908_v40 = vrot.slane %v5907_v30, 2  ;;  %v5963_v3 = vadd.f32 %v5962_v21, %v5961_v37 }
 0xb69   : > { %v5456_v29 = vpop.xlane.xlu1 %5455 }
 0xb6a   : > { %v5547_v38 = vsel %vm5496_vm7, %v4944_v57, %v5456_v29  ;;  %v5899_v29 = vrot.slane %v5898_v12, 4 }
 0xb6b   : > { %v5912_v49 = vsel %vm5561_vm8, %v5547_v38, 0.0  ;;  %v5556_v38 = vsel %vm5496_vm7, %v15108_v54, %v15113_v61 }
 0xb6c   : > { %v5913_v2 = vrot.slane %v5912_v49, 4  ;;  %v5975_v50 = vsel %vm5561_vm8, %v5556_v38, 0.0 }
 0xb6d   : > { %v15329_v17 = vpop.permute.xlu1 %7476 }
 0xb6e   : > { %17391 = vst [vmem:[#allocation43_spill] sm:$0xff] %v15329_v17  ;;  %v5914_v22 = vadd.f32 %v5913_v2, %v5912_v49  ;;  %v5909_v2 = vadd.f32 %v5908_v40, %v5907_v30 }
 0xb70   : > { %v5915_v15 = vrot.slane %v5914_v22, 2 }
 0xb72   : > { %v5916_v41 = vadd.f32 %v5915_v15, %v5914_v22 }
 0xb74   : > { %v5917_v22 = vrot.slane %v5916_v41, 1 }
 0xb7b   : > { %6299 = vmax.xlane.f32.xlu1 %v6298_v1  ;;  %v5555_v1 = vsel %vm5496_vm7, %v15100_v32, %v15102_v52 }
 0xb8b   : > { %v4950_v14 = vpop.xlane.xlu1 %4949 }
 0xb8f   : > { %v5462_v56 = vpop.xlane.xlu1 %5461 }
 0xb90   : > { %v5549_v51 = vsel %vm5496_vm7, %v4950_v14, %v5462_v56  ;;  %v5968_v14 = vsel %vm5561_vm8, %v5555_v1, 0.0  ;;  %v5900_v56 = vadd.f32 %v5899_v29, %v5898_v12  ;;  %v5976_v29 = vrot.slane %v5975_v50, 4 }
 0xb91   : > { %v5926_v45 = vsel %vm5561_vm8, %v5549_v51, 0.0  ;;  %v5924_v51 = vrot.slane %v5923_v0, 1  ;;  %v5969_v58 = vrot.slane %v5968_v14, 4 }
 0xb92   : > { %v5927_v10 = vrot.slane %v5926_v45, 4  ;;  %v5901_v54 = vrot.slane %v5900_v56, 2 }
 0xb93   : > { %v4953_v53 = vpop.xlane.xlu1 %4952  ;;  %v5925_v12 = vadd.f32 %v5924_v51, %v5923_v0  ;;  %v6003_v0 = vsel %vm5561_vm8, %v15158_v16, 0.0 }
 0xb94   : > { %v5928_v32 = vadd.f32 %v5927_v10, %v5926_v45  ;;  %v5970_v10 = vadd.f32 %v5969_v58, %v5968_v14  ;;  %v5902_v38 = vadd.f32 %v5901_v54, %v5900_v56  ;;  %v5977_v58 = vadd.f32 %v5976_v29, %v5975_v50 }
 0xb96   : > { %v5929_v62 = vrot.slane %v5928_v32, 2  ;;  %v5971_v51 = vrot.slane %v5970_v10, 2  ;;  %v5903_v17 = vrot.slane %v5902_v38, 1 }
 0xb97   : > { %v5465_v57 = vpop.xlane.xlu1 %5464 }
 0xb98   : > { %v5550_v55 = vsel %vm5496_vm7, %v4953_v53, %v5465_v57  ;;  %v5557_v53 = vsel %vm5496_vm7, %v15120_v39, %v15125_v28  ;;  %v17392_v57 = vld [vmem:[#allocation179_spill] sm:$0xff]  ;;  %v5989_v39 = vsel %vm5561_vm8, %v15136_v33, 0.0  ;;  %v5996_v28 = vsel %vm5561_vm8, %v15147_v35, 0.0 }
 0xb99   : > { %v5933_v63 = vsel %vm5561_vm8, %v5550_v55, 0.0  ;;  %9922 = vlog2.f32 %v17392_v57  ;;  %v5964_v55 = vrot.slane %v5963_v3, 2  ;;  %v5982_v30 = vsel %vm5561_vm8, %v5557_v53, 0.0 }
 0xb9a   : > { %v5934_v27 = vrot.slane %v5933_v63, 4  ;;  %v5930_v40 = vadd.f32 %v5929_v62, %v5928_v32  ;;  %v5983_v53 = vrot.slane %v5982_v30, 4  ;;  %v5990_v33 = vrot.slane %v5989_v39, 4 }
 0xb9b   : > { %v4956_v52 = vpop.xlane.xlu1 %4955  ;;  %v6004_v32 = vrot.slane %v6003_v0, 4  ;;  %v5918_v62 = vadd.f32 %v5917_v22, %v5916_v41 }
 0xb9c   : > { %v5935_v49 = vadd.f32 %v5934_v27, %v5933_v63  ;;  %v5910_v63 = vrot.slane %v5909_v2, 1  ;;  %v5931_v56 = vrot.slane %v5930_v40, 1  ;;  %v5991_v29 = vadd.f32 %v5990_v33, %v5989_v39 }
 0xb9d   : > { %v6005_v22 = vadd.f32 %v6004_v32, %v6003_v0  ;;  %v15381_v34 = vadd.f32 %v17348_v47, %v5918_v62 }
 0xb9e   : > { %v5936_v61 = vrot.slane %v5935_v49, 2  ;;  %v5911_v57 = vadd.f32 %v5910_v63, %v5909_v2 }
 0xb9f   : > { %v5468_v1 = vpop.xlane.xlu1 %5467  ;;  %v6006_v32 = vrot.slane %v6005_v22, 2 }
 0xba0   : > { %v5551_v45 = vsel %vm5496_vm7, %v4956_v52, %v5468_v1  ;;  %v5937_v14 = vadd.f32 %v5936_v61, %v5935_v49  ;;  %v15369_v52 = vadd.f32 %v17349_v25, %v5925_v12  ;;  %v15371_v1 = vadd.f32 %v5964_v55, %v5963_v3 }
 0xba1   : > { %v5940_v37 = vsel %vm5561_vm8, %v5551_v45, 0.0  ;;  %v5997_v45 = vrot.slane %v5996_v28, 4  ;;  %v5972_v12 = vadd.f32 %v5971_v51, %v5970_v10  ;;  %v15378_v2 = vadd.f32 %v17347_v42, %v5911_v57 }
 0xba2   : > { %v5941_v21 = vrot.slane %v5940_v37, 4  ;;  %v5938_v16 = vrot.slane %v5937_v14, 1  ;;  %v6254_v10 = vrot.slane %v15369_v52, 5  ;;  %v6007_v13 = vadd.f32 %v6006_v32, %v6005_v22 }
 0xba3   : > { %v4959_v27 = vpop.xlane.xlu1 %4958  ;;  %v15375_v3 = vpop.eup %9922  ;;  %v5998_v63 = vadd.f32 %v5997_v45, %v5996_v28  ;;  %v6250_v28 = vrot.slane %v15378_v2, 7 }
 0xba4   : > { %v5942_v15 = vadd.f32 %v5941_v21, %v5940_v37  ;;  %v5978_v37 = vrot.slane %v5977_v58, 2  ;;  %v5984_v21 = vadd.f32 %v5983_v53, %v5982_v30  ;;  %v5904_v30 = vadd.f32 %v5903_v17, %v5902_v38 }
 0xba5   : > { %v5939_v51 = vadd.f32 %v5938_v16, %v5937_v14  ;;  %v5999_v45 = vrot.slane %v5998_v63, 2 }
 0xba6   : > { %v5943_v35 = vrot.slane %v5942_v15, 2  ;;  %v5979_v39 = vadd.f32 %v5978_v37, %v5977_v58  ;;  %v5985_v33 = vrot.slane %v5984_v21, 2  ;;  %v15391_v38 = vadd.f32 %v17356_v60, %v5904_v30 }
 0xba7   : > { %v5471_v54 = vpop.xlane.xlu1 %5470  ;;  %v15394_v14 = vadd.f32 %v17353_v19, %v5939_v51  ;;  %v6000_v59 = vadd.f32 %v5999_v45, %v5998_v63 }
 0xba8   : > { %v5944_v49 = vadd.f32 %v5943_v35, %v5942_v15  ;;  %v5552_v61 = vsel %vm5496_vm7, %v4959_v27, %v5471_v54  ;;  %v5932_v15 = vadd.f32 %v5931_v56, %v5930_v40  ;;  %v5966_v35 = vrot.slane %v15371_v1, 1 }
 0xba9   : > { %v5947_v50 = vsel %vm5561_vm8, %v5552_v61, 0.0  ;;  %v5973_v54 = vrot.slane %v5972_v12, 1  ;;  %v5992_v61 = vrot.slane %v5991_v29, 2  ;;  %v6252_v40 = vrot.slane %v15381_v34, 6 }
 0xbaa   : > { %v5945_v55 = vrot.slane %v5944_v49, 1  ;;  %v5948_v41 = vrot.slane %v5947_v50, 4  ;;  %v15388_v62 = vadd.f32 %v17351_v44, %v5932_v15  ;;  %v5980_v16 = vrot.slane %v5979_v39, 1 }
 0xbab   : > { %v4962_v27 = vpop.xlane.xlu1 %4961  ;;  %v6251_v30 = vsel %vm6160_vm9, %v6250_v28, %v15391_v38 }
 0xbac   : > { %v5949_v53 = vadd.f32 %v5948_v41, %v5947_v50  ;;  %v5946_v57 = vadd.f32 %v5945_v55, %v5944_v49  ;;  %v5986_v49 = vadd.f32 %v5985_v33, %v5984_v21  ;;  %v5993_v55 = vadd.f32 %v5992_v61, %v5991_v29 }
 0xbad   : > { %v6258_v29 = vrot.slane %v15394_v14, 3  ;;  %v5974_v61 = vadd.f32 %v5973_v54, %v5972_v12 }
 0xbae   : > { %v5950_v0 = vrot.slane %v5949_v53, 2  ;;  %v15398_v37 = vadd.f32 %v17358_v5, %v5946_v57  ;;  %v5967_v57 = vadd.f32 %v5966_v35, %v15371_v1  ;;  %v5994_v22 = vrot.slane %v5993_v55, 1 }
 0xbaf   : > { %v5474_v17 = vpop.xlane.xlu1 %5473 }
 0xbb0   : > { %v5951_v58 = vadd.f32 %v5950_v0, %v5949_v53  ;;  %v5553_v56 = vsel %vm5496_vm7, %v4962_v27, %v5474_v17  ;;  %v6253_v53 = vsel %vm6163_vm10, %v6252_v40, %v6251_v30  ;;  %v6256_v27 = vrot.slane %v15388_v62, 4 }
 0xbb1   : > { %v5954_v50 = vsel %vm5561_vm8, %v5553_v56, 0.0  ;;  %v5987_v17 = vrot.slane %v5986_v49, 1  ;;  %v6260_v63 = vrot.slane %v15398_v37, 2  ;;  %v6255_v32 = vsel %vm6166_vm11, %v6254_v10, %v6253_v53 }
 0xbb2   : > { %v5952_v41 = vrot.slane %v5951_v58, 1  ;;  %v5955_v15 = vrot.slane %v5954_v50, 4  ;;  %v5981_v40 = vadd.f32 %v5980_v16, %v5979_v39  ;;  %v6008_v56 = vrot.slane %v6007_v13, 1 }
 0xbb3   : > { %v7481_v51 = vpop.permute.xlu1 %7480  ;;  %v5988_v54 = vadd.f32 %v5987_v17, %v5986_v49  ;;  %v15425_v10 = vadd.f32 %v17347_v42, %v5967_v57  ;;  %v5995_v39 = vadd.f32 %v5994_v22, %v5993_v55  ;;  %v15430_v53 = vadd.f32 %v17348_v47, %v5974_v61  ;;  %v17397_v42 = vld [vmem:[#allocation159_spill] sm:$0xff] }
 0xbb4   : > { %v5953_v0 = vadd.f32 %v5952_v41, %v5951_v58  ;;  %v5956_v21 = vadd.f32 %v5955_v15, %v5954_v50  ;;  %v15407_v33 = vsel %vm4791_vm6, %v14636_v26, %v7481_v51  ;;  %v6001_v58 = vrot.slane %v6000_v59, 1 }
 0xbb5   : > { %17393 = vst [vmem:[#allocation21_spill] sm:$0xff] %v15407_v33  ;;  %v6257_v50 = vsel %vm6169_vm12, %v6256_v27, %v6255_v32  ;;  %17395 = vst [vmem:[#allocation24_spill] sm:$0xff] %v15425_v10  ;;  %v6841_v51 = vmul.f32 0.6931472, %v15375_v3  ;;  %v15434_v49 = vadd.f32 %v17349_v25, %v5981_v40  ;;  %v15441_v57 = vadd.f32 %v17351_v44, %v5988_v54  ;;  %v17399_v3 = vld [vmem:[#allocation81_spill] sm:$0xff]  ;;  %v17404_v32 = vld [vmem:[#allocation72_spill] sm:$0xff] }
 0xbb6   : > { %v15413_v28 = vadd.f32 %v17360_v7, %v5953_v0  ;;  %v5957_v45 = vrot.slane %v5956_v21, 2  ;;  %v6259_v12 = vsel %vm6172_vm13, %v6258_v29, %v6257_v50  ;;  %17396 = vst [vmem:[#allocation19_spill] sm:$0xff] %v15430_v53  ;;  %9924 = vlog2.f32 %v17399_v3  ;;  %v17411_v3 = vld [vmem:[#allocation158_spill] sm:$0xff] }
 0xbb7   : > { %v7485_v26 = vpop.permute.xlu1 %7484  ;;  %v6261_v15 = vsel %vm6175_vm15, %v6260_v63, %v6259_v12  ;;  %v6264_v47 = vrot.slane %v15425_v10, 7  ;;  %v6266_v17 = vrot.slane %v15430_v53, 6  ;;  %v6268_v22 = vrot.slane %v15434_v49, 5  ;;  %v17406_v12 = vld [vmem:[#allocation65_spill] sm:$0xff] }
 0xbb8   : > { %v5958_v41 = vadd.f32 %v5957_v45, %v5956_v21  ;;  %v15419_v1 = vsel %vm4791_vm6, %v14644_v23, %v7485_v26  ;;  %v6262_v35 = vrot.slane %v15413_v28, 1  ;;  %v6002_v23 = vadd.f32 %v6001_v58, %v6000_v59 }
 0xbb9   : > { %17394 = vst [vmem:[#allocation22_spill] sm:$0xff] %v15419_v1  ;;  %v6009_v21 = vadd.f32 %v6008_v56, %v6007_v13  ;;  %v15446_v59 = vadd.f32 %v17353_v19, %v5995_v39  ;;  %v17402_v13 = vld [vmem:[#allocation36_spill] sm:$0xff]  ;;  %v6270_v58 = vrot.slane %v15441_v57, 4 }
 0xbba   : > { %v5959_v16 = vrot.slane %v5958_v41, 1  ;;  %v6263_v30 = vsel %vm6178_vm14, %v6262_v35, %v6261_v15  ;;  %v15452_v61 = vadd.f32 %v6841_v51, %v17402_v13  ;;  %v15456_v63 = vadd.f32 %v17358_v5, %v6002_v23  ;;  %v17408_v23 = vld [vmem:[#allocation182_spill] sm:$0xff] }
 0xbbb   : > { %v7489_v27 = vpop.permute.xlu1 %7488  ;;  %v6304_v0 = vsel %vm5561_vm8, %v6263_v30, -inf  ;;  %17400 = vst [vmem:[#allocation129_spill] sm:$0xff] %v15446_v59  ;;  %v15460_v45 = vadd.f32 %v17360_v7, %v6009_v21  ;;  %v6272_v56 = vrot.slane %v15446_v59, 3 }
 0xbbc   : > { %v5960_v29 = vadd.f32 %v5959_v16, %v5958_v41  ;;  %v15438_v55 = vsel %vm4791_vm6, %v17397_v42, %v7489_v27  ;;  %6305 = vmax.xlane.f32.xlu1 %v6304_v0  ;;  %v6274_v7 = vrot.slane %v15456_v63, 2  ;;  %v6877_v41 = vrot.slane %v15452_v61, 1 }
 0xbbd   : > { %17398 = vst [vmem:[#allocation110_spill] sm:$0xff] %v15438_v55  ;;  %17403 = vst [vmem:[#allocation185_spill] sm:$0xff] %v15460_v45  ;;  %v6276_v15 = vrot.slane %v15460_v45, 1  ;;  %v6879_v0 = vrot.slane %v15452_v61, 3 }
 0xbbe   : > { %v15449_v25 = vadd.f32 %v17356_v60, %v5960_v29  ;;  %v6999_v27 = vsub.f32 %v17408_v23, %v6877_v41  ;;  %v17409_v29 = vld [vmem:[#allocation160_spill] sm:$0xff] }
 0xbbf   : > { %v7493_v44 = vpop.permute.xlu1 %7492 }
 0xbc0   : > { %17401 = vst [vmem:[#allocation38_spill] sm:$0xff] %v15449_v25  ;;  %v6265_v19 = vsel %vm6160_vm9, %v6264_v47, %v15449_v25  ;;  %v15466_v60 = vsel %vm4791_vm6, %v17404_v32, %v7493_v44  ;;  %v9925_v21 = vpop.eup %9924  ;;  %v17412_v47 = vld [vmem:[#allocation53_spill] sm:$0xff] }
 0xbc1   : > { %17405 = vst [vmem:[#allocation55_spill] sm:$0xff] %v15466_v60  ;;  %v6267_v40 = vsel %vm6163_vm10, %v6266_v17, %v6265_v19  ;;  %v7823_v13 = vsel %vm4791_vm6, %v17412_v47, %v17411_v3  ;;  %v6843_v17 = vmul.f32 0.6931472, %v9925_v21  ;;  %v17413_v19 = vld [vmem:[#allocation184_spill] sm:$0xff]  ;;  %v17421_v47 = vld [vmem:[#allocation29_spill] sm:$0xff] }
 0xbc2   : > { %v6269_v5 = vsel %vm6166_vm11, %v6268_v22, %v6267_v40  ;;  %v7093_v22 = vrot.slane %v6999_v27, %v14985_v43  ;;  %v7001_v32 = vsub.f32 %v17413_v19, %v6879_v0  ;;  %v6881_v40 = vrot.slane %v15452_v61, 5  ;;  %v17419_v27 = vld [vmem:[#allocation62_spill] sm:$0xff]  ;;  %v17420_v0 = vld [vmem:[#allocation77_spill] sm:$0xff]  ;;  %v17422_v19 = vld [vmem:[#allocation84_spill] sm:$0xff] }
 0xbc3   : > { %v7497_v26 = vpop.permute.xlu1 %7496  ;;  %v6271_v50 = vsel %vm6169_vm12, %v6270_v58, %v6269_v5  ;;  %v7827_v21 = vsel %vm4791_vm6, %v17420_v0, %v17419_v27 }
 0xbc4   : > { %v15477_v35 = vsel %vm4791_vm6, %v17406_v12, %v7497_v26  ;;  %v6273_v54 = vsel %vm6172_vm13, %v6272_v56, %v6271_v50  ;;  %v17414_v56 = vld [vmem:[#allocation161_spill] sm:$0xff]  ;;  %v6883_v26 = vrot.slane %v15452_v61, 7  ;;  %v17415_v50 = vld [vmem:[#allocation163_spill] sm:$0xff] }
 0xbc5   : > { %17407 = vst [vmem:[#allocation181_spill] sm:$0xff] %v15477_v35  ;;  %v6275_v39 = vsel %vm6175_vm15, %v6274_v7, %v6273_v54  ;;  %9926 = vlog2.f32 %v17414_v56  ;;  %v17416_v7 = vld [vmem:[#allocation74_spill] sm:$0xff]  ;;  %v17417_v12 = vld [vmem:[#allocation113_spill] sm:$0xff]  ;;  %v17424_v56 = vld [vmem:[#allocation120_spill] sm:$0xff] }
 0xbc6   : > { %v6277_v16 = vsel %vm6178_vm14, %v6276_v15, %v6275_v39  ;;  %v7825_v41 = vsel %vm4791_vm6, %v17416_v7, %v17415_v50  ;;  %v15506_v54 = vadd.f32 %v6843_v17, %v17417_v12  ;;  %v7101_v39 = vrot.slane %v7001_v32, %v14985_v43  ;;  %v17423_v32 = vld [vmem:[#allocation46_spill] sm:$0xff]  ;;  %v17425_v12 = vld [vmem:[#allocation187_spill] sm:$0xff] }
 0xbc7   : > { %v7501_v30 = vpop.permute.xlu1 %7500  ;;  %v6307_v51 = vsel %vm5561_vm8, %v6277_v16, -inf  ;;  %v17418_v16 = vld [vmem:[#allocation164_spill] sm:$0xff] }
 0xbc8   : > { %v15488_v42 = vsel %vm4791_vm6, %v17409_v29, %v7501_v30  ;;  %6308 = vmax.xlane.f32.xlu0 %v6307_v51  ;;  %v7003_v30 = vsub.f32 %v17418_v16, %v6881_v40  ;;  %v6884_v17 = vrot.slane %v15506_v54, 1  ;;  %v7829_v40 = vsel %vm4791_vm6, %v17423_v32, %v17422_v19 }
 0xbc9   : > { %17410 = vst [vmem:[#allocation169_spill] sm:$0xff] %v15488_v42  ;;  %v6888_v0 = vrot.slane %v15506_v54, 5  ;;  %v6890_v32 = vrot.slane %v15506_v54, 7 }
 0xbca   : > { %v7109_v3 = vrot.slane %v7003_v30, %v14985_v43  ;;  %v7007_v50 = vsub.f32 %v17424_v56, %v6884_v17  ;;  %v6882_v56 = vrot.slane %v15452_v61, 6 }
 0xbcb   : > { %v7633_v44 = vpop.permute.xlu1 %7632 }
 0xbcc   : > { %v7887_v58 = vsel %vm719_vm0, %v7823_v13, %v7633_v44  ;;  %v7005_v13 = vsub.f32 %v17421_v47, %v6883_v26  ;;  %v6886_v26 = vrot.slane %v15506_v54, 3  ;;  %v6880_v47 = vrot.slane %v15452_v61, 4 }
 0xbcd   : > { %v7952_v5 = vsel %vm7950_vm1, %v7887_v58, 0.0  ;;  %7648 = vrot.lane.b32.xlu1 %v7093_v22, %s10213_s13 }
 0xbce   : > { %8016 = vst [vmem:[%s15199_s29 + $0x8] sm:$0xff] %v7952_v5  ;;  %v7117_v5 = vrot.slane %v7005_v13, %v14985_v43  ;;  %v17428_v13 = vld [vmem:[#allocation111_spill] sm:$0xff] }
 0xbcf   : > { %v7637_v15 = vpop.permute.xlu1 %7636  ;;  %v9927_v7 = vpop.eup %9926 }
 0xbd0   : > { %v7889_v51 = vsel %vm719_vm0, %v7825_v41, %v7637_v15  ;;  %v6998_v15 = vsub.f32 %v17425_v12, %v15452_v61  ;;  %v6845_v30 = vmul.f32 0.6931472, %v9927_v7 }
 0xbd1   : > { %v7954_v23 = vsel %vm7950_vm1, %v7889_v51, 0.0  ;;  %7652 = vrot.lane.b32.xlu1 %v7101_v39, %s10213_s13  ;;  %v6878_v39 = vrot.slane %v15452_v61, 2  ;;  %v7125_v51 = vrot.slane %v7007_v50, %v14985_v43 }
 0xbd2   : > { %8018 = vst [vmem:[%s15199_s29 + $0x18] sm:$0xff] %v7954_v23  ;;  %v17426_v23 = vld [vmem:[#allocation188_spill] sm:$0xff]  ;;  %v15546_v17 = vadd.f32 %v6845_v30, %v17428_v13 }
 0xbd3   : > { %v7641_v29 = vpop.permute.xlu1 %7640  ;;  %v7009_v27 = vsub.f32 %v17426_v23, %v6886_v26  ;;  %v17431_v26 = vld [vmem:[#allocation28_spill] sm:$0xff] }
 0xbd4   : > { %v7891_v44 = vsel %vm719_vm0, %v7827_v21, %v7641_v29  ;;  %v7089_v21 = vrot.slane %v6998_v15, %v14985_v43  ;;  %v17427_v29 = vld [vmem:[#allocation157_spill] sm:$0xff]  ;;  %v7013_v7 = vsub.f32 %v17431_v26, %v6890_v32  ;;  %v17432_v15 = vld [vmem:[#allocation168_spill] sm:$0xff]  ;;  %v6895_v13 = vrot.slane %v15546_v17, 5 }
 0xbd5   : > { %v7956_v22 = vsel %vm7950_vm1, %v7891_v44, 0.0  ;;  %7656 = vrot.lane.b32.xlu1 %v7109_v3, %s10213_s13  ;;  %v7000_v3 = vsub.f32 %v17427_v29, %v6878_v39  ;;  %v7133_v44 = vrot.slane %v7009_v27, %v14985_v43  ;;  %v7004_v39 = vsub.f32 %v17432_v15, %v6882_v56  ;;  %v17434_v27 = vld [vmem:[#allocation139_spill] sm:$0xff]  ;;  %v17437_v56 = vld [vmem:[#allocation166_spill] sm:$0xff] }
 0xbd6   : > { %8020 = vst [vmem:[%s15199_s29 + $0x28] sm:$0xff] %v7956_v22  ;;  %v17429_v22 = vld [vmem:[#allocation172_spill] sm:$0xff]  ;;  %v7149_v61 = vrot.slane %v7013_v7, %v14985_v43  ;;  %v17438_v7 = vld [vmem:[#allocation170_spill] sm:$0xff] }
 0xbd7   : > { %v7645_v58 = vpop.permute.xlu1 %7644  ;;  %v7011_v19 = vsub.f32 %v17429_v22, %v6888_v0  ;;  %v7113_v23 = vrot.slane %v7004_v39, %v14985_v43  ;;  %v7006_v0 = vsub.f32 %v17434_v27, %v15506_v54  ;;  %v17440_v27 = vld [vmem:[#allocation167_spill] sm:$0xff] }
 0xbd8   : > { %v7893_v41 = vsel %vm719_vm0, %v7829_v40, %v7645_v58  ;;  %v7097_v40 = vrot.slane %v7000_v3, %v14985_v43  ;;  %v17430_v58 = vld [vmem:[#allocation144_spill] sm:$0xff]  ;;  %v17435_v3 = vld [vmem:[#allocation143_spill] sm:$0xff] }
 0xbd9   : > { %v7958_v16 = vsel %vm7950_vm1, %v7893_v41, 0.0  ;;  %7660 = vrot.lane.b32.xlu1 %v7117_v5, %s10213_s13  ;;  %v7002_v5 = vsub.f32 %v17430_v58, %v6880_v47  ;;  %v7141_v50 = vrot.slane %v7011_v19, %v14985_v43  ;;  %v6891_v41 = vrot.slane %v15546_v17, 1  ;;  %v17436_v19 = vld [vmem:[#allocation121_spill] sm:$0xff] }
 0xbda   : > { %8022 = vst [vmem:[%s15199_s29 + $0x38] sm:$0xff] %v7958_v16  ;;  %v17433_v16 = vld [vmem:[#allocation123_spill] sm:$0xff]  ;;  %v7121_v22 = vrot.slane %v7006_v0, %v14985_v43  ;;  %v7014_v0 = vsub.f32 %v17440_v27, %v15546_v17 }
 0xbdb   : > { %v7105_v12 = vrot.slane %v7002_v5, %v14985_v43  ;;  %v7015_v30 = vsub.f32 %v17433_v16, %v6891_v41  ;;  %v17439_v16 = vld [vmem:[#allocation31_spill] sm:$0xff] }
 0xbdd   : > { %7664 = vrot.lane.b32.xlu1 %v7125_v51, %s10213_s13  ;;  %v6893_v51 = vrot.slane %v15546_v17, 3  ;;  %v7157_v29 = vrot.slane %v7015_v30, %v14985_v43 }
 0xbde   : > { %7646 = vrot.lane.b32.xlu0 %v7089_v21, %s10213_s13  ;;  %v6885_v21 = vrot.slane %v15506_v54, 2 }
 0xbdf   : > { %v7017_v47 = vsub.f32 %v17435_v3, %v6893_v51 }
 0xbe0   : > { %v7008_v32 = vsub.f32 %v17436_v19, %v6885_v21  ;;  %v6892_v21 = vrot.slane %v15546_v17, 2  ;;  %v17441_v19 = vld [vmem:[#allocation100_spill] sm:$0xff] }
 0xbe1   : > { %7668 = vrot.lane.b32.xlu1 %v7133_v44, %s10213_s13  ;;  %v15575_v44 = vpop.xlane.xlu0 %6302  ;;  %v7165_v5 = vrot.slane %v7017_v47, %v14985_v43 }
 0xbe2   : > { %7650 = vrot.lane.b32.xlu0 %v7097_v40, %s10213_s13  ;;  %v6887_v40 = vrot.slane %v15506_v54, 4  ;;  %v6353_v58 = vrot.slane %v15575_v44, 1  ;;  %v7129_v26 = vrot.slane %v7008_v32, %v14985_v43  ;;  %v6354_v51 = vrot.slane %v15575_v44, 2 }
 0xbe3   : > { %v6356_v47 = vrot.slane %v15575_v44, 4  ;;  %v6478_v32 = vsub.f32 %v17441_v19, %v15575_v44 }
 0xbe4   : > { %v7010_v41 = vsub.f32 %v17438_v7, %v6887_v40  ;;  %v6479_v39 = vsub.f32 %v15051_v24, %v6353_v58  ;;  %v6480_v3 = vsub.f32 %v15054_v4, %v6354_v51  ;;  %v7153_v40 = vrot.slane %v7014_v0, %v14985_v43  ;;  %v17442_v58 = vld [vmem:[#allocation125_spill] sm:$0xff] }
 0xbe5   : > { %7672 = vrot.lane.b32.xlu1 %v7141_v50, %s10213_s13  ;;  %v7019_v50 = vsub.f32 %v17437_v56, %v6895_v13  ;;  %v6894_v13 = vrot.slane %v15546_v17, 4  ;;  %v6358_v56 = vrot.slane %v15575_v44, 6 }
 0xbe6   : > { %7654 = vrot.lane.b32.xlu0 %v7105_v12, %s10213_s13  ;;  %v6889_v12 = vrot.slane %v15506_v54, 6  ;;  %v6586_v7 = vmul.f32 1.442695, %v6480_v3 }
 0xbe7   : > { %v7173_v15 = vrot.slane %v7019_v50, %v14985_v43  ;;  %v17443_v50 = vld [vmem:[#allocation145_spill] sm:$0xff] }
 0xbe8   : > { %v7012_v30 = vsub.f32 %v17439_v16, %v6889_v12 }
 0xbe9   : > { %7676 = vrot.lane.b32.xlu1 %v7149_v61, %s10213_s13  ;;  %v7137_v61 = vrot.slane %v7010_v41, %v14985_v43  ;;  %v17444_v41 = vld [vmem:[#allocation96_spill] sm:$0xff] }
 0xbea   : > { %7658 = vrot.lane.b32.xlu0 %v7113_v23, %s10213_s13  ;;  %v6584_v23 = vmul.f32 1.442695, %v6479_v39  ;;  %v7145_v54 = vrot.slane %v7012_v30, %v14985_v43  ;;  %v6482_v12 = vsub.f32 %v17444_v41, %v6356_v47  ;;  %v6582_v30 = vmul.f32 1.442695, %v6478_v32  ;;  %v17448_v47 = vld [vmem:[#allocation99_spill] sm:$0xff] }
 0xbec   : > { %9928 = vpow2.f32 %v6584_v23  ;;  %v6359_v23 = vrot.slane %v15575_v44, 7 }
 0xbed   : > { %7680 = vrot.lane.b32.xlu1 %v7157_v29, %s10213_s13  ;;  %v6355_v29 = vrot.slane %v15575_v44, 3  ;;  %9930 = vpow2.f32 %v6586_v7 }
 0xbee   : > { %7662 = vrot.lane.b32.xlu0 %v7121_v22, %s10213_s13  ;;  %v6357_v22 = vrot.slane %v15575_v44, 5  ;;  %9932 = vpow2.f32 %v6582_v30 }
 0xbf1   : > { %7684 = vrot.lane.b32.xlu1 %v7165_v5, %s10213_s13  ;;  %v7016_v5 = vsub.f32 %v17442_v58, %v6892_v21  ;;  %v6590_v21 = vmul.f32 1.442695, %v6482_v12 }
 0xbf2   : > { %7666 = vrot.lane.b32.xlu0 %v7129_v26, %s10213_s13  ;;  %v6481_v26 = vsub.f32 %v17443_v50, %v6355_v29 }
 0xbf3   : > { %v7161_v51 = vrot.slane %v7016_v5, %v14985_v43 }
 0xbf4   : > { %v6588_v0 = vmul.f32 1.442695, %v6481_v26 }
 0xbf5   : > { %7688 = vrot.lane.b32.xlu1 %v7173_v15, %s10213_s13  ;;  %v17445_v15 = vld [vmem:[#allocation165_spill] sm:$0xff] }
 0xbf6   : > { %7670 = vrot.lane.b32.xlu0 %v7137_v61, %s10213_s13  ;;  %v7018_v39 = vsub.f32 %v17445_v15, %v6894_v13  ;;  %v17446_v61 = vld [vmem:[#allocation98_spill] sm:$0xff]  ;;  %v6485_v13 = vsub.f32 %v17448_v47, %v6359_v23  ;;  %9934 = vpow2.f32 %v6588_v0 }
 0xbf7   : > { %v6483_v16 = vsub.f32 %v17446_v61, %v6357_v22  ;;  %v9929_v22 = vpop.eup %9928  ;;  %9936 = vpow2.f32 %v6590_v21 }
 0xbf8   : > { %v7169_v3 = vrot.slane %v7018_v39, %v14985_v43  ;;  %v6596_v58 = vmul.f32 1.442695, %v6485_v13  ;;  %v6764_v5 = vrot.slane %v9929_v22, 7 }
 0xbf9   : > { %v6592_v29 = vmul.f32 1.442695, %v6483_v16 }
 0xbfa   : > { %7674 = vrot.lane.b32.xlu0 %v7145_v54, %s10213_s13  ;;  %v17447_v54 = vld [vmem:[#allocation178_spill] sm:$0xff] }
 0xbfb   : > { %v6484_v27 = vsub.f32 %v17447_v54, %v6358_v56  ;;  %9938 = vpow2.f32 %v6592_v29 }
 0xbfe   : > { %7678 = vrot.lane.b32.xlu0 %v7153_v40, %s10213_s13  ;;  %v6594_v40 = vmul.f32 1.442695, %v6484_v27 }
 0xc00   : > { %9940 = vpow2.f32 %v6594_v40 }
 0xc01   : > { %9942 = vpow2.f32 %v6596_v58 }
 0xc02   : > { %7682 = vrot.lane.b32.xlu0 %v7161_v51, %s10213_s13  ;;  %v9931_v51 = vpop.eup %9930 }
 0xc03   : > { %v9933_v60 = vpop.eup %9932 }
 0xc04   : > { %v9935_v55 = vpop.eup %9934 }
 0xc06   : > { %7686 = vrot.lane.b32.xlu0 %v7169_v3, %s10213_s13 }
 0xc08   : > { %v15624_v32 = vpop.xlane.xlu1 %6299 }
 0xc09   : > { %v6346_v56 = vrot.slane %v15624_v32, 1  ;;  %v6470_v26 = vsub.f32 %v15301_v31, %v15624_v32  ;;  %v6347_v7 = vrot.slane %v15624_v32, 2  ;;  %v6348_v12 = vrot.slane %v15624_v32, 3 }
 0xc0a   : > { %v6349_v15 = vrot.slane %v15624_v32, 4  ;;  %v6350_v39 = vrot.slane %v15624_v32, 5  ;;  %v6351_v16 = vrot.slane %v15624_v32, 6  ;;  %v6352_v30 = vrot.slane %v15624_v32, 7 }
 0xc0b   : > { %v6566_v23 = vmul.f32 1.442695, %v6470_v26  ;;  %v6471_v27 = vsub.f32 %v15285_v48, %v6346_v56  ;;  %v6472_v0 = vsub.f32 %v15288_v11, %v6347_v7  ;;  %v6473_v21 = vsub.f32 %v15298_v36, %v6348_v12 }
 0xc0c   : > { %v6474_v29 = vsub.f32 %v15295_v46, %v6349_v15  ;;  %v6475_v3 = vsub.f32 %v15304_v20, %v6350_v39  ;;  %v6476_v13 = vsub.f32 %v15307_v6, %v6351_v16  ;;  %v6477_v40 = vsub.f32 %v15310_v8, %v6352_v30  ;;  %v9937_v15 = vpop.eup %9936 }
 0xc0d   : > { %v6568_v22 = vmul.f32 1.442695, %v6471_v27  ;;  %v6570_v42 = vmul.f32 1.442695, %v6472_v0  ;;  %v6572_v35 = vmul.f32 1.442695, %v6473_v21  ;;  %9944 = vpow2.f32 %v6566_v23  ;;  %v9939_v1 = vpop.eup %9938 }
 0xc0e   : > { %v6574_v26 = vmul.f32 1.442695, %v6474_v29  ;;  %v6766_v56 = vrot.slane %v9931_v51, 6  ;;  %v6576_v7 = vmul.f32 1.442695, %v6475_v3  ;;  %v6765_v12 = vsel %vm6160_vm9, %v6764_v5, %v9933_v60  ;;  %v9941_v16 = vpop.eup %9940 }
 0xc0f   : > { %9946 = vpow2.f32 %v6568_v22  ;;  %v6578_v39 = vmul.f32 1.442695, %v6476_v13  ;;  %v6580_v58 = vmul.f32 1.442695, %v6477_v40  ;;  %v6768_v27 = vrot.slane %v9935_v55, 5  ;;  %v9943_v23 = vpop.eup %9942 }
 0xc10   : > { %9948 = vpow2.f32 %v6570_v42  ;;  %v6767_v30 = vsel %vm6163_vm10, %v6766_v56, %v6765_v12  ;;  %v6770_v0 = vrot.slane %v9937_v15, 4  ;;  %v6772_v5 = vrot.slane %v9939_v1, 3 }
 0xc11   : > { %9950 = vpow2.f32 %v6572_v35  ;;  %v6769_v51 = vsel %vm6166_vm11, %v6768_v27, %v6767_v30  ;;  %v6774_v56 = vrot.slane %v9941_v16, 2 }
 0xc12   : > { %9952 = vpow2.f32 %v6574_v26  ;;  %v6771_v60 = vsel %vm6169_vm12, %v6770_v0, %v6769_v51 }
 0xc13   : > { %9954 = vpow2.f32 %v6576_v7  ;;  %v6773_v40 = vsel %vm6172_vm13, %v6772_v5, %v6771_v60  ;;  %v6776_v60 = vrot.slane %v9943_v23, 1 }
 0xc14   : > { %9956 = vpow2.f32 %v6578_v39  ;;  %v6775_v1 = vsel %vm6175_vm15, %v6774_v56, %v6773_v40 }
 0xc15   : > { %9958 = vpow2.f32 %v6580_v58  ;;  %v6777_v5 = vsel %vm6178_vm14, %v6776_v60, %v6775_v1  ;;  %v17449_v1 = vld [vmem:[#allocation54_spill] sm:$0xff] }
 0xc17   : > { %v9945_v21 = vpop.eup %9944 }
 0xc19   : > { %v9947_v42 = vpop.eup %9946 }
 0xc1a   : > { %v9949_v29 = vpop.eup %9948  ;;  %v6750_v35 = vrot.slane %v9947_v42, 7 }
 0xc1b   : > { %v9951_v3 = vpop.eup %9950  ;;  %v6752_v13 = vrot.slane %v9949_v29, 6 }
 0xc1c   : > { %v9953_v22 = vpop.eup %9952  ;;  %v6751_v55 = vsel %vm6160_vm9, %v6750_v35, %v9945_v21  ;;  %v6754_v26 = vrot.slane %v9951_v3, 5  ;;  %v6829_v3 = vsel %vm5561_vm8, %v6777_v5, 0.0 }
 0xc1d   : > { %v9955_v7 = vpop.eup %9954  ;;  %v6753_v12 = vsel %vm6163_vm10, %v6752_v13, %v6751_v55  ;;  %v6756_v15 = vrot.slane %v9953_v22, 4 }
 0xc1e   : > { %v9957_v39 = vpop.eup %9956  ;;  %v6755_v58 = vsel %vm6166_vm11, %v6754_v26, %v6753_v12  ;;  %v6758_v30 = vrot.slane %v9955_v7, 3 }
 0xc1f   : > { %v9959_v27 = vpop.eup %9958  ;;  %v6757_v51 = vsel %vm6169_vm12, %v6756_v15, %v6755_v58  ;;  %v6760_v0 = vrot.slane %v9957_v39, 2 }
 0xc20   : > { %v6759_v42 = vsel %vm6172_vm13, %v6758_v30, %v6757_v51  ;;  %v6762_v21 = vrot.slane %v9959_v27, 1  ;;  %v17450_v27 = vld [vmem:[#allocation48_spill] sm:$0xff] }
 0xc21   : > { %v6761_v16 = vsel %vm6175_vm15, %v6760_v0, %v6759_v42  ;;  %v7831_v51 = vsel %vm4791_vm6, %v17450_v27, %v17449_v1 }
 0xc22   : > { %v6763_v29 = vsel %vm6178_vm14, %v6762_v21, %v6761_v16 }
 0xc23   : > { %v6826_v35 = vsel %vm5561_vm8, %v6763_v29, 0.0 }
 0xc24   : > { %6827 = vadd.xlane.f32.xlu1 %v6826_v35 }
 0xc25   : > { %6830 = vadd.xlane.f32.xlu0 %v6829_v3 }
 0xc49   : > { %v15658_v13 = vpop.xlane.xlu1 %6305 }
 0xc4a   : > { %v6360_v40 = vrot.slane %v15658_v13, 1  ;;  %v6486_v23 = vsub.f32 %v15391_v38, %v15658_v13  ;;  %v6361_v22 = vrot.slane %v15658_v13, 2  ;;  %v6362_v55 = vrot.slane %v15658_v13, 3 }
 0xc4b   : > { %v6363_v26 = vrot.slane %v15658_v13, 4  ;;  %v6364_v56 = vrot.slane %v15658_v13, 5  ;;  %v6365_v7 = vrot.slane %v15658_v13, 6  ;;  %v6366_v12 = vrot.slane %v15658_v13, 7 }
 0xc4c   : > { %v6598_v15 = vmul.f32 1.442695, %v6486_v23  ;;  %v6487_v39 = vsub.f32 %v15378_v2, %v6360_v40  ;;  %v6488_v58 = vsub.f32 %v15381_v34, %v6361_v22  ;;  %v6489_v30 = vsub.f32 %v15369_v52, %v6362_v55  ;;  %v17451_v55 = vld [vmem:[#allocation70_spill] sm:$0xff] }
 0xc4d   : > { %v7649_v0 = vpop.permute.xlu1 %7648  ;;  %v6490_v60 = vsub.f32 %v15388_v62, %v6363_v26  ;;  %v6491_v42 = vsub.f32 %v15394_v14, %v6364_v56  ;;  %v6492_v21 = vsub.f32 %v15398_v37, %v6365_v7  ;;  %v6493_v5 = vsub.f32 %v15413_v28, %v6366_v12  ;;  %v17452_v26 = vld [vmem:[#allocation52_spill] sm:$0xff] }
 0xc4e   : > { %v7895_v16 = vsel %vm719_vm0, %v7831_v51, %v7649_v0  ;;  %v6600_v29 = vmul.f32 1.442695, %v6487_v39  ;;  %v6602_v35 = vmul.f32 1.442695, %v6488_v58  ;;  %9960 = vpow2.f32 %v6598_v15  ;;  %v17453_v15 = vld [vmem:[#allocation180_spill] sm:$0xff]  ;;  %v17454_v58 = vld [vmem:[#allocation79_spill] sm:$0xff] }
 0xc4f   : > { %v7960_v3 = vsel %vm7950_vm1, %v7895_v16, 0.0  ;;  %v6604_v40 = vmul.f32 1.442695, %v6489_v30  ;;  %v6606_v23 = vmul.f32 1.442695, %v6490_v60  ;;  %v7833_v56 = vsel %vm4791_vm6, %v17452_v26, %v17451_v55  ;;  %v17455_v51 = vld [vmem:[#allocation155_spill] sm:$0xff] }
 0xc50   : > { %8024 = vst [vmem:[%s15199_s29 + $0x48] sm:$0xff] %v7960_v3  ;;  %9962 = vpow2.f32 %v6600_v29  ;;  %v6608_v22 = vmul.f32 1.442695, %v6491_v42  ;;  %v6610_v1 = vmul.f32 1.442695, %v6492_v21  ;;  %v7830_v30 = vsel %vm4791_vm6, %v17454_v58, %v17453_v15  ;;  %v17456_v0 = vld [vmem:[#allocation83_spill] sm:$0xff] }
 0xc51   : > { %v7653_v7 = vpop.permute.xlu1 %7652  ;;  %9964 = vpow2.f32 %v6602_v35  ;;  %v6612_v39 = vmul.f32 1.442695, %v6493_v5  ;;  %v7832_v60 = vsel %vm4791_vm6, %v17456_v0, %v17455_v51  ;;  %v17457_v42 = vld [vmem:[#allocation156_spill] sm:$0xff]  ;;  %v17458_v16 = vld [vmem:[#allocation101_spill] sm:$0xff]  ;;  %v17459_v21 = vld [vmem:[#allocation107_spill] sm:$0xff] }
 0xc52   : > { %v7897_v12 = vsel %vm719_vm0, %v7833_v56, %v7653_v7  ;;  %9966 = vpow2.f32 %v6604_v40  ;;  %v15696_v29 = vsel %vm4791_vm6, %v17458_v16, %v17457_v42  ;;  %v17460_v35 = vld [vmem:[#allocation58_spill] sm:$0xff]  ;;  %v17461_v3 = vld [vmem:[#allocation45_spill] sm:$0xff]  ;;  %v17462_v40 = vld [vmem:[#allocation63_spill] sm:$0xff] }
 0xc53   : > { %v7962_v27 = vsel %vm7950_vm1, %v7897_v12, 0.0  ;;  %9968 = vpow2.f32 %v6606_v23  ;;  %v7835_v5 = vsel %vm4791_vm6, %v17460_v35, %v17459_v21  ;;  %v7837_v23 = vsel %vm4791_vm6, %v17462_v40, %v17461_v3  ;;  %v17463_v55 = vld [vmem:[#allocation9_spill] sm:$0xff]  ;;  %v17464_v26 = vld [vmem:[#allocation102_spill] sm:$0xff]  ;;  %v17466_v12 = vld [vmem:[#allocation75_spill] sm:$0xff] }
 0xc54   : > { %8026 = vst [vmem:[%s15199_s29 + $0x58] sm:$0xff] %v7962_v27  ;;  %9970 = vpow2.f32 %v6608_v22  ;;  %v7839_v56 = vsel %vm4791_vm6, %v17464_v26, %v17463_v55  ;;  %v17465_v7 = vld [vmem:[#allocation85_spill] sm:$0xff] }
 0xc55   : > { %v15711_v15 = vsel %vm4791_vm6, %v17466_v12, %v17465_v7  ;;  %v15713_v58 = vpop.xlane.xlu0 %6308  ;;  %v7657_v51 = vpop.permute.xlu1 %7656  ;;  %9972 = vpow2.f32 %v6610_v1 }
 0xc56   : > { %v6367_v22 = vrot.slane %v15713_v58, 1  ;;  %v6494_v27 = vsub.f32 %v15449_v25, %v15713_v58  ;;  %v7899_v0 = vsel %vm719_vm0, %v7835_v5, %v7657_v51  ;;  %9974 = vpow2.f32 %v6612_v39 }
 0xc57   : > { %v7964_v42 = vsel %vm7950_vm1, %v7899_v0, 0.0  ;;  %v6368_v16 = vrot.slane %v15713_v58, 2  ;;  %v6369_v21 = vrot.slane %v15713_v58, 3  ;;  %v6370_v35 = vrot.slane %v15713_v58, 4 }
 0xc58   : > { %v6614_v3 = vmul.f32 1.442695, %v6494_v27  ;;  %8028 = vst [vmem:[%s15199_s29 + $0x68] sm:$0xff] %v7964_v42  ;;  %v6371_v1 = vrot.slane %v15713_v58, 5  ;;  %v6372_v40 = vrot.slane %v15713_v58, 6  ;;  %v6373_v55 = vrot.slane %v15713_v58, 7  ;;  %v9961_v26 = vpop.eup %9960 }
 0xc59   : > { %v7647_v7 = vpop.permute.xlu0 %7646  ;;  %v7661_v5 = vpop.permute.xlu1 %7660  ;;  %v6495_v39 = vsub.f32 %v15425_v10, %v6367_v22  ;;  %v6496_v12 = vsub.f32 %v15430_v53, %v6368_v16  ;;  %v6497_v51 = vsub.f32 %v15434_v49, %v6369_v21  ;;  %v6498_v27 = vsub.f32 %v15441_v57, %v6370_v35 }
 0xc5a   : > { %v9963_v0 = vpop.eup %9962  ;;  %9976 = vpow2.f32 %v6614_v3  ;;  %v7894_v42 = vsel %vm719_vm0, %v7830_v30, %v7647_v7  ;;  %v7901_v33 = vsel %vm719_vm0, %v7837_v23, %v7661_v5  ;;  %v6499_v9 = vsub.f32 %v15446_v59, %v6371_v1 }
 0xc5b   : > { %v9965_v18 = vpop.eup %9964  ;;  %v7959_v25 = vsel %vm7950_vm1, %v7894_v42, 0.0  ;;  %v7966_v22 = vsel %vm7950_vm1, %v7901_v33, 0.0  ;;  %v6778_v10 = vrot.slane %v9963_v0, 7  ;;  %v6500_v16 = vsub.f32 %v15456_v63, %v6372_v40 }
 0xc5c   : > { %v9967_v53 = vpop.eup %9966  ;;  %8023 = vst [vmem:[%s15199_s29 + $0x40] sm:$0xff] %v7959_v25  ;;  %8030 = vst [vmem:[%s15199_s29 + $0x78] sm:$0xff] %v7966_v22  ;;  %v6780_v21 = vrot.slane %v9965_v18, 6  ;;  %v6501_v35 = vsub.f32 %v15460_v45, %v6373_v55  ;;  %v6616_v3 = vmul.f32 1.442695, %v6495_v39 }
 0xc5d   : > { %v6618_v30 = vmul.f32 1.442695, %v6496_v12  ;;  %v9969_v7 = vpop.eup %9968  ;;  %v7651_v23 = vpop.permute.xlu0 %7650  ;;  %v6779_v1 = vsel %vm6160_vm9, %v6778_v10, %v9961_v26  ;;  %v6782_v42 = vrot.slane %v9967_v53, 5  ;;  %v6620_v33 = vmul.f32 1.442695, %v6497_v51 }
 0xc5e   : > { %v7665_v5 = vpop.permute.xlu1 %7664  ;;  %v6622_v0 = vmul.f32 1.442695, %v6498_v27  ;;  %v9971_v59 = vpop.eup %9970  ;;  %v7896_v40 = vsel %vm719_vm0, %v7832_v60, %v7651_v23  ;;  %v6781_v18 = vsel %vm6163_vm10, %v6780_v21, %v6779_v1  ;;  %v6784_v55 = vrot.slane %v9969_v7, 4 }
 0xc5f   : > { %v7903_v25 = vsel %vm719_vm0, %v7839_v56, %v7665_v5  ;;  %v9973_v39 = vpop.eup %9972  ;;  %v7961_v12 = vsel %vm7950_vm1, %v7896_v40, 0.0  ;;  %v6783_v45 = vsel %vm6166_vm11, %v6782_v42, %v6781_v18  ;;  %v6786_v10 = vrot.slane %v9971_v59, 3  ;;  %v17469_v40 = vld [vmem:[#allocation17_spill] sm:$0xff] }
 0xc60   : > { %v7968_v22 = vsel %vm7950_vm1, %v7903_v25, 0.0  ;;  %v9975_v26 = vpop.eup %9974  ;;  %8025 = vst [vmem:[%s15199_s29 + $0x50] sm:$0xff] %v7961_v12  ;;  %v6785_v53 = vsel %vm6169_vm12, %v6784_v55, %v6783_v45  ;;  %v6788_v51 = vrot.slane %v9973_v39, 2  ;;  %9978 = vpow2.f32 %v6616_v3  ;;  %v17470_v25 = vld [vmem:[#allocation106_spill] sm:$0xff] }
 0xc61   : > { %8032 = vst [vmem:[%s15199_s29 + $0x88] sm:$0xff] %v7968_v22  ;;  %v6624_v60 = vmul.f32 1.442695, %v6499_v9  ;;  %v7655_v56 = vpop.permute.xlu0 %7654  ;;  %v6787_v21 = vsel %vm6172_vm13, %v6786_v10, %v6785_v53  ;;  %v6790_v7 = vrot.slane %v9975_v26, 1  ;;  %9980 = vpow2.f32 %v6618_v30  ;;  %v17468_v30 = vld [vmem:[#allocation61_spill] sm:$0xff]  ;;  %v17471_v10 = vld [vmem:[#allocation162_spill] sm:$0xff] }
 0xc62   : > { %v7669_v27 = vpop.permute.xlu1 %7668  ;;  %v6626_v23 = vmul.f32 1.442695, %v6500_v16  ;;  %v7898_v59 = vsel %vm719_vm0, %v15696_v29, %v7655_v56  ;;  %v6789_v45 = vsel %vm6175_vm15, %v6788_v51, %v6787_v21  ;;  %9982 = vpow2.f32 %v6620_v33  ;;  %v17472_v26 = vld [vmem:[#allocation64_spill] sm:$0xff]  ;;  %v17473_v51 = vld [vmem:[#allocation47_spill] sm:$0xff] }
 0xc63   : > { %v7905_v5 = vsel %vm719_vm0, %v15711_v15, %v7669_v27  ;;  %v7963_v9 = vsel %vm7950_vm1, %v7898_v59, 0.0  ;;  %v6791_v1 = vsel %vm6178_vm14, %v6790_v7, %v6789_v45  ;;  %9984 = vpow2.f32 %v6622_v0  ;;  %v17467_v15 = vld [vmem:[#allocation140_spill] sm:$0xff] }
 0xc64   : > { %v7970_v3 = vsel %vm7950_vm1, %v7905_v5, 0.0  ;;  %v9977_v42 = vpop.eup %9976  ;;  %8027 = vst [vmem:[%s15199_s29 + $0x60] sm:$0xff] %v7963_v9  ;;  %v6832_v29 = vsel %vm5561_vm8, %v6791_v1, 0.0  ;;  %9986 = vpow2.f32 %v6624_v60  ;;  %v6628_v16 = vmul.f32 1.442695, %v6501_v35  ;;  %v17474_v60 = vld [vmem:[#allocation8_spill] sm:$0xff] }
 0xc65   : > { %8034 = vst [vmem:[%s15199_s29 + $0x98] sm:$0xff] %v7970_v3  ;;  %v7836_v33 = vsel %vm4791_vm6, %v17468_v30, %v17467_v15  ;;  %v7843_v18 = vsel %vm4791_vm6, %v17470_v25, %v17469_v40  ;;  %v7659_v55 = vpop.permute.xlu0 %7658  ;;  %6833 = vadd.xlane.f32.xlu1 %v6832_v29  ;;  %9988 = vpow2.f32 %v6626_v23  ;;  %v7838_v53 = vsel %vm4791_vm6, %v17472_v26, %v17471_v10  ;;  %v17475_v30 = vld [vmem:[#allocation56_spill] sm:$0xff]  ;;  %v17477_v25 = vld [vmem:[#allocation50_spill] sm:$0xff] }
 0xc66   : > { %v7673_v0 = vpop.permute.xlu1 %7672  ;;  %v7900_v39 = vsel %vm719_vm0, %v7836_v33, %v7659_v55  ;;  %9990 = vpow2.f32 %v6628_v16  ;;  %v7845_v56 = vsel %vm4791_vm6, %v17474_v60, %v17473_v51  ;;  %v6897_v16 = vrot.slane %v15546_v17, 7  ;;  %v17476_v33 = vld [vmem:[#allocation71_spill] sm:$0xff] }
 0xc67   : > { %v7907_v12 = vsel %vm719_vm0, %v7843_v18, %v7673_v0  ;;  %v7965_v22 = vsel %vm7950_vm1, %v7900_v39, 0.0  ;;  %v7840_v40 = vsel %vm4791_vm6, %v17476_v33, %v17475_v30  ;;  %v17478_v18 = vld [vmem:[#allocation10_spill] sm:$0xff] }
 0xc68   : > { %v7972_v35 = vsel %vm7950_vm1, %v7907_v12, 0.0  ;;  %8029 = vst [vmem:[%s15199_s29 + $0x70] sm:$0xff] %v7965_v22  ;;  %v7847_v55 = vsel %vm4791_vm6, %v17478_v18, %v17477_v25 }
 0xc69   : > { %8036 = vst [vmem:[%s15199_s29 + $0xa8] sm:$0xff] %v7972_v35  ;;  %v7663_v27 = vpop.permute.xlu0 %7662 }
 0xc6a   : > { %v7677_v21 = vpop.permute.xlu1 %7676  ;;  %v9979_v7 = vpop.eup %9978  ;;  %v7902_v23 = vsel %vm719_vm0, %v7838_v53, %v7663_v27 }
 0xc6b   : > { %v7909_v59 = vsel %vm719_vm0, %v7845_v56, %v7677_v21  ;;  %v9981_v5 = vpop.eup %9980  ;;  %v7967_v45 = vsel %vm7950_vm1, %v7902_v23, 0.0  ;;  %v6792_v3 = vrot.slane %v9979_v7, 7 }
 0xc6c   : > { %v7974_v9 = vsel %vm7950_vm1, %v7909_v59, 0.0  ;;  %v9983_v1 = vpop.eup %9982  ;;  %8031 = vst [vmem:[%s15199_s29 + $0x80] sm:$0xff] %v7967_v45  ;;  %v6794_v29 = vrot.slane %v9981_v5, 6  ;;  %v17479_v5 = vld [vmem:[#allocation37_spill] sm:$0xff] }
 0xc6d   : > { %8038 = vst [vmem:[%s15199_s29 + $0xb8] sm:$0xff] %v7974_v9  ;;  %v9985_v15 = vpop.eup %9984  ;;  %v7667_v0 = vpop.permute.xlu0 %7666  ;;  %v6793_v12 = vsel %vm6160_vm9, %v6792_v3, %v9977_v42  ;;  %v6796_v22 = vrot.slane %v9983_v1, 5  ;;  %v7021_v45 = vsub.f32 %v17479_v5, %v6897_v16  ;;  %v17480_v9 = vld [vmem:[#allocation136_spill] sm:$0xff] }
 0xc6e   : > { %v7681_v39 = vpop.permute.xlu1 %7680  ;;  %v9987_v35 = vpop.eup %9986  ;;  %v7904_v10 = vsel %vm719_vm0, %v7840_v40, %v7667_v0  ;;  %v6795_v53 = vsel %vm6163_vm10, %v6794_v29, %v6793_v12  ;;  %v6798_v51 = vrot.slane %v9985_v15, 4  ;;  %v17481_v3 = vld [vmem:[#allocation104_spill] sm:$0xff]  ;;  %v17482_v29 = vld [vmem:[#allocation57_spill] sm:$0xff] }
 0xc6f   : > { %v7911_v26 = vsel %vm719_vm0, %v7847_v55, %v7681_v39  ;;  %v9989_v60 = vpop.eup %9988  ;;  %v7969_v56 = vsel %vm7950_vm1, %v7904_v10, 0.0  ;;  %v6797_v21 = vsel %vm6166_vm11, %v6796_v22, %v6795_v53  ;;  %v6800_v7 = vrot.slane %v9987_v35, 3  ;;  %v17483_v15 = vld [vmem:[#allocation12_spill] sm:$0xff] }
 0xc70   : > { %v7976_v27 = vsel %vm7950_vm1, %v7911_v26, 0.0  ;;  %v9991_v23 = vpop.eup %9990  ;;  %8033 = vst [vmem:[%s15199_s29 + $0x90] sm:$0xff] %v7969_v56  ;;  %v6799_v42 = vsel %vm6169_vm12, %v6798_v51, %v6797_v21  ;;  %v6802_v59 = vrot.slane %v9989_v60, 2  ;;  %v7842_v1 = vsel %vm4791_vm6, %v17481_v3, %v17480_v9  ;;  %v17484_v26 = vld [vmem:[#allocation86_spill] sm:$0xff]  ;;  %v17485_v53 = vld [vmem:[#allocation108_spill] sm:$0xff]  ;;  %v17489_v9 = vld [vmem:[#allocation11_spill] sm:$0xff] }
 0xc71   : > { %8040 = vst [vmem:[%s15199_s29 + $0xc8] sm:$0xff] %v7976_v27  ;;  %v7849_v30 = vsel %vm4791_vm6, %v17483_v15, %v17482_v29  ;;  %v6801_v33 = vsel %vm6172_vm13, %v6800_v7, %v6799_v42  ;;  %v6804_v40 = vrot.slane %v9991_v23, 1  ;;  %v7671_v25 = vpop.permute.xlu0 %7670  ;;  %v7181_v10 = vrot.slane %v7021_v45, %v14985_v43  ;;  %v17486_v60 = vld [vmem:[#allocation68_spill] sm:$0xff]  ;;  %v17487_v56 = vld [vmem:[#allocation14_spill] sm:$0xff] }
 0xc72   : > { %v7685_v18 = vpop.permute.xlu1 %7684  ;;  %v6803_v55 = vsel %vm6175_vm15, %v6802_v59, %v6801_v33  ;;  %v7906_v0 = vsel %vm719_vm0, %v7842_v1, %v7671_v25  ;;  %v7844_v51 = vsel %vm4791_vm6, %v17485_v53, %v17484_v26  ;;  %v7851_v27 = vsel %vm4791_vm6, %v17487_v56, %v17486_v60  ;;  %v17488_v45 = vld [vmem:[#allocation60_spill] sm:$0xff]  ;;  %v17491_v33 = vld [vmem:[#allocation13_spill] sm:$0xff] }
 0xc73   : > { %v7913_v39 = vsel %vm719_vm0, %v7849_v30, %v7685_v18  ;;  %v6805_v16 = vsel %vm6178_vm14, %v6804_v40, %v6803_v55  ;;  %v7971_v12 = vsel %vm7950_vm1, %v7906_v0, 0.0  ;;  %v7846_v3 = vsel %vm4791_vm6, %v17489_v9, %v17488_v45  ;;  %v17490_v30 = vld [vmem:[#allocation103_spill] sm:$0xff]  ;;  %v17492_v0 = vld [vmem:[#allocation44_spill] sm:$0xff]  ;;  %v17494_v26 = vld [vmem:[#allocation33_spill] sm:$0xff] }
 0xc74   : > { %v7978_v22 = vsel %vm7950_vm1, %v7913_v39, 0.0  ;;  %v6835_v35 = vsel %vm5561_vm8, %v6805_v16, 0.0  ;;  %8035 = vst [vmem:[%s15199_s29 + $0xa0] sm:$0xff] %v7971_v12  ;;  %v7848_v40 = vsel %vm4791_vm6, %v17491_v33, %v17490_v30  ;;  %v17493_v39 = vld [vmem:[#allocation15_spill] sm:$0xff] }
 0xc75   : > { %8042 = vst [vmem:[%s15199_s29 + $0xd8] sm:$0xff] %v7978_v22  ;;  %6836 = vadd.xlane.f32.xlu0 %v6835_v35  ;;  %v7675_v21 = vpop.permute.xlu0 %7674  ;;  %v7850_v16 = vsel %vm4791_vm6, %v17493_v39, %v17492_v0  ;;  %v6896_v22 = vrot.slane %v15546_v17, 6 }
 0xc76   : > { %v7689_v7 = vpop.permute.xlu1 %7688  ;;  %v7908_v23 = vsel %vm719_vm0, %v7844_v51, %v7675_v21  ;;  %7692 = vrot.lane.b32.xlu1 %v7181_v10, %s10213_s13 }
 0xc77   : > { %v7915_v42 = vsel %vm719_vm0, %v7851_v27, %v7689_v7  ;;  %v7973_v59 = vsel %vm7950_vm1, %v7908_v23, 0.0  ;;  %v7020_v53 = vsub.f32 %v17494_v26, %v6896_v22 }
 0xc78   : > { %v7980_v5 = vsel %vm7950_vm1, %v7915_v42, 0.0  ;;  %8037 = vst [vmem:[%s15199_s29 + $0xb0] sm:$0xff] %v7973_v59 }
 0xc79   : > { %8044 = vst [vmem:[%s15199_s29 + $0xe8] sm:$0xff] %v7980_v5  ;;  %v7679_v1 = vpop.permute.xlu0 %7678  ;;  %v7177_v51 = vrot.slane %v7020_v53, %v14985_v43 }
 0xc7a   : > { %v7910_v29 = vsel %vm719_vm0, %v7846_v3, %v7679_v1 }
 0xc7b   : > { %v7975_v15 = vsel %vm7950_vm1, %v7910_v29, 0.0 }
 0xc7c   : > { %8039 = vst [vmem:[%s15199_s29 + $0xc0] sm:$0xff] %v7975_v15 }
 0xc7d   : > { %v7683_v25 = vpop.permute.xlu0 %7682 }
 0xc7e   : > { %v7912_v18 = vsel %vm719_vm0, %v7848_v40, %v7683_v25 }
 0xc7f   : > { %v7977_v55 = vsel %vm7950_vm1, %v7912_v18, 0.0 }
 0xc80   : > { %8041 = vst [vmem:[%s15199_s29 + $0xd0] sm:$0xff] %v7977_v55 }
 0xc81   : > { %v7687_v12 = vpop.permute.xlu0 %7686 }
 0xc82   : > { %v7914_v35 = vsel %vm719_vm0, %v7850_v16, %v7687_v12 }
 0xc83   : > { %v7979_v10 = vsel %vm7950_vm1, %v7914_v35, 0.0 }
 0xc84   : > { %8043 = vst [vmem:[%s15199_s29 + $0xe0] sm:$0xff] %v7979_v10 }
 0xc8b   : > { %7690 = vrot.lane.b32.xlu0 %v7177_v51, %s10213_s13 }
 0xcb1   : > { %v6828_v60 = vpop.xlane.xlu1 %6827 }
 0xcb2   : > { %9992 = vlog2.f32 %v6828_v60  ;;  %v6831_v56 = vpop.xlane.xlu0 %6830 }
 0xcb3   : > { %9994 = vlog2.f32 %v6831_v56 }
 0xcbc   : > { %v9993_v27 = vpop.eup %9992 }
 0xcbd   : > { %v6847_v21 = vmul.f32 0.6931472, %v9993_v27  ;;  %v9995_v5 = vpop.eup %9994 }
 0xcbe   : > { %v6849_v29 = vmul.f32 0.6931472, %v9995_v5 }
 0xcbf   : > { %v6858_v7 = vadd.f32 %v6847_v21, %v15624_v32 }
 0xcc1   : > { %v7022_v17 = vsub.f32 %v15301_v31, %v6858_v7  ;;  %v6898_v23 = vrot.slane %v6858_v7, 1  ;;  %v6899_v42 = vrot.slane %v6858_v7, 2  ;;  %v6900_v59 = vrot.slane %v6858_v7, 3 }
 0xcc2   : > { %v6901_v1 = vrot.slane %v6858_v7, 4  ;;  %v6902_v30 = vrot.slane %v6858_v7, 5  ;;  %v6903_v40 = vrot.slane %v6858_v7, 6  ;;  %v6904_v18 = vrot.slane %v6858_v7, 7 }
 0xcc3   : > { %v7185_v45 = vrot.slane %v7022_v17, %v14985_v43  ;;  %v7023_v9 = vsub.f32 %v15285_v48, %v6898_v23  ;;  %v7024_v3 = vsub.f32 %v15288_v11, %v6899_v42  ;;  %v7025_v32 = vsub.f32 %v15298_v36, %v6900_v59  ;;  %v17495_v42 = vld [vmem:[#allocation109_spill] sm:$0xff] }
 0xcc4   : > { %v7026_v33 = vsub.f32 %v15295_v46, %v6901_v1  ;;  %v6859_v48 = vadd.f32 %v6849_v29, %v15575_v44  ;;  %v7027_v25 = vsub.f32 %v15304_v20, %v6902_v30  ;;  %v7028_v55 = vsub.f32 %v15307_v6, %v6903_v40 }
 0xcc5   : > { %7694 = vrot.lane.b32.xlu0 %v7185_v45, %s10213_s13  ;;  %v7189_v15 = vrot.slane %v7023_v9, %v14985_v43  ;;  %v7193_v31 = vrot.slane %v7024_v3, %v14985_v43  ;;  %v7197_v11 = vrot.slane %v7025_v32, %v14985_v43  ;;  %v7029_v0 = vsub.f32 %v15310_v8, %v6904_v18  ;;  %v17498_v18 = vld [vmem:[#allocation89_spill] sm:$0xff] }
 0xcc6   : > { %v7201_v36 = vrot.slane %v7026_v33, %v14985_v43  ;;  %v7205_v46 = vrot.slane %v7027_v25, %v14985_v43  ;;  %v6905_v44 = vrot.slane %v6859_v48, 1  ;;  %v7209_v39 = vrot.slane %v7028_v55, %v14985_v43  ;;  %v17497_v25 = vld [vmem:[#allocation32_spill] sm:$0xff] }
 0xcc7   : > { %7696 = vrot.lane.b32.xlu1 %v7189_v15, %s10213_s13  ;;  %v7030_v20 = vsub.f32 %v17441_v19, %v6859_v48  ;;  %v6906_v16 = vrot.slane %v6859_v48, 2  ;;  %v7213_v12 = vrot.slane %v7029_v0, %v14985_v43  ;;  %v6907_v22 = vrot.slane %v6859_v48, 3 }
 0xcc8   : > { %v7031_v6 = vsub.f32 %v15051_v24, %v6905_v44  ;;  %v6908_v10 = vrot.slane %v6859_v48, 4  ;;  %v6909_v53 = vrot.slane %v6859_v48, 5  ;;  %v6910_v60 = vrot.slane %v6859_v48, 6 }
 0xcc9   : > { %7698 = vrot.lane.b32.xlu0 %v7193_v31, %s10213_s13  ;;  %v7217_v35 = vrot.slane %v7030_v20, %v14985_v43  ;;  %v7032_v8 = vsub.f32 %v15054_v4, %v6906_v16  ;;  %v7033_v19 = vsub.f32 %v17443_v50, %v6907_v22  ;;  %v6911_v27 = vrot.slane %v6859_v48, 7 }
 0xcca   : > { %v7221_v26 = vrot.slane %v7031_v6, %v14985_v43  ;;  %v7034_v24 = vsub.f32 %v17444_v41, %v6908_v10  ;;  %v7035_v4 = vsub.f32 %v17446_v61, %v6909_v53  ;;  %v7036_v50 = vsub.f32 %v17447_v54, %v6910_v60  ;;  %v17496_v54 = vld [vmem:[#allocation20_spill] sm:$0xff] }
 0xccb   : > { %7700 = vrot.lane.b32.xlu1 %v7197_v11, %s10213_s13  ;;  %v7225_v51 = vrot.slane %v7032_v8, %v14985_v43  ;;  %v7229_v56 = vrot.slane %v7033_v19, %v14985_v43  ;;  %v7037_v41 = vsub.f32 %v17448_v47, %v6911_v27  ;;  %v7853_v59 = vsel %vm4791_vm6, %v17496_v54, %v17495_v42  ;;  %v17499_v19 = vld [vmem:[#allocation38_spill] sm:$0xff]  ;;  %v17500_v60 = vld [vmem:[#allocation24_spill] sm:$0xff]  ;;  %v17502_v42 = vld [vmem:[#allocation129_spill] sm:$0xff] }
 0xccc   : > { %v7233_v21 = vrot.slane %v7034_v24, %v14985_v43  ;;  %v7237_v7 = vrot.slane %v7035_v4, %v14985_v43  ;;  %v7241_v17 = vrot.slane %v7036_v50, %v14985_v43 }
 0xccd   : > { %7702 = vrot.lane.b32.xlu0 %v7201_v36, %s10213_s13  ;;  %v7245_v61 = vrot.slane %v7037_v41, %v14985_v43  ;;  %v7852_v36 = vsel %vm4791_vm6, %v17498_v18, %v17497_v25  ;;  %v17509_v25 = vld [vmem:[#allocation117_spill] sm:$0xff] }
 0xccf   : > { %7704 = vrot.lane.b32.xlu1 %v7205_v46, %s10213_s13 }
 0xcd1   : > { %7706 = vrot.lane.b32.xlu0 %v7209_v39, %s10213_s13 }
 0xcd3   : > { %7708 = vrot.lane.b32.xlu1 %v7213_v12, %s10213_s13 }
 0xcd5   : > { %7710 = vrot.lane.b32.xlu0 %v7217_v35, %s10213_s13 }
 0xcd7   : > { %7712 = vrot.lane.b32.xlu1 %v7221_v26, %s10213_s13 }
 0xcd9   : > { %7714 = vrot.lane.b32.xlu0 %v7225_v51, %s10213_s13 }
 0xcdb   : > { %7716 = vrot.lane.b32.xlu1 %v7229_v56, %s10213_s13 }
 0xcdd   : > { %7718 = vrot.lane.b32.xlu0 %v7233_v21, %s10213_s13 }
 0xcdf   : > { %7720 = vrot.lane.b32.xlu1 %v7237_v7, %s10213_s13 }
 0xce1   : > { %7722 = vrot.lane.b32.xlu0 %v7241_v17, %s10213_s13 }
 0xce3   : > { %7724 = vrot.lane.b32.xlu1 %v7245_v61, %s10213_s13 }
 0xcf2   : > { %v6834_v23 = vpop.xlane.xlu1 %6833 }
 0xcf3   : > { %9996 = vlog2.f32 %v6834_v23 }
 0xcf6   : > { %v7693_v5 = vpop.permute.xlu1 %7692 }
 0xcf7   : > { %v7917_v45 = vsel %vm719_vm0, %v7853_v59, %v7693_v5 }
 0xcf8   : > { %v7982_v47 = vsel %vm7950_vm1, %v7917_v45, 0.0 }
 0xcf9   : > { %8046 = vst [vmem:[%s15199_s29 + $0xf8] sm:$0xff] %v7982_v47 }
 0xcfd   : > { %v9997_v9 = vpop.eup %9996 }
 0xcfe   : > { %v6851_v3 = vmul.f32 0.6931472, %v9997_v9 }
 0xd00   : > { %v6860_v1 = vadd.f32 %v6851_v3, %v15658_v13 }
 0xd02   : > { %v6837_v29 = vpop.xlane.xlu0 %6836  ;;  %v7038_v15 = vsub.f32 %v15391_v38, %v6860_v1  ;;  %v6912_v32 = vrot.slane %v6860_v1, 1  ;;  %v6913_v30 = vrot.slane %v6860_v1, 2  ;;  %v6914_v31 = vrot.slane %v6860_v1, 3 }
 0xd03   : > { %9998 = vlog2.f32 %v6837_v29  ;;  %v6915_v11 = vrot.slane %v6860_v1, 4  ;;  %v6916_v46 = vrot.slane %v6860_v1, 5  ;;  %v6917_v39 = vrot.slane %v6860_v1, 6  ;;  %v17505_v29 = vld [vmem:[#allocation34_spill] sm:$0xff] }
 0xd04   : > { %v7249_v33 = vrot.slane %v7038_v15, %v14985_v43  ;;  %v7039_v40 = vsub.f32 %v15378_v2, %v6912_v32  ;;  %v7040_v48 = vsub.f32 %v15381_v34, %v6913_v30  ;;  %v7041_v55 = vsub.f32 %v15369_v52, %v6914_v31  ;;  %v17506_v30 = vld [vmem:[#allocation82_spill] sm:$0xff] }
 0xd05   : > { %v7042_v2 = vsub.f32 %v15388_v62, %v6915_v11  ;;  %v6918_v20 = vrot.slane %v6860_v1, 7  ;;  %v7043_v52 = vsub.f32 %v15394_v14, %v6916_v46  ;;  %v7044_v6 = vsub.f32 %v15398_v37, %v6917_v39  ;;  %v17504_v1 = vld [vmem:[#allocation80_spill] sm:$0xff]  ;;  %v17507_v31 = vld [vmem:[#allocation114_spill] sm:$0xff]  ;;  %v17512_v39 = vld [vmem:[#allocation87_spill] sm:$0xff] }
 0xd06   : > { %v7691_v13 = vpop.permute.xlu0 %7690  ;;  %7726 = vrot.lane.b32.xlu0 %v7249_v33, %s10213_s13  ;;  %v7253_v38 = vrot.slane %v7039_v40, %v14985_v43  ;;  %v7257_v34 = vrot.slane %v7040_v48, %v14985_v43  ;;  %v7261_v16 = vrot.slane %v7041_v55, %v14985_v43  ;;  %v7855_v33 = vsel %vm4791_vm6, %v17507_v31, %v17506_v30  ;;  %v17508_v11 = vld [vmem:[#allocation90_spill] sm:$0xff]  ;;  %v17510_v55 = vld [vmem:[#allocation88_spill] sm:$0xff] }
 0xd07   : > { %v7916_v0 = vsel %vm719_vm0, %v7852_v36, %v7691_v13  ;;  %v7265_v12 = vrot.slane %v7042_v2, %v14985_v43  ;;  %v7045_v35 = vsub.f32 %v15413_v28, %v6918_v20  ;;  %v7269_v62 = vrot.slane %v7043_v52, %v14985_v43  ;;  %v17511_v46 = vld [vmem:[#allocation116_spill] sm:$0xff]  ;;  %v17513_v20 = vld [vmem:[#allocation115_spill] sm:$0xff] }
 0xd08   : > { %v7981_v44 = vsel %vm7950_vm1, %v7916_v0, 0.0  ;;  %7728 = vrot.lane.b32.xlu1 %v7253_v38, %s10213_s13  ;;  %v7273_v14 = vrot.slane %v7044_v6, %v14985_v43  ;;  %v7856_v18 = vsel %vm4791_vm6, %v17509_v25, %v17508_v11  ;;  %v7857_v0 = vsel %vm4791_vm6, %v17511_v46, %v17510_v55 }
 0xd09   : > { %8045 = vst [vmem:[%s15199_s29 + $0xf0] sm:$0xff] %v7981_v44  ;;  %v7277_v26 = vrot.slane %v7045_v35, %v14985_v43  ;;  %v17515_v35 = vld [vmem:[#allocation177_spill] sm:$0xff] }
 0xd0a   : > { %7730 = vrot.lane.b32.xlu0 %v7257_v34, %s10213_s13 }
 0xd0c   : > { %7732 = vrot.lane.b32.xlu1 %v7261_v16, %s10213_s13  ;;  %v7858_v16 = vsel %vm4791_vm6, %v17513_v20, %v17512_v39 }
 0xd0d   : > { %v9999_v22 = vpop.eup %9998 }
 0xd0e   : > { %v6853_v8 = vmul.f32 0.6931472, %v9999_v22  ;;  %7734 = vrot.lane.b32.xlu0 %v7265_v12, %s10213_s13  ;;  %v17514_v22 = vld [vmem:[#allocation91_spill] sm:$0xff] }
 0xd10   : > { %v6861_v10 = vadd.f32 %v6853_v8, %v15713_v58  ;;  %7736 = vrot.lane.b32.xlu1 %v7269_v62, %s10213_s13  ;;  %v17501_v58 = vld [vmem:[#allocation19_spill] sm:$0xff]  ;;  %v7859_v8 = vsel %vm4791_vm6, %v17515_v35, %v17514_v22 }
 0xd12   : > { %7738 = vrot.lane.b32.xlu0 %v7273_v14, %s10213_s13  ;;  %v7046_v37 = vsub.f32 %v17499_v19, %v6861_v10  ;;  %v6919_v53 = vrot.slane %v6861_v10, 1  ;;  %v6920_v51 = vrot.slane %v6861_v10, 2  ;;  %v6921_v28 = vrot.slane %v6861_v10, 3  ;;  %v17517_v19 = vld [vmem:[#allocation149_spill] sm:$0xff] }
 0xd13   : > { %v6922_v27 = vrot.slane %v6861_v10, 4  ;;  %v6923_v7 = vrot.slane %v6861_v10, 5  ;;  %v6924_v61 = vrot.slane %v6861_v10, 6  ;;  %v6925_v59 = vrot.slane %v6861_v10, 7 }
 0xd14   : > { %7740 = vrot.lane.b32.xlu1 %v7277_v26, %s10213_s13  ;;  %v7281_v24 = vrot.slane %v7046_v37, %v14985_v43  ;;  %v7047_v56 = vsub.f32 %v17500_v60, %v6919_v53  ;;  %v7048_v4 = vsub.f32 %v17501_v58, %v6920_v51  ;;  %v7049_v50 = vsub.f32 %v15434_v49, %v6921_v28  ;;  %v17516_v26 = vld [vmem:[#allocation67_spill] sm:$0xff]  ;;  %v17519_v60 = vld [vmem:[#allocation173_spill] sm:$0xff] }
 0xd15   : > { %v7050_v17 = vsub.f32 %v15441_v57, %v6922_v27  ;;  %v7051_v54 = vsub.f32 %v17502_v42, %v6923_v7  ;;  %v7052_v49 = vsub.f32 %v15456_v63, %v6924_v61  ;;  %v17503_v57 = vld [vmem:[#allocation185_spill] sm:$0xff]  ;;  %v7854_v63 = vsel %vm4791_vm6, %v17505_v29, %v17504_v1  ;;  %v17526_v29 = vld [vmem:[#allocation95_spill] sm:$0xff] }
 0xd16   : > { %7742 = vrot.lane.b32.xlu0 %v7281_v24, %s10213_s13  ;;  %v7285_v21 = vrot.slane %v7047_v56, %v14985_v43  ;;  %v7289_v41 = vrot.slane %v7048_v4, %v14985_v43  ;;  %v7293_v23 = vrot.slane %v7049_v50, %v14985_v43  ;;  %v7053_v47 = vsub.f32 %v17503_v57, %v6925_v59  ;;  %v17518_v24 = vld [vmem:[#allocation40_spill] sm:$0xff]  ;;  %v17521_v50 = vld [vmem:[#allocation174_spill] sm:$0xff]  ;;  %v17523_v42 = vld [vmem:[#allocation133_spill] sm:$0xff] }
 0xd17   : > { %v7297_v5 = vrot.slane %v7050_v17, %v14985_v43  ;;  %v7301_v45 = vrot.slane %v7051_v54, %v14985_v43  ;;  %v7305_v9 = vrot.slane %v7052_v49, %v14985_v43  ;;  %v7860_v37 = vsel %vm4791_vm6, %v17517_v19, %v17516_v26  ;;  %v17525_v57 = vld [vmem:[#allocation175_spill] sm:$0xff] }
 0xd18   : > { %7744 = vrot.lane.b32.xlu1 %v7285_v21, %s10213_s13  ;;  %v7309_v3 = vrot.slane %v7053_v47, %v14985_v43  ;;  %v7861_v56 = vsel %vm4791_vm6, %v17519_v60, %v17518_v24  ;;  %v17520_v21 = vld [vmem:[#allocation105_spill] sm:$0xff] }
 0xd19   : > { %v7862_v7 = vsel %vm4791_vm6, %v17521_v50, %v17520_v21 }
 0xd1a   : > { %7746 = vrot.lane.b32.xlu0 %v7289_v41, %s10213_s13 }
 0xd1c   : > { %7748 = vrot.lane.b32.xlu1 %v7293_v23, %s10213_s13  ;;  %v17522_v23 = vld [vmem:[#allocation135_spill] sm:$0xff] }
 0xd1d   : > { %v7863_v54 = vsel %vm4791_vm6, %v17523_v42, %v17522_v23 }
 0xd1e   : > { %7750 = vrot.lane.b32.xlu0 %v7297_v5, %s10213_s13 }
 0xd20   : > { %7752 = vrot.lane.b32.xlu1 %v7301_v45, %s10213_s13  ;;  %v17524_v45 = vld [vmem:[#allocation78_spill] sm:$0xff] }
 0xd21   : > { %v7864_v47 = vsel %vm4791_vm6, %v17525_v57, %v17524_v45 }
 0xd22   : > { %7754 = vrot.lane.b32.xlu0 %v7305_v9, %s10213_s13 }
 0xd24   : > { %7756 = vrot.lane.b32.xlu1 %v7309_v3, %s10213_s13  ;;  %s8438_s13 = sshll.u32 %s10272_s25, 13  ;;  %s16147_s25 = scalar_lea.sflag [#allocation3], %s257_s26 }
 0xd25   : > { %s16136_s14 = scalar_lea.hbm %s16195_s6, %s8438_s13 }
 0xd37   : > { %v7695_v15 = vpop.permute.xlu0 %7694 }
 0xd38   : > { %v7918_v32 = vsel %vm719_vm0, %v7854_v63, %v7695_v15  ;;  %v17527_v63 = vld [vmem:[#allocation141_spill] sm:$0xff] }
 0xd39   : > { %v7983_v40 = vsel %vm7950_vm1, %v7918_v32, 0.0  ;;  %v7697_v48 = vpop.permute.xlu1 %7696  ;;  %v7865_v15 = vsel %vm4791_vm6, %v17527_v63, %v17526_v29  ;;  %v17546_v29 = vld [vmem:[#allocation35_spill] sm:$0xff] }
 0xd3a   : > { %8047 = vst [vmem:[%s15199_s29 + $0x100] sm:$0xff] %v7983_v40  ;;  %v7919_v43 = vsel %vm719_vm0, %v7855_v33, %v7697_v48  ;;  %v17528_v33 = vld [vmem:[#allocation93_spill] sm:$0xff]  ;;  %v17529_v40 = vld [vmem:[#allocation176_spill] sm:$0xff] }
 0xd3b   : > { %v7984_v36 = vsel %vm7950_vm1, %v7919_v43, 0.0  ;;  %v7699_v13 = vpop.permute.xlu0 %7698  ;;  %v7866_v48 = vsel %vm4791_vm6, %v17529_v40, %v17528_v33 }
 0xd3c   : > { %8048 = vst [vmem:[%s15199_s29 + $0x108] sm:$0xff] %v7984_v36  ;;  %v7920_v38 = vsel %vm719_vm0, %v7856_v18, %v7699_v13  ;;  %v17530_v18 = vld [vmem:[#allocation142_spill] sm:$0xff] }
 0xd3d   : > { %v7985_v44 = vsel %vm7950_vm1, %v7920_v38, 0.0  ;;  %v7701_v34 = vpop.permute.xlu1 %7700  ;;  %v17531_v36 = vld [vmem:[#allocation146_spill] sm:$0xff] }
 0xd3e   : > { %8049 = vst [vmem:[%s15199_s29 + $0x110] sm:$0xff] %v7985_v44  ;;  %v7921_v2 = vsel %vm719_vm0, %v7857_v0, %v7701_v34  ;;  %v7867_v13 = vsel %vm4791_vm6, %v17531_v36, %v17530_v18  ;;  %v17532_v0 = vld [vmem:[#allocation92_spill] sm:$0xff]  ;;  %v17533_v44 = vld [vmem:[#allocation137_spill] sm:$0xff]  ;;  %v17549_v18 = vld [vmem:[#allocation110_spill] sm:$0xff] }
 0xd3f   : > { %v7986_v52 = vsel %vm7950_vm1, %v7921_v2, 0.0  ;;  %v7703_v12 = vpop.permute.xlu0 %7702  ;;  %v7868_v34 = vsel %vm4791_vm6, %v17533_v44, %v17532_v0 }
 0xd40   : > { %8050 = vst [vmem:[%s15199_s29 + $0x118] sm:$0xff] %v7986_v52  ;;  %v7922_v6 = vsel %vm719_vm0, %v7858_v16, %v7703_v12  ;;  %v17534_v16 = vld [vmem:[#allocation138_spill] sm:$0xff] }
 0xd41   : > { %v7987_v62 = vsel %vm7950_vm1, %v7922_v6, 0.0  ;;  %v7705_v10 = vpop.permute.xlu1 %7704  ;;  %v17535_v52 = vld [vmem:[#allocation150_spill] sm:$0xff] }
 0xd42   : > { %8051 = vst [vmem:[%s15199_s29 + $0x120] sm:$0xff] %v7987_v62  ;;  %v7923_v14 = vsel %vm719_vm0, %v7859_v8, %v7705_v10  ;;  %v7869_v12 = vsel %vm4791_vm6, %v17535_v52, %v17534_v16  ;;  %v17536_v62 = vld [vmem:[#allocation39_spill] sm:$0xff]  ;;  %v17537_v10 = vld [vmem:[#allocation152_spill] sm:$0xff] }
 0xd43   : > { %v7988_v53 = vsel %vm7950_vm1, %v7923_v14, 0.0  ;;  %v7707_v51 = vpop.permute.xlu0 %7706  ;;  %v7870_v14 = vsel %vm4791_vm6, %v17537_v10, %v17536_v62  ;;  %v17552_v16 = vld [vmem:[#allocation112_spill] sm:$0xff] }
 0xd44   : > { %8052 = vst [vmem:[%s15199_s29 + $0x128] sm:$0xff] %v7988_v53  ;;  %v7924_v28 = vsel %vm719_vm0, %v7860_v37, %v7707_v51  ;;  %v17538_v37 = vld [vmem:[#allocation66_spill] sm:$0xff]  ;;  %v17539_v53 = vld [vmem:[#allocation153_spill] sm:$0xff]  ;;  %v17554_v10 = vld [vmem:[#allocation16_spill] sm:$0xff] }
 0xd45   : > { %v7989_v58 = vsel %vm7950_vm1, %v7924_v28, 0.0  ;;  %v7709_v4 = vpop.permute.xlu1 %7708  ;;  %v7871_v51 = vsel %vm4791_vm6, %v17539_v53, %v17538_v37  ;;  %v17555_v37 = vld [vmem:[#allocation169_spill] sm:$0xff] }
 0xd46   : > { %8053 = vst [vmem:[%s15199_s29 + $0x130] sm:$0xff] %v7989_v58  ;;  %v7925_v27 = vsel %vm719_vm0, %v7861_v56, %v7709_v4  ;;  %v17540_v56 = vld [vmem:[#allocation148_spill] sm:$0xff]  ;;  %v17541_v58 = vld [vmem:[#allocation151_spill] sm:$0xff] }
 0xd47   : > { %v7990_v41 = vsel %vm7950_vm1, %v7925_v27, 0.0  ;;  %v7711_v17 = vpop.permute.xlu0 %7710  ;;  %v7872_v4 = vsel %vm4791_vm6, %v17541_v58, %v17540_v56 }
 0xd48   : > { %8054 = vst [vmem:[%s15199_s29 + $0x138] sm:$0xff] %v7990_v41  ;;  %v7926_v61 = vsel %vm719_vm0, %v7862_v7, %v7711_v17  ;;  %v17542_v7 = vld [vmem:[#allocation43_spill] sm:$0xff]  ;;  %v17543_v41 = vld [vmem:[#allocation122_spill] sm:$0xff] }
 0xd49   : > { %v7991_v59 = vsel %vm7950_vm1, %v7926_v61, 0.0  ;;  %v7713_v5 = vpop.permute.xlu1 %7712  ;;  %v7873_v17 = vsel %vm4791_vm6, %v17543_v41, %v17542_v7 }
 0xd4a   : > { %8055 = vst [vmem:[%s15199_s29 + $0x140] sm:$0xff] %v7991_v59  ;;  %v7927_v49 = vsel %vm719_vm0, %v7863_v54, %v7713_v5  ;;  %v17544_v5 = vld [vmem:[#allocation27_spill] sm:$0xff] }
 0xd4b   : > { %v7992_v9 = vsel %vm7950_vm1, %v7927_v49, 0.0  ;;  %v7715_v3 = vpop.permute.xlu0 %7714 }
 0xd4c   : > { %8056 = vst [vmem:[%s15199_s29 + $0x148] sm:$0xff] %v7992_v9  ;;  %v7928_v1 = vsel %vm719_vm0, %v7864_v47, %v7715_v3  ;;  %v17545_v47 = vld [vmem:[#allocation21_spill] sm:$0xff] }
 0xd4d   : > { %v7993_v32 = vsel %vm7950_vm1, %v7928_v1, 0.0  ;;  %v7717_v30 = vpop.permute.xlu1 %7716 }
 0xd4e   : > { %8057 = vst [vmem:[%s15199_s29 + $0x150] sm:$0xff] %v7993_v32  ;;  %v7929_v31 = vsel %vm719_vm0, %v7865_v15, %v7717_v30  ;;  %v17547_v30 = vld [vmem:[#allocation22_spill] sm:$0xff] }
 0xd4f   : > { %v7994_v43 = vsel %vm7950_vm1, %v7929_v31, 0.0  ;;  %v7719_v11 = vpop.permute.xlu0 %7718 }
 0xd50   : > { %8058 = vst [vmem:[%s15199_s29 + $0x158] sm:$0xff] %v7994_v43  ;;  %v7930_v25 = vsel %vm719_vm0, %v7866_v48, %v7719_v11  ;;  %v17548_v48 = vld [vmem:[#allocation119_spill] sm:$0xff] }
 0xd51   : > { %v7995_v38 = vsel %vm7950_vm1, %v7930_v25, 0.0  ;;  %v7721_v55 = vpop.permute.xlu1 %7720 }
 0xd52   : > { %8059 = vst [vmem:[%s15199_s29 + $0x160] sm:$0xff] %v7995_v38  ;;  %v7931_v46 = vsel %vm719_vm0, %v7867_v13, %v7721_v55  ;;  %v17550_v55 = vld [vmem:[#allocation124_spill] sm:$0xff] }
 0xd53   : > { %v7996_v2 = vsel %vm7950_vm1, %v7931_v46, 0.0  ;;  %v7723_v39 = vpop.permute.xlu0 %7722 }
 0xd54   : > { %8060 = vst [vmem:[%s15199_s29 + $0x168] sm:$0xff] %v7996_v2  ;;  %v7932_v20 = vsel %vm719_vm0, %v7868_v34, %v7723_v39  ;;  %v17551_v34 = vld [vmem:[#allocation55_spill] sm:$0xff] }
 0xd55   : > { %v7997_v6 = vsel %vm7950_vm1, %v7932_v20, 0.0  ;;  %v7725_v22 = vpop.permute.xlu1 %7724 }
 0xd56   : > { %8061 = vst [vmem:[%s15199_s29 + $0x170] sm:$0xff] %v7997_v6  ;;  %v7933_v35 = vsel %vm719_vm0, %v7869_v12, %v7725_v22  ;;  %v17553_v22 = vld [vmem:[#allocation181_spill] sm:$0xff] }
 0xd57   : > { %v7998_v8 = vsel %vm7950_vm1, %v7933_v35, 0.0 }
 0xd58   : > { %8062 = vst [vmem:[%s15199_s29 + $0x178] sm:$0xff] %v7998_v8 }
 0xd78   : > { %v7727_v26 = vpop.permute.xlu0 %7726 }
 0xd79   : > { %v7934_v19 = vsel %vm719_vm0, %v7870_v14, %v7727_v26 }
 0xd7a   : > { %v7999_v28 = vsel %vm7950_vm1, %v7934_v19, 0.0  ;;  %v7729_v24 = vpop.permute.xlu1 %7728 }
 0xd7b   : > { %8063 = vst [vmem:[%s15199_s29 + $0x180] sm:$0xff] %v7999_v28  ;;  %v7935_v60 = vsel %vm719_vm0, %v7871_v51, %v7729_v24 }
 0xd7c   : > { %v8000_v27 = vsel %vm7950_vm1, %v7935_v60, 0.0  ;;  %v7731_v21 = vpop.permute.xlu0 %7730 }
 0xd7d   : > { %8064 = vst [vmem:[%s15199_s29 + $0x188] sm:$0xff] %v8000_v27  ;;  %v7936_v50 = vsel %vm719_vm0, %v7872_v4, %v7731_v21 }
 0xd7e   : > { %v8001_v61 = vsel %vm7950_vm1, %v7936_v50, 0.0  ;;  %v7733_v23 = vpop.permute.xlu1 %7732 }
 0xd7f   : > { %8065 = vst [vmem:[%s15199_s29 + $0x190] sm:$0xff] %v8001_v61  ;;  %v7937_v42 = vsel %vm719_vm0, %v7873_v17, %v7733_v23 }
 0xd80   : > { %v8002_v54 = vsel %vm7950_vm1, %v7937_v42, 0.0  ;;  %v7735_v59 = vpop.permute.xlu0 %7734 }
 0xd81   : > { %8066 = vst [vmem:[%s15199_s29 + $0x198] sm:$0xff] %v8002_v54  ;;  %v7938_v49 = vsel %vm719_vm0, %v17544_v5, %v7735_v59 }
 0xd82   : > { %v8003_v45 = vsel %vm7950_vm1, %v7938_v49, 0.0  ;;  %v7737_v57 = vpop.permute.xlu1 %7736 }
 0xd83   : > { %8067 = vst [vmem:[%s15199_s29 + $0x1a0] sm:$0xff] %v8003_v45  ;;  %v7939_v9 = vsel %vm719_vm0, %v17545_v47, %v7737_v57 }
 0xd84   : > { %v8004_v3 = vsel %vm7950_vm1, %v7939_v9, 0.0  ;;  %v7739_v1 = vpop.permute.xlu0 %7738 }
 0xd85   : > { %8068 = vst [vmem:[%s15199_s29 + $0x1a8] sm:$0xff] %v8004_v3  ;;  %v7940_v63 = vsel %vm719_vm0, %v17546_v29, %v7739_v1 }
 0xd86   : > { %v8005_v15 = vsel %vm7950_vm1, %v7940_v63, 0.0  ;;  %v7741_v32 = vpop.permute.xlu1 %7740 }
 0xd87   : > { %8069 = vst [vmem:[%s15199_s29 + $0x1b0] sm:$0xff] %v8005_v15  ;;  %v7941_v31 = vsel %vm719_vm0, %v17547_v30, %v7741_v32 }
 0xd88   : > { %v8006_v33 = vsel %vm7950_vm1, %v7941_v31, 0.0  ;;  %v7743_v40 = vpop.permute.xlu0 %7742 }
 0xd89   : > { %8070 = vst [vmem:[%s15199_s29 + $0x1b8] sm:$0xff] %v8006_v33  ;;  %v7942_v43 = vsel %vm719_vm0, %v17548_v48, %v7743_v40 }
 0xd8a   : > { %v8007_v11 = vsel %vm7950_vm1, %v7942_v43, 0.0  ;;  %v7745_v25 = vpop.permute.xlu1 %7744 }
 0xd8b   : > { %8071 = vst [vmem:[%s15199_s29 + $0x1c0] sm:$0xff] %v8007_v11  ;;  %v7943_v36 = vsel %vm719_vm0, %v17549_v18, %v7745_v25 }
 0xd8c   : > { %v8008_v13 = vsel %vm7950_vm1, %v7943_v36, 0.0  ;;  %v7747_v38 = vpop.permute.xlu0 %7746 }
 0xd8d   : > { %8072 = vst [vmem:[%s15199_s29 + $0x1c8] sm:$0xff] %v8008_v13  ;;  %v7944_v46 = vsel %vm719_vm0, %v17550_v55, %v7747_v38 }
 0xd8e   : > { %v8009_v0 = vsel %vm7950_vm1, %v7944_v46, 0.0  ;;  %v7749_v44 = vpop.permute.xlu1 %7748 }
 0xd8f   : > { %8073 = vst [vmem:[%s15199_s29 + $0x1d0] sm:$0xff] %v8009_v0  ;;  %v7945_v2 = vsel %vm719_vm0, %v17551_v34, %v7749_v44 }
 0xd90   : > { %v8010_v39 = vsel %vm7950_vm1, %v7945_v2, 0.0  ;;  %v7751_v20 = vpop.permute.xlu0 %7750 }
 0xd91   : > { %8074 = vst [vmem:[%s15199_s29 + $0x1d8] sm:$0xff] %v8010_v39  ;;  %v7946_v52 = vsel %vm719_vm0, %v17552_v16, %v7751_v20 }
 0xd92   : > { %v8011_v12 = vsel %vm7950_vm1, %v7946_v52, 0.0  ;;  %v7753_v6 = vpop.permute.xlu1 %7752 }
 0xd93   : > { %8075 = vst [vmem:[%s15199_s29 + $0x1e0] sm:$0xff] %v8011_v12  ;;  %v7947_v35 = vsel %vm719_vm0, %v17553_v22, %v7753_v6 }
 0xd94   : > { %v8012_v8 = vsel %vm7950_vm1, %v7947_v35, 0.0  ;;  %v7755_v62 = vpop.permute.xlu0 %7754 }
 0xd95   : > { %8076 = vst [vmem:[%s15199_s29 + $0x1e8] sm:$0xff] %v8012_v8  ;;  %v7948_v14 = vsel %vm719_vm0, %v17554_v10, %v7755_v62 }
 0xd96   : > { %v8013_v26 = vsel %vm7950_vm1, %v7948_v14, 0.0  ;;  %v7757_v19 = vpop.permute.xlu1 %7756 }
 0xd97   : > { %8077 = vst [vmem:[%s15199_s29 + $0x1f0] sm:$0xff] %v8013_v26  ;;  %v7949_v53 = vsel %vm719_vm0, %v17555_v37, %v7757_v19 }
 0xd98   : > { %v8014_v51 = vsel %vm7950_vm1, %v7949_v53, 0.0 }
 0xd99   : > { %8078 = vst [vmem:[%s15199_s29 + $0x1f8] sm:$0xff] %v8014_v51 }
 0xd9a   : > { %10150 = shalt.err (!%p10147_p2)
}
 0xd9b   : > { %s10151_s19 = scalar_lea.hbm %s16136_s14, 8192  ;;  %s10155_s28 = scalar_lea.hbm %s16195_s6, 16384 }
 0xd9c   : > { %p10152_p3 = scmp.ne.s32.totalorder %s16136_s14, %s10151_s19  ;;  %p10156_p8 = scmp.lt.u32.totalorder %s16136_s14, %s16195_s6 }
 0xd9d   : > { %p10157_p11 = scmp.lt.u32.totalorder %s10155_s28, %s10151_s19  ;;  %p10159_p10 = scmp.lt.u32.totalorder %s10151_s19, %s16136_s14 }
 0xd9e   : > { %p10153_p4 = pnand %p10152_p3, %p10289_p5 }
 0xd9f   : > { %p10158_p9 = por %p10157_p11, %p10156_p8 }
 0xda0   : > { %p10154_p7 = pneg %p10153_p4 }
 0xda1   : > { %p10160_p12 = por %p10159_p10, %p10158_p9 }
 0xda3   : > { %p10161_p13 = pnand %p10160_p12, %p10154_p7 }
 0xda5   : > { %10164 = shalt.err (!%p10161_p13)
}
 0xda6   : > { %s10215_s11 = smov 128  }
 0xda7   : > { %9095 = dma.vmem_to_hbm [thread:$0]  (%p10289_p5), %s16141_s9, 8192, %s16136_s14, %s16147_s25, %s10215_s11, %s10215_s11, %s10212_s10  }
 0xda8 PF: > { %p9107_p0 = scmp.ge.s32.totalorder %s10203_s24, 2  ;;  %s8108_s12 = sand.u32 1, %s10191_s21  }
 0xda9   : > { %s8109_s15 = scalar_lea.sflag [#allocation3], %s8108_s12 }
 0xdaa   : > { %p9102_p1 = pnand %p9107_p0, %p10293_p6 }
 0xdac   : > { %10186 = dma.done.wait (!%p9102_p1), %s8109_s15, 8192  }
 0xdad   : > { %10188 = vsyncadd (!%p9102_p1), %s8109_s15, 4294959104  ;;  %p17_p2 = scmp.ge.s32.totalorder %s10276_s27, 4   ;;  %s17556_s21 = smov %s10195_s22 }
 0xdae   : > { %s17557_s22 = smov %s10199_s23  ;;  %s17558_s23 = smov %s10287_s30 }
 0xdaf   : > { %s17559_s24 = smov %s10276_s27  ;;  %19 = sbr.rel (!%p17_p2) target bundleno = 4 (0x4), region = 84 }
 0xdb6   :  { %8114 = vsyncpa [#allocation3], 1 }
 0xdb7   :  { %8116 = vsyncpa [#allocation3 + $0x1], 1 }
 0xdb8   :  { %8117 = vsyncpa [#allocation4], 1 }
 0xdb9   :  { %8119 = vsyncpa [#allocation4 + $0x1], 1 }

</bundles_post_ra>
